<compile_context>
chip_gen: v7x
topology: tpu7x:2x2x1
jax: 0.10.0
libtpu: 0.0.40
codegen_flags: <defaults>
</compile_context>

<pallas_src>
import functools
import math

import jax
import jax.numpy as jnp
from jax.experimental import pallas as pl
from jax.experimental.pallas import tpu as pltpu

# ---- model hyper-parameters (from VACNN.__init__ defaults) ------------------
C_IN = 3          # in_channel
C_OUT = 128       # out_channel
NUM_PERSON = 2
SUB_CLASS = 6
NUM_CLASS = 60
RES_FEAT = 2048   # resnet feature width consumed by Liner_layer
BN_EPS = 1e-5
KSIZE = 5
STRIDE = 2
POOL = 7

VMEM_LIMIT = 32 * 1024 * 1024   # fits v5e/v6e/v7x scoped VMEM; tiles use < 4 MiB


def _round_up(x, m):
    return (x + m - 1) // m * m


# =============================== Pallas kernels ==============================

def _conv1_kernel(x_ref, w_ref, scale_ref, shift_ref, o_ref):
    """o = relu((x @ w) * scale + shift); bf16 MXU operands, f32 epilogue."""
    y = jnp.dot(x_ref[...], w_ref[...], preferred_element_type=jnp.float32)
    y = jnp.maximum(y * scale_ref[...] + shift_ref[...], 0.0)
    o_ref[...] = y.astype(o_ref.dtype)


def conv1_bn_relu(patches, wmat, scale, shift, *, rows_out, grid_m=2):
    """sub_conv1 = Conv2d(3,128,5,2,bias=False) + folded BN + ReLU as an
    im2col matmul.  Returns the *row-padded* (rows_pad, 128) bf16 output so the
    conv2 kernel's tap slices (which read up to `rows_out`) stay in bounds."""
    rows, kdim = patches.shape
    co = wmat.shape[1]
    kp = _round_up(kdim, 128)                 # zero-pad K 75 -> 128 (clean MXU feed)
    if kp != kdim:
        patches = jnp.pad(patches, ((0, 0), (0, kp - kdim)))
        wmat = jnp.pad(wmat, ((0, kp - kdim), (0, 0)))
    # 2-way row grid: balanced "parallel" split for v7x megacore; ~2 steps only
    # on single-TC v5e/v6e so the per-step overhead is negligible.
    tm = _round_up(pl.cdiv(max(rows, rows_out), grid_m), 16)   # bf16 sublane pack
    rows_pad = tm * grid_m
    if rows_pad != rows:
        patches = jnp.pad(patches, ((0, rows_pad - rows), (0, 0)))

    return pl.pallas_call(
        _conv1_kernel,
        out_shape=jax.ShapeDtypeStruct((rows_pad, co), jnp.bfloat16),
        grid=(grid_m,),
        in_specs=[
            pl.BlockSpec((tm, kp), lambda i: (i, 0)),
            pl.BlockSpec((kp, co), lambda i: (0, 0)),
            pl.BlockSpec((1, co), lambda i: (0, 0)),
            pl.BlockSpec((1, co), lambda i: (0, 0)),
        ],
        out_specs=pl.BlockSpec((tm, co), lambda i: (i, 0)),
        compiler_params=pltpu.CompilerParams(
            dimension_semantics=("parallel",),
            vmem_limit_bytes=VMEM_LIMIT),
    )(patches.astype(jnp.bfloat16), wmat.astype(jnp.bfloat16),
      scale.reshape(1, co).astype(jnp.float32),
      shift.reshape(1, co).astype(jnp.float32))


def _conv2_head_kernel(y_ref, w2_ref, scale_ref, shift_ref, mask_ref,
                       fcw_ref, fcb_ref, o_ref, *,
                       nb, hw, nrows, macc, k, stride, ww):
    """Conv2d(128,128,5,2) + BN + ReLU + MaxPool2d(7) + sub_fc, fully fused.

    y_ref rows are conv1 outputs ordered (phase_h, phase_w, b, i, j), so every
    5x5/stride-2 tap (dh, dw) is a single CONTIGUOUS row slice and is
    accumulated as one (macc, 128) x (128, 128) MXU matmul — no concat, no
    strided gathers, batch folded into M.
    """
    acc = jnp.zeros((macc, w2_ref.shape[2]), jnp.float32)
    for dh in range(k):
        rh, qh = dh % stride, dh // stride
        for dw in range(k):
            rw, qw = dw % stride, dw // stride
            base = (rh * stride + rw) * nrows + qh * ww + qw
            acc = acc + jnp.dot(y_ref[base:base + macc, :],
                                w2_ref[dh * k + dw],
                                preferred_element_type=jnp.float32)
    # BN + ReLU, then zero out invalid grid positions (phase padding / overflow
    # rows); ReLU output is >= 0 so the masked max-pool equals the true one.
    y = jnp.maximum(acc * scale_ref[...] + shift_ref[...], 0.0) * mask_ref[...]
    # global max pool per sample (== nn.MaxPool2d(7) on a 7x7 map)
    pooled = jnp.concatenate(
        [jnp.max(y[s * hw:(s + 1) * hw, :], axis=0, keepdims=True)
         for s in range(nb)], axis=0)                        # (nb, C)
    # sub_fc epilogue (f32 matmul for angle accuracy; it feeds trig downstream)
    o_ref[...] = (jnp.dot(pooled, fcw_ref[...],
                          preferred_element_type=jnp.float32) + fcb_ref[...])


def conv2_pool_fc(y1, w2_taps, scale, shift, mask, fc_w, fc_b, *,
                  nb, hh, ww, nrows, macc):
    rows_pad, c = y1.shape
    ncp = fc_w.shape[1]
    kernel = functools.partial(
        _conv2_head_kernel, nb=nb, hw=hh * ww, nrows=nrows, macc=macc,
        k=KSIZE, stride=STRIDE, ww=ww)
    return pl.pallas_call(
        kernel,
        out_shape=jax.ShapeDtypeStruct((nb, ncp), jnp.float32),
        grid=(1,),
        in_specs=[
            pl.BlockSpec((rows_pad, c), lambda i: (0, 0)),
            pl.BlockSpec(w2_taps.shape, lambda i: (0, 0, 0)),
            pl.BlockSpec((1, c), lambda i: (0, 0)),
            pl.BlockSpec((1, c), lambda i: (0, 0)),
            pl.BlockSpec((macc, 1), lambda i: (0, 0)),
            pl.BlockSpec((c, ncp), lambda i: (0, 0)),
            pl.BlockSpec((1, ncp), lambda i: (0, 0)),
        ],
        out_specs=pl.BlockSpec((nb, ncp), lambda i: (0, 0)),
        compiler_params=pltpu.CompilerParams(
            dimension_semantics=("arbitrary",),
            vmem_limit_bytes=VMEM_LIMIT),
    )(y1, w2_taps.astype(jnp.bfloat16),
      scale.reshape(1, c).astype(jnp.float32),
      shift.reshape(1, c).astype(jnp.float32),
      mask,
      fc_w.astype(jnp.float32),
      fc_b.reshape(1, ncp).astype(jnp.float32))


def _tail_kernel(f_ref, bbw_ref, bbb_ref, linw_ref, linb_ref, o_ref, *, n):
    """Stand-in backbone Linear+ReLU, per-person max over the 2048-d features,
    then Liner_layer — matches the torch ordering (resnet_layer has no fc)."""
    feats = jnp.dot(f_ref[...], bbw_ref[...], preferred_element_type=jnp.float32)
    feats = jnp.maximum(feats + bbb_ref[...], 0.0)           # (2n, 2048)
    fmax = jnp.maximum(feats[:n, :], feats[n:2 * n, :])      # (n, 2048)
    o_ref[...] = (jnp.dot(fmax.astype(linw_ref.dtype), linw_ref[...],
                          preferred_element_type=jnp.float32) + linb_ref[...])


def backbone_max_linear(feat_in, bb_w, bb_b, lin_w, lin_b, *, n):
    b, kin = feat_in.shape
    kp = _round_up(kin, 128)
    feat = bb_w.shape[1]
    nc = lin_w.shape[1]
    ncp = _round_up(nc, 128)
    f = jnp.pad(feat_in, ((0, 0), (0, kp - kin))).astype(jnp.bfloat16)
    bbw = jnp.pad(bb_w, ((0, kp - kin), (0, 0))).astype(jnp.bfloat16)
    linw = jnp.pad(lin_w, ((0, 0), (0, ncp - nc))).astype(jnp.bfloat16)
    linb = jnp.pad(lin_b, ((0, ncp - nc),))
    return pl.pallas_call(
        functools.partial(_tail_kernel, n=n),
        out_shape=jax.ShapeDtypeStruct((n, ncp), jnp.float32),
        grid=(1,),
        in_specs=[
            pl.BlockSpec((b, kp), lambda i: (0, 0)),
            pl.BlockSpec((kp, feat), lambda i: (0, 0)),
            pl.BlockSpec((1, feat), lambda i: (0, 0)),
            pl.BlockSpec((feat, ncp), lambda i: (0, 0)),
            pl.BlockSpec((1, ncp), lambda i: (0, 0)),
        ],
        out_specs=pl.BlockSpec((n, ncp), lambda i: (0, 0)),
        compiler_params=pltpu.CompilerParams(vmem_limit_bytes=VMEM_LIMIT),
    )(f, bbw, bb_b.reshape(1, feat).astype(jnp.float32),
      linw, linb.reshape(1, ncp).astype(jnp.float32))


# ============================ JAX glue (layout only) ==========================

def im2col_phase_order(xh, k, stride, hh, ww):
    """im2col for Conv2d(k, stride) with rows ordered (ph, pw, b, i, j), where
    the conv output position is (oh, ow) = (stride*i+ph, stride*j+pw).  Pure
    layout glue on the tiny (C=3) input; it lets the conv2 kernel read every
    tap as a contiguous row-slice of the conv1 output (no post-conv1 HBM
    transpose)."""
    b, t, v, c = xh.shape
    hout, wout = stride * hh, stride * ww
    hin, win = (hout - 1) * stride + k, (wout - 1) * stride + k
    xp = jnp.pad(xh, ((0, 0), (0, max(0, hin - t)), (0, max(0, win - v)), (0, 0)))
    taps = []
    for dh in range(k):
        for dw in range(k):
            taps.append(xp[:, dh:dh + stride * hout:stride,
                           dw:dw + stride * wout:stride, :])   # (b, hout, wout, c)
    p = jnp.stack(taps, axis=3)                                # (b, hout, wout, k*k, c)
    p = p.reshape(b, hh, stride, ww, stride, k * k * c)        # oh=(i,ph), ow=(j,pw)
    p = jnp.transpose(p, (2, 4, 0, 1, 3, 5))                   # (ph, pw, b, i, j, K)
    return p.reshape(stride * stride * b * hh * ww, k * k * c)


def build_rotations(angles):
    """Rx @ Ry @ Rz exactly as written in the torch forward (angles * pi)."""
    a = angles[:, 0] * math.pi
    b = angles[:, 1] * math.pi
    c = angles[:, 2] * math.pi
    z = jnp.zeros_like(a)
    o = jnp.ones_like(a)
    rx = jnp.stack([jnp.stack([o, z, z], -1),
                    jnp.stack([z, jnp.cos(a), jnp.sin(a)], -1),
                    jnp.stack([z, jnp.sin(-a), jnp.cos(a)], -1)], axis=1)
    ry = jnp.stack([jnp.stack([jnp.cos(b), z, jnp.sin(-b)], -1),
                    jnp.stack([z, o, z], -1),
                    jnp.stack([jnp.sin(b), z, jnp.cos(b)], -1)], axis=1)
    rz = jnp.stack([jnp.stack([jnp.cos(c), jnp.sin(c), z], -1),
                    jnp.stack([jnp.sin(-c), jnp.cos(c), z], -1),
                    jnp.stack([z, z, o], -1)], axis=1)
    return jnp.einsum('nij,njk,nkl->nil', rx, ry, rz)


def vacnn_forward(x, params):
    """x: (N, C, T, V, M) float32 — same axis convention as the torch module."""
    n, c, t, v, m = x.shape
    assert c == C_IN and m == NUM_PERSON
    min_map = jnp.array([-3.602826, -3.602826, -3.602826], jnp.float32)

    # ---- batch the two persons: rows [0:N] = person 0, [N:2N] = person 1 -----
    xb = jnp.moveaxis(x, 4, 0).reshape(m * n, c, t, v)       # (B, C, T, V)
    xh = jnp.transpose(xb, (0, 2, 3, 1))                     # (B, T, V, C) NHWC
    b = m * n

    h1 = (t - KSIZE) // STRIDE + 1
    w1 = (v - KSIZE) // STRIDE + 1
    h2 = (h1 - KSIZE) // STRIDE + 1
    w2 = (w1 - KSIZE) // STRIDE + 1
    # TODO(synk): demo shapes give a global max (h2 == w2 == 7 == POOL); larger
    #             resolutions need a pooled-tile accumulator instead.
    assert h2 == POOL and w2 == POOL, "fused conv2+pool assumes a 7x7 map"
    q = (KSIZE - 1) // STRIDE
    hh, ww = h2 + q, w2 + q                                  # per-phase grid (9, 9)
    nrows = b * hh * ww                                      # rows per stride-phase
    macc = _round_up(nrows, 8)                               # conv2 matmul M
    rows_out = (STRIDE * STRIDE - 1) * nrows + q * ww + q + macc

    # ---- sub_conv1: Conv2d(3,128,5,2,no bias) + BN + ReLU (im2col matmul) ----
    p1 = im2col_phase_order(xh, KSIZE, STRIDE, hh, ww)       # (4*B*hh*ww, 75)
    y1 = conv1_bn_relu(p1, params['conv1_wmat'],
                       params['bn1_scale'], params['bn1_shift'],
                       rows_out=rows_out)                    # (rows_pad, 128) bf16

    # ---- sub_conv2 + BN + ReLU + MaxPool2d(7) + sub_fc, fully fused ----------
    idx = jnp.arange(hh * ww)
    valid = ((idx // ww) < h2) & ((idx % ww) < w2)
    mask = jnp.pad(jnp.tile(valid, (b,)),
                   (0, macc - nrows)).astype(jnp.float32)[:, None]   # (macc, 1)
    ncp = _round_up(SUB_CLASS, 128)
    fc_wp = jnp.pad(params['fc_w'], ((0, 0), (0, ncp - SUB_CLASS)))
    fc_bp = jnp.pad(params['fc_b'], ((0, ncp - SUB_CLASS),))
    ang = conv2_pool_fc(y1, params['conv2_w_taps'],
                        params['bn2_scale'], params['bn2_shift'],
                        mask, fc_wp, fc_bp,
                        nb=b, hh=hh, ww=ww, nrows=nrows, macc=macc)[:, :SUB_CLASS]

    # ---- view-adaptation: o = R@X + 255*(R@(min_map+trans) - min_map)/8.812765
    # 3x3 trig setup is plain-JAX glue (a pallas launch would be pure overhead).
    rot = build_rotations(ang[:, :3])                        # (B, 3, 3)
    col = min_map[None, :] + ang[:, 3:6]                     # (B, 3)
    shift_vec = 255.0 * (jnp.einsum('nij,nj->ni', rot, col)
                         - min_map[None, :]) / 8.812765      # (B, 3)

    # Stand-in backbone = GAP + Linear(3,2048) + ReLU; GAP is linear, so
    # GAP(R @ X + s) == R @ GAP(X) + s: rotate the 3-vector mean directly.
    # TODO(synk): the real `resnet_layer` is an external torchvision ResNet-50;
    #             with it, the rotated (B,3,T,V) tensor must be materialized.
    mean_x = jnp.mean(xb.reshape(b, c, t * v), axis=2)                 # (B, 3)
    feat_in = jnp.einsum('nij,nj->ni', rot, mean_x) + shift_vec        # (B, 3)

    # ---- backbone matmul + max(person0, person1) + Liner_layer, one kernel ---
    out = backbone_max_linear(feat_in, params['bb_w'], params['bb_b'],
                              params['lin_w'], params['lin_b'], n=n)
    return out[:, :NUM_CLASS]


# ============================== parameter setup ===============================

def init_params(key, t, v):
    h1 = (t - KSIZE) // STRIDE + 1
    w1 = (v - KSIZE) // STRIDE + 1
    h2 = (h1 - KSIZE) // STRIDE + 1
    w2 = (w1 - KSIZE) // STRIDE + 1
    flat = C_OUT * (h2 // POOL) * (w2 // POOL)   # 128 at demo shapes (6272 at 224-res)

    ks = jax.random.split(key, 16)

    def nrm(k_, shape, scale):
        return scale * jax.random.normal(k_, shape, jnp.float32)

    conv1_w = nrm(ks[0], (C_OUT, C_IN, KSIZE, KSIZE), 0.05)
    conv2_w = nrm(ks[1], (C_OUT, C_OUT, KSIZE, KSIZE), 0.02)
    bn1_g = 1.0 + nrm(ks[2], (C_OUT,), 0.1)
    bn1_b = nrm(ks[3], (C_OUT,), 0.1)
    bn1_m = nrm(ks[4], (C_OUT,), 0.1)
    bn1_v = 1.0 + jnp.abs(nrm(ks[5], (C_OUT,), 0.1))
    bn2_g = 1.0 + nrm(ks[6], (C_OUT,), 0.1)
    bn2_b = nrm(ks[7], (C_OUT,), 0.1)
    bn2_m = nrm(ks[8], (C_OUT,), 0.1)
    bn2_v = 1.0 + jnp.abs(nrm(ks[9], (C_OUT,), 0.1))
    fc_w = nrm(ks[10], (SUB_CLASS, flat), 0.02)          # nn.Linear(flat, 6)
    fc_b = nrm(ks[11], (SUB_CLASS,), 0.01)
    bb_w = nrm(ks[12], (RES_FEAT, C_IN), 0.05)           # stand-in backbone Linear
    bb_b = nrm(ks[13], (RES_FEAT,), 0.01)
    lin_w = nrm(ks[14], (NUM_CLASS, RES_FEAT), 0.02)     # nn.Linear(2048, 60)
    lin_b = nrm(ks[15], (NUM_CLASS,), 0.01)

    bn1_s = bn1_g / jnp.sqrt(bn1_v + BN_EPS)
    bn2_s = bn2_g / jnp.sqrt(bn2_v + BN_EPS)
    return {
        'conv1_wmat': jnp.transpose(conv1_w, (2, 3, 1, 0)
                                    ).reshape(KSIZE * KSIZE * C_IN, C_OUT),
        'conv2_w_taps': jnp.transpose(conv2_w, (2, 3, 1, 0)
                                      ).reshape(KSIZE * KSIZE, C_OUT, C_OUT),
        'bn1_scale': bn1_s, 'bn1_shift': bn1_b - bn1_m * bn1_s,
        'bn2_scale': bn2_s, 'bn2_shift': bn2_b - bn2_m * bn2_s,
        'fc_w': fc_w.T, 'fc_b': fc_b,
        'bb_w': bb_w.T, 'bb_b': bb_b,
        'lin_w': lin_w.T, 'lin_b': lin_b,
    }


# =================================== demo =====================================

if __name__ == "__main__":
    # Shapes consistent with the forward: C must be 3 (rotation / min_map);
    # (T, V) chosen so conv1 -> conv2 -> MaxPool2d(7) is valid: 37 -> 17 -> 7 -> 1.
    N, C, T, V, M = 2, 3, 37, 37, 2

    key = jax.random.PRNGKey(0)
    k_x, k_p = jax.random.split(key)
    x = jax.random.normal(k_x, (N, C, T, V, M), jnp.float32)
    params = init_params(k_p, T, V)

    out = jax.jit(vacnn_forward)(x, params)
    out = jax.block_until_ready(out)

    assert out.shape == (N, NUM_CLASS), out.shape
    # mirrors `assert not (t != t).any()` in the torch forward
    assert not bool(jnp.isnan(out).any())
    print("KERNEL_OK")
</pallas_src>

<mosaic_0001>
module attributes {stable_mosaic.version = 11 : i64} {
  func.func @_conv1_kernel(%arg0: i32, %arg1: memref<672x128xbf16, #tpu.memory_space<vmem>>, %arg2: memref<128x128xbf16, #tpu.memory_space<vmem>>, %arg3: memref<1x128xf32, #tpu.memory_space<vmem>>, %arg4: memref<1x128xf32, #tpu.memory_space<vmem>>, %arg5: memref<672x128xbf16, #tpu.memory_space<vmem>>) attributes {dimension_semantics = [#tpu.dimension_semantics<parallel>], iteration_bounds = array<i64: 2>, scalar_prefetch = 0 : i64, scratch_operands = 0 : i64, tpu.core_type = #tpu.core_type<tc>, window_params = [{transform_indices = @transform_0, window_bounds = array<i64: 672, 128>}, {pipeline_mode = #tpu.pipeline_mode<synchronous>, transform_indices = @transform_1, window_bounds = array<i64: 128, 128>}, {pipeline_mode = #tpu.pipeline_mode<synchronous>, transform_indices = @transform_2, window_bounds = array<i64: 1, 128>}, {pipeline_mode = #tpu.pipeline_mode<synchronous>, transform_indices = @transform_3, window_bounds = array<i64: 1, 128>}, {transform_indices = @transform_4, window_bounds = array<i64: 672, 128>}]} {
    %c0 = arith.constant 0 : index
    %c0_0 = arith.constant 0 : index
    %0 = vector.load %arg1[%c0, %c0_0] : memref<672x128xbf16, #tpu.memory_space<vmem>>, vector<672x128xbf16>
    %c0_1 = arith.constant 0 : index
    %c0_2 = arith.constant 0 : index
    %1 = vector.load %arg2[%c0_1, %c0_2] : memref<128x128xbf16, #tpu.memory_space<vmem>>, vector<128x128xbf16>
    %cst = arith.constant dense<0.000000e+00> : vector<672x128xf32>
    %2 = tpu.matmul %0, %1, %cst {dimension_numbers = #tpu.dot_dimension_numbers<[1], [0], [0], [1], [0, 0, 1, 1], [], []>} : vector<672x128xbf16>, vector<128x128xbf16>, vector<672x128xf32> -> vector<672x128xf32>
    %c0_3 = arith.constant 0 : index
    %c0_4 = arith.constant 0 : index
    %3 = vector.load %arg3[%c0_3, %c0_4] : memref<1x128xf32, #tpu.memory_space<vmem>>, vector<1x128xf32>
    %4 = vector.broadcast %3 : vector<1x128xf32> to vector<672x128xf32>
    %5 = arith.mulf %2, %4 : vector<672x128xf32>
    %c0_5 = arith.constant 0 : index
    %c0_6 = arith.constant 0 : index
    %6 = vector.load %arg4[%c0_5, %c0_6] : memref<1x128xf32, #tpu.memory_space<vmem>>, vector<1x128xf32>
    %7 = vector.broadcast %6 : vector<1x128xf32> to vector<672x128xf32>
    %8 = arith.addf %5, %7 : vector<672x128xf32>
    %cst_7 = arith.constant 0.000000e+00 : f32
    %9 = vector.broadcast %cst_7 : f32 to vector<672x128xf32>
    %10 = arith.maximumf %8, %9 : vector<672x128xf32>
    %11 = arith.truncf %10 : vector<672x128xf32> to vector<672x128xbf16>
    %c0_8 = arith.constant 0 : index
    %c0_9 = arith.constant 0 : index
    %12 = vector.load %arg5[%c0_8, %c0_9] : memref<672x128xbf16, #tpu.memory_space<vmem>>, vector<672x128xbf16>
    tpu.vector_store %arg5[%c0_8, %c0_9], %11 {strides = array<i32>} : memref<672x128xbf16, #tpu.memory_space<vmem>>, vector<672x128xbf16>,
    return
  }
  func.func @transform_0(%arg0: i32) -> (i32, i32) {
    %c0_i32 = arith.constant 0 : i32
    %c0_i32_0 = arith.constant 0 : i32
    return %arg0, %c0_i32 : i32, i32
  }
  func.func @transform_1(%arg0: i32) -> (i32, i32) {
    %c0_i32 = arith.constant 0 : i32
    %c0_i32_0 = arith.constant 0 : i32
    %c0_i32_1 = arith.constant 0 : i32
    return %c0_i32, %c0_i32_0 : i32, i32
  }
  func.func @transform_2(%arg0: i32) -> (i32, i32) {
    %c0_i32 = arith.constant 0 : i32
    %c0_i32_0 = arith.constant 0 : i32
    %c0_i32_1 = arith.constant 0 : i32
    return %c0_i32, %c0_i32_0 : i32, i32
  }
  func.func @transform_3(%arg0: i32) -> (i32, i32) {
    %c0_i32 = arith.constant 0 : i32
    %c0_i32_0 = arith.constant 0 : i32
    %c0_i32_1 = arith.constant 0 : i32
    return %c0_i32, %c0_i32_0 : i32, i32
  }
  func.func @transform_4(%arg0: i32) -> (i32, i32) {
    %c0_i32 = arith.constant 0 : i32
    %c0_i32_0 = arith.constant 0 : i32
    return %arg0, %c0_i32 : i32, i32
  }
}

module attributes {stable_mosaic.version = 11 : i64} {
  func.func @_conv2_head_kernel(%arg0: i32, %arg1: memref<1344x128xbf16, #tpu.memory_space<vmem>>, %arg2: memref<25x128x128xbf16, #tpu.memory_space<vmem>>, %arg3: memref<1x128xf32, #tpu.memory_space<vmem>>, %arg4: memref<1x128xf32, #tpu.memory_space<vmem>>, %arg5: memref<328x1xf32, #tpu.memory_space<vmem>>, %arg6: memref<128x128xf32, #tpu.memory_space<vmem>>, %arg7: memref<1x128xf32, #tpu.memory_space<vmem>>, %arg8: memref<4x128xf32, #tpu.memory_space<vmem>>) attributes {dimension_semantics = [#tpu.dimension_semantics<arbitrary>], iteration_bounds = array<i64: 1>, scalar_prefetch = 0 : i64, scratch_operands = 0 : i64, tpu.core_type = #tpu.core_type<tc>, window_params = [{pipeline_mode = #tpu.pipeline_mode<synchronous>, transform_indices = @transform_0, window_bounds = array<i64: 1344, 128>}, {pipeline_mode = #tpu.pipeline_mode<synchronous>, transform_indices = @transform_1, window_bounds = array<i64: 25, 128, 128>}, {pipeline_mode = #tpu.pipeline_mode<synchronous>, transform_indices = @transform_2, window_bounds = array<i64: 1, 128>}, {pipeline_mode = #tpu.pipeline_mode<synchronous>, transform_indices = @transform_3, window_bounds = array<i64: 1, 128>}, {pipeline_mode = #tpu.pipeline_mode<synchronous>, transform_indices = @transform_4, window_bounds = array<i64: 328, 1>}, {pipeline_mode = #tpu.pipeline_mode<synchronous>, transform_indices = @transform_5, window_bounds = array<i64: 128, 128>}, {pipeline_mode = #tpu.pipeline_mode<synchronous>, transform_indices = @transform_6, window_bounds = array<i64: 1, 128>}, {pipeline_mode = #tpu.pipeline_mode<synchronous>, transform_indices = @transform_7, window_bounds = array<i64: 4, 128>}]} {
    %cst = arith.constant 0.000000e+00 : f32
    %0 = vector.broadcast %cst : f32 to vector<328x128xf32>
    %c0 = arith.constant 0 : index
    %c0_0 = arith.constant 0 : index
    %1 = vector.load %arg1[%c0, %c0_0] : memref<1344x128xbf16, #tpu.memory_space<vmem>>, vector<328x128xbf16>
    %c0_1 = arith.constant 0 : index
    %c0_2 = arith.constant 0 : index
    %c0_3 = arith.constant 0 : index
    %2 = vector.load %arg2[%c0_1, %c0_2, %c0_3] : memref<25x128x128xbf16, #tpu.memory_space<vmem>>, vector<1x128x128xbf16>
    %3 = vector.shape_cast %2 : vector<1x128x128xbf16> to vector<128x128xbf16>
    %cst_4 = arith.constant dense<0.000000e+00> : vector<328x128xf32>
    %4 = tpu.matmul %1, %3, %cst_4 {dimension_numbers = #tpu.dot_dimension_numbers<[1], [0], [0], [1], [0, 0, 1, 1], [], []>} : vector<328x128xbf16>, vector<128x128xbf16>, vector<328x128xf32> -> vector<328x128xf32>
    %5 = arith.addf %0, %4 : vector<328x128xf32>
    %c324 = arith.constant 324 : index
    %c0_5 = arith.constant 0 : index
    %6 = vector.load %arg1[%c324, %c0_5] : memref<1344x128xbf16, #tpu.memory_space<vmem>>, vector<328x128xbf16>
    %c1 = arith.constant 1 : index
    %c0_6 = arith.constant 0 : index
    %c0_7 = arith.constant 0 : index
    %7 = vector.load %arg2[%c1, %c0_6, %c0_7] : memref<25x128x128xbf16, #tpu.memory_space<vmem>>, vector<1x128x128xbf16>
    %8 = vector.shape_cast %7 : vector<1x128x128xbf16> to vector<128x128xbf16>
    %cst_8 = arith.constant dense<0.000000e+00> : vector<328x128xf32>
    %9 = tpu.matmul %6, %8, %cst_8 {dimension_numbers = #tpu.dot_dimension_numbers<[1], [0], [0], [1], [0, 0, 1, 1], [], []>} : vector<328x128xbf16>, vector<128x128xbf16>, vector<328x128xf32> -> vector<328x128xf32>
    %10 = arith.addf %5, %9 : vector<328x128xf32>
    %c1_9 = arith.constant 1 : index
    %c0_10 = arith.constant 0 : index
    %11 = vector.load %arg1[%c1_9, %c0_10] : memref<1344x128xbf16, #tpu.memory_space<vmem>>, vector<328x128xbf16>
    %c2 = arith.constant 2 : index
    %c0_11 = arith.constant 0 : index
    %c0_12 = arith.constant 0 : index
    %12 = vector.load %arg2[%c2, %c0_11, %c0_12] : memref<25x128x128xbf16, #tpu.memory_space<vmem>>, vector<1x128x128xbf16>
    %13 = vector.shape_cast %12 : vector<1x128x128xbf16> to vector<128x128xbf16>
    %cst_13 = arith.constant dense<0.000000e+00> : vector<328x128xf32>
    %14 = tpu.matmul %11, %13, %cst_13 {dimension_numbers = #tpu.dot_dimension_numbers<[1], [0], [0], [1], [0, 0, 1, 1], [], []>} : vector<328x128xbf16>, vector<128x128xbf16>, vector<328x128xf32> -> vector<328x128xf32>
    %15 = arith.addf %10, %14 : vector<328x128xf32>
    %c325 = arith.constant 325 : index
    %c0_14 = arith.constant 0 : index
    %16 = vector.load %arg1[%c325, %c0_14] : memref<1344x128xbf16, #tpu.memory_space<vmem>>, vector<328x128xbf16>
    %c3 = arith.constant 3 : index
    %c0_15 = arith.constant 0 : index
    %c0_16 = arith.constant 0 : index
    %17 = vector.load %arg2[%c3, %c0_15, %c0_16] : memref<25x128x128xbf16, #tpu.memory_space<vmem>>, vector<1x128x128xbf16>
    %18 = vector.shape_cast %17 : vector<1x128x128xbf16> to vector<128x128xbf16>
    %cst_17 = arith.constant dense<0.000000e+00> : vector<328x128xf32>
    %19 = tpu.matmul %16, %18, %cst_17 {dimension_numbers = #tpu.dot_dimension_numbers<[1], [0], [0], [1], [0, 0, 1, 1], [], []>} : vector<328x128xbf16>, vector<128x128xbf16>, vector<328x128xf32> -> vector<328x128xf32>
    %20 = arith.addf %15, %19 : vector<328x128xf32>
    %c2_18 = arith.constant 2 : index
    %c0_19 = arith.constant 0 : index
    %21 = vector.load %arg1[%c2_18, %c0_19] : memref<1344x128xbf16, #tpu.memory_space<vmem>>, vector<328x128xbf16>
    %c4 = arith.constant 4 : index
    %c0_20 = arith.constant 0 : index
    %c0_21 = arith.constant 0 : index
    %22 = vector.load %arg2[%c4, %c0_20, %c0_21] : memref<25x128x128xbf16, #tpu.memory_space<vmem>>, vector<1x128x128xbf16>
    %23 = vector.shape_cast %22 : vector<1x128x128xbf16> to vector<128x128xbf16>
    %cst_22 = arith.constant dense<0.000000e+00> : vector<328x128xf32>
    %24 = tpu.matmul %21, %23, %cst_22 {dimension_numbers = #tpu.dot_dimension_numbers<[1], [0], [0], [1], [0, 0, 1, 1], [], []>} : vector<328x128xbf16>, vector<128x128xbf16>, vector<328x128xf32> -> vector<328x128xf32>
    %25 = arith.addf %20, %24 : vector<328x128xf32>
    %c648 = arith.constant 648 : index
    %c0_23 = arith.constant 0 : index
    %26 = vector.load %arg1[%c648, %c0_23] : memref<1344x128xbf16, #tpu.memory_space<vmem>>, vector<328x128xbf16>
    %c5 = arith.constant 5 : index
    %c0_24 = arith.constant 0 : index
    %c0_25 = arith.constant 0 : index
    %27 = vector.load %arg2[%c5, %c0_24, %c0_25] : memref<25x128x128xbf16, #tpu.memory_space<vmem>>, vector<1x128x128xbf16>
    %28 = vector.shape_cast %27 : vector<1x128x128xbf16> to vector<128x128xbf16>
    %cst_26 = arith.constant dense<0.000000e+00> : vector<328x128xf32>
    %29 = tpu.matmul %26, %28, %cst_26 {dimension_numbers = #tpu.dot_dimension_numbers<[1], [0], [0], [1], [0, 0, 1, 1], [], []>} : vector<328x128xbf16>, vector<128x128xbf16>, vector<328x128xf32> -> vector<328x128xf32>
    %30 = arith.addf %25, %29 : vector<328x128xf32>
    %c972 = arith.constant 972 : index
    %c0_27 = arith.constant 0 : index
    %31 = vector.load %arg1[%c972, %c0_27] : memref<1344x128xbf16, #tpu.memory_space<vmem>>, vector<328x128xbf16>
    %c6 = arith.constant 6 : index
    %c0_28 = arith.constant 0 : index
    %c0_29 = arith.constant 0 : index
    %32 = vector.load %arg2[%c6, %c0_28, %c0_29] : memref<25x128x128xbf16, #tpu.memory_space<vmem>>, vector<1x128x128xbf16>
    %33 = vector.shape_cast %32 : vector<1x128x128xbf16> to vector<128x128xbf16>
    %cst_30 = arith.constant dense<0.000000e+00> : vector<328x128xf32>
    %34 = tpu.matmul %31, %33, %cst_30 {dimension_numbers = #tpu.dot_dimension_numbers<[1], [0], [0], [1], [0, 0, 1, 1], [], []>} : vector<328x128xbf16>, vector<128x128xbf16>, vector<328x128xf32> -> vector<328x128xf32>
    %35 = arith.addf %30, %34 : vector<328x128xf32>
    %c649 = arith.constant 649 : index
    %c0_31 = arith.constant 0 : index
    %36 = vector.load %arg1[%c649, %c0_31] : memref<1344x128xbf16, #tpu.memory_space<vmem>>, vector<328x128xbf16>
    %c7 = arith.constant 7 : index
    %c0_32 = arith.constant 0 : index
    %c0_33 = arith.constant 0 : index
    %37 = vector.load %arg2[%c7, %c0_32, %c0_33] : memref<25x128x128xbf16, #tpu.memory_space<vmem>>, vector<1x128x128xbf16>
    %38 = vector.shape_cast %37 : vector<1x128x128xbf16> to vector<128x128xbf16>
    %cst_34 = arith.constant dense<0.000000e+00> : vector<328x128xf32>
    %39 = tpu.matmul %36, %38, %cst_34 {dimension_numbers = #tpu.dot_dimension_numbers<[1], [0], [0], [1], [0, 0, 1, 1], [], []>} : vector<328x128xbf16>, vector<128x128xbf16>, vector<328x128xf32> -> vector<328x128xf32>
    %40 = arith.addf %35, %39 : vector<328x128xf32>
    %c973 = arith.constant 973 : index
    %c0_35 = arith.constant 0 : index
    %41 = vector.load %arg1[%c973, %c0_35] : memref<1344x128xbf16, #tpu.memory_space<vmem>>, vector<328x128xbf16>
    %c8 = arith.constant 8 : index
    %c0_36 = arith.constant 0 : index
    %c0_37 = arith.constant 0 : index
    %42 = vector.load %arg2[%c8, %c0_36, %c0_37] : memref<25x128x128xbf16, #tpu.memory_space<vmem>>, vector<1x128x128xbf16>
    %43 = vector.shape_cast %42 : vector<1x128x128xbf16> to vector<128x128xbf16>
    %cst_38 = arith.constant dense<0.000000e+00> : vector<328x128xf32>
    %44 = tpu.matmul %41, %43, %cst_38 {dimension_numbers = #tpu.dot_dimension_numbers<[1], [0], [0], [1], [0, 0, 1, 1], [], []>} : vector<328x128xbf16>, vector<128x128xbf16>, vector<328x128xf32> -> vector<328x128xf32>
    %45 = arith.addf %40, %44 : vector<328x128xf32>
    %c650 = arith.constant 650 : index
    %c0_39 = arith.constant 0 : index
    %46 = vector.load %arg1[%c650, %c0_39] : memref<1344x128xbf16, #tpu.memory_space<vmem>>, vector<328x128xbf16>
    %c9 = arith.constant 9 : index
    %c0_40 = arith.constant 0 : index
    %c0_41 = arith.constant 0 : index
    %47 = vector.load %arg2[%c9, %c0_40, %c0_41] : memref<25x128x128xbf16, #tpu.memory_space<vmem>>, vector<1x128x128xbf16>
    %48 = vector.shape_cast %47 : vector<1x128x128xbf16> to vector<128x128xbf16>
    %cst_42 = arith.constant dense<0.000000e+00> : vector<328x128xf32>
    %49 = tpu.matmul %46, %48, %cst_42 {dimension_numbers = #tpu.dot_dimension_numbers<[1], [0], [0], [1], [0, 0, 1, 1], [], []>} : vector<328x128xbf16>, vector<128x128xbf16>, vector<328x128xf32> -> vector<328x128xf32>
    %50 = arith.addf %45, %49 : vector<328x128xf32>
    %c9_43 = arith.constant 9 : index
    %c0_44 = arith.constant 0 : index
    %51 = vector.load %arg1[%c9_43, %c0_44] : memref<1344x128xbf16, #tpu.memory_space<vmem>>, vector<328x128xbf16>
    %c10 = arith.constant 10 : index
    %c0_45 = arith.constant 0 : index
    %c0_46 = arith.constant 0 : index
    %52 = vector.load %arg2[%c10, %c0_45, %c0_46] : memref<25x128x128xbf16, #tpu.memory_space<vmem>>, vector<1x128x128xbf16>
    %53 = vector.shape_cast %52 : vector<1x128x128xbf16> to vector<128x128xbf16>
    %cst_47 = arith.constant dense<0.000000e+00> : vector<328x128xf32>
    %54 = tpu.matmul %51, %53, %cst_47 {dimension_numbers = #tpu.dot_dimension_numbers<[1], [0], [0], [1], [0, 0, 1, 1], [], []>} : vector<328x128xbf16>, vector<128x128xbf16>, vector<328x128xf32> -> vector<328x128xf32>
    %55 = arith.addf %50, %54 : vector<328x128xf32>
    %c333 = arith.constant 333 : index
    %c0_48 = arith.constant 0 : index
    %56 = vector.load %arg1[%c333, %c0_48] : memref<1344x128xbf16, #tpu.memory_space<vmem>>, vector<328x128xbf16>
    %c11 = arith.constant 11 : index
    %c0_49 = arith.constant 0 : index
    %c0_50 = arith.constant 0 : index
    %57 = vector.load %arg2[%c11, %c0_49, %c0_50] : memref<25x128x128xbf16, #tpu.memory_space<vmem>>, vector<1x128x128xbf16>
    %58 = vector.shape_cast %57 : vector<1x128x128xbf16> to vector<128x128xbf16>
    %cst_51 = arith.constant dense<0.000000e+00> : vector<328x128xf32>
    %59 = tpu.matmul %56, %58, %cst_51 {dimension_numbers = #tpu.dot_dimension_numbers<[1], [0], [0], [1], [0, 0, 1, 1], [], []>} : vector<328x128xbf16>, vector<128x128xbf16>, vector<328x128xf32> -> vector<328x128xf32>
    %60 = arith.addf %55, %59 : vector<328x128xf32>
    %c10_52 = arith.constant 10 : index
    %c0_53 = arith.constant 0 : index
    %61 = vector.load %arg1[%c10_52, %c0_53] : memref<1344x128xbf16, #tpu.memory_space<vmem>>, vector<328x128xbf16>
    %c12 = arith.constant 12 : index
    %c0_54 = arith.constant 0 : index
    %c0_55 = arith.constant 0 : index
    %62 = vector.load %arg2[%c12, %c0_54, %c0_55] : memref<25x128x128xbf16, #tpu.memory_space<vmem>>, vector<1x128x128xbf16>
    %63 = vector.shape_cast %62 : vector<1x128x128xbf16> to vector<128x128xbf16>
    %cst_56 = arith.constant dense<0.000000e+00> : vector<328x128xf32>
    %64 = tpu.matmul %61, %63, %cst_56 {dimension_numbers = #tpu.dot_dimension_numbers<[1], [0], [0], [1], [0, 0, 1, 1], [], []>} : vector<328x128xbf16>, vector<128x128xbf16>, vector<328x128xf32> -> vector<328x128xf32>
    %65 = arith.addf %60, %64 : vector<328x128xf32>
    %c334 = arith.constant 334 : index
    %c0_57 = arith.constant 0 : index
    %66 = vector.load %arg1[%c334, %c0_57] : memref<1344x128xbf16, #tpu.memory_space<vmem>>, vector<328x128xbf16>
    %c13 = arith.constant 13 : index
    %c0_58 = arith.constant 0 : index
    %c0_59 = arith.constant 0 : index
    %67 = vector.load %arg2[%c13, %c0_58, %c0_59] : memref<25x128x128xbf16, #tpu.memory_space<vmem>>, vector<1x128x128xbf16>
    %68 = vector.shape_cast %67 : vector<1x128x128xbf16> to vector<128x128xbf16>
    %cst_60 = arith.constant dense<0.000000e+00> : vector<328x128xf32>
    %69 = tpu.matmul %66, %68, %cst_60 {dimension_numbers = #tpu.dot_dimension_numbers<[1], [0], [0], [1], [0, 0, 1, 1], [], []>} : vector<328x128xbf16>, vector<128x128xbf16>, vector<328x128xf32> -> vector<328x128xf32>
    %70 = arith.addf %65, %69 : vector<328x128xf32>
    %c11_61 = arith.constant 11 : index
    %c0_62 = arith.constant 0 : index
    %71 = vector.load %arg1[%c11_61, %c0_62] : memref<1344x128xbf16, #tpu.memory_space<vmem>>, vector<328x128xbf16>
    %c14 = arith.constant 14 : index
    %c0_63 = arith.constant 0 : index
    %c0_64 = arith.constant 0 : index
    %72 = vector.load %arg2[%c14, %c0_63, %c0_64] : memref<25x128x128xbf16, #tpu.memory_space<vmem>>, vector<1x128x128xbf16>
    %73 = vector.shape_cast %72 : vector<1x128x128xbf16> to vector<128x128xbf16>
    %cst_65 = arith.constant dense<0.000000e+00> : vector<328x128xf32>
    %74 = tpu.matmul %71, %73, %cst_65 {dimension_numbers = #tpu.dot_dimension_numbers<[1], [0], [0], [1], [0, 0, 1, 1], [], []>} : vector<328x128xbf16>, vector<128x128xbf16>, vector<328x128xf32> -> vector<328x128xf32>
    %75 = arith.addf %70, %74 : vector<328x128xf32>
    %c657 = arith.constant 657 : index
    %c0_66 = arith.constant 0 : index
    %76 = vector.load %arg1[%c657, %c0_66] : memref<1344x128xbf16, #tpu.memory_space<vmem>>, vector<328x128xbf16>
    %c15 = arith.constant 15 : index
    %c0_67 = arith.constant 0 : index
    %c0_68 = arith.constant 0 : index
    %77 = vector.load %arg2[%c15, %c0_67, %c0_68] : memref<25x128x128xbf16, #tpu.memory_space<vmem>>, vector<1x128x128xbf16>
    %78 = vector.shape_cast %77 : vector<1x128x128xbf16> to vector<128x128xbf16>
    %cst_69 = arith.constant dense<0.000000e+00> : vector<328x128xf32>
    %79 = tpu.matmul %76, %78, %cst_69 {dimension_numbers = #tpu.dot_dimension_numbers<[1], [0], [0], [1], [0, 0, 1, 1], [], []>} : vector<328x128xbf16>, vector<128x128xbf16>, vector<328x128xf32> -> vector<328x128xf32>
    %80 = arith.addf %75, %79 : vector<328x128xf32>
    %c981 = arith.constant 981 : index
    %c0_70 = arith.constant 0 : index
    %81 = vector.load %arg1[%c981, %c0_70] : memref<1344x128xbf16, #tpu.memory_space<vmem>>, vector<328x128xbf16>
    %c16 = arith.constant 16 : index
    %c0_71 = arith.constant 0 : index
    %c0_72 = arith.constant 0 : index
    %82 = vector.load %arg2[%c16, %c0_71, %c0_72] : memref<25x128x128xbf16, #tpu.memory_space<vmem>>, vector<1x128x128xbf16>
    %83 = vector.shape_cast %82 : vector<1x128x128xbf16> to vector<128x128xbf16>
    %cst_73 = arith.constant dense<0.000000e+00> : vector<328x128xf32>
    %84 = tpu.matmul %81, %83, %cst_73 {dimension_numbers = #tpu.dot_dimension_numbers<[1], [0], [0], [1], [0, 0, 1, 1], [], []>} : vector<328x128xbf16>, vector<128x128xbf16>, vector<328x128xf32> -> vector<328x128xf32>
    %85 = arith.addf %80, %84 : vector<328x128xf32>
    %c658 = arith.constant 658 : index
    %c0_74 = arith.constant 0 : index
    %86 = vector.load %arg1[%c658, %c0_74] : memref<1344x128xbf16, #tpu.memory_space<vmem>>, vector<328x128xbf16>
    %c17 = arith.constant 17 : index
    %c0_75 = arith.constant 0 : index
    %c0_76 = arith.constant 0 : index
    %87 = vector.load %arg2[%c17, %c0_75, %c0_76] : memref<25x128x128xbf16, #tpu.memory_space<vmem>>, vector<1x128x128xbf16>
    %88 = vector.shape_cast %87 : vector<1x128x128xbf16> to vector<128x128xbf16>
    %cst_77 = arith.constant dense<0.000000e+00> : vector<328x128xf32>
    %89 = tpu.matmul %86, %88, %cst_77 {dimension_numbers = #tpu.dot_dimension_numbers<[1], [0], [0], [1], [0, 0, 1, 1], [], []>} : vector<328x128xbf16>, vector<128x128xbf16>, vector<328x128xf32> -> vector<328x128xf32>
    %90 = arith.addf %85, %89 : vector<328x128xf32>
    %c982 = arith.constant 982 : index
    %c0_78 = arith.constant 0 : index
    %91 = vector.load %arg1[%c982, %c0_78] : memref<1344x128xbf16, #tpu.memory_space<vmem>>, vector<328x128xbf16>
    %c18 = arith.constant 18 : index
    %c0_79 = arith.constant 0 : index
    %c0_80 = arith.constant 0 : index
    %92 = vector.load %arg2[%c18, %c0_79, %c0_80] : memref<25x128x128xbf16, #tpu.memory_space<vmem>>, vector<1x128x128xbf16>
    %93 = vector.shape_cast %92 : vector<1x128x128xbf16> to vector<128x128xbf16>
    %cst_81 = arith.constant dense<0.000000e+00> : vector<328x128xf32>
    %94 = tpu.matmul %91, %93, %cst_81 {dimension_numbers = #tpu.dot_dimension_numbers<[1], [0], [0], [1], [0, 0, 1, 1], [], []>} : vector<328x128xbf16>, vector<128x128xbf16>, vector<328x128xf32> -> vector<328x128xf32>
    %95 = arith.addf %90, %94 : vector<328x128xf32>
    %c659 = arith.constant 659 : index
    %c0_82 = arith.constant 0 : index
    %96 = vector.load %arg1[%c659, %c0_82] : memref<1344x128xbf16, #tpu.memory_space<vmem>>, vector<328x128xbf16>
    %c19 = arith.constant 19 : index
    %c0_83 = arith.constant 0 : index
    %c0_84 = arith.constant 0 : index
    %97 = vector.load %arg2[%c19, %c0_83, %c0_84] : memref<25x128x128xbf16, #tpu.memory_space<vmem>>, vector<1x128x128xbf16>
    %98 = vector.shape_cast %97 : vector<1x128x128xbf16> to vector<128x128xbf16>
    %cst_85 = arith.constant dense<0.000000e+00> : vector<328x128xf32>
    %99 = tpu.matmul %96, %98, %cst_85 {dimension_numbers = #tpu.dot_dimension_numbers<[1], [0], [0], [1], [0, 0, 1, 1], [], []>} : vector<328x128xbf16>, vector<128x128xbf16>, vector<328x128xf32> -> vector<328x128xf32>
    %100 = arith.addf %95, %99 : vector<328x128xf32>
    %c18_86 = arith.constant 18 : index
    %c0_87 = arith.constant 0 : index
    %101 = vector.load %arg1[%c18_86, %c0_87] : memref<1344x128xbf16, #tpu.memory_space<vmem>>, vector<328x128xbf16>
    %c20 = arith.constant 20 : index
    %c0_88 = arith.constant 0 : index
    %c0_89 = arith.constant 0 : index
    %102 = vector.load %arg2[%c20, %c0_88, %c0_89] : memref<25x128x128xbf16, #tpu.memory_space<vmem>>, vector<1x128x128xbf16>
    %103 = vector.shape_cast %102 : vector<1x128x128xbf16> to vector<128x128xbf16>
    %cst_90 = arith.constant dense<0.000000e+00> : vector<328x128xf32>
    %104 = tpu.matmul %101, %103, %cst_90 {dimension_numbers = #tpu.dot_dimension_numbers<[1], [0], [0], [1], [0, 0, 1, 1], [], []>} : vector<328x128xbf16>, vector<128x128xbf16>, vector<328x128xf32> -> vector<328x128xf32>
    %105 = arith.addf %100, %104 : vector<328x128xf32>
    %c342 = arith.constant 342 : index
    %c0_91 = arith.constant 0 : index
    %106 = vector.load %arg1[%c342, %c0_91] : memref<1344x128xbf16, #tpu.memory_space<vmem>>, vector<328x128xbf16>
    %c21 = arith.constant 21 : index
    %c0_92 = arith.constant 0 : index
    %c0_93 = arith.constant 0 : index
    %107 = vector.load %arg2[%c21, %c0_92, %c0_93] : memref<25x128x128xbf16, #tpu.memory_space<vmem>>, vector<1x128x128xbf16>
    %108 = vector.shape_cast %107 : vector<1x128x128xbf16> to vector<128x128xbf16>
    %cst_94 = arith.constant dense<0.000000e+00> : vector<328x128xf32>
    %109 = tpu.matmul %106, %108, %cst_94 {dimension_numbers = #tpu.dot_dimension_numbers<[1], [0], [0], [1], [0, 0, 1, 1], [], []>} : vector<328x128xbf16>, vector<128x128xbf16>, vector<328x128xf32> -> vector<328x128xf32>
    %110 = arith.addf %105, %109 : vector<328x128xf32>
    %c19_95 = arith.constant 19 : index
    %c0_96 = arith.constant 0 : index
    %111 = vector.load %arg1[%c19_95, %c0_96] : memref<1344x128xbf16, #tpu.memory_space<vmem>>, vector<328x128xbf16>
    %c22 = arith.constant 22 : index
    %c0_97 = arith.constant 0 : index
    %c0_98 = arith.constant 0 : index
    %112 = vector.load %arg2[%c22, %c0_97, %c0_98] : memref<25x128x128xbf16, #tpu.memory_space<vmem>>, vector<1x128x128xbf16>
    %113 = vector.shape_cast %112 : vector<1x128x128xbf16> to vector<128x128xbf16>
    %cst_99 = arith.constant dense<0.000000e+00> : vector<328x128xf32>
    %114 = tpu.matmul %111, %113, %cst_99 {dimension_numbers = #tpu.dot_dimension_numbers<[1], [0], [0], [1], [0, 0, 1, 1], [], []>} : vector<328x128xbf16>, vector<128x128xbf16>, vector<328x128xf32> -> vector<328x128xf32>
    %115 = arith.addf %110, %114 : vector<328x128xf32>
    %c343 = arith.constant 343 : index
    %c0_100 = arith.constant 0 : index
    %116 = vector.load %arg1[%c343, %c0_100] : memref<1344x128xbf16, #tpu.memory_space<vmem>>, vector<328x128xbf16>
    %c23 = arith.constant 23 : index
    %c0_101 = arith.constant 0 : index
    %c0_102 = arith.constant 0 : index
    %117 = vector.load %arg2[%c23, %c0_101, %c0_102] : memref<25x128x128xbf16, #tpu.memory_space<vmem>>, vector<1x128x128xbf16>
    %118 = vector.shape_cast %117 : vector<1x128x128xbf16> to vector<128x128xbf16>
    %cst_103 = arith.constant dense<0.000000e+00> : vector<328x128xf32>
    %119 = tpu.matmul %116, %118, %cst_103 {dimension_numbers = #tpu.dot_dimension_numbers<[1], [0], [0], [1], [0, 0, 1, 1], [], []>} : vector<328x128xbf16>, vector<128x128xbf16>, vector<328x128xf32> -> vector<328x128xf32>
    %120 = arith.addf %115, %119 : vector<328x128xf32>
    %c20_104 = arith.constant 20 : index
    %c0_105 = arith.constant 0 : index
    %121 = vector.load %arg1[%c20_104, %c0_105] : memref<1344x128xbf16, #tpu.memory_space<vmem>>, vector<328x128xbf16>
    %c24 = arith.constant 24 : index
    %c0_106 = arith.constant 0 : index
    %c0_107 = arith.constant 0 : index
    %122 = vector.load %arg2[%c24, %c0_106, %c0_107] : memref<25x128x128xbf16, #tpu.memory_space<vmem>>, vector<1x128x128xbf16>
    %123 = vector.shape_cast %122 : vector<1x128x128xbf16> to vector<128x128xbf16>
    %cst_108 = arith.constant dense<0.000000e+00> : vector<328x128xf32>
    %124 = tpu.matmul %121, %123, %cst_108 {dimension_numbers = #tpu.dot_dimension_numbers<[1], [0], [0], [1], [0, 0, 1, 1], [], []>} : vector<328x128xbf16>, vector<128x128xbf16>, vector<328x128xf32> -> vector<328x128xf32>
    %125 = arith.addf %120, %124 : vector<328x128xf32>
    %c0_109 = arith.constant 0 : index
    %c0_110 = arith.constant 0 : index
    %126 = vector.load %arg3[%c0_109, %c0_110] : memref<1x128xf32, #tpu.memory_space<vmem>>, vector<1x128xf32>
    %127 = vector.broadcast %126 : vector<1x128xf32> to vector<328x128xf32>
    %128 = arith.mulf %125, %127 : vector<328x128xf32>
    %c0_111 = arith.constant 0 : index
    %c0_112 = arith.constant 0 : index
    %129 = vector.load %arg4[%c0_111, %c0_112] : memref<1x128xf32, #tpu.memory_space<vmem>>, vector<1x128xf32>
    %130 = vector.broadcast %129 : vector<1x128xf32> to vector<328x128xf32>
    %131 = arith.addf %128, %130 : vector<328x128xf32>
    %cst_113 = arith.constant 0.000000e+00 : f32
    %132 = vector.broadcast %cst_113 : f32 to vector<328x128xf32>
    %133 = arith.maximumf %131, %132 : vector<328x128xf32>
    %c0_114 = arith.constant 0 : index
    %c0_115 = arith.constant 0 : index
    %134 = vector.load %arg5[%c0_114, %c0_115] : memref<328x1xf32, #tpu.memory_space<vmem>>, vector<328x1xf32>
    %135 = vector.broadcast %134 : vector<328x1xf32> to vector<328x128xf32>
    %136 = arith.mulf %133, %135 : vector<328x128xf32>
    %137 = vector.extract_strided_slice %136 {offsets = [0, 0], sizes = [81, 128], strides = [1, 1]} : vector<328x128xf32> to vector<81x128xf32>
    %cst_116 = arith.constant dense<0xFF800000> : vector<128xf32>
    %138 = vector.multi_reduction <maximumf>, %137, %cst_116 [0] : vector<81x128xf32> to vector<128xf32>
    %139 = vector.shape_cast %138 : vector<128xf32> to vector<1x128xf32>
    %140 = vector.extract_strided_slice %136 {offsets = [81, 0], sizes = [81, 128], strides = [1, 1]} : vector<328x128xf32> to vector<81x128xf32>
    %cst_117 = arith.constant dense<0xFF800000> : vector<128xf32>
    %141 = vector.multi_reduction <maximumf>, %140, %cst_117 [0] : vector<81x128xf32> to vector<128xf32>
    %142 = vector.shape_cast %141 : vector<128xf32> to vector<1x128xf32>
    %143 = vector.extract_strided_slice %136 {offsets = [162, 0], sizes = [81, 128], strides = [1, 1]} : vector<328x128xf32> to vector<81x128xf32>
    %cst_118 = arith.constant dense<0xFF800000> : vector<128xf32>
    %144 = vector.multi_reduction <maximumf>, %143, %cst_118 [0] : vector<81x128xf32> to vector<128xf32>
    %145 = vector.shape_cast %144 : vector<128xf32> to vector<1x128xf32>
    %146 = vector.extract_strided_slice %136 {offsets = [243, 0], sizes = [81, 128], strides = [1, 1]} : vector<328x128xf32> to vector<81x128xf32>
    %cst_119 = arith.constant dense<0xFF800000> : vector<128xf32>
    %147 = vector.multi_reduction <maximumf>, %146, %cst_119 [0] : vector<81x128xf32> to vector<128xf32>
    %148 = vector.shape_cast %147 : vector<128xf32> to vector<1x128xf32>
    %149 = tpu.concatenate %139, %142, %145, %148 in 0 : vector<1x128xf32>, vector<1x128xf32>, vector<1x128xf32>, vector<1x128xf32> -> vector<4x128xf32>
    %c0_120 = arith.constant 0 : index
    %c0_121 = arith.constant 0 : index
    %150 = vector.load %arg6[%c0_120, %c0_121] : memref<128x128xf32, #tpu.memory_space<vmem>>, vector<128x128xf32>
    %cst_122 = arith.constant dense<0.000000e+00> : vector<4x128xf32>
    %151 = tpu.matmul %149, %150, %cst_122 {dimension_numbers = #tpu.dot_dimension_numbers<[1], [0], [0], [1], [0, 0, 1, 1], [], []>} : vector<4x128xf32>, vector<128x128xf32>, vector<4x128xf32> -> vector<4x128xf32>
    %c0_123 = arith.constant 0 : index
    %c0_124 = arith.constant 0 : index
    %152 = vector.load %arg7[%c0_123, %c0_124] : memref<1x128xf32, #tpu.memory_space<vmem>>, vector<1x128xf32>
    %153 = vector.broadcast %152 : vector<1x128xf32> to vector<4x128xf32>
    %154 = arith.addf %151, %153 : vector<4x128xf32>
    %c0_125 = arith.constant 0 : index
    %c0_126 = arith.constant 0 : index
    %155 = vector.load %arg8[%c0_125, %c0_126] : memref<4x128xf32, #tpu.memory_space<vmem>>, vector<4x128xf32>
    tpu.vector_store %arg8[%c0_125, %c0_126], %154 {strides = array<i32>} : memref<4x128xf32, #tpu.memory_space<vmem>>, vector<4x128xf32>,
    return
  }
  func.func @transform_0(%arg0: i32) -> (i32, i32) {
    %c0_i32 = arith.constant 0 : i32
    %c0_i32_0 = arith.constant 0 : i32
    %c0_i32_1 = arith.constant 0 : i32
    return %c0_i32, %c0_i32_0 : i32, i32
  }
  func.func @transform_1(%arg0: i32) -> (i32, i32, i32) {
    %c0_i32 = arith.constant 0 : i32
    %c0_i32_0 = arith.constant 0 : i32
    %c0_i32_1 = arith.constant 0 : i32
    %c0_i32_2 = arith.constant 0 : i32
    return %c0_i32, %c0_i32_0, %c0_i32_1 : i32, i32, i32
  }
  func.func @transform_2(%arg0: i32) -> (i32, i32) {
    %c0_i32 = arith.constant 0 : i32
    %c0_i32_0 = arith.constant 0 : i32
    %c0_i32_1 = arith.constant 0 : i32
    return %c0_i32, %c0_i32_0 : i32, i32
  }
  func.func @transform_3(%arg0: i32) -> (i32, i32) {
    %c0_i32 = arith.constant 0 : i32
    %c0_i32_0 = arith.constant 0 : i32
    %c0_i32_1 = arith.constant 0 : i32
    return %c0_i32, %c0_i32_0 : i32, i32
  }
  func.func @transform_4(%arg0: i32) -> (i32, i32) {
    %c0_i32 = arith.constant 0 : i32
    %c0_i32_0 = arith.constant 0 : i32
    %c0_i32_1 = arith.constant 0 : i32
    return %c0_i32, %c0_i32_0 : i32, i32
  }
  func.func @transform_5(%arg0: i32) -> (i32, i32) {
    %c0_i32 = arith.constant 0 : i32
    %c0_i32_0 = arith.constant 0 : i32
    %c0_i32_1 = arith.constant 0 : i32
    return %c0_i32, %c0_i32_0 : i32, i32
  }
  func.func @transform_6(%arg0: i32) -> (i32, i32) {
    %c0_i32 = arith.constant 0 : i32
    %c0_i32_0 = arith.constant 0 : i32
    %c0_i32_1 = arith.constant 0 : i32
    return %c0_i32, %c0_i32_0 : i32, i32
  }
  func.func @transform_7(%arg0: i32) -> (i32, i32) {
    %c0_i32 = arith.constant 0 : i32
    %c0_i32_0 = arith.constant 0 : i32
    %c0_i32_1 = arith.constant 0 : i32
    return %c0_i32, %c0_i32_0 : i32, i32
  }
}

module attributes {stable_mosaic.version = 11 : i64} {
  func.func @_tail_kernel(%arg0: i32, %arg1: memref<4x128xbf16, #tpu.memory_space<vmem>>, %arg2: memref<128x2048xbf16, #tpu.memory_space<vmem>>, %arg3: memref<1x2048xf32, #tpu.memory_space<vmem>>, %arg4: memref<2048x128xbf16, #tpu.memory_space<vmem>>, %arg5: memref<1x128xf32, #tpu.memory_space<vmem>>, %arg6: memref<2x128xf32, #tpu.memory_space<vmem>>) attributes {dimension_semantics = [#tpu.dimension_semantics<arbitrary>], iteration_bounds = array<i64: 1>, scalar_prefetch = 0 : i64, scratch_operands = 0 : i64, tpu.core_type = #tpu.core_type<tc>, window_params = [{pipeline_mode = #tpu.pipeline_mode<synchronous>, transform_indices = @transform_0, window_bounds = array<i64: 4, 128>}, {pipeline_mode = #tpu.pipeline_mode<synchronous>, transform_indices = @transform_1, window_bounds = array<i64: 128, 2048>}, {pipeline_mode = #tpu.pipeline_mode<synchronous>, transform_indices = @transform_2, window_bounds = array<i64: 1, 2048>}, {pipeline_mode = #tpu.pipeline_mode<synchronous>, transform_indices = @transform_3, window_bounds = array<i64: 2048, 128>}, {pipeline_mode = #tpu.pipeline_mode<synchronous>, transform_indices = @transform_4, window_bounds = array<i64: 1, 128>}, {pipeline_mode = #tpu.pipeline_mode<synchronous>, transform_indices = @transform_5, window_bounds = array<i64: 2, 128>}]} {
    %c0 = arith.constant 0 : index
    %c0_0 = arith.constant 0 : index
    %0 = vector.load %arg1[%c0, %c0_0] : memref<4x128xbf16, #tpu.memory_space<vmem>>, vector<4x128xbf16>
    %c0_1 = arith.constant 0 : index
    %c0_2 = arith.constant 0 : index
    %1 = vector.load %arg2[%c0_1, %c0_2] : memref<128x2048xbf16, #tpu.memory_space<vmem>>, vector<128x2048xbf16>
    %cst = arith.constant dense<0.000000e+00> : vector<4x2048xf32>
    %2 = tpu.matmul %0, %1, %cst {dimension_numbers = #tpu.dot_dimension_numbers<[1], [0], [0], [1], [0, 0, 1, 1], [], []>} : vector<4x128xbf16>, vector<128x2048xbf16>, vector<4x2048xf32> -> vector<4x2048xf32>
    %c0_3 = arith.constant 0 : index
    %c0_4 = arith.constant 0 : index
    %3 = vector.load %arg3[%c0_3, %c0_4] : memref<1x2048xf32, #tpu.memory_space<vmem>>, vector<1x2048xf32>
    %4 = vector.broadcast %3 : vector<1x2048xf32> to vector<4x2048xf32>
    %5 = arith.addf %2, %4 : vector<4x2048xf32>
    %cst_5 = arith.constant 0.000000e+00 : f32
    %6 = vector.broadcast %cst_5 : f32 to vector<4x2048xf32>
    %7 = arith.maximumf %5, %6 : vector<4x2048xf32>
    %8 = vector.extract_strided_slice %7 {offsets = [0, 0], sizes = [2, 2048], strides = [1, 1]} : vector<4x2048xf32> to vector<2x2048xf32>
    %9 = vector.extract_strided_slice %7 {offsets = [2, 0], sizes = [2, 2048], strides = [1, 1]} : vector<4x2048xf32> to vector<2x2048xf32>
    %10 = arith.maximumf %8, %9 : vector<2x2048xf32>
    %11 = arith.truncf %10 : vector<2x2048xf32> to vector<2x2048xbf16>
    %c0_6 = arith.constant 0 : index
    %c0_7 = arith.constant 0 : index
    %12 = vector.load %arg4[%c0_6, %c0_7] : memref<2048x128xbf16, #tpu.memory_space<vmem>>, vector<2048x128xbf16>
    %cst_8 = arith.constant dense<0.000000e+00> : vector<2x128xf32>
    %13 = tpu.matmul %11, %12, %cst_8 {dimension_numbers = #tpu.dot_dimension_numbers<[1], [0], [0], [1], [0, 0, 1, 1], [], []>} : vector<2x2048xbf16>, vector<2048x128xbf16>, vector<2x128xf32> -> vector<2x128xf32>
    %c0_9 = arith.constant 0 : index
    %c0_10 = arith.constant 0 : index
    %14 = vector.load %arg5[%c0_9, %c0_10] : memref<1x128xf32, #tpu.memory_space<vmem>>, vector<1x128xf32>
    %15 = vector.broadcast %14 : vector<1x128xf32> to vector<2x128xf32>
    %16 = arith.addf %13, %15 : vector<2x128xf32>
    %c0_11 = arith.constant 0 : index
    %c0_12 = arith.constant 0 : index
    %17 = vector.load %arg6[%c0_11, %c0_12] : memref<2x128xf32, #tpu.memory_space<vmem>>, vector<2x128xf32>
    tpu.vector_store %arg6[%c0_11, %c0_12], %16 {strides = array<i32>} : memref<2x128xf32, #tpu.memory_space<vmem>>, vector<2x128xf32>,
    return
  }
  func.func @transform_0(%arg0: i32) -> (i32, i32) {
    %c0_i32 = arith.constant 0 : i32
    %c0_i32_0 = arith.constant 0 : i32
    %c0_i32_1 = arith.constant 0 : i32
    return %c0_i32, %c0_i32_0 : i32, i32
  }
  func.func @transform_1(%arg0: i32) -> (i32, i32) {
    %c0_i32 = arith.constant 0 : i32
    %c0_i32_0 = arith.constant 0 : i32
    %c0_i32_1 = arith.constant 0 : i32
    return %c0_i32, %c0_i32_0 : i32, i32
  }
  func.func @transform_2(%arg0: i32) -> (i32, i32) {
    %c0_i32 = arith.constant 0 : i32
    %c0_i32_0 = arith.constant 0 : i32
    %c0_i32_1 = arith.constant 0 : i32
    return %c0_i32, %c0_i32_0 : i32, i32
  }
  func.func @transform_3(%arg0: i32) -> (i32, i32) {
    %c0_i32 = arith.constant 0 : i32
    %c0_i32_0 = arith.constant 0 : i32
    %c0_i32_1 = arith.constant 0 : i32
    return %c0_i32, %c0_i32_0 : i32, i32
  }
  func.func @transform_4(%arg0: i32) -> (i32, i32) {
    %c0_i32 = arith.constant 0 : i32
    %c0_i32_0 = arith.constant 0 : i32
    %c0_i32_1 = arith.constant 0 : i32
    return %c0_i32, %c0_i32_0 : i32, i32
  }
  func.func @transform_5(%arg0: i32) -> (i32, i32) {
    %c0_i32 = arith.constant 0 : i32
    %c0_i32_0 = arith.constant 0 : i32
    %c0_i32_1 = arith.constant 0 : i32
    return %c0_i32, %c0_i32_0 : i32, i32
  }
}

</mosaic_0001>

<bundles_post_ra>
// kernel: vacnn_forward.3
= control target key start
LH: loop header
LB: loop body
LE: loop exit
PB: predicated region body
PF: predicated region fallthrough
CT: control target
= control target key end

     0   :  { %s2450_s15 = smov 0   ;;  %s2764_s0 = inlined_call_operand.vmem [shape: bf16[1344,128], index: 0, kind: input, shape index: {}]   ;;  %s2765_s1 = inlined_call_operand.vmem [shape: bf16[128,128], index: 1, kind: input, shape index: {}]   ;;  %s2766_s2 = inlined_call_operand.vmem [shape: f32[1,128], index: 2, kind: input, shape index: {}]   ;;  %s2767_s3 = inlined_call_operand.vmem [shape: f32[1,128], index: 3, kind: input, shape index: {}]   ;;  %s2768_s4 = inlined_call_operand.vmem [shape: bf16[1344,128], index: 4, kind: output, shape index: {}]  }
   0x1 LB: > { %s1713_s16 = sadd.s32 4294967295, %s2423_s15   ;;  %p1717_p0 = scmp.ge.s32.totalorder %s2423_s15, 1  ;;  %s2423_s15 = sphi %s2450_s15, %s14_s15  }
   0x2   : > { %p163_p1 = scmp.lt.s32.totalorder %s2423_s15, 3 }
   0x4   : > { %p164_p2 = pnand %p1717_p0, %p163_p1 }
   0x5   : > { %v2367_v0 = vld [vmem:[%s2765_s1] sm:$0xff] (!%p164_p2)   ;;  %s189_s19 = smul.u32 (!%p164_p2), 84, %s1713_s16  ;;  %v2368_v1 = vld [vmem:[%s2765_s1 + $0x8] sm:$0xff] (!%p164_p2)   ;;  %v2369_v2 = vld [vmem:[%s2765_s1 + $0x10] sm:$0xff] (!%p164_p2)  }
   0x6   : > { %167 = sbr.rel (%p164_p2) target bundleno = 342 (0x156), region = 36  ;;  %2243 = vmatprep.subr.bf16.mxu0 (!%p164_p2), %v2367_v0  ;;  %2343 = vmatprep.subr.bf16.mxu1 (!%p164_p2), %v2367_v0  ;;  %v2370_v3 = vld [vmem:[%s2765_s1 + $0x18] sm:$0xff] (!%p164_p2)   ;;  %v2371_v6 = vld [vmem:[%s2765_s1 + $0x20] sm:$0xff] (!%p164_p2)   ;;  %v2372_v7 = vld [vmem:[%s2765_s1 + $0x28] sm:$0xff] (!%p164_p2)  }
   0x7   : > { %p190_p3 = scmp.lt.s32.totalorder (!%p164_p2), %s189_s19, 167  ;;  %2244 = vmatpush3.bf16.msra.mxu0 (!%p164_p2), %v2367_v0  ;;  %2351 = vmatpush3.bf16.msra.mxu1 (!%p164_p2), %v2367_v0  ;;  %v2373_v8 = vld [vmem:[%s2765_s1 + $0x30] sm:$0xff] (!%p164_p2)   ;;  %v2374_v9 = vld [vmem:[%s2765_s1 + $0x38] sm:$0xff] (!%p164_p2)   ;;  %v2537_v50 = vld [vmem:[%s2766_s2] ss:$0 sm:$0xff] (!%p164_p2) }
   0x8   : > { %2245 = vmatprep.subr.bf16.mxu0 (!%p164_p2), %v2368_v1  ;;  %2344 = vmatprep.subr.bf16.mxu1 (!%p164_p2), %v2368_v1  ;;  %v2542_v52 = vld [vmem:[%s2767_s3] ss:$0 sm:$0xff] (!%p164_p2) }
   0xb   : > { %2246 = vmatpush3.bf16.msra.mxu0 (!%p164_p2), %v2368_v1  ;;  %2352 = vmatpush3.bf16.msra.mxu1 (!%p164_p2), %v2368_v1 }
   0xc   : > { %2247 = vmatprep.subr.bf16.mxu0 (!%p164_p2), %v2369_v2  ;;  %2345 = vmatprep.subr.bf16.mxu1 (!%p164_p2), %v2369_v2 }
   0xd   : > { %s2770_s19 = smov (!%p190_p3, %s189_s19), 167 }
   0xe   : > { %s1718_s24 = sshll.u32 %s2770_s19, 2 }
   0xf   : > { %s2478_s29 = scalar_lea.vmem %s2764_s0, %s1718_s24  ;;  %2248 = vmatpush3.bf16.msra.mxu0 %v2369_v2  ;;  %2353 = vmatpush3.bf16.msra.mxu1 %v2369_v2  ;;  %s2565_s20 = scalar_lea.vmem %s2768_s4, %s1718_s24 }
  0x10   : > { %v2375_v4 = vld [vmem:[%s2478_s29] sm:$0xff]   ;;  %v2377_v5 = vld [vmem:[%s2478_s29 + $0xb0] sm:$0xff]   ;;  %2249 = vmatprep.subr.bf16.mxu0 %v2370_v3  ;;  %2346 = vmatprep.subr.bf16.mxu1 %v2370_v3  ;;  %v2376_v10 = vld [vmem:[%s2478_s29 + $0x8] sm:$0xff]  }
  0x11   : > { %2259 = vmatprep.mubr.bf16.mxu0 %v2375_v4  ;;  %2303 = vmatprep.mubr.bf16.mxu1 %v2377_v5  ;;  %v2378_v11 = vld [vmem:[%s2478_s29 + $0xb8] sm:$0xff]   ;;  %v2379_v12 = vld [vmem:[%s2478_s29 + $0x10] sm:$0xff]   ;;  %v2381_v13 = vld [vmem:[%s2478_s29 + $0xc0] sm:$0xff]  }
  0x12   : > { %v2380_v14 = vld [vmem:[%s2478_s29 + $0x18] sm:$0xff]   ;;  %v2382_v15 = vld [vmem:[%s2478_s29 + $0xc8] sm:$0xff]   ;;  %v2383_v16 = vld [vmem:[%s2478_s29 + $0x20] sm:$0xff]  }
  0x13   : > { %2250 = vmatpush3.bf16.msra.mxu0 %v2370_v3  ;;  %2354 = vmatpush3.bf16.msra.mxu1 %v2370_v3  ;;  %v2385_v17 = vld [vmem:[%s2478_s29 + $0xd0] sm:$0xff]   ;;  %v2384_v18 = vld [vmem:[%s2478_s29 + $0x28] sm:$0xff]   ;;  %v2386_v19 = vld [vmem:[%s2478_s29 + $0xd8] sm:$0xff]  }
  0x14   : > { %2251 = vmatprep.subr.bf16.mxu0 %v2371_v6  ;;  %2347 = vmatprep.subr.bf16.mxu1 %v2371_v6  ;;  %v2387_v20 = vld [vmem:[%s2478_s29 + $0x30] sm:$0xff]   ;;  %v2389_v21 = vld [vmem:[%s2478_s29 + $0xe0] sm:$0xff]   ;;  %v2388_v22 = vld [vmem:[%s2478_s29 + $0x38] sm:$0xff]  }
  0x15   : > { %v2390_v23 = vld [vmem:[%s2478_s29 + $0xe8] sm:$0xff]   ;;  %v2391_v24 = vld [vmem:[%s2478_s29 + $0x40] sm:$0xff]   ;;  %v2393_v25 = vld [vmem:[%s2478_s29 + $0xf0] sm:$0xff]  }
  0x16   : > { %v2392_v26 = vld [vmem:[%s2478_s29 + $0x48] sm:$0xff]   ;;  %v2394_v27 = vld [vmem:[%s2478_s29 + $0xf8] sm:$0xff]   ;;  %v2395_v28 = vld [vmem:[%s2478_s29 + $0x50] sm:$0xff]  }
  0x17   : > { %2252 = vmatpush3.bf16.msra.mxu0 %v2371_v6  ;;  %2355 = vmatpush3.bf16.msra.mxu1 %v2371_v6  ;;  %v2397_v29 = vld [vmem:[%s2478_s29 + $0x100] sm:$0xff]   ;;  %v2396_v30 = vld [vmem:[%s2478_s29 + $0x58] sm:$0xff]   ;;  %v2398_v31 = vld [vmem:[%s2478_s29 + $0x108] sm:$0xff]  }
  0x18   : > { %2253 = vmatprep.subr.bf16.mxu0 %v2372_v7  ;;  %2348 = vmatprep.subr.bf16.mxu1 %v2372_v7  ;;  %v2399_v32 = vld [vmem:[%s2478_s29 + $0x60] sm:$0xff]   ;;  %v2401_v33 = vld [vmem:[%s2478_s29 + $0x110] sm:$0xff]   ;;  %v2400_v34 = vld [vmem:[%s2478_s29 + $0x68] sm:$0xff]  }
  0x19   : > { %v2402_v35 = vld [vmem:[%s2478_s29 + $0x118] sm:$0xff]   ;;  %v2403_v36 = vld [vmem:[%s2478_s29 + $0x70] sm:$0xff]   ;;  %v2405_v37 = vld [vmem:[%s2478_s29 + $0x120] sm:$0xff]  }
  0x1a   : > { %v2404_v38 = vld [vmem:[%s2478_s29 + $0x78] sm:$0xff]   ;;  %v2406_v39 = vld [vmem:[%s2478_s29 + $0x128] sm:$0xff]   ;;  %v2407_v40 = vld [vmem:[%s2478_s29 + $0x80] sm:$0xff]  }
  0x1b   : > { %2254 = vmatpush3.bf16.msra.mxu0 %v2372_v7  ;;  %2356 = vmatpush3.bf16.msra.mxu1 %v2372_v7  ;;  %v2409_v41 = vld [vmem:[%s2478_s29 + $0x130] sm:$0xff]   ;;  %v2408_v42 = vld [vmem:[%s2478_s29 + $0x88] sm:$0xff]   ;;  %v2410_v43 = vld [vmem:[%s2478_s29 + $0x138] sm:$0xff]  }
  0x1c   : > { %2255 = vmatprep.subr.bf16.mxu0 %v2373_v8  ;;  %2349 = vmatprep.subr.bf16.mxu1 %v2373_v8  ;;  %v2411_v44 = vld [vmem:[%s2478_s29 + $0x90] sm:$0xff]   ;;  %v2413_v45 = vld [vmem:[%s2478_s29 + $0x140] sm:$0xff]   ;;  %v2412_v46 = vld [vmem:[%s2478_s29 + $0x98] sm:$0xff]  }
  0x1d   : > { %v2414_v47 = vld [vmem:[%s2478_s29 + $0x148] sm:$0xff]   ;;  %v2415_v48 = vld [vmem:[%s2478_s29 + $0xa0] sm:$0xff]  }
  0x1e   : > { %v2416_v49 = vld [vmem:[%s2478_s29 + $0xa8] sm:$0xff]  }
  0x1f   : > { %2256 = vmatpush3.bf16.msra.mxu0 %v2373_v8  ;;  %2357 = vmatpush3.bf16.msra.mxu1 %v2373_v8 }
  0x20   : > { %2257 = vmatprep.subr.bf16.mxu0 %v2374_v9  ;;  %2350 = vmatprep.subr.bf16.mxu1 %v2374_v9 }
  0x23   : > { %2258 = vmatpush3.bf16.msra.mxu0 %v2374_v9  ;;  %2358 = vmatpush3.bf16.msra.mxu1 %v2374_v9 }
  0x26   : > { %2260 = vmatmul.mubr.bf16.vlgmr.msra.gmra.mrb[0].mxu0 %v2376_v10  ;;  %2304 = vmatmul.mubr.bf16.vlgmr.msra.gmra.mrb[0].mxu1 %v2378_v11 }
  0x27   : > { %2263 = vmatprep.mubr.bf16.mxu0 %v2379_v12  ;;  %2307 = vmatprep.mubr.bf16.mxu1 %v2381_v13 }
  0x2e   : > { %2264 = vmatmul.mubr.bf16.gmra.mrb[4].mxu0 %v2380_v14  ;;  %2308 = vmatmul.mubr.bf16.gmra.mrb[4].mxu1 %v2382_v15 }
  0x2f   : > { %2267 = vmatprep.mubr.bf16.mxu0 %v2383_v16  ;;  %2311 = vmatprep.mubr.bf16.mxu1 %v2385_v17 }
  0x36   : > { %2268 = vmatmul.mubr.bf16.gmra.mrb[8].mxu0 %v2384_v18  ;;  %2312 = vmatmul.mubr.bf16.gmra.mrb[8].mxu1 %v2386_v19 }
  0x37   : > { %2271 = vmatprep.mubr.bf16.mxu0 %v2387_v20  ;;  %2315 = vmatprep.mubr.bf16.mxu1 %v2389_v21 }
  0x3e   : > { %2272 = vmatmul.mubr.bf16.gmra.mrb[12].mxu0 %v2388_v22  ;;  %2316 = vmatmul.mubr.bf16.gmra.mrb[12].mxu1 %v2390_v23 }
  0x3f   : > { %2275 = vmatprep.mubr.bf16.mxu0 %v2391_v24  ;;  %2319 = vmatprep.mubr.bf16.mxu1 %v2393_v25 }
  0x46   : > { %2276 = vmatmul.mubr.bf16.gmra.mrb[16].mxu0 %v2392_v26  ;;  %2320 = vmatmul.mubr.bf16.gmra.mrb[16].mxu1 %v2394_v27 }
  0x47   : > { %2279 = vmatprep.mubr.bf16.mxu0 %v2395_v28  ;;  %2323 = vmatprep.mubr.bf16.mxu1 %v2397_v29 }
  0x4e   : > { %2280 = vmatmul.mubr.bf16.gmra.mrb[20].mxu0 %v2396_v30  ;;  %2324 = vmatmul.mubr.bf16.gmra.mrb[20].mxu1 %v2398_v31 }
  0x4f   : > { %2283 = vmatprep.mubr.bf16.mxu0 %v2399_v32  ;;  %2327 = vmatprep.mubr.bf16.mxu1 %v2401_v33 }
  0x56   : > { %2284 = vmatmul.mubr.bf16.gmra.mrb[24].mxu0 %v2400_v34  ;;  %2328 = vmatmul.mubr.bf16.gmra.mrb[24].mxu1 %v2402_v35 }
  0x57   : > { %2287 = vmatprep.mubr.bf16.mxu0 %v2403_v36  ;;  %2331 = vmatprep.mubr.bf16.mxu1 %v2405_v37 }
  0x5e   : > { %2288 = vmatmul.mubr.bf16.gmra.mrb[28].mxu0 %v2404_v38  ;;  %2332 = vmatmul.mubr.bf16.gmra.mrb[28].mxu1 %v2406_v39 }
  0x5f   : > { %2291 = vmatprep.mubr.bf16.mxu0 %v2407_v40  ;;  %2335 = vmatprep.mubr.bf16.mxu1 %v2409_v41 }
  0x66   : > { %2292 = vmatmul.mubr.bf16.gmra.mrb[32].mxu0 %v2408_v42  ;;  %2336 = vmatmul.mubr.bf16.gmra.mrb[32].mxu1 %v2410_v43 }
  0x67   : > { %2295 = vmatprep.mubr.bf16.mxu0 %v2411_v44  ;;  %2339 = vmatprep.mubr.bf16.mxu1 %v2413_v45 }
  0x6e   : > { %2296 = vmatmul.mubr.bf16.gmra.mrb[36].mxu0 %v2412_v46  ;;  %2340 = vmatmul.mubr.bf16.gmra.mrb[36].mxu1 %v2414_v47 }
  0x6f   : > { %2299 = vmatprep.mubr.bf16.mxu0 %v2415_v48 }
  0x76   : > { %2300 = vmatmul.mubr.bf16.gmra.mrb[40].mxu0 %v2416_v49 }
  0xf9   : > { %v2261_v51 = vpop.f32.mrb[0].mxu0  ;;  %v2305_v53 = vpop.f32.mrb[0].mxu1 }
  0xfa   : > { %v980_v54 = vmul.f32 %v2261_v51, %v2537_v50  ;;  %v636_v55 = vpop.f32.mrb[1].mxu0  ;;  %v1024_v56 = vmul.f32 %v2305_v53, %v2537_v50  ;;  %v812_v57 = vpop.f32.mrb[1].mxu1 }
  0xfb   : > { %v978_v58 = vmul.f32 %v2537_v50, %v636_v55  ;;  %v2262_v59 = vpop.f32.mrb[2].mxu0  ;;  %v1022_v60 = vmul.f32 %v2537_v50, %v812_v57  ;;  %v2306_v61 = vpop.f32.mrb[2].mxu1 }
  0xfc   : > { %v1071_v62 = vadd.f32 %v2542_v52, %v980_v54  ;;  %v981_v63 = vmul.f32 %v2262_v59, %v2537_v50  ;;  %v639_v0 = vpop.f32.mrb[3].mxu0  ;;  %v1115_v1 = vadd.f32 %v2542_v52, %v1024_v56  ;;  %v1025_v2 = vmul.f32 %v2306_v61, %v2537_v50  ;;  %v815_v3 = vpop.f32.mrb[3].mxu1 }
  0xfd   : > { %v1069_v4 = vadd.f32 %v2542_v52, %v978_v58  ;;  %v979_v5 = vmul.f32 %v2537_v50, %v639_v0  ;;  %v1113_v6 = vadd.f32 %v2542_v52, %v1022_v60  ;;  %v1023_v7 = vmul.f32 %v2537_v50, %v815_v3 }
  0xfe   : > { %v1072_v8 = vadd.f32 %v2542_v52, %v981_v63  ;;  %v1199_v9 = vmax.f32 %v1115_v1, 0.0  ;;  %v1116_v10 = vadd.f32 %v2542_v52, %v1025_v2  ;;  %v1155_v14 = vmax.f32 %v1071_v62, 0.0 }
  0xff   : > { %v1070_v11 = vadd.f32 %v2542_v52, %v979_v5  ;;  %v1197_v12 = vmax.f32 %v1113_v6, 0.0  ;;  %v1114_v13 = vadd.f32 %v2542_v52, %v1023_v7  ;;  %v1153_v17 = vmax.f32 %v1069_v4, 0.0 }
 0x100   : > { %v1156_v15 = vmax.f32 %v1072_v8, 0.0  ;;  %v1200_v16 = vmax.f32 %v1116_v10, 0.0 }
 0x101   : > { %v1154_v18 = vmax.f32 %v1070_v11, 0.0  ;;  %v2265_v19 = vpop.f32.mrb[4].mxu0  ;;  %v1198_v20 = vmax.f32 %v1114_v13, 0.0  ;;  %v2309_v21 = vpop.f32.mrb[4].mxu1 }
 0x102   : > { %v1950_v22 = vpack.c.bf16 %v1156_v15, %v1155_v14  ;;  %v2060_v23 = vpack.c.bf16 %v1200_v16, %v1199_v9  ;;  %v984_v24 = vmul.f32 %v2265_v19, %v2537_v50  ;;  %v652_v25 = vpop.f32.mrb[5].mxu0  ;;  %v1028_v26 = vmul.f32 %v2309_v21, %v2537_v50  ;;  %v828_v27 = vpop.f32.mrb[5].mxu1 }
 0x103   : > { %v1945_v28 = vpack.c.bf16 %v1154_v18, %v1153_v17  ;;  %v2055_v29 = vpack.c.bf16 %v1198_v20, %v1197_v12  ;;  %v982_v30 = vmul.f32 %v2537_v50, %v652_v25  ;;  %v2266_v31 = vpop.f32.mrb[6].mxu0  ;;  %v1026_v32 = vmul.f32 %v2537_v50, %v828_v27  ;;  %v2310_v33 = vpop.f32.mrb[6].mxu1 }
 0x104   : > { %2152 = vst [vmem:[%s2565_s20 + $0x8] sm:$0xff] %v1950_v22   ;;  %2174 = vst [vmem:[%s2565_s20 + $0xb8] sm:$0xff] %v2060_v23   ;;  %v1075_v34 = vadd.f32 %v2542_v52, %v984_v24  ;;  %v985_v35 = vmul.f32 %v2266_v31, %v2537_v50  ;;  %v655_v36 = vpop.f32.mrb[7].mxu0  ;;  %v1119_v37 = vadd.f32 %v2542_v52, %v1028_v26  ;;  %v831_v39 = vpop.f32.mrb[7].mxu1 }
 0x105   : > { %v1029_v38 = vmul.f32 %v2310_v33, %v2537_v50  ;;  %1946 = vst [vmem:[%s2565_s20] sm:$0xff] %v1945_v28   ;;  %2173 = vst [vmem:[%s2565_s20 + $0xb0] sm:$0xff] %v2055_v29   ;;  %v1073_v40 = vadd.f32 %v2542_v52, %v982_v30  ;;  %v983_v41 = vmul.f32 %v2537_v50, %v655_v36 }
 0x106   : > { %v1117_v42 = vadd.f32 %v2542_v52, %v1026_v32  ;;  %v1027_v43 = vmul.f32 %v2537_v50, %v831_v39  ;;  %v1076_v44 = vadd.f32 %v2542_v52, %v985_v35  ;;  %v1203_v45 = vmax.f32 %v1119_v37, 0.0 }
 0x107   : > { %v1120_v46 = vadd.f32 %v2542_v52, %v1029_v38  ;;  %v1074_v47 = vadd.f32 %v2542_v52, %v983_v41  ;;  %v1159_v51 = vmax.f32 %v1075_v34, 0.0  ;;  %v1157_v55 = vmax.f32 %v1073_v40, 0.0 }
 0x108   : > { %v1201_v48 = vmax.f32 %v1117_v42, 0.0  ;;  %v1118_v49 = vadd.f32 %v2542_v52, %v1027_v43  ;;  %v1160_v53 = vmax.f32 %v1076_v44, 0.0 }
 0x109   : > { %v1204_v54 = vmax.f32 %v1120_v46, 0.0  ;;  %v1158_v56 = vmax.f32 %v1074_v47, 0.0  ;;  %v2269_v57 = vpop.f32.mrb[8].mxu0  ;;  %v2313_v59 = vpop.f32.mrb[8].mxu1 }
 0x10a   : > { %v1202_v58 = vmax.f32 %v1118_v49, 0.0  ;;  %v1960_v60 = vpack.c.bf16 %v1160_v53, %v1159_v51  ;;  %v988_v62 = vmul.f32 %v2269_v57, %v2537_v50  ;;  %v668_v63 = vpop.f32.mrb[9].mxu0  ;;  %v1032_v0 = vmul.f32 %v2313_v59, %v2537_v50  ;;  %v844_v1 = vpop.f32.mrb[9].mxu1 }
 0x10b   : > { %v2070_v61 = vpack.c.bf16 %v1204_v54, %v1203_v45  ;;  %v1955_v2 = vpack.c.bf16 %v1158_v56, %v1157_v55  ;;  %v986_v4 = vmul.f32 %v2537_v50, %v668_v63  ;;  %v2270_v5 = vpop.f32.mrb[10].mxu0  ;;  %v1030_v6 = vmul.f32 %v2537_v50, %v844_v1  ;;  %v2314_v7 = vpop.f32.mrb[10].mxu1 }
 0x10c   : > { %v2065_v3 = vpack.c.bf16 %v1202_v58, %v1201_v48  ;;  %2154 = vst [vmem:[%s2565_s20 + $0x18] sm:$0xff] %v1960_v60   ;;  %v1079_v8 = vadd.f32 %v2542_v52, %v988_v62  ;;  %v989_v9 = vmul.f32 %v2270_v5, %v2537_v50  ;;  %v671_v10 = vpop.f32.mrb[11].mxu0  ;;  %v1123_v11 = vadd.f32 %v2542_v52, %v1032_v0  ;;  %v847_v13 = vpop.f32.mrb[11].mxu1 }
 0x10d   : > { %2176 = vst [vmem:[%s2565_s20 + $0xc8] sm:$0xff] %v2070_v61   ;;  %v1033_v12 = vmul.f32 %v2314_v7, %v2537_v50  ;;  %2153 = vst [vmem:[%s2565_s20 + $0x10] sm:$0xff] %v1955_v2   ;;  %v1077_v14 = vadd.f32 %v2542_v52, %v986_v4  ;;  %v987_v15 = vmul.f32 %v2537_v50, %v671_v10 }
 0x10e   : > { %2175 = vst [vmem:[%s2565_s20 + $0xc0] sm:$0xff] %v2065_v3   ;;  %v1121_v16 = vadd.f32 %v2542_v52, %v1030_v6  ;;  %v1031_v17 = vmul.f32 %v2537_v50, %v847_v13  ;;  %v1080_v18 = vadd.f32 %v2542_v52, %v989_v9  ;;  %v1207_v19 = vmax.f32 %v1123_v11, 0.0 }
 0x10f   : > { %v1124_v20 = vadd.f32 %v2542_v52, %v1033_v12  ;;  %v1078_v21 = vadd.f32 %v2542_v52, %v987_v15  ;;  %v1163_v24 = vmax.f32 %v1079_v8, 0.0  ;;  %v1161_v27 = vmax.f32 %v1077_v14, 0.0 }
 0x110   : > { %v1205_v22 = vmax.f32 %v1121_v16, 0.0  ;;  %v1122_v23 = vadd.f32 %v2542_v52, %v1031_v17  ;;  %v1164_v25 = vmax.f32 %v1080_v18, 0.0 }
 0x111   : > { %v1208_v26 = vmax.f32 %v1124_v20, 0.0  ;;  %v1162_v28 = vmax.f32 %v1078_v21, 0.0  ;;  %v2273_v29 = vpop.f32.mrb[12].mxu0  ;;  %v2317_v31 = vpop.f32.mrb[12].mxu1 }
 0x112   : > { %v1206_v30 = vmax.f32 %v1122_v23, 0.0  ;;  %v1970_v32 = vpack.c.bf16 %v1164_v25, %v1163_v24  ;;  %v992_v34 = vmul.f32 %v2273_v29, %v2537_v50  ;;  %v684_v35 = vpop.f32.mrb[13].mxu0  ;;  %v1036_v36 = vmul.f32 %v2317_v31, %v2537_v50  ;;  %v860_v37 = vpop.f32.mrb[13].mxu1 }
 0x113   : > { %v2080_v33 = vpack.c.bf16 %v1208_v26, %v1207_v19  ;;  %v1965_v38 = vpack.c.bf16 %v1162_v28, %v1161_v27  ;;  %v990_v40 = vmul.f32 %v2537_v50, %v684_v35  ;;  %v2274_v41 = vpop.f32.mrb[14].mxu0  ;;  %v1034_v42 = vmul.f32 %v2537_v50, %v860_v37  ;;  %v2318_v43 = vpop.f32.mrb[14].mxu1 }
 0x114   : > { %v2075_v39 = vpack.c.bf16 %v1206_v30, %v1205_v22  ;;  %2156 = vst [vmem:[%s2565_s20 + $0x28] sm:$0xff] %v1970_v32   ;;  %v1083_v44 = vadd.f32 %v2542_v52, %v992_v34  ;;  %v993_v45 = vmul.f32 %v2274_v41, %v2537_v50  ;;  %v687_v46 = vpop.f32.mrb[15].mxu0  ;;  %v1127_v47 = vadd.f32 %v2542_v52, %v1036_v36  ;;  %v863_v49 = vpop.f32.mrb[15].mxu1 }
 0x115   : > { %2178 = vst [vmem:[%s2565_s20 + $0xd8] sm:$0xff] %v2080_v33   ;;  %v1037_v48 = vmul.f32 %v2318_v43, %v2537_v50  ;;  %2155 = vst [vmem:[%s2565_s20 + $0x20] sm:$0xff] %v1965_v38   ;;  %v1081_v51 = vadd.f32 %v2542_v52, %v990_v40  ;;  %v991_v53 = vmul.f32 %v2537_v50, %v687_v46 }
 0x116   : > { %2177 = vst [vmem:[%s2565_s20 + $0xd0] sm:$0xff] %v2075_v39   ;;  %v1125_v54 = vadd.f32 %v2542_v52, %v1034_v42  ;;  %v1035_v55 = vmul.f32 %v2537_v50, %v863_v49  ;;  %v1084_v56 = vadd.f32 %v2542_v52, %v993_v45  ;;  %v1211_v57 = vmax.f32 %v1127_v47, 0.0 }
 0x117   : > { %v1128_v58 = vadd.f32 %v2542_v52, %v1037_v48  ;;  %v1082_v59 = vadd.f32 %v2542_v52, %v991_v53  ;;  %v1167_v62 = vmax.f32 %v1083_v44, 0.0  ;;  %v1165_v1 = vmax.f32 %v1081_v51, 0.0 }
 0x118   : > { %v1209_v60 = vmax.f32 %v1125_v54, 0.0  ;;  %v1126_v61 = vadd.f32 %v2542_v52, %v1035_v55  ;;  %v1168_v63 = vmax.f32 %v1084_v56, 0.0 }
 0x119   : > { %v1212_v0 = vmax.f32 %v1128_v58, 0.0  ;;  %v1166_v2 = vmax.f32 %v1082_v59, 0.0  ;;  %v2277_v3 = vpop.f32.mrb[16].mxu0  ;;  %v2321_v5 = vpop.f32.mrb[16].mxu1 }
 0x11a   : > { %v1210_v4 = vmax.f32 %v1126_v61, 0.0  ;;  %v1980_v6 = vpack.c.bf16 %v1168_v63, %v1167_v62  ;;  %v996_v8 = vmul.f32 %v2277_v3, %v2537_v50  ;;  %v700_v9 = vpop.f32.mrb[17].mxu0  ;;  %v1040_v10 = vmul.f32 %v2321_v5, %v2537_v50  ;;  %v876_v11 = vpop.f32.mrb[17].mxu1 }
 0x11b   : > { %v2090_v7 = vpack.c.bf16 %v1212_v0, %v1211_v57  ;;  %v1975_v12 = vpack.c.bf16 %v1166_v2, %v1165_v1  ;;  %v994_v14 = vmul.f32 %v2537_v50, %v700_v9  ;;  %v2278_v15 = vpop.f32.mrb[18].mxu0  ;;  %v1038_v16 = vmul.f32 %v2537_v50, %v876_v11  ;;  %v2322_v17 = vpop.f32.mrb[18].mxu1 }
 0x11c   : > { %v2085_v13 = vpack.c.bf16 %v1210_v4, %v1209_v60  ;;  %2158 = vst [vmem:[%s2565_s20 + $0x38] sm:$0xff] %v1980_v6   ;;  %v1087_v18 = vadd.f32 %v2542_v52, %v996_v8  ;;  %v997_v19 = vmul.f32 %v2278_v15, %v2537_v50  ;;  %v703_v20 = vpop.f32.mrb[19].mxu0  ;;  %v1131_v21 = vadd.f32 %v2542_v52, %v1040_v10  ;;  %v879_v23 = vpop.f32.mrb[19].mxu1 }
 0x11d   : > { %2180 = vst [vmem:[%s2565_s20 + $0xe8] sm:$0xff] %v2090_v7   ;;  %v1041_v22 = vmul.f32 %v2322_v17, %v2537_v50  ;;  %2157 = vst [vmem:[%s2565_s20 + $0x30] sm:$0xff] %v1975_v12   ;;  %v1085_v24 = vadd.f32 %v2542_v52, %v994_v14  ;;  %v995_v25 = vmul.f32 %v2537_v50, %v703_v20 }
 0x11e   : > { %2179 = vst [vmem:[%s2565_s20 + $0xe0] sm:$0xff] %v2085_v13   ;;  %v1129_v26 = vadd.f32 %v2542_v52, %v1038_v16  ;;  %v1039_v27 = vmul.f32 %v2537_v50, %v879_v23  ;;  %v1088_v28 = vadd.f32 %v2542_v52, %v997_v19  ;;  %v1215_v29 = vmax.f32 %v1131_v21, 0.0 }
 0x11f   : > { %v1132_v30 = vadd.f32 %v2542_v52, %v1041_v22  ;;  %v1086_v31 = vadd.f32 %v2542_v52, %v995_v25  ;;  %v1171_v34 = vmax.f32 %v1087_v18, 0.0  ;;  %v1169_v37 = vmax.f32 %v1085_v24, 0.0 }
 0x120   : > { %v1213_v32 = vmax.f32 %v1129_v26, 0.0  ;;  %v1130_v33 = vadd.f32 %v2542_v52, %v1039_v27  ;;  %v1172_v35 = vmax.f32 %v1088_v28, 0.0 }
 0x121   : > { %v1216_v36 = vmax.f32 %v1132_v30, 0.0  ;;  %v1170_v38 = vmax.f32 %v1086_v31, 0.0  ;;  %v2281_v39 = vpop.f32.mrb[20].mxu0  ;;  %v2325_v41 = vpop.f32.mrb[20].mxu1 }
 0x122   : > { %v1214_v40 = vmax.f32 %v1130_v33, 0.0  ;;  %v1990_v42 = vpack.c.bf16 %v1172_v35, %v1171_v34  ;;  %v1000_v44 = vmul.f32 %v2281_v39, %v2537_v50  ;;  %v716_v45 = vpop.f32.mrb[21].mxu0  ;;  %v1044_v46 = vmul.f32 %v2325_v41, %v2537_v50  ;;  %v892_v47 = vpop.f32.mrb[21].mxu1 }
 0x123   : > { %v2100_v43 = vpack.c.bf16 %v1216_v36, %v1215_v29  ;;  %v1985_v48 = vpack.c.bf16 %v1170_v38, %v1169_v37  ;;  %v998_v51 = vmul.f32 %v2537_v50, %v716_v45  ;;  %v2282_v53 = vpop.f32.mrb[22].mxu0  ;;  %v1042_v54 = vmul.f32 %v2537_v50, %v892_v47  ;;  %v2326_v55 = vpop.f32.mrb[22].mxu1 }
 0x124   : > { %v2095_v49 = vpack.c.bf16 %v1214_v40, %v1213_v32  ;;  %2160 = vst [vmem:[%s2565_s20 + $0x48] sm:$0xff] %v1990_v42   ;;  %v1091_v56 = vadd.f32 %v2542_v52, %v1000_v44  ;;  %v1001_v57 = vmul.f32 %v2282_v53, %v2537_v50  ;;  %v719_v58 = vpop.f32.mrb[23].mxu0  ;;  %v1135_v59 = vadd.f32 %v2542_v52, %v1044_v46  ;;  %v895_v61 = vpop.f32.mrb[23].mxu1 }
 0x125   : > { %2182 = vst [vmem:[%s2565_s20 + $0xf8] sm:$0xff] %v2100_v43   ;;  %v1045_v60 = vmul.f32 %v2326_v55, %v2537_v50  ;;  %2159 = vst [vmem:[%s2565_s20 + $0x40] sm:$0xff] %v1985_v48   ;;  %v1089_v62 = vadd.f32 %v2542_v52, %v998_v51  ;;  %v999_v63 = vmul.f32 %v2537_v50, %v719_v58 }
 0x126   : > { %2181 = vst [vmem:[%s2565_s20 + $0xf0] sm:$0xff] %v2095_v49   ;;  %v1133_v0 = vadd.f32 %v2542_v52, %v1042_v54  ;;  %v1043_v1 = vmul.f32 %v2537_v50, %v895_v61  ;;  %v1092_v2 = vadd.f32 %v2542_v52, %v1001_v57  ;;  %v1219_v3 = vmax.f32 %v1135_v59, 0.0 }
 0x127   : > { %v1136_v4 = vadd.f32 %v2542_v52, %v1045_v60  ;;  %v1090_v5 = vadd.f32 %v2542_v52, %v999_v63  ;;  %v1175_v8 = vmax.f32 %v1091_v56, 0.0  ;;  %v1173_v11 = vmax.f32 %v1089_v62, 0.0 }
 0x128   : > { %v1217_v6 = vmax.f32 %v1133_v0, 0.0  ;;  %v1134_v7 = vadd.f32 %v2542_v52, %v1043_v1  ;;  %v1176_v9 = vmax.f32 %v1092_v2, 0.0 }
 0x129   : > { %v1220_v10 = vmax.f32 %v1136_v4, 0.0  ;;  %v1174_v12 = vmax.f32 %v1090_v5, 0.0  ;;  %v2285_v13 = vpop.f32.mrb[24].mxu0  ;;  %v2329_v15 = vpop.f32.mrb[24].mxu1 }
 0x12a   : > { %v1218_v14 = vmax.f32 %v1134_v7, 0.0  ;;  %v2000_v16 = vpack.c.bf16 %v1176_v9, %v1175_v8  ;;  %v1004_v18 = vmul.f32 %v2285_v13, %v2537_v50  ;;  %v732_v19 = vpop.f32.mrb[25].mxu0  ;;  %v1048_v20 = vmul.f32 %v2329_v15, %v2537_v50  ;;  %v908_v21 = vpop.f32.mrb[25].mxu1 }
 0x12b   : > { %v2110_v17 = vpack.c.bf16 %v1220_v10, %v1219_v3  ;;  %v1995_v22 = vpack.c.bf16 %v1174_v12, %v1173_v11  ;;  %v1002_v24 = vmul.f32 %v2537_v50, %v732_v19  ;;  %v2286_v25 = vpop.f32.mrb[26].mxu0  ;;  %v1046_v26 = vmul.f32 %v2537_v50, %v908_v21  ;;  %v2330_v27 = vpop.f32.mrb[26].mxu1 }
 0x12c   : > { %v2105_v23 = vpack.c.bf16 %v1218_v14, %v1217_v6  ;;  %2162 = vst [vmem:[%s2565_s20 + $0x58] sm:$0xff] %v2000_v16   ;;  %v1095_v28 = vadd.f32 %v2542_v52, %v1004_v18  ;;  %v1005_v29 = vmul.f32 %v2286_v25, %v2537_v50  ;;  %v735_v30 = vpop.f32.mrb[27].mxu0  ;;  %v1139_v31 = vadd.f32 %v2542_v52, %v1048_v20  ;;  %v911_v33 = vpop.f32.mrb[27].mxu1 }
 0x12d   : > { %2184 = vst [vmem:[%s2565_s20 + $0x108] sm:$0xff] %v2110_v17   ;;  %v1049_v32 = vmul.f32 %v2330_v27, %v2537_v50  ;;  %2161 = vst [vmem:[%s2565_s20 + $0x50] sm:$0xff] %v1995_v22   ;;  %v1093_v34 = vadd.f32 %v2542_v52, %v1002_v24  ;;  %v1003_v35 = vmul.f32 %v2537_v50, %v735_v30 }
 0x12e   : > { %2183 = vst [vmem:[%s2565_s20 + $0x100] sm:$0xff] %v2105_v23   ;;  %v1137_v36 = vadd.f32 %v2542_v52, %v1046_v26  ;;  %v1047_v37 = vmul.f32 %v2537_v50, %v911_v33  ;;  %v1096_v38 = vadd.f32 %v2542_v52, %v1005_v29  ;;  %v1223_v39 = vmax.f32 %v1139_v31, 0.0 }
 0x12f   : > { %v1140_v40 = vadd.f32 %v2542_v52, %v1049_v32  ;;  %v1094_v41 = vadd.f32 %v2542_v52, %v1003_v35  ;;  %v1179_v44 = vmax.f32 %v1095_v28, 0.0  ;;  %v1177_v47 = vmax.f32 %v1093_v34, 0.0 }
 0x130   : > { %v1221_v42 = vmax.f32 %v1137_v36, 0.0  ;;  %v1138_v43 = vadd.f32 %v2542_v52, %v1047_v37  ;;  %v1180_v45 = vmax.f32 %v1096_v38, 0.0 }
 0x131   : > { %v1224_v46 = vmax.f32 %v1140_v40, 0.0  ;;  %v1178_v48 = vmax.f32 %v1094_v41, 0.0  ;;  %v2289_v49 = vpop.f32.mrb[28].mxu0  ;;  %v2333_v53 = vpop.f32.mrb[28].mxu1 }
 0x132   : > { %v1222_v51 = vmax.f32 %v1138_v43, 0.0  ;;  %v2010_v54 = vpack.c.bf16 %v1180_v45, %v1179_v44  ;;  %v1008_v56 = vmul.f32 %v2289_v49, %v2537_v50  ;;  %v748_v57 = vpop.f32.mrb[29].mxu0  ;;  %v1052_v58 = vmul.f32 %v2333_v53, %v2537_v50  ;;  %v924_v59 = vpop.f32.mrb[29].mxu1 }
 0x133   : > { %v2120_v55 = vpack.c.bf16 %v1224_v46, %v1223_v39  ;;  %v2005_v60 = vpack.c.bf16 %v1178_v48, %v1177_v47  ;;  %v1006_v62 = vmul.f32 %v2537_v50, %v748_v57  ;;  %v2290_v63 = vpop.f32.mrb[30].mxu0  ;;  %v1050_v0 = vmul.f32 %v2537_v50, %v924_v59  ;;  %v2334_v1 = vpop.f32.mrb[30].mxu1 }
 0x134   : > { %v2115_v61 = vpack.c.bf16 %v1222_v51, %v1221_v42  ;;  %2164 = vst [vmem:[%s2565_s20 + $0x68] sm:$0xff] %v2010_v54   ;;  %v1099_v2 = vadd.f32 %v2542_v52, %v1008_v56  ;;  %v1009_v3 = vmul.f32 %v2290_v63, %v2537_v50  ;;  %v751_v4 = vpop.f32.mrb[31].mxu0  ;;  %v1143_v5 = vadd.f32 %v2542_v52, %v1052_v58  ;;  %v927_v7 = vpop.f32.mrb[31].mxu1 }
 0x135   : > { %2186 = vst [vmem:[%s2565_s20 + $0x118] sm:$0xff] %v2120_v55   ;;  %v1053_v6 = vmul.f32 %v2334_v1, %v2537_v50  ;;  %2163 = vst [vmem:[%s2565_s20 + $0x60] sm:$0xff] %v2005_v60   ;;  %v1097_v8 = vadd.f32 %v2542_v52, %v1006_v62  ;;  %v1007_v9 = vmul.f32 %v2537_v50, %v751_v4 }
 0x136   : > { %2185 = vst [vmem:[%s2565_s20 + $0x110] sm:$0xff] %v2115_v61   ;;  %v1141_v10 = vadd.f32 %v2542_v52, %v1050_v0  ;;  %v1051_v11 = vmul.f32 %v2537_v50, %v927_v7  ;;  %v1100_v12 = vadd.f32 %v2542_v52, %v1009_v3  ;;  %v1227_v13 = vmax.f32 %v1143_v5, 0.0 }
 0x137   : > { %v1144_v14 = vadd.f32 %v2542_v52, %v1053_v6  ;;  %v1098_v15 = vadd.f32 %v2542_v52, %v1007_v9  ;;  %v1183_v18 = vmax.f32 %v1099_v2, 0.0  ;;  %v1181_v21 = vmax.f32 %v1097_v8, 0.0 }
 0x138   : > { %v1225_v16 = vmax.f32 %v1141_v10, 0.0  ;;  %v1142_v17 = vadd.f32 %v2542_v52, %v1051_v11  ;;  %v1184_v19 = vmax.f32 %v1100_v12, 0.0 }
 0x139   : > { %v1228_v20 = vmax.f32 %v1144_v14, 0.0  ;;  %v1182_v22 = vmax.f32 %v1098_v15, 0.0  ;;  %v2293_v23 = vpop.f32.mrb[32].mxu0  ;;  %v2337_v25 = vpop.f32.mrb[32].mxu1 }
 0x13a   : > { %v1226_v24 = vmax.f32 %v1142_v17, 0.0  ;;  %v2020_v26 = vpack.c.bf16 %v1184_v19, %v1183_v18  ;;  %v1012_v28 = vmul.f32 %v2293_v23, %v2537_v50  ;;  %v764_v29 = vpop.f32.mrb[33].mxu0  ;;  %v1056_v30 = vmul.f32 %v2337_v25, %v2537_v50  ;;  %v940_v31 = vpop.f32.mrb[33].mxu1 }
 0x13b   : > { %v2130_v27 = vpack.c.bf16 %v1228_v20, %v1227_v13  ;;  %v2015_v32 = vpack.c.bf16 %v1182_v22, %v1181_v21  ;;  %v1010_v34 = vmul.f32 %v2537_v50, %v764_v29  ;;  %v2294_v35 = vpop.f32.mrb[34].mxu0  ;;  %v1054_v36 = vmul.f32 %v2537_v50, %v940_v31  ;;  %v2338_v37 = vpop.f32.mrb[34].mxu1 }
 0x13c   : > { %v2125_v33 = vpack.c.bf16 %v1226_v24, %v1225_v16  ;;  %2166 = vst [vmem:[%s2565_s20 + $0x78] sm:$0xff] %v2020_v26   ;;  %v1103_v38 = vadd.f32 %v2542_v52, %v1012_v28  ;;  %v1013_v39 = vmul.f32 %v2294_v35, %v2537_v50  ;;  %v767_v40 = vpop.f32.mrb[35].mxu0  ;;  %v1147_v41 = vadd.f32 %v2542_v52, %v1056_v30  ;;  %v943_v43 = vpop.f32.mrb[35].mxu1 }
 0x13d   : > { %2188 = vst [vmem:[%s2565_s20 + $0x128] sm:$0xff] %v2130_v27   ;;  %v1057_v42 = vmul.f32 %v2338_v37, %v2537_v50  ;;  %2165 = vst [vmem:[%s2565_s20 + $0x70] sm:$0xff] %v2015_v32   ;;  %v1101_v44 = vadd.f32 %v2542_v52, %v1010_v34  ;;  %v1011_v45 = vmul.f32 %v2537_v50, %v767_v40 }
 0x13e   : > { %2187 = vst [vmem:[%s2565_s20 + $0x120] sm:$0xff] %v2125_v33   ;;  %v1145_v46 = vadd.f32 %v2542_v52, %v1054_v36  ;;  %v1055_v47 = vmul.f32 %v2537_v50, %v943_v43  ;;  %v1104_v48 = vadd.f32 %v2542_v52, %v1013_v39  ;;  %v1231_v49 = vmax.f32 %v1147_v41, 0.0 }
 0x13f   : > { %v1148_v51 = vadd.f32 %v2542_v52, %v1057_v42  ;;  %v1102_v53 = vadd.f32 %v2542_v52, %v1011_v45  ;;  %v1187_v56 = vmax.f32 %v1103_v38, 0.0  ;;  %v1185_v59 = vmax.f32 %v1101_v44, 0.0 }
 0x140   : > { %v1229_v54 = vmax.f32 %v1145_v46, 0.0  ;;  %v1146_v55 = vadd.f32 %v2542_v52, %v1055_v47  ;;  %v1188_v57 = vmax.f32 %v1104_v48, 0.0 }
 0x141   : > { %v1232_v58 = vmax.f32 %v1148_v51, 0.0  ;;  %v1186_v60 = vmax.f32 %v1102_v53, 0.0  ;;  %v2297_v61 = vpop.f32.mrb[36].mxu0  ;;  %v2341_v63 = vpop.f32.mrb[36].mxu1 }
 0x142   : > { %v1230_v62 = vmax.f32 %v1146_v55, 0.0  ;;  %v2030_v0 = vpack.c.bf16 %v1188_v57, %v1187_v56  ;;  %v1016_v2 = vmul.f32 %v2297_v61, %v2537_v50  ;;  %v780_v3 = vpop.f32.mrb[37].mxu0  ;;  %v1060_v4 = vmul.f32 %v2341_v63, %v2537_v50  ;;  %v956_v5 = vpop.f32.mrb[37].mxu1 }
 0x143   : > { %v2140_v1 = vpack.c.bf16 %v1232_v58, %v1231_v49  ;;  %v2025_v6 = vpack.c.bf16 %v1186_v60, %v1185_v59  ;;  %v1014_v8 = vmul.f32 %v2537_v50, %v780_v3  ;;  %v2298_v9 = vpop.f32.mrb[38].mxu0  ;;  %v1058_v10 = vmul.f32 %v2537_v50, %v956_v5  ;;  %v2342_v11 = vpop.f32.mrb[38].mxu1 }
 0x144   : > { %v2135_v7 = vpack.c.bf16 %v1230_v62, %v1229_v54  ;;  %2168 = vst [vmem:[%s2565_s20 + $0x88] sm:$0xff] %v2030_v0   ;;  %v1107_v12 = vadd.f32 %v2542_v52, %v1016_v2  ;;  %v1017_v13 = vmul.f32 %v2298_v9, %v2537_v50  ;;  %v783_v14 = vpop.f32.mrb[39].mxu0  ;;  %v1151_v15 = vadd.f32 %v2542_v52, %v1060_v4  ;;  %v959_v17 = vpop.f32.mrb[39].mxu1 }
 0x145   : > { %2190 = vst [vmem:[%s2565_s20 + $0x138] sm:$0xff] %v2140_v1   ;;  %v1061_v16 = vmul.f32 %v2342_v11, %v2537_v50  ;;  %2167 = vst [vmem:[%s2565_s20 + $0x80] sm:$0xff] %v2025_v6   ;;  %v1105_v18 = vadd.f32 %v2542_v52, %v1014_v8  ;;  %v1015_v19 = vmul.f32 %v2537_v50, %v783_v14 }
 0x146   : > { %2189 = vst [vmem:[%s2565_s20 + $0x130] sm:$0xff] %v2135_v7   ;;  %v1149_v20 = vadd.f32 %v2542_v52, %v1058_v10  ;;  %v1059_v21 = vmul.f32 %v2537_v50, %v959_v17  ;;  %v1108_v22 = vadd.f32 %v2542_v52, %v1017_v13  ;;  %v1235_v23 = vmax.f32 %v1151_v15, 0.0 }
 0x147   : > { %v1152_v24 = vadd.f32 %v2542_v52, %v1061_v16  ;;  %v1106_v25 = vadd.f32 %v2542_v52, %v1015_v19  ;;  %v1191_v28 = vmax.f32 %v1107_v12, 0.0  ;;  %v1189_v31 = vmax.f32 %v1105_v18, 0.0 }
 0x148   : > { %v1233_v26 = vmax.f32 %v1149_v20, 0.0  ;;  %v1150_v27 = vadd.f32 %v2542_v52, %v1059_v21  ;;  %v1192_v29 = vmax.f32 %v1108_v22, 0.0 }
 0x149   : > { %v1236_v30 = vmax.f32 %v1152_v24, 0.0  ;;  %v1190_v32 = vmax.f32 %v1106_v25, 0.0  ;;  %v2301_v33 = vpop.f32.mrb[40].mxu0 }
 0x14a   : > { %v1234_v34 = vmax.f32 %v1150_v27, 0.0  ;;  %v2040_v35 = vpack.c.bf16 %v1192_v29, %v1191_v28  ;;  %v1020_v37 = vmul.f32 %v2301_v33, %v2537_v50  ;;  %v796_v38 = vpop.f32.mrb[41].mxu0 }
 0x14b   : > { %v2150_v36 = vpack.c.bf16 %v1236_v30, %v1235_v23  ;;  %v2035_v39 = vpack.c.bf16 %v1190_v32, %v1189_v31  ;;  %v1018_v41 = vmul.f32 %v2537_v50, %v796_v38  ;;  %v2302_v42 = vpop.f32.mrb[42].mxu0 }
 0x14c   : > { %v2145_v40 = vpack.c.bf16 %v1234_v34, %v1233_v26  ;;  %2170 = vst [vmem:[%s2565_s20 + $0x98] sm:$0xff] %v2040_v35   ;;  %v1111_v43 = vadd.f32 %v2542_v52, %v1020_v37  ;;  %v1021_v44 = vmul.f32 %v2302_v42, %v2537_v50  ;;  %v799_v45 = vpop.f32.mrb[43].mxu0 }
 0x14d   : > { %2192 = vst [vmem:[%s2565_s20 + $0x148] sm:$0xff] %v2150_v36   ;;  %2169 = vst [vmem:[%s2565_s20 + $0x90] sm:$0xff] %v2035_v39   ;;  %v1109_v46 = vadd.f32 %v2542_v52, %v1018_v41  ;;  %v1019_v47 = vmul.f32 %v2537_v50, %v799_v45 }
 0x14e   : > { %2191 = vst [vmem:[%s2565_s20 + $0x140] sm:$0xff] %v2145_v40   ;;  %v1112_v48 = vadd.f32 %v2542_v52, %v1021_v44  ;;  %v1195_v51 = vmax.f32 %v1111_v43, 0.0 }
 0x14f   : > { %v1110_v49 = vadd.f32 %v2542_v52, %v1019_v47  ;;  %v1193_v54 = vmax.f32 %v1109_v46, 0.0 }
 0x150   : > { %v1196_v53 = vmax.f32 %v1112_v48, 0.0 }
 0x151   : > { %v1194_v55 = vmax.f32 %v1110_v49, 0.0 }
 0x152   : > { %v2050_v56 = vpack.c.bf16 %v1196_v53, %v1195_v51 }
 0x153   : > { %v2045_v57 = vpack.c.bf16 %v1194_v55, %v1193_v54 }
 0x154   : > { %2172 = vst [vmem:[%s2565_s20 + $0xa8] sm:$0xff] %v2050_v56  }
 0x155   : > { %2171 = vst [vmem:[%s2565_s20 + $0xa0] sm:$0xff] %v2045_v57  }
 0x156 PF: > { %s14_s15 = sadd.s32 1, %s2423_s15  }
 0x157   : > { %p11_p4 = scmp.ge.s32.totalorder %s14_s15, 4  }
 0x159   :  { %13 = sbr.rel (!%p11_p4) target bundleno = 1 (0x1), region = 66 }

// kernel: tile.8
= control target key start
LH: loop header
LB: loop body
LE: loop exit
PB: predicated region body
PF: predicated region fallthrough
CT: control target
= control target key end

     0   :  { %v13_v2 = vmov 0   ;;  %s30_s0 = inlined_call_operand.vmem [shape: pred[81], index: 0, kind: input, shape index: {}]   ;;  %s31_s1 = inlined_call_operand.vmem [shape: pred[4,81], index: 1, kind: output, shape index: {}]  }
   0x1   :  { %v4_v0 = vld [vmem:[%s30_s0] ss:$0 sm:$0xff] }
   0x2   :  { %v7_v1 = vand.u32 255, %v4_v0 }
   0x4   :  { %v8_v3 = vpack.c.b16 %v13_v2, %v7_v1 }
   0x6   :  { %v9_v4 = vpack.c.b8 %v13_v2, %v8_v3 }
   0x8   :  { %11 = vst [vmem:[%s31_s1] sm:$0x1] %v9_v4 }

// kernel: tile.9
= control target key start
LH: loop header
LB: loop body
LE: loop exit
PB: predicated region body
PF: predicated region fallthrough
CT: control target
= control target key end

     0   :  { %vm25_vm0 = vcmask 105472   ;;  %vm39_vm1 = vcmask 384000   ;;  %vm19_vm2 = vcmask 662528   ;;  %s69_s8 = smov 34   ;;  %s70_s9 = smov 81   ;;  %vm29_vm3 = vcmask 556032   ;;  %s88_s0 = inlined_call_operand.vmem [shape: pred[4,81], index: 0, kind: input, shape index: {}]   ;;  %s89_s1 = inlined_call_operand.vmem [shape: pred[324], index: 1, kind: output, shape index: {}]  }
   0x1   :  { %v12_v0 = vld [vmem:[%s88_s0] sm:$0x1]  ;;  %s68_s0 = smov 115   ;;  %vm32_vm4 = vcmask 1048472   ;;  %vm43_vm5 = vcmask 277504   ;;  %vm46_vm6 = vcmask 1048200  }
   0x2   :  { %v13_v1 = vunpack.c.0.s8 %v12_v0  ;;  %vm52_vm7 = vcmask 941328   ;;  %v71_v14 = vmov 0  }
   0x4   :  { %17 = vst [vmem:[#allocation1] sm:$0xf] %v13_v1 }
   0xb   :  { %v22_v2 = vld [vmem:[#allocation1 + $0x3] sm:$0x1]   ;;  %v36_v4 = vld [vmem:[#allocation1 + $0x1] sm:$0x1]   ;;  %v49_v7 = vld [vmem:[#allocation1 + $0x2] sm:$0x1]  }
   0xc   :  { %v24_v3 = vld [vmem:[#allocation1 + $0x3] sm:$0x1]   ;;  %v38_v6 = vld [vmem:[#allocation1 + $0x1] sm:$0x1]   ;;  %v18_v8 = vld [vmem:[#allocation1] sm:$0x1]   ;;  %50 = vrot.lane.b32.xlu1 %v49_v7, %s69_s8 }
   0xd   :  { %v26_v5 = vsel %vm25_vm0, %v24_v3, %v22_v2  ;;  %20 = vst.msk [vmem:[#allocation0] sm:$0x1] %vm19_vm2, %v18_v8   ;;  %v40_v9 = vsel %vm39_vm1, %v38_v6, %v36_v4 }
   0xe   :  { %27 = vrot.lane.b32.xlu0 %v26_v5, %s68_s0 }
  0x12   :  { %41 = vrot.lane.b32.xlu0 %v40_v9, %s70_s9 }
  0x7e   :  { %v51_v11 = vpop.permute.xlu1 %50  }
  0x80   :  { %v28_v10 = vpop.permute.xlu0 %27  }
  0x81   :  { %31 = vst.msk [vmem:[#allocation0 + $0x2] sm:$0x1] %vm29_vm3, %v28_v10  }
  0x82   :  { %34 = vst.msk [vmem:[#allocation0 + $0x1] sm:$0x1] %vm32_vm4, %v28_v10  }
  0x84   :  { %v42_v12 = vpop.permute.xlu0 %41  }
  0x85   :  { %45 = vst.msk [vmem:[#allocation0 + $0x1] sm:$0x1] %vm43_vm5, %v42_v12  }
  0x86   :  { %47 = vst.msk [vmem:[#allocation0] sm:$0x1] %vm46_vm6, %v42_v12  }
  0x87   :  { %54 = vst.msk [vmem:[#allocation0 + $0x1] sm:$0x1] %vm52_vm7, %v51_v11  }
  0x8e   :  { %v59_v13 = vld [vmem:[#allocation0] sm:$0xf] }
  0x8f   :  { %v61_v15 = vpack.c.b16 %v71_v14, %v59_v13 }
  0x91   :  { %v62_v16 = vpack.c.b8 %v71_v14, %v61_v15 }
  0x93   :  { %63 = vst [vmem:[%s89_s1] sm:$0x1] %v62_v16 }

// kernel: vacnn_forward.5
= control target key start
LH: loop header
LB: loop body
LE: loop exit
PB: predicated region body
PF: predicated region fallthrough
CT: control target
= control target key end

     0   :  { %v3253_v8 = vmov 0   ;;  %s4158_s0 = inlined_call_operand.vmem [shape: bf16[4,128], index: 0, kind: input, shape index: {}]   ;;  %s4159_s1 = inlined_call_operand.vmem [shape: bf16[128,2048], index: 1, kind: input, shape index: {}]   ;;  %s4160_s2 = inlined_call_operand.vmem [shape: f32[1,2048], index: 2, kind: input, shape index: {}]   ;;  %s4161_s3 = inlined_call_operand.vmem [shape: bf16[2048,128], index: 3, kind: input, shape index: {}]   ;;  %s4162_s4 = inlined_call_operand.vmem [shape: f32[1,128], index: 4, kind: input, shape index: {}]   ;;  %s4163_s5 = inlined_call_operand.hbm [shape: f32[2,128], index: 5, kind: output, shape index: {}]  }
   0x1   :  { %v23_v0 = vld [vmem:[%s4159_s1] sm:$0xff]  ;;  %v24_v2 = vld [vmem:[%s4159_s1 + $0x8] sm:$0xff]  ;;  %907 = vmatprep.mubr.bf16.mxu0 %v3253_v8  ;;  %948 = vmatprep.mubr.bf16.mxu1 %v3253_v8  ;;  %v25_v63 = vld [vmem:[%s4159_s1 + $0x10] sm:$0xff] }
   0x2   :  { %v31_v1 = vld [vmem:[%s4159_s1 + $0x40] sm:$0xff]  ;;  %v32_v4 = vld [vmem:[%s4159_s1 + $0x48] sm:$0xff] }
   0x3   :  { %v2666_v3 = vcombine.high %v23_v0, %v31_v1  ;;  %v2665_v5 = vcombine.low %v23_v0, %v31_v1  ;;  %v39_v6 = vld [vmem:[%s4159_s1 + $0x80] sm:$0xff]  ;;  %v2668_v9 = vcombine.high %v24_v2, %v32_v4  ;;  %v2667_v10 = vcombine.low %v24_v2, %v32_v4  ;;  %v40_v12 = vld [vmem:[%s4159_s1 + $0x88] sm:$0xff]  ;;  %v33_v0 = vld [vmem:[%s4159_s1 + $0x50] sm:$0xff] }
   0x4   :  { %v47_v7 = vld [vmem:[%s4159_s1 + $0xc0] sm:$0xff]  ;;  %v48_v13 = vld [vmem:[%s4159_s1 + $0xc8] sm:$0xff]  ;;  %v26_v1 = vld [vmem:[%s4159_s1 + $0x18] sm:$0xff] }
   0x5   :  { %v2682_v11 = vcombine.high %v39_v6, %v47_v7  ;;  %v55_v14 = vld [vmem:[%s4159_s1 + $0x100] sm:$0xff]  ;;  %875 = vmatprep.subr.bf16.mxu0 %v2666_v3  ;;  %v2684_v15 = vcombine.high %v40_v12, %v48_v13  ;;  %v56_v17 = vld [vmem:[%s4159_s1 + $0x108] sm:$0xff]  ;;  %916 = vmatprep.subr.bf16.mxu1 %v2668_v9  ;;  %v2681_v19 = vcombine.low %v39_v6, %v47_v7  ;;  %v34_v2 = vld [vmem:[%s4159_s1 + $0x58] sm:$0xff] }
   0x6   :  { %v63_v16 = vld [vmem:[%s4159_s1 + $0x140] sm:$0xff]  ;;  %v64_v18 = vld [vmem:[%s4159_s1 + $0x148] sm:$0xff]  ;;  %876 = vmatpush1.bf16.msra.mxu0 %v2665_v5  ;;  %917 = vmatpush1.bf16.msra.mxu1 %v2667_v10  ;;  %v2683_v20 = vcombine.low %v40_v12, %v48_v13  ;;  %v2670_v5 = vcombine.high %v25_v63, %v33_v0  ;;  %v2672_v6 = vcombine.high %v26_v1, %v34_v2  ;;  %v41_v7 = vld [vmem:[%s4159_s1 + $0x90] sm:$0xff] }
   0x7   :  { %877 = vmatprep.subr.bf16.mxu0 %v2682_v11  ;;  %v2698_v21 = vcombine.high %v55_v14, %v63_v16  ;;  %918 = vmatprep.subr.bf16.mxu1 %v2684_v15  ;;  %v2700_v22 = vcombine.high %v56_v17, %v64_v18  ;;  %v71_v23 = vld [vmem:[%s4159_s1 + $0x180] sm:$0xff]  ;;  %v72_v25 = vld [vmem:[%s4159_s1 + $0x188] sm:$0xff]  ;;  %v2697_v27 = vcombine.low %v55_v14, %v63_v16  ;;  %v49_v9 = vld [vmem:[%s4159_s1 + $0xd0] sm:$0xff] }
   0x8   :  { %v79_v24 = vld [vmem:[%s4159_s1 + $0x1c0] sm:$0xff]  ;;  %v80_v26 = vld [vmem:[%s4159_s1 + $0x1c8] sm:$0xff]  ;;  %v2699_v28 = vcombine.low %v56_v17, %v64_v18  ;;  %v42_v10 = vld [vmem:[%s4159_s1 + $0x98] sm:$0xff]  ;;  %v2669_v13 = vcombine.low %v25_v63, %v33_v0  ;;  %v2671_v14 = vcombine.low %v26_v1, %v34_v2  ;;  %v2686_v15 = vcombine.high %v41_v7, %v49_v9 }
   0x9   :  { %v2714_v29 = vcombine.high %v71_v23, %v79_v24  ;;  %v2716_v30 = vcombine.high %v72_v25, %v80_v26  ;;  %v87_v31 = vld [vmem:[%s4159_s1 + $0x200] sm:$0xff]  ;;  %v88_v33 = vld [vmem:[%s4159_s1 + $0x208] sm:$0xff]  ;;  %v2713_v35 = vcombine.low %v71_v23, %v79_v24  ;;  %v2715_v36 = vcombine.low %v72_v25, %v80_v26  ;;  %v50_v11 = vld [vmem:[%s4159_s1 + $0xd8] sm:$0xff] }
   0xa   :  { %878 = vmatpush1.bf16.msra.mxu0 %v2681_v19  ;;  %919 = vmatpush1.bf16.msra.mxu1 %v2683_v20  ;;  %v95_v32 = vld [vmem:[%s4159_s1 + $0x240] sm:$0xff]  ;;  %v96_v34 = vld [vmem:[%s4159_s1 + $0x248] sm:$0xff]  ;;  %v2688_v16 = vcombine.high %v42_v10, %v50_v11  ;;  %v57_v17 = vld [vmem:[%s4159_s1 + $0x110] sm:$0xff] }
   0xb   :  { %879 = vmatprep.subr.bf16.mxu0 %v2698_v21  ;;  %920 = vmatprep.subr.bf16.mxu1 %v2700_v22  ;;  %v2730_v37 = vcombine.high %v87_v31, %v95_v32  ;;  %v2732_v38 = vcombine.high %v88_v33, %v96_v34  ;;  %v103_v39 = vld [vmem:[%s4159_s1 + $0x280] sm:$0xff]  ;;  %v104_v41 = vld [vmem:[%s4159_s1 + $0x288] sm:$0xff]  ;;  %v2729_v43 = vcombine.low %v87_v31, %v95_v32  ;;  %v65_v18 = vld [vmem:[%s4159_s1 + $0x150] sm:$0xff] }
   0xc   :  { %v111_v40 = vld [vmem:[%s4159_s1 + $0x2c0] sm:$0xff]  ;;  %v112_v42 = vld [vmem:[%s4159_s1 + $0x2c8] sm:$0xff]  ;;  %v2731_v44 = vcombine.low %v88_v33, %v96_v34  ;;  %v58_v19 = vld [vmem:[%s4159_s1 + $0x118] sm:$0xff]  ;;  %v2685_v21 = vcombine.low %v41_v7, %v49_v9  ;;  %v2687_v22 = vcombine.low %v42_v10, %v50_v11  ;;  %v2702_v23 = vcombine.high %v57_v17, %v65_v18 }
   0xd   :  { %v2746_v45 = vcombine.high %v103_v39, %v111_v40  ;;  %v2748_v46 = vcombine.high %v104_v41, %v112_v42  ;;  %v119_v47 = vld [vmem:[%s4159_s1 + $0x300] sm:$0xff]  ;;  %v120_v49 = vld [vmem:[%s4159_s1 + $0x308] sm:$0xff]  ;;  %v2745_v51 = vcombine.low %v103_v39, %v111_v40  ;;  %v2747_v52 = vcombine.low %v104_v41, %v112_v42  ;;  %v66_v20 = vld [vmem:[%s4159_s1 + $0x158] sm:$0xff] }
   0xe   :  { %880 = vmatpush1.bf16.msra.mxu0 %v2697_v27  ;;  %921 = vmatpush1.bf16.msra.mxu1 %v2699_v28  ;;  %v127_v48 = vld [vmem:[%s4159_s1 + $0x340] sm:$0xff]  ;;  %v128_v50 = vld [vmem:[%s4159_s1 + $0x348] sm:$0xff]  ;;  %v2704_v24 = vcombine.high %v58_v19, %v66_v20  ;;  %v73_v25 = vld [vmem:[%s4159_s1 + $0x190] sm:$0xff] }
   0xf   :  { %881 = vmatprep.subr.bf16.mxu0 %v2714_v29  ;;  %922 = vmatprep.subr.bf16.mxu1 %v2716_v30  ;;  %v2762_v53 = vcombine.high %v119_v47, %v127_v48  ;;  %v2764_v54 = vcombine.high %v120_v49, %v128_v50  ;;  %v135_v55 = vld [vmem:[%s4159_s1 + $0x380] sm:$0xff]  ;;  %v136_v57 = vld [vmem:[%s4159_s1 + $0x388] sm:$0xff]  ;;  %v2761_v59 = vcombine.low %v119_v47, %v127_v48  ;;  %v81_v26 = vld [vmem:[%s4159_s1 + $0x1d0] sm:$0xff] }
  0x10   :  { %v143_v56 = vld [vmem:[%s4159_s1 + $0x3c0] sm:$0xff]  ;;  %v144_v58 = vld [vmem:[%s4159_s1 + $0x3c8] sm:$0xff]  ;;  %v2763_v60 = vcombine.low %v120_v49, %v128_v50  ;;  %v74_v27 = vld [vmem:[%s4159_s1 + $0x198] sm:$0xff]  ;;  %v2701_v29 = vcombine.low %v57_v17, %v65_v18  ;;  %v2703_v30 = vcombine.low %v58_v19, %v66_v20  ;;  %v2718_v31 = vcombine.high %v73_v25, %v81_v26 }
  0x11   :  { %v2778_v61 = vcombine.high %v135_v55, %v143_v56  ;;  %v2780_v62 = vcombine.high %v136_v57, %v144_v58  ;;  %v2777_v3 = vcombine.low %v135_v55, %v143_v56  ;;  %v2779_v4 = vcombine.low %v136_v57, %v144_v58  ;;  %v3410_v12 = vld [vmem:[%s4158_s0] sm:$0x3]  ;;  %v82_v28 = vld [vmem:[%s4159_s1 + $0x1d8] sm:$0xff]  ;;  %v89_v33 = vld [vmem:[%s4159_s1 + $0x210] sm:$0xff] }
  0x12   :  { %882 = vmatpush1.bf16.msra.mxu0 %v2713_v35  ;;  %923 = vmatpush1.bf16.msra.mxu1 %v2715_v36  ;;  %v2720_v32 = vcombine.high %v74_v27, %v82_v28  ;;  %v97_v34 = vld [vmem:[%s4159_s1 + $0x250] sm:$0xff]  ;;  %v90_v35 = vld [vmem:[%s4159_s1 + $0x218] sm:$0xff]  ;;  %v2719_v39 = vcombine.low %v74_v27, %v82_v28  ;;  %v35_v1 = vld [vmem:[%s4159_s1 + $0x60] sm:$0xff] }
  0x13   :  { %883 = vmatprep.subr.bf16.mxu0 %v2730_v37  ;;  %924 = vmatprep.subr.bf16.mxu1 %v2732_v38  ;;  %v98_v36 = vld [vmem:[%s4159_s1 + $0x258] sm:$0xff]  ;;  %v2717_v37 = vcombine.low %v73_v25, %v81_v26  ;;  %v105_v38 = vld [vmem:[%s4159_s1 + $0x290] sm:$0xff]  ;;  %v2734_v40 = vcombine.high %v89_v33, %v97_v34  ;;  %v51_v10 = vld [vmem:[%s4159_s1 + $0xe0] sm:$0xff] }
  0x14   :  { %v113_v41 = vld [vmem:[%s4159_s1 + $0x2d0] sm:$0xff]  ;;  %v2736_v42 = vcombine.high %v90_v35, %v98_v36  ;;  %v2735_v47 = vcombine.low %v90_v35, %v98_v36  ;;  %v67_v17 = vld [vmem:[%s4159_s1 + $0x160] sm:$0xff]  ;;  %v60_v20 = vld [vmem:[%s4159_s1 + $0x128] sm:$0xff] }
  0x15   :  { %v2750_v48 = vcombine.high %v105_v38, %v113_v41  ;;  %v129_v49 = vld [vmem:[%s4159_s1 + $0x350] sm:$0xff]  ;;  %v83_v25 = vld [vmem:[%s4159_s1 + $0x1e0] sm:$0xff]  ;;  %v76_v28 = vld [vmem:[%s4159_s1 + $0x1a8] sm:$0xff] }
  0x16   :  { %884 = vmatpush1.bf16.msra.mxu0 %v2729_v43  ;;  %925 = vmatpush1.bf16.msra.mxu1 %v2731_v44  ;;  %v106_v43 = vld [vmem:[%s4159_s1 + $0x298] sm:$0xff]  ;;  %v145_v57 = vld [vmem:[%s4159_s1 + $0x3d0] sm:$0xff]  ;;  %v92_v36 = vld [vmem:[%s4159_s1 + $0x228] sm:$0xff] }
  0x17   :  { %885 = vmatprep.subr.bf16.mxu0 %v2746_v45  ;;  %926 = vmatprep.subr.bf16.mxu1 %v2748_v46  ;;  %v114_v44 = vld [vmem:[%s4159_s1 + $0x2d8] sm:$0xff]  ;;  %v2733_v45 = vcombine.low %v89_v33, %v97_v34  ;;  %v121_v46 = vld [vmem:[%s4159_s1 + $0x310] sm:$0xff]  ;;  %v99_v33 = vld [vmem:[%s4159_s1 + $0x260] sm:$0xff] }
  0x18   :  { %v2752_v50 = vcombine.high %v106_v43, %v114_v44  ;;  %v2751_v55 = vcombine.low %v106_v43, %v114_v44  ;;  %v2766_v56 = vcombine.high %v121_v46, %v129_v49  ;;  %v108_v44 = vld [vmem:[%s4159_s1 + $0x2a8] sm:$0xff] }
  0x1a   :  { %886 = vmatpush1.bf16.msra.mxu0 %v2745_v51  ;;  %927 = vmatpush1.bf16.msra.mxu1 %v2747_v52  ;;  %v122_v51 = vld [vmem:[%s4159_s1 + $0x318] sm:$0xff] }
  0x1b   :  { %887 = vmatprep.subr.bf16.mxu0 %v2762_v53  ;;  %928 = vmatprep.subr.bf16.mxu1 %v2764_v54  ;;  %v130_v52 = vld [vmem:[%s4159_s1 + $0x358] sm:$0xff]  ;;  %v2749_v53 = vcombine.low %v105_v38, %v113_v41  ;;  %v137_v54 = vld [vmem:[%s4159_s1 + $0x390] sm:$0xff]  ;;  %v115_v41 = vld [vmem:[%s4159_s1 + $0x2e0] sm:$0xff] }
  0x1c   :  { %v2768_v58 = vcombine.high %v122_v51, %v130_v52  ;;  %v2767_v63 = vcombine.low %v122_v51, %v130_v52  ;;  %v2782_v0 = vcombine.high %v137_v54, %v145_v57  ;;  %v124_v52 = vld [vmem:[%s4159_s1 + $0x328] sm:$0xff] }
  0x1e   :  { %888 = vmatpush1.bf16.msra.mxu0 %v2761_v59  ;;  %929 = vmatpush1.bf16.msra.mxu1 %v2763_v60  ;;  %v138_v59 = vld [vmem:[%s4159_s1 + $0x398] sm:$0xff] }
  0x1f   :  { %889 = vmatprep.subr.bf16.mxu0 %v2778_v61  ;;  %930 = vmatprep.subr.bf16.mxu1 %v2780_v62  ;;  %v146_v60 = vld [vmem:[%s4159_s1 + $0x3d8] sm:$0xff]  ;;  %v2765_v61 = vcombine.low %v121_v46, %v129_v49  ;;  %v27_v62 = vld [vmem:[%s4159_s1 + $0x20] sm:$0xff] }
  0x20   :  { %v2784_v2 = vcombine.high %v138_v59, %v146_v60  ;;  %v2783_v7 = vcombine.low %v138_v59, %v146_v60  ;;  %v2674_v9 = vcombine.high %v27_v62, %v35_v1  ;;  %v131_v49 = vld [vmem:[%s4159_s1 + $0x360] sm:$0xff]  ;;  %v140_v60 = vld [vmem:[%s4159_s1 + $0x3a8] sm:$0xff] }
  0x22   :  { %890 = vmatpush1.bf16.msra.mxu0 %v2777_v3  ;;  %931 = vmatpush1.bf16.msra.mxu1 %v2779_v4  ;;  %v28_v3 = vld [vmem:[%s4159_s1 + $0x28] sm:$0xff] }
  0x23   :  { %957 = vmatprep.subr.bf16.mxu0 %v2670_v5  ;;  %998 = vmatprep.subr.bf16.mxu1 %v2672_v6  ;;  %v36_v4 = vld [vmem:[%s4159_s1 + $0x68] sm:$0xff]  ;;  %v2781_v5 = vcombine.low %v137_v54, %v145_v57  ;;  %v43_v6 = vld [vmem:[%s4159_s1 + $0xa0] sm:$0xff] }
  0x24   :  { %v2676_v11 = vcombine.high %v28_v3, %v36_v4  ;;  %v2675_v18 = vcombine.low %v28_v3, %v36_v4  ;;  %v2690_v19 = vcombine.high %v43_v6, %v51_v10  ;;  %v147_v57 = vld [vmem:[%s4159_s1 + $0x3e0] sm:$0xff]  ;;  %v30_v4 = vld [vmem:[%s4159_s1 + $0x38] sm:$0xff] }
  0x25   :  { %908 = vmatmul.mubr.bf16.vlgmr.msra.gmra.mrb[0].mxu0 %v3410_v12  ;;  %949 = vmatmul.mubr.bf16.vlgmr.msra.gmra.mrb[0].mxu1 %v3410_v12 }
  0x26   :  { %958 = vmatpush1.bf16.msra.mxu0 %v2669_v13  ;;  %999 = vmatpush1.bf16.msra.mxu1 %v2671_v14  ;;  %v44_v13 = vld [vmem:[%s4159_s1 + $0xa8] sm:$0xff] }
  0x27   :  { %959 = vmatprep.subr.bf16.mxu0 %v2686_v15  ;;  %1000 = vmatprep.subr.bf16.mxu1 %v2688_v16  ;;  %v52_v14 = vld [vmem:[%s4159_s1 + $0xe8] sm:$0xff]  ;;  %v2673_v15 = vcombine.low %v27_v62, %v35_v1  ;;  %v59_v16 = vld [vmem:[%s4159_s1 + $0x120] sm:$0xff]  ;;  %v37_v1 = vld [vmem:[%s4159_s1 + $0x70] sm:$0xff] }
  0x28   :  { %989 = vmatprep.mubr.bf16.mxu0 %v3253_v8  ;;  %1030 = vmatprep.mubr.bf16.mxu1 %v3253_v8  ;;  %v2691_v26 = vcombine.low %v44_v13, %v52_v14  ;;  %v2706_v27 = vcombine.high %v59_v16, %v67_v17 }
  0x2a   :  { %960 = vmatpush1.bf16.msra.mxu0 %v2685_v21  ;;  %1001 = vmatpush1.bf16.msra.mxu1 %v2687_v22  ;;  %v68_v21 = vld [vmem:[%s4159_s1 + $0x168] sm:$0xff]  ;;  %v2692_v22 = vcombine.high %v44_v13, %v52_v14  ;;  %v46_v14 = vld [vmem:[%s4159_s1 + $0xb8] sm:$0xff] }
  0x2b   :  { %961 = vmatprep.subr.bf16.mxu0 %v2702_v23  ;;  %1002 = vmatprep.subr.bf16.mxu1 %v2704_v24  ;;  %v2689_v23 = vcombine.low %v43_v6, %v51_v10  ;;  %v75_v24 = vld [vmem:[%s4159_s1 + $0x1a0] sm:$0xff]  ;;  %v2707_v34 = vcombine.low %v60_v20, %v68_v21  ;;  %v53_v10 = vld [vmem:[%s4159_s1 + $0xf0] sm:$0xff] }
  0x2c   :  { %v2722_v35 = vcombine.high %v75_v24, %v83_v25 }
  0x2e   :  { %962 = vmatpush1.bf16.msra.mxu0 %v2701_v29  ;;  %1003 = vmatpush1.bf16.msra.mxu1 %v2703_v30  ;;  %v84_v29 = vld [vmem:[%s4159_s1 + $0x1e8] sm:$0xff]  ;;  %v2708_v30 = vcombine.high %v60_v20, %v68_v21 }
  0x2f   :  { %963 = vmatprep.subr.bf16.mxu0 %v2718_v31  ;;  %1004 = vmatprep.subr.bf16.mxu1 %v2720_v32  ;;  %v2705_v31 = vcombine.low %v59_v16, %v67_v17  ;;  %v91_v32 = vld [vmem:[%s4159_s1 + $0x220] sm:$0xff]  ;;  %v2724_v38 = vcombine.high %v76_v28, %v84_v29 }
  0x30   :  { %v2738_v43 = vcombine.high %v91_v32, %v99_v33 }
  0x32   :  { %964 = vmatpush1.bf16.msra.mxu0 %v2717_v37  ;;  %1005 = vmatpush1.bf16.msra.mxu1 %v2719_v39  ;;  %v100_v37 = vld [vmem:[%s4159_s1 + $0x268] sm:$0xff]  ;;  %v2721_v39 = vcombine.low %v75_v24, %v83_v25 }
  0x33   :  { %965 = vmatprep.subr.bf16.mxu0 %v2734_v40  ;;  %1006 = vmatprep.subr.bf16.mxu1 %v2736_v42  ;;  %v107_v40 = vld [vmem:[%s4159_s1 + $0x2a0] sm:$0xff]  ;;  %v2723_v42 = vcombine.low %v76_v28, %v84_v29  ;;  %v2740_v46 = vcombine.high %v92_v36, %v100_v37 }
  0x34   :  { %v2754_v51 = vcombine.high %v107_v40, %v115_v41 }
  0x36   :  { %966 = vmatpush1.bf16.msra.mxu0 %v2733_v45  ;;  %1007 = vmatpush1.bf16.msra.mxu1 %v2735_v47  ;;  %v116_v45 = vld [vmem:[%s4159_s1 + $0x2e8] sm:$0xff]  ;;  %v2737_v47 = vcombine.low %v91_v32, %v99_v33  ;;  %v93_v33 = vld [vmem:[%s4159_s1 + $0x230] sm:$0xff] }
  0x37   :  { %967 = vmatprep.subr.bf16.mxu0 %v2750_v48  ;;  %1008 = vmatprep.subr.bf16.mxu1 %v2752_v50  ;;  %v123_v48 = vld [vmem:[%s4159_s1 + $0x320] sm:$0xff]  ;;  %v2739_v50 = vcombine.low %v92_v36, %v100_v37  ;;  %v2756_v54 = vcombine.high %v108_v44, %v116_v45  ;;  %v94_v37 = vld [vmem:[%s4159_s1 + $0x238] sm:$0xff] }
  0x38   :  { %v2770_v59 = vcombine.high %v123_v48, %v131_v49 }
  0x3a   :  { %968 = vmatpush1.bf16.msra.mxu0 %v2749_v53  ;;  %1009 = vmatpush1.bf16.msra.mxu1 %v2751_v55  ;;  %v132_v53 = vld [vmem:[%s4159_s1 + $0x368] sm:$0xff]  ;;  %v2753_v55 = vcombine.low %v107_v40, %v115_v41  ;;  %v109_v40 = vld [vmem:[%s4159_s1 + $0x2b0] sm:$0xff] }
  0x3b   :  { %969 = vmatprep.subr.bf16.mxu0 %v2766_v56  ;;  %1010 = vmatprep.subr.bf16.mxu1 %v2768_v58  ;;  %v139_v56 = vld [vmem:[%s4159_s1 + $0x3a0] sm:$0xff]  ;;  %v2755_v58 = vcombine.low %v108_v44, %v116_v45  ;;  %v2772_v62 = vcombine.high %v124_v52, %v132_v53  ;;  %v117_v41 = vld [vmem:[%s4159_s1 + $0x2f0] sm:$0xff]  ;;  %v110_v44 = vld [vmem:[%s4159_s1 + $0x2b8] sm:$0xff] }
  0x3c   :  { %v2786_v3 = vcombine.high %v139_v56, %v147_v57  ;;  %v118_v45 = vld [vmem:[%s4159_s1 + $0x2f8] sm:$0xff] }
  0x3e   :  { %970 = vmatpush1.bf16.msra.mxu0 %v2765_v61  ;;  %1011 = vmatpush1.bf16.msra.mxu1 %v2767_v63  ;;  %v148_v61 = vld [vmem:[%s4159_s1 + $0x3e8] sm:$0xff]  ;;  %v2769_v63 = vcombine.low %v123_v48, %v131_v49  ;;  %v125_v48 = vld [vmem:[%s4159_s1 + $0x330] sm:$0xff] }
  0x3f   :  { %971 = vmatprep.subr.bf16.mxu0 %v2782_v0  ;;  %1012 = vmatprep.subr.bf16.mxu1 %v2784_v2  ;;  %v29_v0 = vld [vmem:[%s4159_s1 + $0x30] sm:$0xff]  ;;  %v2771_v2 = vcombine.low %v124_v52, %v132_v53  ;;  %v2788_v6 = vcombine.high %v140_v60, %v148_v61  ;;  %v126_v52 = vld [vmem:[%s4159_s1 + $0x338] sm:$0xff] }
  0x40   :  { %v2678_v13 = vcombine.high %v29_v0, %v37_v1  ;;  %v2677_v17 = vcombine.low %v29_v0, %v37_v1  ;;  %v133_v49 = vld [vmem:[%s4159_s1 + $0x370] sm:$0xff]  ;;  %v134_v53 = vld [vmem:[%s4159_s1 + $0x378] sm:$0xff] }
  0x41   :  { %v2775_v0 = vcombine.low %v126_v52, %v134_v53 }
  0x42   :  { %972 = vmatpush1.bf16.msra.mxu0 %v2781_v5  ;;  %1013 = vmatpush1.bf16.msra.mxu1 %v2783_v7  ;;  %v38_v5 = vld [vmem:[%s4159_s1 + $0x78] sm:$0xff]  ;;  %v2785_v7 = vcombine.low %v139_v56, %v147_v57  ;;  %v2759_v56 = vcombine.low %v110_v44, %v118_v45  ;;  %v2774_v57 = vcombine.high %v125_v48, %v133_v49 }
  0x43   :  { %1039 = vmatprep.subr.bf16.mxu0 %v2674_v9  ;;  %1080 = vmatprep.subr.bf16.mxu1 %v2676_v11  ;;  %v45_v9 = vld [vmem:[%s4159_s1 + $0xb0] sm:$0xff]  ;;  %v2787_v11 = vcombine.low %v140_v60, %v148_v61  ;;  %v2680_v16 = vcombine.high %v30_v4, %v38_v5  ;;  %v2679_v20 = vcombine.low %v30_v4, %v38_v5  ;;  %v142_v61 = vld [vmem:[%s4159_s1 + $0x3b8] sm:$0xff] }
  0x44   :  { %v2694_v21 = vcombine.high %v45_v9, %v53_v10  ;;  %v2693_v25 = vcombine.low %v45_v9, %v53_v10  ;;  %v149_v60 = vld [vmem:[%s4159_s1 + $0x3f0] sm:$0xff]  ;;  %v3103_v9 = vld [vmem:[%s4161_s3 + $0x80] sm:$0xff]   ;;  %v3104_v10 = vld [vmem:[%s4161_s3 + $0x48] sm:$0xff]  }
  0x45   :  { %990 = vmatmul.mubr.bf16.vlgmr.msra.gmra.mrb[4].mxu0 %v3410_v12  ;;  %1031 = vmatmul.mubr.bf16.vlgmr.msra.gmra.mrb[4].mxu1 %v3410_v12 }
  0x46   :  { %1040 = vmatpush1.bf16.msra.mxu0 %v2673_v15  ;;  %1081 = vmatpush1.bf16.msra.mxu1 %v2675_v18  ;;  %v54_v15 = vld [vmem:[%s4159_s1 + $0xf8] sm:$0xff]  ;;  %v61_v18 = vld [vmem:[%s4159_s1 + $0x130] sm:$0xff] }
  0x47   :  { %1041 = vmatprep.subr.bf16.mxu0 %v2690_v19  ;;  %1082 = vmatprep.subr.bf16.mxu1 %v2692_v22  ;;  %v69_v19 = vld [vmem:[%s4159_s1 + $0x170] sm:$0xff]  ;;  %v62_v22 = vld [vmem:[%s4159_s1 + $0x138] sm:$0xff]  ;;  %v2696_v24 = vcombine.high %v46_v14, %v54_v15  ;;  %v2695_v28 = vcombine.low %v46_v14, %v54_v15  ;;  %v3106_v14 = vld [vmem:[%s4161_s3 + $0x8] sm:$0xff]  }
  0x48   :  { %1071 = vmatprep.mubr.bf16.mxu0 %v3253_v8  ;;  %1112 = vmatprep.mubr.bf16.mxu1 %v3253_v8  ;;  %v2710_v29 = vcombine.high %v61_v18, %v69_v19  ;;  %v2709_v32 = vcombine.low %v61_v18, %v69_v19  ;;  %v3107_v15 = vld [vmem:[%s4161_s3 + $0x88] sm:$0xff]   ;;  %v3110_v18 = vld [vmem:[%s4161_s3 + $0x10] sm:$0xff]  }
  0x49   :  { %v3111_v19 = vld [vmem:[%s4161_s3 + $0x90] sm:$0xff]  }
  0x4a   :  { %1042 = vmatpush1.bf16.msra.mxu0 %v2689_v23  ;;  %1083 = vmatpush1.bf16.msra.mxu1 %v2691_v26  ;;  %v70_v23 = vld [vmem:[%s4159_s1 + $0x178] sm:$0xff]  ;;  %v77_v26 = vld [vmem:[%s4159_s1 + $0x1b0] sm:$0xff] }
  0x4b   :  { %1043 = vmatprep.subr.bf16.mxu0 %v2706_v27  ;;  %1084 = vmatprep.subr.bf16.mxu1 %v2708_v30  ;;  %v85_v27 = vld [vmem:[%s4159_s1 + $0x1f0] sm:$0xff]  ;;  %v78_v30 = vld [vmem:[%s4159_s1 + $0x1b8] sm:$0xff] }
  0x4c   :  { %v2726_v36 = vcombine.high %v77_v26, %v85_v27 }
  0x4e   :  { %1044 = vmatpush1.bf16.msra.mxu0 %v2705_v31  ;;  %1085 = vmatpush1.bf16.msra.mxu1 %v2707_v34  ;;  %v2712_v31 = vcombine.high %v62_v22, %v70_v23  ;;  %v101_v34 = vld [vmem:[%s4159_s1 + $0x270] sm:$0xff] }
  0x4f   :  { %1045 = vmatprep.subr.bf16.mxu0 %v2722_v35  ;;  %1086 = vmatprep.subr.bf16.mxu1 %v2724_v38  ;;  %v2711_v35 = vcombine.low %v62_v22, %v70_v23  ;;  %v3114_v22 = vld [vmem:[%s4161_s3 + $0x18] sm:$0xff]  }
  0x50   :  { %v3115_v23 = vld [vmem:[%s4161_s3 + $0x98] sm:$0xff]  }
  0x52   :  { %1046 = vmatpush1.bf16.msra.mxu0 %v2721_v39  ;;  %1087 = vmatpush1.bf16.msra.mxu1 %v2723_v42  ;;  %v2725_v39 = vcombine.low %v77_v26, %v85_v27  ;;  %v3118_v26 = vld [vmem:[%s4161_s3 + $0x20] sm:$0xff]  }
  0x53   :  { %1047 = vmatprep.subr.bf16.mxu0 %v2738_v43  ;;  %1088 = vmatprep.subr.bf16.mxu1 %v2740_v46  ;;  %v2742_v43 = vcombine.high %v93_v33, %v101_v34  ;;  %v3119_v27 = vld [vmem:[%s4161_s3 + $0xa0] sm:$0xff]  }
  0x56   :  { %1048 = vmatpush1.bf16.msra.mxu0 %v2737_v47  ;;  %1089 = vmatpush1.bf16.msra.mxu1 %v2739_v50  ;;  %v2741_v47 = vcombine.low %v93_v33, %v101_v34 }
  0x57   :  { %1049 = vmatprep.subr.bf16.mxu0 %v2754_v51  ;;  %1090 = vmatprep.subr.bf16.mxu1 %v2756_v54  ;;  %v2758_v51 = vcombine.high %v109_v40, %v117_v41  ;;  %v2760_v54 = vcombine.high %v110_v44, %v118_v45 }
  0x5a   :  { %1050 = vmatpush1.bf16.msra.mxu0 %v2753_v55  ;;  %1091 = vmatpush1.bf16.msra.mxu1 %v2755_v58  ;;  %v2757_v55 = vcombine.low %v109_v40, %v117_v41  ;;  %v2776_v58 = vcombine.high %v126_v52, %v134_v53 }
  0x5b   :  { %1051 = vmatprep.subr.bf16.mxu0 %v2770_v59  ;;  %1092 = vmatprep.subr.bf16.mxu1 %v2772_v62  ;;  %v141_v59 = vld [vmem:[%s4159_s1 + $0x3b0] sm:$0xff]  ;;  %v150_v62 = vld [vmem:[%s4159_s1 + $0x3f8] sm:$0xff] }
  0x5c   :  { %v2790_v1 = vcombine.high %v141_v59, %v149_v60  ;;  %v2789_v4 = vcombine.low %v141_v59, %v149_v60  ;;  %v2791_v5 = vcombine.low %v142_v61, %v150_v62 }
  0x5e   :  { %1052 = vmatpush1.bf16.msra.mxu0 %v2769_v63  ;;  %1093 = vmatpush1.bf16.msra.mxu1 %v2771_v2  ;;  %v2773_v63 = vcombine.low %v125_v48, %v133_v49  ;;  %v2792_v2 = vcombine.high %v142_v61, %v150_v62 }
  0x5f   :  { %1053 = vmatprep.subr.bf16.mxu0 %v2786_v3  ;;  %1094 = vmatprep.subr.bf16.mxu1 %v2788_v6  ;;  %v3100_v3 = vld [vmem:[%s4161_s3 + $0x40] sm:$0xff]  }
  0x60   :  { %v3101_v6 = vld [vmem:[%s4161_s3 + $0xc0] sm:$0xff]  }
  0x62   :  { %1054 = vmatpush1.bf16.msra.mxu0 %v2785_v7  ;;  %1095 = vmatpush1.bf16.msra.mxu1 %v2787_v11  ;;  %v3102_v7 = vld [vmem:[%s4161_s3] sm:$0xff]   ;;  %v3105_v11 = vld [vmem:[%s4161_s3 + $0xc8] sm:$0xff]  }
  0x63   :  { %1121 = vmatprep.subr.bf16.mxu0 %v2678_v13  ;;  %1162 = vmatprep.subr.bf16.mxu1 %v2680_v16  ;;  %v3228_v13 = vld [vmem:[%s4158_s0] sm:$0x3]  ;;  %v3108_v16 = vld [vmem:[%s4161_s3 + $0x50] sm:$0xff]  }
  0x65   :  { %1072 = vmatmul.mubr.bf16.vlgmr.msra.gmra.mrb[8].mxu0 %v3410_v12  ;;  %1113 = vmatmul.mubr.bf16.vlgmr.msra.gmra.mrb[8].mxu1 %v3410_v12  ;;  %v86_v12 = vld [vmem:[%s4159_s1 + $0x1f8] sm:$0xff] }
  0x66   :  { %1122 = vmatpush1.bf16.msra.mxu0 %v2677_v17  ;;  %1163 = vmatpush1.bf16.msra.mxu1 %v2679_v20  ;;  %v2728_v38 = vcombine.high %v78_v30, %v86_v12  ;;  %v2727_v42 = vcombine.low %v78_v30, %v86_v12  ;;  %v3109_v17 = vld [vmem:[%s4161_s3 + $0xd0] sm:$0xff]   ;;  %v3112_v20 = vld [vmem:[%s4161_s3 + $0x58] sm:$0xff]  }
  0x67   :  { %1123 = vmatprep.subr.bf16.mxu0 %v2694_v21  ;;  %1164 = vmatprep.subr.bf16.mxu1 %v2696_v24  ;;  %v3113_v21 = vld [vmem:[%s4161_s3 + $0xd8] sm:$0xff]   ;;  %v3116_v24 = vld [vmem:[%s4161_s3 + $0x60] sm:$0xff]  }
  0x68   :  { %1153 = vmatprep.mubr.bf16.mxu0 %v3253_v8  ;;  %1194 = vmatprep.mubr.bf16.mxu1 %v3253_v8  ;;  %v102_v8 = vld [vmem:[%s4159_s1 + $0x278] sm:$0xff] }
  0x69   :  { %v2744_v46 = vcombine.high %v94_v37, %v102_v8  ;;  %v2743_v50 = vcombine.low %v94_v37, %v102_v8 }
  0x6a   :  { %1124 = vmatpush1.bf16.msra.mxu0 %v2693_v25  ;;  %1165 = vmatpush1.bf16.msra.mxu1 %v2695_v28  ;;  %v3117_v25 = vld [vmem:[%s4161_s3 + $0xe0] sm:$0xff]   ;;  %v3120_v28 = vld [vmem:[%s4161_s3 + $0x68] sm:$0xff]  }
  0x6b   :  { %1125 = vmatprep.subr.bf16.mxu0 %v2710_v29  ;;  %1166 = vmatprep.subr.bf16.mxu1 %v2712_v31  ;;  %v3121_v29 = vld [vmem:[%s4161_s3 + $0xe8] sm:$0xff]  }
  0x6e   :  { %1126 = vmatpush1.bf16.msra.mxu0 %v2709_v32  ;;  %1167 = vmatpush1.bf16.msra.mxu1 %v2711_v35 }
  0x6f   :  { %1127 = vmatprep.subr.bf16.mxu0 %v2726_v36  ;;  %1168 = vmatprep.subr.bf16.mxu1 %v2728_v38 }
  0x72   :  { %1128 = vmatpush1.bf16.msra.mxu0 %v2725_v39  ;;  %1169 = vmatpush1.bf16.msra.mxu1 %v2727_v42 }
  0x73   :  { %1129 = vmatprep.subr.bf16.mxu0 %v2742_v43  ;;  %1170 = vmatprep.subr.bf16.mxu1 %v2744_v46 }
  0x76   :  { %1130 = vmatpush1.bf16.msra.mxu0 %v2741_v47  ;;  %1171 = vmatpush1.bf16.msra.mxu1 %v2743_v50 }
  0x77   :  { %1131 = vmatprep.subr.bf16.mxu0 %v2758_v51  ;;  %1172 = vmatprep.subr.bf16.mxu1 %v2760_v54 }
  0x7a   :  { %1132 = vmatpush1.bf16.msra.mxu0 %v2757_v55  ;;  %1173 = vmatpush1.bf16.msra.mxu1 %v2759_v56 }
  0x7b   :  { %1133 = vmatprep.subr.bf16.mxu0 %v2774_v57  ;;  %1174 = vmatprep.subr.bf16.mxu1 %v2776_v58 }
  0x7e   :  { %1134 = vmatpush1.bf16.msra.mxu0 %v2773_v63  ;;  %1175 = vmatpush1.bf16.msra.mxu1 %v2775_v0 }
  0x7f   :  { %1135 = vmatprep.subr.bf16.mxu0 %v2790_v1  ;;  %1176 = vmatprep.subr.bf16.mxu1 %v2792_v2 }
  0x82   :  { %1136 = vmatpush1.bf16.msra.mxu0 %v2789_v4  ;;  %1177 = vmatpush1.bf16.msra.mxu1 %v2791_v5 }
  0x83   :  { %2922 = vmatprep.subr.bf16.mxu0 %v3100_v3  ;;  %2944 = vmatprep.subr.bf16.mxu1 %v3101_v6 }
  0x85   :  { %1154 = vmatmul.mubr.bf16.vlgmr.msra.gmra.mrb[12].mxu0 %v3228_v13  ;;  %1195 = vmatmul.mubr.bf16.vlgmr.msra.gmra.mrb[12].mxu1 %v3228_v13 }
  0x86   :  { %2923 = vmatpush3.bf16.msra.mxu0 %v3102_v7  ;;  %2945 = vmatpush3.bf16.msra.mxu1 %v3103_v9 }
  0x87   :  { %2924 = vmatprep.subr.bf16.mxu0 %v3104_v10  ;;  %2946 = vmatprep.subr.bf16.mxu1 %v3105_v11 }
  0x8a   :  { %2925 = vmatpush3.bf16.msra.mxu0 %v3106_v14  ;;  %2947 = vmatpush3.bf16.msra.mxu1 %v3107_v15 }
  0x8b   :  { %2926 = vmatprep.subr.bf16.mxu0 %v3108_v16  ;;  %2948 = vmatprep.subr.bf16.mxu1 %v3109_v17 }
  0x8e   :  { %2927 = vmatpush3.bf16.msra.mxu0 %v3110_v18  ;;  %2949 = vmatpush3.bf16.msra.mxu1 %v3111_v19 }
  0x8f   :  { %2928 = vmatprep.subr.bf16.mxu0 %v3112_v20  ;;  %2950 = vmatprep.subr.bf16.mxu1 %v3113_v21 }
  0x92   :  { %2929 = vmatpush3.bf16.msra.mxu0 %v3114_v22  ;;  %2951 = vmatpush3.bf16.msra.mxu1 %v3115_v23 }
  0x93   :  { %2930 = vmatprep.subr.bf16.mxu0 %v3116_v24  ;;  %2952 = vmatprep.subr.bf16.mxu1 %v3117_v25 }
  0x94   :  { %10 = vsyncpa [#allocation3], 0  ;;  %v3122_v30 = vld [vmem:[%s4161_s3 + $0x28] sm:$0xff]   ;;  %v3124_v31 = vld [vmem:[%s4161_s3 + $0x70] sm:$0xff]   ;;  %v155_v40 = vlaneseq }
  0x95   :  { %v3123_v12 = vld [vmem:[%s4161_s3 + $0xa8] sm:$0xff]   ;;  %v3125_v32 = vld [vmem:[%s4161_s3 + $0xf0] sm:$0xff]   ;;  %v3128_v35 = vld [vmem:[%s4161_s3 + $0x78] sm:$0xff]  }
  0x96   :  { %2931 = vmatpush3.bf16.msra.mxu0 %v3118_v26  ;;  %2953 = vmatpush3.bf16.msra.mxu1 %v3119_v27  ;;  %v3126_v33 = vld [vmem:[%s4161_s3 + $0x30] sm:$0xff]   ;;  %v3129_v36 = vld [vmem:[%s4161_s3 + $0xf8] sm:$0xff]   ;;  %v3132_v38 = vld [vmem:[%s4161_s3 + $0x140] sm:$0xff]   ;;  %v3793_v41 = vshrl.u32 %v155_v40, 7 }
  0x97   :  { %2932 = vmatprep.subr.bf16.mxu0 %v3120_v28  ;;  %2954 = vmatprep.subr.bf16.mxu1 %v3121_v29  ;;  %v3127_v34 = vld [vmem:[%s4161_s3 + $0xb0] sm:$0xff]   ;;  %v3130_v37 = vld [vmem:[%s4161_s3 + $0x38] sm:$0xff]   ;;  %v3133_v39 = vld [vmem:[%s4161_s3 + $0x1c0] sm:$0xff]  }
  0x98   :  { %v3131_v8 = vld [vmem:[%s4161_s3 + $0xb8] sm:$0xff]   ;;  %v157_v42 = vsub.s32 0, %v3793_v41  ;;  %v3799_v43 = vld [vmem:[%s4160_s2] sm:$0xff]  ;;  %v165_v44 = vsub.s32 2, %v3793_v41  ;;  %v161_v45 = vsub.s32 1, %v3793_v41  ;;  %v169_v46 = vsub.s32 3, %v3793_v41 }
  0x99   :  { %v3134_v15 = vld [vmem:[%s4161_s3 + $0x100] sm:$0xff]   ;;  %v3136_v19 = vld [vmem:[%s4161_s3 + $0x148] sm:$0xff]   ;;  %v3140_v23 = vld [vmem:[%s4161_s3 + $0x150] sm:$0xff]  }
  0x9a   :  { %2933 = vmatpush3.bf16.msra.mxu0 %v3122_v30  ;;  %2955 = vmatpush3.bf16.msra.mxu1 %v3123_v12  ;;  %v158_v47 = vrot.slane %v3799_v43, %v157_v42  ;;  %v166_v48 = vrot.slane %v3799_v43, %v165_v44  ;;  %v162_v49 = vrot.slane %v3799_v43, %v161_v45  ;;  %v3135_v18 = vld [vmem:[%s4161_s3 + $0x180] sm:$0xff]   ;;  %v3137_v20 = vld [vmem:[%s4161_s3 + $0x1c8] sm:$0xff]   ;;  %v3141_v24 = vld [vmem:[%s4161_s3 + $0x1d0] sm:$0xff]  }
  0x9b   :  { %2934 = vmatprep.subr.bf16.mxu0 %v3124_v31  ;;  %2956 = vmatprep.subr.bf16.mxu1 %v3125_v32  ;;  %v170_v50 = vrot.slane %v3799_v43, %v169_v46  ;;  %v3138_v21 = vld [vmem:[%s4161_s3 + $0x108] sm:$0xff]   ;;  %v3142_v25 = vld [vmem:[%s4161_s3 + $0x110] sm:$0xff]   ;;  %v3144_v27 = vld [vmem:[%s4161_s3 + $0x158] sm:$0xff]   ;;  %v173_v32 = vsub.s32 4, %v3793_v41 }
  0x9c   :  { %v3139_v22 = vld [vmem:[%s4161_s3 + $0x188] sm:$0xff]   ;;  %v3143_v26 = vld [vmem:[%s4161_s3 + $0x190] sm:$0xff]   ;;  %v3145_v28 = vld [vmem:[%s4161_s3 + $0x1d8] sm:$0xff]  }
  0x9d   :  { %v3146_v29 = vld [vmem:[%s4161_s3 + $0x118] sm:$0xff]   ;;  %v3148_v12 = vld [vmem:[%s4161_s3 + $0x160] sm:$0xff]  }
  0x9e   :  { %2935 = vmatpush3.bf16.msra.mxu0 %v3126_v33  ;;  %2957 = vmatpush3.bf16.msra.mxu1 %v3127_v34  ;;  %v3147_v30 = vld [vmem:[%s4161_s3 + $0x198] sm:$0xff]   ;;  %v3149_v31 = vld [vmem:[%s4161_s3 + $0x1e0] sm:$0xff]   ;;  %v181_v34 = vsub.s32 6, %v3793_v41 }
  0x9f   :  { %2936 = vmatprep.subr.bf16.mxu0 %v3128_v35  ;;  %2958 = vmatprep.subr.bf16.mxu1 %v3129_v36  ;;  %v3150_v33 = vld [vmem:[%s4161_s3 + $0x120] sm:$0xff]   ;;  %v177_v35 = vsub.s32 5, %v3793_v41 }
  0xa0   :  { %v3151_v36 = vld [vmem:[%s4161_s3 + $0x1a0] sm:$0xff]   ;;  %v182_v40 = vrot.slane %v3799_v43, %v181_v34 }
  0xa2   :  { %2937 = vmatpush3.bf16.msra.mxu0 %v3130_v37  ;;  %2959 = vmatpush3.bf16.msra.mxu1 %v3131_v8  ;;  %v185_v37 = vsub.s32 7, %v3793_v41  ;;  %v3152_v8 = vld [vmem:[%s4161_s3 + $0x168] sm:$0xff]  }
  0xa3   :  { %2966 = vmatprep.subr.bf16.mxu0 %v3132_v38  ;;  %2988 = vmatprep.subr.bf16.mxu1 %v3133_v39  ;;  %v3153_v38 = vld [vmem:[%s4161_s3 + $0x1e8] sm:$0xff]   ;;  %v174_v39 = vrot.slane %v3799_v43, %v173_v32 }
  0xf8   :  { %v909_v51 = vpop.f32.mrb[0].mxu0  ;;  %v950_v53 = vpop.f32.mrb[0].mxu1 }
  0xf9   :  { %v910_v52 = vadd.f32 %v909_v51, %v158_v47  ;;  %v911_v54 = vpop.f32.mrb[1].mxu0  ;;  %v951_v55 = vadd.f32 %v950_v53, %v166_v48  ;;  %v952_v57 = vpop.f32.mrb[1].mxu1  ;;  %v178_v47 = vrot.slane %v3799_v43, %v177_v35  ;;  %v3154_v48 = vld [vmem:[%s4161_s3 + $0x128] sm:$0xff]   ;;  %v3156_v51 = vld [vmem:[%s4161_s3 + $0x170] sm:$0xff]  }
  0xfa   :  { %v912_v56 = vadd.f32 %v911_v54, %v162_v49  ;;  %v913_v58 = vpop.f32.mrb[2].mxu0  ;;  %v953_v60 = vadd.f32 %v952_v57, %v170_v50  ;;  %v954_v61 = vpop.f32.mrb[2].mxu1  ;;  %v186_v49 = vrot.slane %v3799_v43, %v185_v37  ;;  %v3155_v50 = vld [vmem:[%s4161_s3 + $0x1a8] sm:$0xff]   ;;  %v3157_v53 = vld [vmem:[%s4161_s3 + $0x1f0] sm:$0xff]  }
  0xfb   :  { %v1203_v59 = vmax.f32 %v910_v52, 0.0  ;;  %v914_v62 = vpop.f32.mrb[3].mxu0  ;;  %v1205_v63 = vmax.f32 %v951_v55, 0.0  ;;  %v955_v1 = vpop.f32.mrb[3].mxu1 }
  0xfc   :  { %v1204_v0 = vmax.f32 %v912_v56, 0.0  ;;  %v1206_v3 = vmax.f32 %v953_v60, 0.0  ;;  %v3158_v60 = vld [vmem:[%s4161_s3 + $0x130] sm:$0xff]  }
  0xfd   :  { %v1235_v2 = vrot.slane %v1203_v59, 2  ;;  %v1237_v4 = vrot.slane %v1205_v63, 2  ;;  %v3159_v1 = vld [vmem:[%s4161_s3 + $0x1b0] sm:$0xff]  }
  0xfe   :  { %v1236_v5 = vrot.slane %v1204_v0, 2  ;;  %v1238_v7 = vrot.slane %v1206_v3, 2 }
  0xff   :  { %v1267_v6 = vmax.f32 %v1203_v59, %v1235_v2  ;;  %v1269_v9 = vmax.f32 %v1205_v63, %v1237_v4  ;;  %v3160_v2 = vld [vmem:[%s4161_s3 + $0x178] sm:$0xff]  }
 0x100   :  { %v1268_v10 = vmax.f32 %v1204_v0, %v1236_v5  ;;  %v1270_v11 = vmax.f32 %v1206_v3, %v1238_v7 }
 0x101   :  { %v1285_v13 = vpack.c.bf16 %v1269_v9, %v1269_v9  ;;  %v1283_v16 = vpack.c.bf16 %v1267_v6, %v1267_v6  ;;  %v3161_v6 = vld [vmem:[%s4161_s3 + $0x1f8] sm:$0xff]  }
 0x102   :  { %v1284_v14 = vpack.c.bf16 %v1268_v10, %v1268_v10  ;;  %v1286_v17 = vpack.c.bf16 %v1270_v11, %v1270_v11 }
 0x104   :  { %2362 = vmatprep.mubr.bf16.mxu0 %v1284_v14  ;;  %2402 = vmatprep.mubr.bf16.mxu1 %v1286_v17  ;;  %v3164_v17 = vld [vmem:[%s4161_s3 + $0x240] sm:$0xff]  }
 0x105   :  { %2363 = vmatmul.mubr.bf16.vlgmr.msra.gmra.mrb[16].mxu0 %v1283_v16  ;;  %2403 = vmatmul.mubr.bf16.vlgmr.msra.gmra.mrb[16].mxu1 %v1285_v13  ;;  %v3162_v13 = vld [vmem:[%s4161_s3 + $0x138] sm:$0xff]  }
 0x106   :  { %2967 = vmatpush3.bf16.msra.mxu0 %v3134_v15  ;;  %2989 = vmatpush3.bf16.msra.mxu1 %v3135_v18  ;;  %v3163_v16 = vld [vmem:[%s4161_s3 + $0x1b8] sm:$0xff]  }
 0x107   :  { %2968 = vmatprep.subr.bf16.mxu0 %v3136_v19  ;;  %2990 = vmatprep.subr.bf16.mxu1 %v3137_v20  ;;  %v3165_v20 = vld [vmem:[%s4161_s3 + $0x2c0] sm:$0xff]  }
 0x10a   :  { %2969 = vmatpush3.bf16.msra.mxu0 %v3138_v21  ;;  %2991 = vmatpush3.bf16.msra.mxu1 %v3139_v22 }
 0x10b   :  { %2970 = vmatprep.subr.bf16.mxu0 %v3140_v23  ;;  %2992 = vmatprep.subr.bf16.mxu1 %v3141_v24  ;;  %v3166_v24 = vld [vmem:[%s4161_s3 + $0x200] sm:$0xff]  }
 0x10e   :  { %2971 = vmatpush3.bf16.msra.mxu0 %v3142_v25  ;;  %2993 = vmatpush3.bf16.msra.mxu1 %v3143_v26 }
 0x10f   :  { %2972 = vmatprep.subr.bf16.mxu0 %v3144_v27  ;;  %2994 = vmatprep.subr.bf16.mxu1 %v3145_v28  ;;  %v3167_v27 = vld [vmem:[%s4161_s3 + $0x280] sm:$0xff]   ;;  %v3168_v28 = vld [vmem:[%s4161_s3 + $0x248] sm:$0xff]  }
 0x112   :  { %2973 = vmatpush3.bf16.msra.mxu0 %v3146_v29  ;;  %2995 = vmatpush3.bf16.msra.mxu1 %v3147_v30  ;;  %v3169_v29 = vld [vmem:[%s4161_s3 + $0x2c8] sm:$0xff]  }
 0x113   :  { %2974 = vmatprep.subr.bf16.mxu0 %v3148_v12  ;;  %2996 = vmatprep.subr.bf16.mxu1 %v3149_v31  ;;  %v3170_v30 = vld [vmem:[%s4161_s3 + $0x208] sm:$0xff]   ;;  %v3172_v31 = vld [vmem:[%s4161_s3 + $0x250] sm:$0xff]  }
 0x114   :  { %v3171_v12 = vld [vmem:[%s4161_s3 + $0x288] sm:$0xff]  }
 0x116   :  { %2975 = vmatpush3.bf16.msra.mxu0 %v3150_v33  ;;  %2997 = vmatpush3.bf16.msra.mxu1 %v3151_v36  ;;  %v3173_v33 = vld [vmem:[%s4161_s3 + $0x2d0] sm:$0xff]  }
 0x117   :  { %2976 = vmatprep.subr.bf16.mxu0 %v3152_v8  ;;  %2998 = vmatprep.subr.bf16.mxu1 %v3153_v38  ;;  %v3174_v36 = vld [vmem:[%s4161_s3 + $0x210] sm:$0xff]   ;;  %v3176_v38 = vld [vmem:[%s4161_s3 + $0x258] sm:$0xff]  }
 0x118   :  { %v991_v52 = vpop.f32.mrb[4].mxu0  ;;  %v1032_v55 = vpop.f32.mrb[4].mxu1  ;;  %v3175_v8 = vld [vmem:[%s4161_s3 + $0x290] sm:$0xff]  }
 0x119   :  { %v992_v54 = vadd.f32 %v991_v52, %v174_v39  ;;  %v993_v56 = vpop.f32.mrb[5].mxu0  ;;  %v1033_v57 = vadd.f32 %v1032_v55, %v182_v40  ;;  %v1034_v58 = vpop.f32.mrb[5].mxu1  ;;  %v3177_v39 = vld [vmem:[%s4161_s3 + $0x2d8] sm:$0xff]   ;;  %v3183_v52 = vld [vmem:[%s4161_s3 + $0x2a0] sm:$0xff]  }
 0x11a   :  { %v994_v43 = vadd.f32 %v993_v56, %v178_v47  ;;  %v995_v59 = vpop.f32.mrb[6].mxu0  ;;  %2977 = vmatpush3.bf16.msra.mxu0 %v3154_v48  ;;  %v1035_v62 = vadd.f32 %v1034_v58, %v186_v49  ;;  %v1036_v63 = vpop.f32.mrb[6].mxu1  ;;  %2999 = vmatpush3.bf16.msra.mxu1 %v3155_v50  ;;  %v3178_v40 = vld [vmem:[%s4161_s3 + $0x218] sm:$0xff]   ;;  %v3180_v48 = vld [vmem:[%s4161_s3 + $0x260] sm:$0xff]  }
 0x11b   :  { %v1207_v61 = vmax.f32 %v992_v54, 0.0  ;;  %v996_v0 = vpop.f32.mrb[7].mxu0  ;;  %2978 = vmatprep.subr.bf16.mxu0 %v3156_v51  ;;  %v1209_v3 = vmax.f32 %v1033_v57, 0.0  ;;  %v1037_v5 = vpop.f32.mrb[7].mxu1  ;;  %3000 = vmatprep.subr.bf16.mxu1 %v3157_v53  ;;  %v3179_v47 = vld [vmem:[%s4161_s3 + $0x298] sm:$0xff]   ;;  %v3181_v49 = vld [vmem:[%s4161_s3 + $0x2e0] sm:$0xff]  }
 0x11c   :  { %v1208_v4 = vmax.f32 %v994_v43, 0.0  ;;  %v1210_v9 = vmax.f32 %v1035_v62, 0.0  ;;  %v3182_v50 = vld [vmem:[%s4161_s3 + $0x220] sm:$0xff]   ;;  %v3982_v51 = vld [vmem:[%s4160_s2 + $0x8] sm:$0xff] }
 0x11d   :  { %v1239_v7 = vrot.slane %v1207_v61, 2  ;;  %v1241_v10 = vrot.slane %v1209_v3, 2  ;;  %v3184_v53 = vld [vmem:[%s4161_s3 + $0x268] sm:$0xff]   ;;  %v190_v55 = vrot.slane %v3982_v51, %v157_v42  ;;  %v198_v56 = vrot.slane %v3982_v51, %v165_v44  ;;  %v3188_v44 = vld [vmem:[%s4161_s3 + $0x270] sm:$0xff]  }
 0x11e   :  { %v1240_v11 = vrot.slane %v1208_v4, 2  ;;  %2979 = vmatpush3.bf16.msra.mxu0 %v3158_v60  ;;  %v1242_v15 = vrot.slane %v1210_v9, 2  ;;  %3001 = vmatpush3.bf16.msra.mxu1 %v3159_v1  ;;  %v3185_v54 = vld [vmem:[%s4161_s3 + $0x2e8] sm:$0xff]   ;;  %v194_v57 = vrot.slane %v3982_v51, %v161_v45  ;;  %v202_v58 = vrot.slane %v3982_v51, %v169_v46  ;;  %v3189_v45 = vld [vmem:[%s4161_s3 + $0x2f0] sm:$0xff]  }
 0x11f   :  { %v1271_v14 = vmax.f32 %v1207_v61, %v1239_v7  ;;  %2980 = vmatprep.subr.bf16.mxu0 %v3160_v2  ;;  %v1273_v18 = vmax.f32 %v1209_v3, %v1241_v10  ;;  %3002 = vmatprep.subr.bf16.mxu1 %v3161_v6  ;;  %v3186_v43 = vld [vmem:[%s4161_s3 + $0x228] sm:$0xff]   ;;  %v3190_v2 = vld [vmem:[%s4161_s3 + $0x230] sm:$0xff]  }
 0x120   :  { %v1272_v19 = vmax.f32 %v1208_v4, %v1240_v11  ;;  %v1274_v21 = vmax.f32 %v1210_v9, %v1242_v15  ;;  %v3187_v42 = vld [vmem:[%s4161_s3 + $0x2a8] sm:$0xff]   ;;  %v3191_v7 = vld [vmem:[%s4161_s3 + $0x2b0] sm:$0xff]   ;;  %v3192_v9 = vld [vmem:[%s4161_s3 + $0x278] sm:$0xff]  }
 0x121   :  { %v1289_v22 = vpack.c.bf16 %v1273_v18, %v1273_v18  ;;  %v1287_v25 = vpack.c.bf16 %v1271_v14, %v1271_v14  ;;  %v3193_v14 = vld [vmem:[%s4161_s3 + $0x2f8] sm:$0xff]  }
 0x122   :  { %v1288_v23 = vpack.c.bf16 %v1272_v19, %v1272_v19  ;;  %2981 = vmatpush3.bf16.msra.mxu0 %v3162_v13  ;;  %v1290_v26 = vpack.c.bf16 %v1274_v21, %v1274_v21  ;;  %3003 = vmatpush3.bf16.msra.mxu1 %v3163_v16  ;;  %v3194_v19 = vld [vmem:[%s4161_s3 + $0x238] sm:$0xff]  }
 0x123   :  { %3010 = vmatprep.subr.bf16.mxu0 %v3164_v17  ;;  %3032 = vmatprep.subr.bf16.mxu1 %v3165_v20 }
 0x124   :  { %2442 = vmatprep.mubr.bf16.mxu0 %v1288_v23  ;;  %2482 = vmatprep.mubr.bf16.mxu1 %v1290_v26  ;;  %v3196_v23 = vld [vmem:[%s4161_s3 + $0x340] sm:$0xff]  }
 0x125   :  { %2443 = vmatmul.mubr.bf16.vlgmr.msra.gmra.mrb[20].mxu0 %v1287_v25  ;;  %2483 = vmatmul.mubr.bf16.vlgmr.msra.gmra.mrb[20].mxu1 %v1289_v22  ;;  %v3195_v22 = vld [vmem:[%s4161_s3 + $0x2b8] sm:$0xff]   ;;  %v3197_v26 = vld [vmem:[%s4161_s3 + $0x3c0] sm:$0xff]  }
 0x126   :  { %3011 = vmatpush3.bf16.msra.mxu0 %v3166_v24  ;;  %3033 = vmatpush3.bf16.msra.mxu1 %v3167_v27 }
 0x127   :  { %3012 = vmatprep.subr.bf16.mxu0 %v3168_v28  ;;  %3034 = vmatprep.subr.bf16.mxu1 %v3169_v29 }
 0x12a   :  { %3013 = vmatpush3.bf16.msra.mxu0 %v3170_v30  ;;  %3035 = vmatpush3.bf16.msra.mxu1 %v3171_v12  ;;  %v3198_v30 = vld [vmem:[%s4161_s3 + $0x300] sm:$0xff]  }
 0x12b   :  { %3014 = vmatprep.subr.bf16.mxu0 %v3172_v31  ;;  %3036 = vmatprep.subr.bf16.mxu1 %v3173_v33  ;;  %v3199_v33 = vld [vmem:[%s4161_s3 + $0x380] sm:$0xff]  }
 0x12e   :  { %3015 = vmatpush3.bf16.msra.mxu0 %v3174_v36  ;;  %3037 = vmatpush3.bf16.msra.mxu1 %v3175_v8  ;;  %v3200_v36 = vld [vmem:[%s4161_s3 + $0x348] sm:$0xff]  }
 0x12f   :  { %3016 = vmatprep.subr.bf16.mxu0 %v3176_v38  ;;  %3038 = vmatprep.subr.bf16.mxu1 %v3177_v39  ;;  %v3201_v8 = vld [vmem:[%s4161_s3 + $0x3c8] sm:$0xff]  }
 0x130   :  { %v3202_v38 = vld [vmem:[%s4161_s3 + $0x308] sm:$0xff]  }
 0x131   :  { %v3203_v39 = vld [vmem:[%s4161_s3 + $0x388] sm:$0xff]  }
 0x132   :  { %3017 = vmatpush3.bf16.msra.mxu0 %v3178_v40  ;;  %3039 = vmatpush3.bf16.msra.mxu1 %v3179_v47  ;;  %v3204_v40 = vld [vmem:[%s4161_s3 + $0x350] sm:$0xff]  }
 0x133   :  { %3018 = vmatprep.subr.bf16.mxu0 %v3180_v48  ;;  %3040 = vmatprep.subr.bf16.mxu1 %v3181_v49  ;;  %v3205_v47 = vld [vmem:[%s4161_s3 + $0x3d0] sm:$0xff]  }
 0x134   :  { %v3206_v48 = vld [vmem:[%s4161_s3 + $0x310] sm:$0xff]  }
 0x135   :  { %v3207_v49 = vld [vmem:[%s4161_s3 + $0x390] sm:$0xff]  }
 0x136   :  { %3019 = vmatpush3.bf16.msra.mxu0 %v3182_v50  ;;  %3041 = vmatpush3.bf16.msra.mxu1 %v3183_v52  ;;  %v3208_v50 = vld [vmem:[%s4161_s3 + $0x358] sm:$0xff]  }
 0x137   :  { %3020 = vmatprep.subr.bf16.mxu0 %v3184_v53  ;;  %3042 = vmatprep.subr.bf16.mxu1 %v3185_v54  ;;  %v3209_v52 = vld [vmem:[%s4161_s3 + $0x3d8] sm:$0xff]  }
 0x138   :  { %v1073_v59 = vpop.f32.mrb[8].mxu0  ;;  %v1114_v61 = vpop.f32.mrb[8].mxu1  ;;  %v3210_v53 = vld [vmem:[%s4161_s3 + $0x318] sm:$0xff]  }
 0x139   :  { %v1074_v60 = vadd.f32 %v1073_v59, %v190_v55  ;;  %v1075_v62 = vpop.f32.mrb[9].mxu0  ;;  %v1115_v63 = vadd.f32 %v1114_v61, %v198_v56  ;;  %v1116_v0 = vpop.f32.mrb[9].mxu1  ;;  %v3211_v54 = vld [vmem:[%s4161_s3 + $0x398] sm:$0xff]   ;;  %v3212_v55 = vld [vmem:[%s4161_s3 + $0x360] sm:$0xff]   ;;  %v214_v59 = vrot.slane %v3982_v51, %v181_v34  ;;  %v218_v61 = vrot.slane %v3982_v51, %v185_v37  ;;  %v3220_v34 = vld [vmem:[%s4161_s3 + $0x370] sm:$0xff]  }
 0x13a   :  { %v1076_v46 = vadd.f32 %v1075_v62, %v194_v57  ;;  %v1077_v1 = vpop.f32.mrb[10].mxu0  ;;  %3021 = vmatpush3.bf16.msra.mxu0 %v3186_v43  ;;  %v1117_v4 = vadd.f32 %v1116_v0, %v202_v58  ;;  %v1118_v5 = vpop.f32.mrb[10].mxu1  ;;  %3043 = vmatpush3.bf16.msra.mxu1 %v3187_v42  ;;  %v3213_v56 = vld [vmem:[%s4161_s3 + $0x3e0] sm:$0xff]   ;;  %v3216_v58 = vld [vmem:[%s4161_s3 + $0x368] sm:$0xff]  }
 0x13b   :  { %v1211_v3 = vmax.f32 %v1074_v60, 0.0  ;;  %v1078_v6 = vpop.f32.mrb[11].mxu0  ;;  %3022 = vmatprep.subr.bf16.mxu0 %v3188_v44  ;;  %v1213_v10 = vmax.f32 %v1115_v63, 0.0  ;;  %v1119_v13 = vpop.f32.mrb[11].mxu1  ;;  %3044 = vmatprep.subr.bf16.mxu1 %v3189_v45  ;;  %v3214_v57 = vld [vmem:[%s4161_s3 + $0x320] sm:$0xff]   ;;  %v3217_v42 = vld [vmem:[%s4161_s3 + $0x3e8] sm:$0xff]   ;;  %v206_v44 = vrot.slane %v3982_v51, %v173_v32  ;;  %v210_v45 = vrot.slane %v3982_v51, %v177_v35 }
 0x13c   :  { %v1212_v11 = vmax.f32 %v1076_v46, 0.0  ;;  %v1214_v16 = vmax.f32 %v1117_v4, 0.0  ;;  %v3215_v43 = vld [vmem:[%s4161_s3 + $0x3a0] sm:$0xff]   ;;  %v3218_v60 = vld [vmem:[%s4161_s3 + $0x328] sm:$0xff]   ;;  %v3221_v35 = vld [vmem:[%s4161_s3 + $0x3f0] sm:$0xff]  }
 0x13d   :  { %v1243_v15 = vrot.slane %v1211_v3, 2  ;;  %v1245_v17 = vrot.slane %v1213_v10, 2  ;;  %v3219_v32 = vld [vmem:[%s4161_s3 + $0x3a8] sm:$0xff]  }
 0x13e   :  { %v1244_v18 = vrot.slane %v1212_v11, 2  ;;  %3023 = vmatpush3.bf16.msra.mxu0 %v3190_v2  ;;  %v1246_v21 = vrot.slane %v1214_v16, 2  ;;  %3045 = vmatpush3.bf16.msra.mxu1 %v3191_v7  ;;  %v3222_v2 = vld [vmem:[%s4161_s3 + $0x330] sm:$0xff]  }
 0x13f   :  { %v1275_v20 = vmax.f32 %v1211_v3, %v1243_v15  ;;  %3024 = vmatprep.subr.bf16.mxu0 %v3192_v9  ;;  %v1277_v24 = vmax.f32 %v1213_v10, %v1245_v17  ;;  %3046 = vmatprep.subr.bf16.mxu1 %v3193_v14  ;;  %v3223_v7 = vld [vmem:[%s4161_s3 + $0x3b0] sm:$0xff]   ;;  %v3224_v9 = vld [vmem:[%s4161_s3 + $0x378] sm:$0xff]  }
 0x140   :  { %v1276_v25 = vmax.f32 %v1212_v11, %v1244_v18  ;;  %v1278_v27 = vmax.f32 %v1214_v16, %v1246_v21  ;;  %v3225_v14 = vld [vmem:[%s4161_s3 + $0x3f8] sm:$0xff]  }
 0x141   :  { %v1293_v28 = vpack.c.bf16 %v1277_v24, %v1277_v24  ;;  %v1291_v12 = vpack.c.bf16 %v1275_v20, %v1275_v20 }
 0x142   :  { %v1292_v29 = vpack.c.bf16 %v1276_v25, %v1276_v25  ;;  %3025 = vmatpush3.bf16.msra.mxu0 %v3194_v19  ;;  %v1294_v31 = vpack.c.bf16 %v1278_v27, %v1278_v27  ;;  %3047 = vmatpush3.bf16.msra.mxu1 %v3195_v22  ;;  %v3226_v19 = vld [vmem:[%s4161_s3 + $0x338] sm:$0xff]  }
 0x143   :  { %3054 = vmatprep.subr.bf16.mxu0 %v3196_v23  ;;  %3076 = vmatprep.subr.bf16.mxu1 %v3197_v26  ;;  %v3227_v22 = vld [vmem:[%s4161_s3 + $0x3b8] sm:$0xff]   ;;  %s3254_s3 = smov [#allocation2]  }
 0x144   :  { %2522 = vmatprep.mubr.bf16.mxu0 %v1292_v29  ;;  %2562 = vmatprep.mubr.bf16.mxu1 %v1294_v31  ;;  %v2793_v31 = vld [vmem:[%s4162_s4] ss:$0 sm:$0xff]  ;;  %s2657_s4 = sshll.u32 %s3254_s3, 4  ;;  %s2658_s4 = int_to_ptr.vmem [resolvable:$true] %s2657_s4 }
 0x145   :  { %2523 = vmatmul.mubr.bf16.vlgmr.msra.gmra.mrb[24].mxu0 %v1291_v12  ;;  %2563 = vmatmul.mubr.bf16.vlgmr.msra.gmra.mrb[24].mxu1 %v1293_v28  ;;  %s3229_s17 = scalar_lea.vmem %s2658_s4, 32  ;;  %p3234_p1 = scmp.lt.s32.totalorder %s2658_s4, %s2658_s4 }
 0x146   :  { %3055 = vmatpush3.bf16.msra.mxu0 %v3198_v30  ;;  %3077 = vmatpush3.bf16.msra.mxu1 %v3199_v33  ;;  %p3230_p0 = scmp.ne.s32.totalorder %s2658_s4, %s3229_s17  ;;  %p3235_p2 = scmp.lt.s32.totalorder %s3229_s17, %s3229_s17 }
 0x147   :  { %3056 = vmatprep.subr.bf16.mxu0 %v3200_v36  ;;  %3078 = vmatprep.subr.bf16.mxu1 %v3201_v8 }
 0x148   :  { %p3236_p3 = por %p3235_p2, %p3234_p1 }
 0x14a   :  { %3057 = vmatpush3.bf16.msra.mxu0 %v3202_v38  ;;  %3079 = vmatpush3.bf16.msra.mxu1 %v3203_v39  ;;  %p3237_p4 = pnand %p3236_p3, %p3230_p0 }
 0x14b   :  { %3058 = vmatprep.subr.bf16.mxu0 %v3204_v40  ;;  %3080 = vmatprep.subr.bf16.mxu1 %v3205_v47 }
 0x14e   :  { %3059 = vmatpush3.bf16.msra.mxu0 %v3206_v48  ;;  %3081 = vmatpush3.bf16.msra.mxu1 %v3207_v49 }
 0x14f   :  { %3060 = vmatprep.subr.bf16.mxu0 %v3208_v50  ;;  %3082 = vmatprep.subr.bf16.mxu1 %v3209_v52 }
 0x152   :  { %3061 = vmatpush3.bf16.msra.mxu0 %v3210_v53  ;;  %3083 = vmatpush3.bf16.msra.mxu1 %v3211_v54 }
 0x153   :  { %3062 = vmatprep.subr.bf16.mxu0 %v3212_v55  ;;  %3084 = vmatprep.subr.bf16.mxu1 %v3213_v56 }
 0x156   :  { %3063 = vmatpush3.bf16.msra.mxu0 %v3214_v57  ;;  %3085 = vmatpush3.bf16.msra.mxu1 %v3215_v43 }
 0x157   :  { %3064 = vmatprep.subr.bf16.mxu0 %v3216_v58  ;;  %3086 = vmatprep.subr.bf16.mxu1 %v3217_v42 }
 0x158   :  { %v1155_v62 = vpop.f32.mrb[12].mxu0  ;;  %v1196_v46 = vpop.f32.mrb[12].mxu1 }
 0x159   :  { %v1156_v63 = vadd.f32 %v1155_v62, %v206_v44  ;;  %v1157_v41 = vpop.f32.mrb[13].mxu0  ;;  %v1197_v0 = vadd.f32 %v1196_v46, %v214_v59  ;;  %v1198_v51 = vpop.f32.mrb[13].mxu1 }
 0x15a   :  { %v1158_v37 = vadd.f32 %v1157_v41, %v210_v45  ;;  %v1159_v1 = vpop.f32.mrb[14].mxu0  ;;  %3065 = vmatpush3.bf16.msra.mxu0 %v3218_v60  ;;  %v1199_v4 = vadd.f32 %v1198_v51, %v218_v61  ;;  %v1200_v5 = vpop.f32.mrb[14].mxu1  ;;  %3087 = vmatpush3.bf16.msra.mxu1 %v3219_v32 }
 0x15b   :  { %v1215_v3 = vmax.f32 %v1156_v63, 0.0  ;;  %v1160_v6 = vpop.f32.mrb[15].mxu0  ;;  %3066 = vmatprep.subr.bf16.mxu0 %v3220_v34  ;;  %v1217_v10 = vmax.f32 %v1197_v0, 0.0  ;;  %v1201_v13 = vpop.f32.mrb[15].mxu1  ;;  %3088 = vmatprep.subr.bf16.mxu1 %v3221_v35 }
 0x15c   :  { %v1216_v11 = vmax.f32 %v1158_v37, 0.0  ;;  %v1218_v16 = vmax.f32 %v1199_v4, 0.0 }
 0x15d   :  { %v1247_v15 = vrot.slane %v1215_v3, 2  ;;  %v1249_v17 = vrot.slane %v1217_v10, 2 }
 0x15e   :  { %v1248_v18 = vrot.slane %v1216_v11, 2  ;;  %3067 = vmatpush3.bf16.msra.mxu0 %v3222_v2  ;;  %v1250_v21 = vrot.slane %v1218_v16, 2  ;;  %3089 = vmatpush3.bf16.msra.mxu1 %v3223_v7 }
 0x15f   :  { %v1279_v20 = vmax.f32 %v1215_v3, %v1247_v15  ;;  %3068 = vmatprep.subr.bf16.mxu0 %v3224_v9  ;;  %v1281_v23 = vmax.f32 %v1217_v10, %v1249_v17  ;;  %3090 = vmatprep.subr.bf16.mxu1 %v3225_v14 }
 0x160   :  { %v1280_v24 = vmax.f32 %v1216_v11, %v1248_v18  ;;  %v1282_v25 = vmax.f32 %v1218_v16, %v1250_v21 }
 0x161   :  { %v1295_v27 = vpack.c.bf16 %v1279_v20, %v1279_v20  ;;  %v1297_v29 = vpack.c.bf16 %v1281_v23, %v1281_v23 }
 0x162   :  { %v1296_v26 = vpack.c.bf16 %v1280_v24, %v1280_v24  ;;  %3069 = vmatpush3.bf16.msra.mxu0 %v3226_v19  ;;  %v1298_v28 = vpack.c.bf16 %v1282_v25, %v1282_v25  ;;  %3091 = vmatpush3.bf16.msra.mxu1 %v3227_v22 }
 0x164   :  { %2602 = vmatprep.mubr.bf16.mxu0 %v1296_v26  ;;  %2642 = vmatprep.mubr.bf16.mxu1 %v1298_v28 }
 0x165   :  { %2603 = vmatmul.mubr.bf16.vlgmr.msra.gmra.mrb[28].mxu0 %v1295_v27  ;;  %2643 = vmatmul.mubr.bf16.vlgmr.msra.gmra.mrb[28].mxu1 %v1297_v29 }
 0x1d8   :  { %v2938_v30 = vpop.f32.mrb[16].mxu0  ;;  %v2960_v12 = vpop.f32.mrb[16].mxu1 }
 0x1d9   :  { %v2939_v33 = vpop.f32.mrb[17].mxu0  ;;  %v2961_v8 = vpop.f32.mrb[17].mxu1 }
 0x1da   :  { %v2940_v36 = vadd.f32 %v2939_v33, %v2938_v30  ;;  %v2941_v38 = vpop.f32.mrb[18].mxu0  ;;  %v2962_v39 = vadd.f32 %v2961_v8, %v2960_v12  ;;  %v2963_v40 = vpop.f32.mrb[18].mxu1 }
 0x1db   :  { %v2942_v47 = vpop.f32.mrb[19].mxu0  ;;  %v2964_v49 = vpop.f32.mrb[19].mxu1 }
 0x1dc   :  { %v2365_v48 = vadd.f32 %v2940_v36, %v2793_v31 }
 0x1de   :  { %v2405_v50 = vadd.f32 %v2962_v39, %v2365_v48 }
 0x1f8   :  { %v2982_v52 = vpop.f32.mrb[20].mxu0  ;;  %v3004_v53 = vpop.f32.mrb[20].mxu1 }
 0x1f9   :  { %v2983_v54 = vpop.f32.mrb[21].mxu0  ;;  %v3005_v56 = vpop.f32.mrb[21].mxu1 }
 0x1fa   :  { %v2984_v55 = vadd.f32 %v2983_v54, %v2982_v52  ;;  %v2985_v57 = vpop.f32.mrb[22].mxu0  ;;  %v3006_v43 = vadd.f32 %v3005_v56, %v3004_v53  ;;  %v3007_v58 = vpop.f32.mrb[22].mxu1 }
 0x1fb   :  { %v2986_v42 = vpop.f32.mrb[23].mxu0  ;;  %v3008_v59 = vpop.f32.mrb[23].mxu1 }
 0x1fc   :  { %v2445_v44 = vadd.f32 %v2984_v55, %v2405_v50 }
 0x1fe   :  { %v2485_v45 = vadd.f32 %v3006_v43, %v2445_v44 }
 0x218   :  { %v3026_v60 = vpop.f32.mrb[24].mxu0  ;;  %v3048_v61 = vpop.f32.mrb[24].mxu1 }
 0x219   :  { %v3027_v32 = vpop.f32.mrb[25].mxu0  ;;  %v3049_v62 = vpop.f32.mrb[25].mxu1 }
 0x21a   :  { %v3028_v34 = vadd.f32 %v3027_v32, %v3026_v60  ;;  %v3029_v35 = vpop.f32.mrb[26].mxu0  ;;  %v3050_v63 = vadd.f32 %v3049_v62, %v3048_v61  ;;  %v3051_v46 = vpop.f32.mrb[26].mxu1 }
 0x21b   :  { %v3030_v41 = vpop.f32.mrb[27].mxu0  ;;  %v3052_v37 = vpop.f32.mrb[27].mxu1 }
 0x21c   :  { %v2525_v0 = vadd.f32 %v3028_v34, %v2485_v45 }
 0x21e   :  { %v2565_v51 = vadd.f32 %v3050_v63, %v2525_v0 }
 0x238   :  { %v3070_v1 = vpop.f32.mrb[28].mxu0  ;;  %v3092_v2 = vpop.f32.mrb[28].mxu1 }
 0x239   :  { %v3071_v3 = vpop.f32.mrb[29].mxu0  ;;  %v3093_v5 = vpop.f32.mrb[29].mxu1 }
 0x23a   :  { %v3072_v4 = vadd.f32 %v3071_v3, %v3070_v1  ;;  %v3073_v6 = vpop.f32.mrb[30].mxu0  ;;  %v3094_v7 = vadd.f32 %v3093_v5, %v3092_v2  ;;  %v3095_v9 = vpop.f32.mrb[30].mxu1 }
 0x23b   :  { %v3074_v10 = vpop.f32.mrb[31].mxu0  ;;  %v3096_v13 = vpop.f32.mrb[31].mxu1 }
 0x23c   :  { %v2605_v11 = vadd.f32 %v3072_v4, %v2565_v51 }
 0x23e   :  { %v2645_v14 = vadd.f32 %v3094_v7, %v2605_v11 }
 0x240   :  { %2650 = vst [vmem:[#allocation2] sm:$0x3] %v2645_v14 }
 0x241   :  { %3240 = shalt.err (!%p3237_p4)
}
 0x242   :  { %s3241_s20 = scalar_lea.hbm %s4163_s5, 32 }
 0x243   :  { %p3242_p5 = scmp.ne.s32.totalorder %s4163_s5, %s3241_s20  ;;  %p3245_p6 = scmp.lt.u32.totalorder %s3241_s20, %s4163_s5 }
 0x245   :  { %p3247_p7 = pnand %p3245_p6, %p3242_p5 }
 0x247   :  { %3250 = shalt.err (!%p3247_p7)
}
 0x248   :  { %2660 = dma.vmem_to_hbm [thread:$0]  %s2658_s4, 32, %s4163_s5, [#allocation3]  }
 0x249   :  { %3251 = dma.done.wait [#allocation3], 32  }
 0x24a   :  { %3252 = vsyncadd [#allocation3], 4294967264 }
 0x24b   :  { %2664 = vsyncpa [#allocation3], 1 }

// kernel: vacnn_forward.4
= control target key start
LH: loop header
LB: loop body
LE: loop exit
PB: predicated region body
PF: predicated region fallthrough
CT: control target
= control target key end

     0   :  { %v19809_v0 = vmov 0.0   ;;  %vm19810_vm0 = vmmov 0   ;;  %vm248_vm1 = vcmask 1045504   ;;  %vm2114_vm2 = vcmask 1046528   ;;  %s24671_s1 = inlined_call_operand.vmem [shape: bf16[25,128,128], index: 1, kind: input, shape index: {}]   ;;  %s24672_s0 = inlined_call_operand.vmem [shape: bf16[1344,128], index: 0, kind: input, shape index: {}]   ;;  %s24673_s4 = inlined_call_operand.vmem [shape: f32[328,1], index: 4, kind: input, shape index: {}]   ;;  %s24674_s5 = inlined_call_operand.vmem [shape: f32[128,128], index: 5, kind: input, shape index: {}]   ;;  %s24675_s2 = inlined_call_operand.vmem [shape: f32[1,128], index: 2, kind: input, shape index: {}]   ;;  %s24676_s3 = inlined_call_operand.vmem [shape: f32[1,128], index: 3, kind: input, shape index: {}]   ;;  %s24677_s6 = inlined_call_operand.vmem [shape: f32[1,128], index: 6, kind: input, shape index: {}]   ;;  %s24678_s7 = inlined_call_operand.vmem [shape: f32[4,128], index: 7, kind: output, shape index: {}]  }
   0x1   :  { %14566 = vmatprep.subr.bf16.mxu1 %v19809_v0  ;;  %15766 = vmatprep.subr.bf16.mxu0 %v19809_v0  ;;  %v19120_v1 = vld [vmem:[%s24671_s1 + $0x40] sm:$0xff]   ;;  %v19122_v3 = vld [vmem:[%s24671_s1 + $0x48] sm:$0xff]   ;;  %v19124_v5 = vld [vmem:[%s24671_s1 + $0x50] sm:$0xff]   ;;  %vm6680_vm3 = vcmask 1044480   ;;  %vm7053_vm4 = vsmask.f32 6400 }
   0x2   :  { %v19121_v2 = vld [vmem:[%s24671_s1 + $0x300] sm:$0xff]   ;;  %14582 = vmatprep.mubr.msk.bf16.mxu1 %vm19810_vm0, %v19809_v0  ;;  %15782 = vmatprep.mubr.msk.bf16.mxu0 %vm19810_vm0, %v19809_v0  ;;  %v19123_v4 = vld [vmem:[%s24671_s1 + $0x308] sm:$0xff]   ;;  %v19125_v6 = vld [vmem:[%s24671_s1 + $0x310] sm:$0xff]   ;;  %vm1095_vm5 = vsmask.f32 7424  ;;  %vm12799_vm8 = vcmask 1040384  }
   0x3   :  { %14567 = vmatpush3.bf16.msra.mxu1 %v19120_v1  ;;  %15767 = vmatpush3.bf16.msra.mxu0 %v19121_v2  ;;  %v19126_v7 = vld [vmem:[%s24671_s1 + $0x58] sm:$0xff]   ;;  %v19128_v9 = vld [vmem:[%s24671_s1 + $0x60] sm:$0xff]   ;;  %v19130_v11 = vld [vmem:[%s24671_s1 + $0x68] sm:$0xff]   ;;  %vm1594_vm6 = vsmask.f32 5376  ;;  %vm12811_vm9 = vcmask 1047553  }
   0x4   :  { %14568 = vmatprep.subr.bf16.mxu1 %v19809_v0  ;;  %15768 = vmatprep.subr.bf16.mxu0 %v19809_v0  ;;  %v19127_v8 = vld [vmem:[%s24671_s1 + $0x318] sm:$0xff]   ;;  %v19129_v10 = vld [vmem:[%s24671_s1 + $0x320] sm:$0xff]   ;;  %v19131_v12 = vld [vmem:[%s24671_s1 + $0x328] sm:$0xff]   ;;  %vm11498_vm7 = vsmask.f32 4352  ;;  %vm12819_vm10 = vcmask 1041408  }
   0x5   :  { %v4985_v13 = vld [vmem:[%s24672_s0 + $0x8] sm:$0xf]  ;;  %v19132_v14 = vld [vmem:[%s24671_s1 + $0x70] sm:$0xff]   ;;  %v6287_v15 = vld [vmem:[%s24672_s0 + $0x4] sm:$0xe]  ;;  %vm12831_vm11 = vcmask 1047554  }
   0x6   :  { %v19133_v16 = vld [vmem:[%s24671_s1 + $0x330] sm:$0xff]   ;;  %v19136_v17 = vld [vmem:[%s24672_s0 + $0xa0] sm:$0xfc]   ;;  %v19137_v18 = vld [vmem:[%s24672_s0 + $0xa8] sm:$0xff]   ;;  %v19927_v20 = vcombine.low %v6287_v15, %v4985_v13  ;;  %vm12839_vm12 = vcmask 1042432   ;;  %vm12851_vm13 = vcmask 1047555  }
   0x7   :  { %14569 = vmatpush3.bf16.msra.mxu1 %v19122_v3  ;;  %15769 = vmatpush3.bf16.msra.mxu0 %v19123_v4  ;;  %v19139_v19 = vld [vmem:[%s24672_s0 + $0xc] sm:$0xff]   ;;  %v19134_v21 = vld [vmem:[%s24671_s1 + $0x78] sm:$0xff]   ;;  %v249_v23 = vrot.slane %v19136_v17, 2  ;;  %v250_v24 = vrot.slane %v19137_v18, 2  ;;  %v19141_v27 = vld [vmem:[%s24671_s1 + $0x340] sm:$0xff]   ;;  %vm12859_vm14 = vcmask 1043456  }
   0x8   :  { %14570 = vmatprep.subr.bf16.mxu1 %v19809_v0  ;;  %15770 = vmatprep.subr.bf16.mxu0 %v19809_v0  ;;  %v19135_v22 = vld [vmem:[%s24671_s1 + $0x338] sm:$0xff]   ;;  %v6308_v25 = vrot.slane %v19927_v20, 1  ;;  %v6309_v26 = vrot.slane %v19139_v19, 1  ;;  %v19142_v29 = vld [vmem:[%s24672_s0 + $0xb0] sm:$0xff]   ;;  %v19144_v32 = vld [vmem:[%s24671_s1] sm:$0xff]  }
   0x9   :  { %v251_v28 = vsel %vm248_vm1, %v249_v23, %v250_v24  ;;  %v19143_v31 = vld [vmem:[%s24672_s0 + $0x14] sm:$0xff]   ;;  %v252_v33 = vrot.slane %v19142_v29, 2  ;;  %v19145_v35 = vld [vmem:[%s24671_s1 + $0x348] sm:$0xff]   ;;  %v19147_v39 = vld [vmem:[%s24672_s0 + $0x1c] sm:$0xff]  }
   0xa   :  { %v6310_v30 = vsel %vm2114_vm2, %v6308_v25, %v6309_v26  ;;  %v6311_v34 = vrot.slane %v19143_v31, 1  ;;  %v19151_v36 = vld [vmem:[%s24671_s1 + $0x8] sm:$0xff]   ;;  %v19146_v37 = vld [vmem:[%s24672_s0 + $0xb8] sm:$0xff]   ;;  %v19148_v41 = vld [vmem:[%s24671_s1 + $0x350] sm:$0xff]   ;;  %v6313_v44 = vrot.slane %v19147_v39, 1 }
   0xb   :  { %14571 = vmatpush3.bf16.msra.mxu1 %v19124_v5  ;;  %15771 = vmatpush3.bf16.msra.mxu0 %v19125_v6  ;;  %v253_v38 = vsel %vm248_vm1, %v250_v24, %v252_v33  ;;  %v19160_v42 = vld [vmem:[%s24671_s1 + $0x10] sm:$0xff]   ;;  %v254_v43 = vrot.slane %v19146_v37, 2  ;;  %v19154_v45 = vld [vmem:[%s24671_s1 + $0x358] sm:$0xff]   ;;  %v19149_v46 = vld [vmem:[%s24672_s0 + $0xc0] sm:$0xff]  }
   0xc   :  { %14572 = vmatprep.subr.bf16.mxu1 %v19809_v0  ;;  %15772 = vmatprep.subr.bf16.mxu0 %v19809_v0  ;;  %v6312_v40 = vsel %vm2114_vm2, %v6309_v26, %v6311_v34  ;;  %v19150_v48 = vld [vmem:[%s24672_s0 + $0x24] sm:$0xff]   ;;  %v6314_v49 = vsel %vm2114_vm2, %v6311_v34, %v6313_v44  ;;  %v19168_v51 = vld [vmem:[%s24671_s1 + $0x18] sm:$0xff]   ;;  %v256_v52 = vrot.slane %v19149_v46, 2  ;;  %v19153_v58 = vld [vmem:[%s24672_s0 + $0x2c] sm:$0xff]  }
   0xd   :  { %v255_v47 = vsel %vm248_vm1, %v252_v33, %v254_v43  ;;  %v19157_v50 = vld [vmem:[%s24671_s1 + $0x360] sm:$0xff]   ;;  %v6315_v53 = vrot.slane %v19150_v48, 1  ;;  %v19163_v54 = vld [vmem:[%s24671_s1 + $0x368] sm:$0xff]   ;;  %v19166_v59 = vld [vmem:[%s24671_s1 + $0x370] sm:$0xff]   ;;  %v6317_v62 = vrot.slane %v19153_v58, 1 }
   0xe   :  { %v257_v55 = vsel %vm248_vm1, %v254_v43, %v256_v52  ;;  %v19152_v56 = vld [vmem:[%s24672_s0 + $0xc8] sm:$0xff]   ;;  %v19178_v60 = vld [vmem:[%s24671_s1 + $0x20] sm:$0xff]   ;;  %v19170_v63 = vld [vmem:[%s24671_s1 + $0x378] sm:$0xff]  }
   0xf   :  { %14573 = vmatpush3.bf16.msra.mxu1 %v19126_v7  ;;  %15773 = vmatpush3.bf16.msra.mxu0 %v19127_v8  ;;  %v6316_v57 = vsel %vm2114_vm2, %v6313_v44, %v6315_v53  ;;  %v258_v61 = vrot.slane %v19152_v56, 2  ;;  %v19155_v2 = vld [vmem:[%s24672_s0 + $0xd0] sm:$0xff]   ;;  %v6318_v3 = vsel %vm2114_vm2, %v6315_v53, %v6317_v62  ;;  %v19186_v5 = vld [vmem:[%s24671_s1 + $0x28] sm:$0xff]   ;;  %v19158_v8 = vld [vmem:[%s24672_s0 + $0xd8] sm:$0xff]  }
  0x10   :  { %14574 = vmatprep.subr.bf16.mxu1 %v19809_v0  ;;  %15774 = vmatprep.subr.bf16.mxu0 %v19809_v0  ;;  %v19156_v4 = vld [vmem:[%s24672_s0 + $0x34] sm:$0xff]   ;;  %v260_v6 = vrot.slane %v19155_v2, 2  ;;  %v262_v13 = vrot.slane %v19158_v8, 2  ;;  %v19161_v15 = vld [vmem:[%s24672_s0 + $0xe0] sm:$0xff]   ;;  %v19164_v24 = vld [vmem:[%s24672_s0 + $0xe8] sm:$0xff]  }
  0x11   :  { %v259_v1 = vsel %vm248_vm1, %v256_v52, %v258_v61  ;;  %v6319_v7 = vrot.slane %v19156_v4, 1  ;;  %v19162_v17 = vld [vmem:[%s24672_s0 + $0x44] sm:$0xff]   ;;  %v19201_v19 = vld [vmem:[%s24671_s1 + $0x38] sm:$0xff]   ;;  %v19165_v26 = vld [vmem:[%s24672_s0 + $0x4c] sm:$0xff]  }
  0x12   :  { %v19167_v29 = vld [vmem:[%s24672_s0 + $0xf0] sm:$0xff]   ;;  %v19171_v34 = vld [vmem:[%s24672_s0 + $0xf8] sm:$0xff]   ;;  %v6659_v43 = vld [vmem:[%s24672_s0 + $0xa4] sm:$0x8] }
  0x13   :  { %14575 = vmatpush3.bf16.msra.mxu1 %v19128_v9  ;;  %15775 = vmatpush3.bf16.msra.mxu0 %v19129_v10  ;;  %v261_v9 = vsel %vm248_vm1, %v258_v61, %v260_v6  ;;  %v19159_v10 = vld [vmem:[%s24672_s0 + $0x3c] sm:$0xff]   ;;  %v268_v33 = vrot.slane %v19167_v29, 2  ;;  %v270_v39 = vrot.slane %v19171_v34, 2  ;;  %v19179_v52 = vld [vmem:[%s24672_s0 + $0x108] sm:$0xff]  }
  0x14   :  { %14576 = vmatprep.subr.bf16.mxu1 %v19809_v0  ;;  %15776 = vmatprep.subr.bf16.mxu0 %v19809_v0  ;;  %v274_v56 = vrot.slane %v19179_v52, 2  ;;  %v19184_v4 = vld [vmem:[%s24672_s0 + $0x118] sm:$0xff]   ;;  %v19205_v8 = vld [vmem:[%s24671_s1 + $0x3a0] sm:$0xff]  }
  0x15   :  { %v271_v44 = vsel %vm248_vm1, %v268_v33, %v270_v39 }
  0x17   :  { %14577 = vmatpush3.bf16.msra.mxu1 %v19130_v11  ;;  %15777 = vmatpush3.bf16.msra.mxu0 %v19131_v12  ;;  %v6320_v11 = vsel %vm2114_vm2, %v6317_v62, %v6319_v7  ;;  %v19192_v12 = vld [vmem:[%s24671_s1 + $0x30] sm:$0xff]  }
  0x18   :  { %14578 = vmatprep.subr.bf16.mxu1 %v19809_v0  ;;  %15778 = vmatprep.subr.bf16.mxu0 %v19809_v0 }
  0x1b   :  { %14579 = vmatpush3.bf16.msra.mxu1 %v19132_v14  ;;  %15779 = vmatpush3.bf16.msra.mxu0 %v19133_v16  ;;  %v6321_v14 = vrot.slane %v19159_v10, 1  ;;  %v263_v16 = vsel %vm248_vm1, %v260_v6, %v262_v13 }
  0x1c   :  { %14580 = vmatprep.subr.bf16.mxu1 %v19809_v0  ;;  %15780 = vmatprep.subr.bf16.mxu0 %v19809_v0 }
  0x1d   :  { %v6322_v18 = vsel %vm2114_vm2, %v6319_v7, %v6321_v14 }
  0x1f   :  { %14581 = vmatpush3.bf16.msra.mxu1 %v19134_v21  ;;  %15781 = vmatpush3.bf16.msra.mxu0 %v19135_v22  ;;  %v264_v21 = vrot.slane %v19161_v15, 2  ;;  %v6323_v22 = vrot.slane %v19162_v17, 1  ;;  %v19219_v17 = vld [vmem:[%s24671_s1 + $0x3b0] sm:$0xff]  }
  0x20   :  { %14666 = vmatprep.subr.bf16.mxu1 %v19809_v0  ;;  %15866 = vmatprep.subr.bf16.mxu0 %v19809_v0 }
  0x21   :  { %v265_v23 = vsel %vm248_vm1, %v262_v13, %v264_v21  ;;  %v6324_v25 = vsel %vm2114_vm2, %v6321_v14, %v6323_v22  ;;  %v19213_v13 = vld [vmem:[%s24671_s1 + $0x3a8] sm:$0xff]  }
  0x22   :  { %14583 = vmatmul.mubr.bf16.vlgmr.msra.gmra.mrb[0].mxu1 %v251_v28  ;;  %15783 = vmatmul.mubr.bf16.vlgmr.msra.gmra.mrb[0].mxu0 %v6310_v30  ;;  %v6325_v28 = vrot.slane %v19165_v26, 1  ;;  %v19189_v14 = vld [vmem:[%s24672_s0 + $0x128] sm:$0xff]  }
  0x23   :  { %14586 = vmatprep.mubr.msk.bf16.mxu1 %vm19810_vm0, %v19809_v0  ;;  %15867 = vmatpush3.bf16.msra.mxu0 %v19141_v27  ;;  %v266_v27 = vrot.slane %v19164_v24, 2 }
  0x24   :  { %15786 = vmatprep.mubr.msk.bf16.mxu0 %vm19810_vm0, %v19809_v0  ;;  %14667 = vmatpush3.bf16.msra.mxu1 %v19144_v32  ;;  %v6326_v31 = vsel %vm2114_vm2, %v6323_v22, %v6325_v28  ;;  %v19169_v32 = vld [vmem:[%s24672_s0 + $0x54] sm:$0xff]  }
  0x25   :  { %15868 = vmatprep.subr.bf16.mxu0 %v19809_v0  ;;  %14668 = vmatprep.subr.bf16.mxu1 %v19809_v0  ;;  %v267_v30 = vsel %vm248_vm1, %v264_v21, %v266_v27  ;;  %v269_v37 = vsel %vm248_vm1, %v266_v27, %v268_v33  ;;  %v282_v21 = vrot.slane %v19189_v14, 2  ;;  %v19227_v22 = vld [vmem:[%s24671_s1 + $0x3b8] sm:$0xff]   ;;  %v19193_v27 = vld [vmem:[%s24672_s0 + $0x130] sm:$0xff]  }
  0x27   :  { %15869 = vmatpush3.bf16.msra.mxu0 %v19145_v35  ;;  %v6327_v35 = vrot.slane %v19169_v32, 1  ;;  %v284_v32 = vrot.slane %v19193_v27, 2 }
  0x28   :  { %15870 = vmatprep.subr.bf16.mxu0 %v19809_v0  ;;  %14669 = vmatpush3.bf16.msra.mxu1 %v19151_v36  ;;  %v20119_v36 = vld [vmem:[%s24672_s0 + $0x5c] sm:$0xff]  }
  0x29   :  { %14670 = vmatprep.subr.bf16.mxu1 %v19809_v0  ;;  %24761 = vst [vmem:[#allocation2_spill] sm:$0xff] %v20119_v36 }
  0x2a   :  { %14587 = vmatmul.mubr.bf16.gmra.mrb[4].mxu1 %v253_v38  ;;  %15787 = vmatmul.mubr.bf16.gmra.mrb[4].mxu0 %v6312_v40  ;;  %v6328_v38 = vsel %vm2114_vm2, %v6325_v28, %v6327_v35  ;;  %v24679_v40 = vrot.slane %v20119_v36, 1  ;;  %v19194_v28 = vld [vmem:[%s24672_s0 + $0xdc] sm:$0xff]  }
  0x2b   :  { %14590 = vmatprep.mubr.msk.bf16.mxu1 %vm19810_vm0, %v19809_v0  ;;  %15790 = vmatprep.mubr.msk.bf16.mxu0 %vm19810_vm0, %v19809_v0  ;;  %v6694_v33 = vrot.slane %v19194_v28, 3  ;;  %v19224_v28 = vld [vmem:[%s24672_s0 + $0x134] sm:$0xff]  }
  0x2c   :  { %15871 = vmatpush3.bf16.msra.mxu0 %v19148_v41  ;;  %14671 = vmatpush3.bf16.msra.mxu1 %v19160_v42  ;;  %v19173_v41 = vld [vmem:[%s24672_s0 + $0x100] sm:$0xff]   ;;  %v5626_v42 = vld [vmem:[%s24672_s0 + $0xa8] sm:$0xf]  ;;  %v21692_v36 = vld [vmem:[%s24672_s0 + $0x278] sm:$0xff]  }
  0x2d   :  { %15872 = vmatprep.subr.bf16.mxu0 %v19809_v0  ;;  %14672 = vmatprep.subr.bf16.mxu1 %v19809_v0  ;;  %v272_v46 = vrot.slane %v19173_v41, 2  ;;  %v13457_v48 = vcombine.low %v6659_v43, %v5626_v42  ;;  %v125_v42 = vld [vmem:[%s24672_s0 + $0x144] sm:$0x3]  ;;  %v19199_v43 = vld [vmem:[%s24672_s0 + $0xec] sm:$0xff]  }
  0x2f   :  { %v273_v53 = vsel %vm248_vm1, %v270_v39, %v272_v46  ;;  %v275_v61 = vsel %vm248_vm1, %v272_v46, %v274_v56  ;;  %v124_v39 = vld [vmem:[%s24672_s0 + $0x140] sm:$0xf] }
  0x30   :  { %15873 = vmatpush3.bf16.msra.mxu0 %v19154_v45  ;;  %14673 = vmatpush3.bf16.msra.mxu1 %v19168_v51  ;;  %v6330_v45 = vsel %vm2114_vm2, %v6327_v35, %v24679_v40  ;;  %v19177_v51 = vld [vmem:[%s24671_s1 + $0x380] sm:$0xff]  }
  0x31   :  { %15874 = vmatprep.subr.bf16.mxu0 %v19809_v0  ;;  %14674 = vmatprep.subr.bf16.mxu1 %v19809_v0  ;;  %v19196_v35 = vld [vmem:[%s24672_s0 + $0xe4] sm:$0xff]  }
  0x32   :  { %14591 = vmatmul.mubr.bf16.gmra.mrb[8].mxu1 %v255_v47  ;;  %15791 = vmatmul.mubr.bf16.gmra.mrb[8].mxu0 %v6314_v49  ;;  %v19175_v47 = vld [vmem:[%s24672_s0 + $0xac] sm:$0xff]   ;;  %v6681_v49 = vrot.slane %v13457_v48, 3  ;;  %v6696_v41 = vrot.slane %v19196_v35, 3  ;;  %v6698_v48 = vrot.slane %v19199_v43, 3  ;;  %v7058_v43 = vshll.u32 %v19927_v20, 16 }
  0x33   :  { %14594 = vmatprep.mubr.msk.bf16.mxu1 %vm19810_vm0, %v19809_v0  ;;  %15794 = vmatprep.mubr.msk.bf16.mxu0 %vm19810_vm0, %v19809_v0 }
  0x34   :  { %15875 = vmatpush3.bf16.msra.mxu0 %v19157_v50  ;;  %14675 = vmatpush3.bf16.msra.mxu1 %v19178_v60  ;;  %v6682_v50 = vrot.slane %v19175_v47, 3  ;;  %v19182_v60 = vld [vmem:[%s24672_s0 + $0xbc] sm:$0xff]   ;;  %v6697_v46 = vsel %vm6680_vm3, %v6694_v33, %v6696_v41 }
  0x35   :  { %15876 = vmatprep.subr.bf16.mxu0 %v19809_v0  ;;  %14676 = vmatprep.subr.bf16.mxu1 %v19809_v0  ;;  %v6686_v2 = vrot.slane %v19182_v60, 3  ;;  %v19206_v60 = vld [vmem:[%s24672_s0 + $0x8] sm:$0xff]  }
  0x38   :  { %15877 = vmatpush3.bf16.msra.mxu0 %v19163_v54  ;;  %14677 = vmatpush3.bf16.msra.mxu1 %v19186_v5  ;;  %v6683_v54 = vsel %vm6680_vm3, %v6681_v49, %v6682_v50  ;;  %v19185_v5 = vld [vmem:[%s24672_s0 + $0xc4] sm:$0xff]   ;;  %v19202_v49 = vld [vmem:[%s24672_s0 + $0xf4] sm:$0xff]  }
  0x39   :  { %15878 = vmatprep.subr.bf16.mxu0 %v19809_v0  ;;  %14678 = vmatprep.subr.bf16.mxu1 %v19809_v0  ;;  %v6688_v10 = vrot.slane %v19185_v5, 3  ;;  %v6700_v52 = vrot.slane %v19202_v49, 3  ;;  %v19229_v5 = vld [vmem:[%s24671_s1 + $0x98] sm:$0xff]  }
  0x3a   :  { %14595 = vmatmul.mubr.bf16.gmra.mrb[12].mxu1 %v257_v55  ;;  %15795 = vmatmul.mubr.bf16.gmra.mrb[12].mxu0 %v6316_v57  ;;  %v19180_v55 = vld [vmem:[%s24672_s0 + $0xb4] sm:$0xff]  }
  0x3b   :  { %14598 = vmatprep.mubr.msk.bf16.mxu1 %vm19810_vm0, %v19809_v0  ;;  %15798 = vmatprep.mubr.msk.bf16.mxu0 %vm19810_vm0, %v19809_v0  ;;  %v19181_v57 = vld [vmem:[%s24672_s0 + $0x110] sm:$0xff]   ;;  %v6684_v58 = vrot.slane %v19180_v55, 3  ;;  %v19203_v55 = vld [vmem:[%s24672_s0] sm:$0xff]  }
  0x3c   :  { %15879 = vmatpush3.bf16.msra.mxu0 %v19166_v59  ;;  %14679 = vmatpush3.bf16.msra.mxu1 %v19192_v12  ;;  %v19183_v59 = vld [vmem:[%s24671_s1 + $0x388] sm:$0xff]  }
  0x3d   :  { %15880 = vmatprep.subr.bf16.mxu0 %v19809_v0  ;;  %14680 = vmatprep.subr.bf16.mxu1 %v19809_v0  ;;  %v6685_v62 = vsel %vm6680_vm3, %v6682_v50, %v6684_v58  ;;  %v6687_v7 = vsel %vm6680_vm3, %v6684_v58, %v6686_v2  ;;  %v19188_v12 = vld [vmem:[%s24672_s0 + $0xcc] sm:$0xff]   ;;  %v19208_v58 = vld [vmem:[%s24671_s1 + $0x80] sm:$0xff]  }
  0x40   :  { %15881 = vmatpush3.bf16.msra.mxu0 %v19170_v63  ;;  %14681 = vmatpush3.bf16.msra.mxu1 %v19201_v19  ;;  %v276_v63 = vrot.slane %v19181_v57, 2  ;;  %v6690_v19 = vrot.slane %v19188_v12, 3  ;;  %v19207_v57 = vld [vmem:[%s24672_s0 + $0x104] sm:$0xff]   ;;  %v19216_v12 = vld [vmem:[%s24672_s0 + $0x11c] sm:$0xff]  }
  0x41   :  { %15966 = vmatprep.subr.bf16.mxu0 %v19809_v0  ;;  %14766 = vmatprep.subr.bf16.mxu1 %v19809_v0 }
  0x42   :  { %14599 = vmatmul.mubr.bf16.gmra.mrb[16].mxu1 %v259_v1  ;;  %15799 = vmatmul.mubr.bf16.gmra.mrb[16].mxu0 %v6318_v3  ;;  %v19191_v1 = vld [vmem:[%s24671_s1 + $0x390] sm:$0xff]   ;;  %v19200_v3 = vld [vmem:[%s24671_s1 + $0x398] sm:$0xff]   ;;  %v277_v6 = vsel %vm248_vm1, %v274_v56, %v276_v63 }
  0x43   :  { %14602 = vmatprep.mubr.msk.bf16.mxu1 %vm19810_vm0, %v19809_v0  ;;  %15802 = vmatprep.mubr.msk.bf16.mxu0 %vm19810_vm0, %v19809_v0 }
  0x4a   :  { %14603 = vmatmul.mubr.bf16.gmra.mrb[20].mxu1 %v261_v9  ;;  %15803 = vmatmul.mubr.bf16.gmra.mrb[20].mxu0 %v6320_v11  ;;  %v278_v9 = vrot.slane %v19184_v4, 2  ;;  %v19187_v11 = vld [vmem:[%s24672_s0 + $0x120] sm:$0xff]  }
  0x4b   :  { %14606 = vmatprep.mubr.msk.bf16.mxu1 %vm19810_vm0, %v19809_v0  ;;  %15806 = vmatprep.mubr.msk.bf16.mxu0 %vm19810_vm0, %v19809_v0 }
  0x4c   :  { %v279_v15 = vsel %vm248_vm1, %v276_v63, %v278_v9  ;;  %v19210_v63 = vld [vmem:[%s24672_s0 + $0x10c] sm:$0xff]  }
  0x4d   :  { %v6706_v4 = vrot.slane %v19210_v63, 3 }
  0x52   :  { %14607 = vmatmul.mubr.bf16.gmra.mrb[24].mxu1 %v263_v16  ;;  %15807 = vmatmul.mubr.bf16.gmra.mrb[24].mxu0 %v6322_v18  ;;  %v6689_v16 = vsel %vm6680_vm3, %v6686_v2, %v6688_v10  ;;  %v280_v18 = vrot.slane %v19187_v11, 2  ;;  %v19239_v11 = vld [vmem:[%s24671_s1 + $0xa8] sm:$0xff]  }
  0x53   :  { %14610 = vmatprep.mubr.msk.bf16.mxu1 %vm19810_vm0, %v19809_v0  ;;  %15810 = vmatprep.mubr.msk.bf16.mxu0 %vm19810_vm0, %v19809_v0 }
  0x54   :  { %v281_v24 = vsel %vm248_vm1, %v278_v9, %v280_v18  ;;  %v283_v29 = vsel %vm248_vm1, %v280_v18, %v282_v21  ;;  %v19211_v9 = vld [vmem:[%s24672_s0 + $0x18] sm:$0xff]   ;;  %v19218_v18 = vld [vmem:[%s24672_s0 + $0x124] sm:$0xff]  }
  0x5a   :  { %14611 = vmatmul.mubr.bf16.gmra.mrb[28].mxu1 %v265_v23  ;;  %15811 = vmatmul.mubr.bf16.gmra.mrb[28].mxu0 %v6324_v25  ;;  %v19190_v23 = vld [vmem:[%s24672_s0 + $0xd4] sm:$0xff]   ;;  %v6691_v25 = vsel %vm6680_vm3, %v6688_v10, %v6690_v19 }
  0x5b   :  { %14614 = vmatprep.mubr.msk.bf16.mxu1 %vm19810_vm0, %v19809_v0  ;;  %15814 = vmatprep.mubr.msk.bf16.mxu0 %vm19810_vm0, %v19809_v0  ;;  %v6692_v26 = vrot.slane %v19190_v23, 3 }
  0x62   :  { %14615 = vmatmul.mubr.bf16.gmra.mrb[32].mxu1 %v267_v30  ;;  %15815 = vmatmul.mubr.bf16.gmra.mrb[32].mxu0 %v6326_v31  ;;  %v6693_v30 = vsel %vm6680_vm3, %v6690_v19, %v6692_v26  ;;  %v19195_v31 = vld [vmem:[%s24672_s0 + $0x138] sm:$0xff]  }
  0x63   :  { %14618 = vmatprep.mubr.msk.bf16.mxu1 %vm19810_vm0, %v19809_v0  ;;  %15818 = vmatprep.mubr.msk.bf16.mxu0 %vm19810_vm0, %v19809_v0  ;;  %v286_v34 = vrot.slane %v19195_v31, 2 }
  0x6a   :  { %14619 = vmatmul.mubr.bf16.gmra.mrb[36].mxu1 %v269_v37  ;;  %15819 = vmatmul.mubr.bf16.gmra.mrb[36].mxu0 %v6328_v38  ;;  %v285_v37 = vsel %vm248_vm1, %v282_v21, %v284_v32  ;;  %v6695_v38 = vsel %vm6680_vm3, %v6692_v26, %v6694_v33  ;;  %v6712_v21 = vrot.slane %v19218_v18, 3  ;;  %v19220_v26 = vld [vmem:[%s24672_s0 + $0x30] sm:$0xff]  }
  0x6b   :  { %14622 = vmatprep.mubr.msk.bf16.mxu1 %vm19810_vm0, %v19809_v0  ;;  %15822 = vmatprep.mubr.msk.bf16.mxu0 %vm19810_vm0, %v19809_v0  ;;  %v20529_v18 = vld [vmem:[%s24672_s0 + $0x2c] sm:$0xff]  }
  0x72   :  { %14623 = vmatmul.mubr.bf16.gmra.mrb[40].mxu1 %v271_v44  ;;  %15823 = vmatmul.mubr.bf16.gmra.mrb[40].mxu0 %v6330_v45  ;;  %v287_v44 = vsel %vm248_vm1, %v284_v32, %v286_v34  ;;  %v13008_v45 = vcombine.low %v124_v39, %v125_v42  ;;  %v19226_v32 = vld [vmem:[%s24672_s0 + $0x13c] sm:$0xff]   ;;  %v19228_v39 = vld [vmem:[%s24672_s0 + $0x48] sm:$0xff]   ;;  %v7055_v42 = vshrl.u32 %v19927_v20, 16  ;;  %v19231_v20 = vld [vmem:[%s24672_s0 + $0x50] sm:$0xff]  }
  0x73   :  { %14626 = vmatprep.mubr.msk.bf16.mxu1 %vm19810_vm0, %v19809_v0  ;;  %15882 = vmatprep.mubr.msk.bf16.mxu0 %vm19810_vm0, %v19809_v0  ;;  %v6718_v33 = vrot.slane %v19226_v32, 3 }
  0x74   :  { %v288_v47 = vrot.slane %v13008_v45, 2 }
  0x76   :  { %v289_v50 = vsel %vm248_vm1, %v286_v34, %v288_v47  ;;  %v19225_v34 = vld [vmem:[%s24672_s0 + $0x40] sm:$0xff]  }
  0x7a   :  { %14627 = vmatmul.mubr.bf16.gmra.mrb[44].mxu1 %v273_v53  ;;  %15883 = vmatmul.mubr.bf16.vlgmr.msra.gmra.mrb[0].mxu0 %v6683_v54  ;;  %v19204_v53 = vld [vmem:[%s24672_s0 + $0xfc] sm:$0xff]   ;;  %v6701_v54 = vsel %vm6680_vm3, %v6698_v48, %v6700_v52 }
  0x7b   :  { %14630 = vmatprep.mubr.msk.bf16.mxu1 %vm19810_vm0, %v19809_v0  ;;  %15967 = vmatpush3.bf16.msra.mxu0 %v19177_v51  ;;  %v6699_v51 = vsel %vm6680_vm3, %v6696_v41, %v6698_v48  ;;  %v6702_v56 = vrot.slane %v19204_v53, 3  ;;  %v7060_v48 = vrot.slane %v7058_v43, 2  ;;  %v20458_v53 = vld [vmem:[%s24672_s0 + $0x14] sm:$0xff]  }
  0x7c   :  { %15886 = vmatprep.mubr.msk.bf16.mxu0 %vm19810_vm0, %v19809_v0  ;;  %15968 = vmatprep.subr.bf16.mxu0 %v19809_v0 }
  0x7f   :  { %15969 = vmatpush3.bf16.msra.mxu0 %v19183_v59  ;;  %v6703_v59 = vsel %vm6680_vm3, %v6700_v52, %v6702_v56 }
  0x80   :  { %15970 = vmatprep.subr.bf16.mxu0 %v19809_v0 }
  0x82   :  { %14631 = vmatmul.mubr.bf16.gmra.mrb[48].mxu1 %v275_v61  ;;  %15887 = vmatmul.mubr.bf16.gmra.mrb[4].mxu0 %v6685_v62  ;;  %v6704_v61 = vrot.slane %v19207_v57, 3  ;;  %v19214_v62 = vld [vmem:[%s24671_s1 + $0x88] sm:$0xff]   ;;  %v19233_v57 = vld [vmem:[%s24671_s1 + $0x3c0] sm:$0xff]  }
  0x83   :  { %14634 = vmatprep.mubr.msk.bf16.mxu1 %vm19810_vm0, %v19809_v0  ;;  %15890 = vmatprep.mubr.msk.bf16.mxu0 %vm19810_vm0, %v19809_v0 }
  0x84   :  { %15971 = vmatpush3.bf16.msra.mxu0 %v19191_v1  ;;  %v19222_v1 = vld [vmem:[%s24671_s1 + $0x90] sm:$0xff]   ;;  %v6705_v2 = vsel %vm6680_vm3, %v6702_v56, %v6704_v61  ;;  %v19232_v56 = vld [vmem:[%s24672_s0 + $0x58] sm:$0xff]  }
  0x85   :  { %15972 = vmatprep.subr.bf16.mxu0 %v19809_v0 }
  0x88   :  { %15973 = vmatpush3.bf16.msra.mxu0 %v19200_v3  ;;  %v19209_v3 = vld [vmem:[%s24672_s0 + $0x10] sm:$0xff]  }
  0x89   :  { %15974 = vmatprep.subr.bf16.mxu0 %v19809_v0 }
  0x8a   :  { %14635 = vmatmul.mubr.bf16.gmra.mrb[52].mxu1 %v277_v6  ;;  %15891 = vmatmul.mubr.bf16.gmra.mrb[8].mxu0 %v6687_v7  ;;  %v19212_v6 = vld [vmem:[%s24672_s0 + $0x114] sm:$0xff]   ;;  %v19234_v7 = vld [vmem:[%s24671_s1 + $0xa0] sm:$0xff]  }
  0x8b   :  { %14638 = vmatprep.mubr.msk.bf16.mxu1 %vm19810_vm0, %v19809_v0  ;;  %15894 = vmatprep.mubr.msk.bf16.mxu0 %vm19810_vm0, %v19809_v0  ;;  %v6708_v10 = vrot.slane %v19212_v6, 3 }
  0x8c   :  { %15975 = vmatpush3.bf16.msra.mxu0 %v19205_v8  ;;  %v6707_v8 = vsel %vm6680_vm3, %v6704_v61, %v6706_v4  ;;  %v20476_v61 = vld [vmem:[%s24672_s0 + $0x1c] sm:$0xff]  }
  0x8d   :  { %15976 = vmatprep.subr.bf16.mxu0 %v19809_v0  ;;  %v6709_v14 = vsel %vm6680_vm3, %v6706_v4, %v6708_v10 }
  0x90   :  { %15977 = vmatpush3.bf16.msra.mxu0 %v19213_v13  ;;  %v19243_v13 = vld [vmem:[%s24671_s1 + $0xb0] sm:$0xff]  }
  0x91   :  { %15978 = vmatprep.subr.bf16.mxu0 %v19809_v0 }
  0x92   :  { %14639 = vmatmul.mubr.bf16.gmra.mrb[56].mxu1 %v279_v15  ;;  %15895 = vmatmul.mubr.bf16.gmra.mrb[12].mxu0 %v6689_v16  ;;  %v19215_v15 = vld [vmem:[%s24672_s0 + $0x20] sm:$0xff]   ;;  %v6710_v16 = vrot.slane %v19216_v12, 3  ;;  %v19247_v12 = vld [vmem:[%s24671_s1 + $0x3d8] sm:$0xff]  }
  0x93   :  { %14642 = vmatprep.mubr.msk.bf16.mxu1 %vm19810_vm0, %v19809_v0  ;;  %15898 = vmatprep.mubr.msk.bf16.mxu0 %vm19810_vm0, %v19809_v0 }
  0x94   :  { %15979 = vmatpush3.bf16.msra.mxu0 %v19219_v17  ;;  %v19248_v17 = vld [vmem:[%s24671_s1 + $0xb8] sm:$0xff]   ;;  %v6711_v19 = vsel %vm6680_vm3, %v6708_v10, %v6710_v16  ;;  %v6713_v23 = vsel %vm6680_vm3, %v6710_v16, %v6712_v21 }
  0x95   :  { %15980 = vmatprep.subr.bf16.mxu0 %v19809_v0 }
  0x98   :  { %15981 = vmatpush3.bf16.msra.mxu0 %v19227_v22  ;;  %v19217_v22 = vld [vmem:[%s24672_s0 + $0x28] sm:$0xff]  }
  0x99   :  { %16066 = vmatprep.subr.bf16.mxu0 %v19809_v0 }
  0x9a   :  { %14643 = vmatmul.mubr.bf16.gmra.mrb[60].mxu1 %v281_v24  ;;  %15899 = vmatmul.mubr.bf16.gmra.mrb[16].mxu0 %v6691_v25  ;;  %v19221_v24 = vld [vmem:[%s24672_s0 + $0x12c] sm:$0xff]  }
  0x9b   :  { %14646 = vmatprep.mubr.msk.bf16.mxu1 %vm19810_vm0, %v19809_v0  ;;  %15902 = vmatprep.mubr.msk.bf16.mxu0 %vm19810_vm0, %v19809_v0  ;;  %v6714_v25 = vrot.slane %v19221_v24, 3  ;;  %v19238_v24 = vld [vmem:[%s24672_s0 + $0x70] sm:$0xff]  }
  0x9d   :  { %v6715_v27 = vsel %vm6680_vm3, %v6712_v21, %v6714_v25 }
  0xa2   :  { %14647 = vmatmul.mubr.bf16.gmra.mrb[64].mxu1 %v283_v29  ;;  %15903 = vmatmul.mubr.bf16.gmra.mrb[20].mxu0 %v6693_v30  ;;  %v6716_v29 = vrot.slane %v19224_v28, 3  ;;  %v19223_v30 = vld [vmem:[%s24672_s0 + $0x38] sm:$0xff]   ;;  %v19266_v28 = vld [vmem:[%s24671_s1 + $0x3f0] sm:$0xff]  }
  0xa3   :  { %14650 = vmatprep.mubr.msk.bf16.mxu1 %vm19810_vm0, %v19809_v0  ;;  %15906 = vmatprep.mubr.msk.bf16.mxu0 %vm19810_vm0, %v19809_v0 }
  0xa4   :  { %v6717_v31 = vsel %vm6680_vm3, %v6714_v25, %v6716_v29  ;;  %v6719_v35 = vsel %vm6680_vm3, %v6716_v29, %v6718_v33  ;;  %v20557_v29 = vld [vmem:[%s24672_s0 + $0x34] sm:$0xff]  }
  0xa5   :  { %v24706_v32 = vshrl.u32 %v20557_v29, 16 }
  0xaa   :  { %14651 = vmatmul.mubr.bf16.gmra.mrb[68].mxu1 %v285_v37  ;;  %15907 = vmatmul.mubr.bf16.gmra.mrb[24].mxu0 %v6695_v38  ;;  %v19230_v37 = vld [vmem:[%s24672_s0 + $0x144] sm:$0x7f]  }
  0xab   :  { %14654 = vmatprep.mubr.msk.bf16.mxu1 %vm19810_vm0, %v19809_v0  ;;  %15910 = vmatprep.mubr.msk.bf16.mxu0 %vm19810_vm0, %v19809_v0  ;;  %v6720_v38 = vrot.slane %v19230_v37, 3  ;;  %v7082_v37 = vrot.slane %v24706_v32, 1 }
  0xad   :  { %v6721_v41 = vsel %vm6680_vm3, %v6718_v33, %v6720_v38  ;;  %v19274_v33 = vld [vmem:[%s24671_s1 + $0x3f8] sm:$0xff]  }
  0xb2   :  { %14655 = vmatmul.mubr.bf16.gmra.mrb[72].mxu1 %v287_v44  ;;  %15911 = vmatmul.mubr.bf16.gmra.mrb[28].mxu0 %v6697_v46  ;;  %v20440_v44 = vld [vmem:[%s24672_s0 + $0xc] sm:$0xff]  }
  0xb3   :  { %14658 = vmatprep.mubr.msk.bf16.mxu1 %vm19810_vm0, %v19809_v0  ;;  %15914 = vmatprep.mubr.msk.bf16.mxu0 %vm19810_vm0, %v19809_v0  ;;  %v24717_v45 = vshll.u32 %v20440_v44, 16  ;;  %v24716_v46 = vshrl.u32 %v20440_v44, 16 }
  0xb5   :  { %v7062_v49 = vrot.slane %v24716_v46, 1 }
  0xba   :  { %14659 = vmatmul.mubr.bf16.gmra.mrb[76].mxu1 %v289_v50  ;;  %15915 = vmatmul.mubr.bf16.gmra.mrb[32].mxu0 %v6699_v51  ;;  %v7063_v50 = vrot.slane %v24717_v45, 2 }
  0xbb   :  { %14662 = vmatprep.mubr.msk.bf16.mxu1 %vm19810_vm0, %v19809_v0  ;;  %15918 = vmatprep.mubr.msk.bf16.mxu0 %vm19810_vm0, %v19809_v0 }
  0xbc   :  { %v7064_v52 = vor.u32 %v7063_v50, %v7062_v49  ;;  %v20600_v50 = vld [vmem:[%s24672_s0 + $0x44] sm:$0xff]  }
  0xc2   :  { %14663 = vmatmul.mubr.bf16.gmra.mrb[80].mxu1 %v288_v47  ;;  %15919 = vmatmul.mubr.bf16.gmra.mrb[36].mxu0 %v6701_v54  ;;  %v7057_v47 = vrot.slane %v7055_v42, 1  ;;  %v24715_v54 = vshll.u32 %v20458_v53, 16 }
  0xc3   :  { %14682 = vmatprep.mubr.msk.bf16.mxu1 %vm19810_vm0, %v19809_v0  ;;  %15922 = vmatprep.mubr.msk.bf16.mxu0 %vm19810_vm0, %v19809_v0 }
  0xc4   :  { %v7061_v51 = vor.u32 %v7060_v48, %v7057_v47 }
  0xca   :  { %14683 = vmatmul.mubr.bf16.vlgmr.msra.gmra.mrb[0].mxu1 %v19203_v55  ;;  %15923 = vmatmul.mubr.bf16.gmra.mrb[40].mxu0 %v6703_v59  ;;  %v24714_v55 = vshrl.u32 %v20458_v53, 16 }
  0xcb   :  { %14686 = vmatprep.mubr.msk.bf16.mxu1 %vm19810_vm0, %v19809_v0  ;;  %15926 = vmatprep.mubr.msk.bf16.mxu0 %vm19810_vm0, %v19809_v0 }
  0xcc   :  { %14767 = vmatpush3.bf16.msra.mxu1 %v19208_v58  ;;  %v7065_v58 = vsel %vm7053_vm4, %v7061_v51, %v7064_v52  ;;  %v7066_v59 = vrot.slane %v24714_v55, 1  ;;  %v24703_v51 = vshll.u32 %v20600_v50, 16 }
  0xcd   :  { %14768 = vmatprep.subr.bf16.mxu1 %v19809_v0 }
  0xd0   :  { %14769 = vmatpush3.bf16.msra.mxu1 %v19214_v62  ;;  %v24712_v62 = vshrl.u32 %v20476_v61, 16 }
  0xd1   :  { %14770 = vmatprep.subr.bf16.mxu1 %v19809_v0 }
  0xd2   :  { %14687 = vmatmul.mubr.bf16.gmra.mrb[4].mxu1 %v19206_v60  ;;  %15927 = vmatmul.mubr.bf16.gmra.mrb[44].mxu0 %v6705_v2  ;;  %v7067_v60 = vrot.slane %v24715_v54, 2  ;;  %v19237_v2 = vld [vmem:[%s24671_s1 + $0x3c8] sm:$0xff]   ;;  %v7070_v4 = vrot.slane %v24712_v62, 1 }
  0xd3   :  { %14690 = vmatprep.mubr.msk.bf16.mxu1 %vm19810_vm0, %v19809_v0  ;;  %15930 = vmatprep.mubr.msk.bf16.mxu0 %vm19810_vm0, %v19809_v0 }
  0xd4   :  { %14771 = vmatpush3.bf16.msra.mxu1 %v19222_v1  ;;  %v7068_v63 = vor.u32 %v7067_v60, %v7066_v59  ;;  %v24713_v1 = vshll.u32 %v20476_v61, 16  ;;  %v7091_v59 = vrot.slane %v24703_v51, 2 }
  0xd5   :  { %14772 = vmatprep.subr.bf16.mxu1 %v19809_v0 }
  0xd6   :  { %v7071_v6 = vrot.slane %v24713_v1, 2 }
  0xd8   :  { %14773 = vmatpush3.bf16.msra.mxu1 %v19229_v5  ;;  %v7069_v5 = vsel %vm7053_vm4, %v7064_v52, %v7068_v63  ;;  %v7072_v10 = vor.u32 %v7071_v6, %v7070_v4  ;;  %v24702_v52 = vshrl.u32 %v20600_v50, 16  ;;  %v19245_v4 = vld [vmem:[%s24672_s0 + $0x90] sm:$0xff]  }
  0xd9   :  { %14774 = vmatprep.subr.bf16.mxu1 %v19809_v0 }
  0xda   :  { %14691 = vmatmul.mubr.bf16.gmra.mrb[8].mxu1 %v19209_v3  ;;  %15931 = vmatmul.mubr.bf16.gmra.mrb[48].mxu0 %v6707_v8  ;;  %v19235_v3 = vld [vmem:[%s24672_s0 + $0x60] sm:$0xff]  }
  0xdb   :  { %14694 = vmatprep.mubr.msk.bf16.mxu1 %vm19810_vm0, %v19809_v0  ;;  %15934 = vmatprep.mubr.msk.bf16.mxu0 %vm19810_vm0, %v19809_v0  ;;  %v20503_v8 = vld [vmem:[%s24672_s0 + $0x24] sm:$0xff]  }
  0xdc   :  { %14775 = vmatpush3.bf16.msra.mxu1 %v19234_v7  ;;  %v19242_v7 = vld [vmem:[%s24671_s1 + $0x3d0] sm:$0xff]  }
  0xdd   :  { %14776 = vmatprep.subr.bf16.mxu1 %v19809_v0 }
  0xe0   :  { %14777 = vmatpush3.bf16.msra.mxu1 %v19239_v11  ;;  %v24711_v11 = vshll.u32 %v20503_v8, 16 }
  0xe1   :  { %14778 = vmatprep.subr.bf16.mxu1 %v19809_v0 }
  0xe2   :  { %14695 = vmatmul.mubr.bf16.gmra.mrb[12].mxu1 %v19211_v9  ;;  %15935 = vmatmul.mubr.bf16.gmra.mrb[52].mxu0 %v6709_v14  ;;  %v24710_v9 = vshrl.u32 %v20503_v8, 16  ;;  %v7075_v16 = vrot.slane %v24711_v11, 2 }
  0xe3   :  { %14698 = vmatprep.mubr.msk.bf16.mxu1 %vm19810_vm0, %v19809_v0  ;;  %15938 = vmatprep.mubr.msk.bf16.mxu0 %vm19810_vm0, %v19809_v0 }
  0xe4   :  { %14779 = vmatpush3.bf16.msra.mxu1 %v19243_v13  ;;  %v19236_v13 = vld [vmem:[%s24672_s0 + $0x68] sm:$0xff]   ;;  %v7074_v14 = vrot.slane %v24710_v9, 1  ;;  %v19302_v9 = vld [vmem:[%s24672_s0 + $0xa0] sm:$0x1f]  }
  0xe5   :  { %14780 = vmatprep.subr.bf16.mxu1 %v19809_v0 }
  0xe6   :  { %v7076_v21 = vor.u32 %v7075_v16, %v7074_v14  ;;  %v20644_v14 = vld [vmem:[%s24672_s0 + $0x54] sm:$0xff]  }
  0xe7   :  { %v24698_v16 = vshrl.u32 %v20644_v14, 16 }
  0xe8   :  { %14781 = vmatpush3.bf16.msra.mxu1 %v19248_v17  ;;  %v19252_v17 = vld [vmem:[%s24671_s1 + $0x3e0] sm:$0xff]  }
  0xe9   :  { %14866 = vmatprep.subr.bf16.mxu1 %v19809_v0 }
  0xea   :  { %14699 = vmatmul.mubr.bf16.gmra.mrb[16].mxu1 %v19215_v15  ;;  %15939 = vmatmul.mubr.bf16.gmra.mrb[56].mxu0 %v6711_v19  ;;  %v7073_v15 = vsel %vm7053_vm4, %v7068_v63, %v7072_v10  ;;  %v24708_v19 = vshrl.u32 %v20529_v18, 16  ;;  %v20619_v63 = vld [vmem:[%s24672_s0 + $0x4c] sm:$0xff]  }
  0xeb   :  { %14702 = vmatprep.mubr.msk.bf16.mxu1 %vm19810_vm0, %v19809_v0  ;;  %15942 = vmatprep.mubr.msk.bf16.mxu0 %vm19810_vm0, %v19809_v0 }
  0xec   :  { %v7078_v25 = vrot.slane %v24708_v19, 1 }
  0xf2   :  { %14703 = vmatmul.mubr.bf16.gmra.mrb[20].mxu1 %v19217_v22  ;;  %15943 = vmatmul.mubr.bf16.gmra.mrb[60].mxu0 %v6713_v23  ;;  %v24709_v22 = vshll.u32 %v20529_v18, 16  ;;  %v19260_v23 = vld [vmem:[%s24671_s1 + $0x3e8] sm:$0xff]  }
  0xf3   :  { %14706 = vmatprep.mubr.msk.bf16.mxu1 %vm19810_vm0, %v19809_v0  ;;  %15946 = vmatprep.mubr.msk.bf16.mxu0 %vm19810_vm0, %v19809_v0 }
  0xfa   :  { %14707 = vmatmul.mubr.bf16.gmra.mrb[24].mxu1 %v19220_v26  ;;  %15947 = vmatmul.mubr.bf16.gmra.mrb[64].mxu0 %v6715_v27  ;;  %v7077_v26 = vsel %vm7053_vm4, %v7072_v10, %v7076_v21  ;;  %v7079_v27 = vrot.slane %v24709_v22, 2  ;;  %v931_v10 = vld [vmem:[%s24672_s0] sm:$0xf] }
  0xfb   :  { %14710 = vmatprep.mubr.msk.bf16.mxu1 %vm19810_vm0, %v19809_v0  ;;  %15950 = vmatprep.mubr.msk.bf16.mxu0 %vm19810_vm0, %v19809_v0 }
 0x102   :  { %14711 = vmatmul.mubr.bf16.gmra.mrb[28].mxu1 %v19223_v30  ;;  %15951 = vmatmul.mubr.bf16.gmra.mrb[68].mxu0 %v6717_v31  ;;  %v24707_v30 = vshll.u32 %v20557_v29, 16  ;;  %v7080_v31 = vor.u32 %v7079_v27, %v7078_v25  ;;  %v19251_v25 = vld [vmem:[%s24672_s0 + $0x8] sm:$0xff]  }
 0x103   :  { %14714 = vmatprep.mubr.msk.bf16.mxu1 %vm19810_vm0, %v19809_v0  ;;  %15954 = vmatprep.mubr.msk.bf16.mxu0 %vm19810_vm0, %v19809_v0 }
 0x10a   :  { %14715 = vmatmul.mubr.bf16.gmra.mrb[32].mxu1 %v19225_v34  ;;  %15955 = vmatmul.mubr.bf16.gmra.mrb[72].mxu0 %v6719_v35  ;;  %v19240_v34 = vld [vmem:[%s24672_s0 + $0x78] sm:$0xff]   ;;  %v7081_v35 = vsel %vm7053_vm4, %v7076_v21, %v7080_v31 }
 0x10b   :  { %14718 = vmatprep.mubr.msk.bf16.mxu1 %vm19810_vm0, %v19809_v0  ;;  %15958 = vmatprep.mubr.msk.bf16.mxu0 %vm19810_vm0, %v19809_v0  ;;  %v19246_v21 = vld [vmem:[%s24672_s0 + $0x98] sm:$0xff]  }
 0x112   :  { %14719 = vmatmul.mubr.bf16.gmra.mrb[36].mxu1 %v19228_v39  ;;  %15959 = vmatmul.mubr.bf16.gmra.mrb[76].mxu0 %v6721_v41  ;;  %v20585_v41 = vld [vmem:[%s24672_s0 + $0x3c] sm:$0xff]  }
 0x113   :  { %14722 = vmatprep.mubr.msk.bf16.mxu1 %vm19810_vm0, %v19809_v0  ;;  %15962 = vmatprep.mubr.msk.bf16.mxu0 %vm19810_vm0, %v19809_v0  ;;  %v24705_v42 = vshll.u32 %v20585_v41, 16  ;;  %v24704_v43 = vshrl.u32 %v20585_v41, 16 }
 0x115   :  { %v7086_v48 = vrot.slane %v24704_v43, 1  ;;  %v7087_v49 = vrot.slane %v24705_v42, 2 }
 0x11a   :  { %14723 = vmatmul.mubr.bf16.gmra.mrb[40].mxu1 %v19231_v20  ;;  %15963 = vmatmul.mubr.bf16.gmra.mrb[80].mxu0 %v6720_v38  ;;  %v7083_v38 = vrot.slane %v24707_v30, 2  ;;  %v19241_v20 = vld [vmem:[%s24672_s0 + $0x80] sm:$0xff]   ;;  %v19300_v30 = vld [vmem:[%s24672_s0 + $0x98] sm:$0xff]  }
 0x11b   :  { %14726 = vmatprep.mubr.msk.bf16.mxu1 %vm19810_vm0, %v19809_v0  ;;  %15982 = vmatprep.mubr.msk.bf16.mxu0 %vm19810_vm0, %v19809_v0 }
 0x11c   :  { %v7084_v39 = vor.u32 %v7083_v38, %v7082_v37  ;;  %v20673_v37 = vld [vmem:[%s24672_s0 + $0x64] sm:$0xff]   ;;  %v19249_v38 = vld [vmem:[%s24672_s0 + $0xa0] ss:$0 sps:$4 sm:$0xff]  }
 0x11e   :  { %v7085_v47 = vsel %vm7053_vm4, %v7080_v31, %v7084_v39 }
 0x122   :  { %14727 = vmatmul.mubr.bf16.gmra.mrb[44].mxu1 %v19232_v56  ;;  %15983 = vmatmul.mubr.bf16.vlgmr.msra.gmra.mrb[0].mxu0 %v7065_v58  ;;  %v7088_v56 = vor.u32 %v7087_v49, %v7086_v48  ;;  %v7090_v58 = vrot.slane %v24702_v52, 1 }
 0x123   :  { %14730 = vmatprep.mubr.msk.bf16.mxu1 %vm19810_vm0, %v19809_v0  ;;  %16067 = vmatpush3.bf16.msra.mxu0 %v19233_v57  ;;  %v19244_v57 = vld [vmem:[%s24672_s0 + $0x88] sm:$0xff]  }
 0x124   :  { %15986 = vmatprep.mubr.msk.bf16.mxu0 %vm19810_vm0, %v19809_v0  ;;  %16068 = vmatprep.subr.bf16.mxu0 %v19809_v0  ;;  %v7089_v60 = vsel %vm7053_vm4, %v7084_v39, %v7088_v56 }
 0x127   :  { %16069 = vmatpush3.bf16.msra.mxu0 %v19237_v2  ;;  %v24701_v2 = vshll.u32 %v20619_v63, 16 }
 0x128   :  { %16070 = vmatprep.subr.bf16.mxu0 %v19809_v0 }
 0x12a   :  { %14731 = vmatmul.mubr.bf16.gmra.mrb[48].mxu1 %v19235_v3  ;;  %15987 = vmatmul.mubr.bf16.gmra.mrb[4].mxu0 %v7069_v5  ;;  %v24700_v3 = vshrl.u32 %v20619_v63, 16  ;;  %v7092_v5 = vor.u32 %v7091_v59, %v7090_v58  ;;  %v24695_v58 = vshll.u32 %v20673_v37, 16 }
 0x12b   :  { %14734 = vmatprep.mubr.msk.bf16.mxu1 %vm19810_vm0, %v19809_v0  ;;  %15990 = vmatprep.mubr.msk.bf16.mxu0 %vm19810_vm0, %v19809_v0 }
 0x12c   :  { %16071 = vmatpush3.bf16.msra.mxu0 %v19242_v7  ;;  %v7094_v6 = vrot.slane %v24700_v3, 1  ;;  %v7095_v7 = vrot.slane %v24701_v2, 2 }
 0x12d   :  { %16072 = vmatprep.subr.bf16.mxu0 %v19809_v0 }
 0x130   :  { %16073 = vmatpush3.bf16.msra.mxu0 %v19247_v12  ;;  %v932_v12 = vld [vmem:[%s24672_s0 + $0x4] sm:$0xf] }
 0x131   :  { %16074 = vmatprep.subr.bf16.mxu0 %v19809_v0 }
 0x132   :  { %14735 = vmatmul.mubr.bf16.gmra.mrb[52].mxu1 %v19236_v13  ;;  %15991 = vmatmul.mubr.bf16.gmra.mrb[8].mxu0 %v7073_v15  ;;  %v7093_v13 = vsel %vm7053_vm4, %v7088_v56, %v7092_v5  ;;  %v24699_v15 = vshll.u32 %v20644_v14, 16 }
 0x133   :  { %14738 = vmatprep.mubr.msk.bf16.mxu1 %vm19810_vm0, %v19809_v0  ;;  %15994 = vmatprep.mubr.msk.bf16.mxu0 %vm19810_vm0, %v19809_v0 }
 0x134   :  { %16075 = vmatpush3.bf16.msra.mxu0 %v19252_v17  ;;  %v13062_v17 = vcombine.low %v931_v10, %v932_v12 }
 0x135   :  { %16076 = vmatprep.subr.bf16.mxu0 %v19809_v0 }
 0x136   :  { %v1099_v27 = vshll.u32 %v13062_v17, 16 }
 0x138   :  { %16077 = vmatpush3.bf16.msra.mxu0 %v19260_v23  ;;  %v7096_v23 = vor.u32 %v7095_v7, %v7094_v6  ;;  %v1108_v7 = vshrl.u32 %v19251_v25, 16 }
 0x139   :  { %16078 = vmatprep.subr.bf16.mxu0 %v19809_v0 }
 0x13a   :  { %14739 = vmatmul.mubr.bf16.gmra.mrb[56].mxu1 %v19238_v24  ;;  %15995 = vmatmul.mubr.bf16.gmra.mrb[12].mxu0 %v7077_v26  ;;  %v7098_v24 = vrot.slane %v24698_v16, 1  ;;  %v7099_v26 = vrot.slane %v24699_v15, 2 }
 0x13b   :  { %14742 = vmatprep.mubr.msk.bf16.mxu1 %vm19810_vm0, %v19809_v0  ;;  %15998 = vmatprep.mubr.msk.bf16.mxu0 %vm19810_vm0, %v19809_v0 }
 0x13c   :  { %16079 = vmatpush3.bf16.msra.mxu0 %v19266_v28  ;;  %v20665_v28 = vld [vmem:[%s24672_s0 + $0x5c] sm:$0xff]   ;;  %v7100_v39 = vor.u32 %v7099_v26, %v7098_v24 }
 0x13d   :  { %16080 = vmatprep.subr.bf16.mxu0 %v19809_v0  ;;  %v24697_v31 = vshll.u32 %v20665_v28, 16 }
 0x13e   :  { %v7101_v59 = vsel %vm7053_vm4, %v7096_v23, %v7100_v39 }
 0x13f   :  { %v7103_v48 = vrot.slane %v24697_v31, 2 }
 0x140   :  { %16081 = vmatpush3.bf16.msra.mxu0 %v19274_v33  ;;  %v24696_v33 = vshrl.u32 %v20665_v28, 16 }
 0x141   :  { %16166 = vmatprep.subr.bf16.mxu0 %v19809_v0 }
 0x142   :  { %14743 = vmatmul.mubr.bf16.gmra.mrb[60].mxu1 %v19240_v34  ;;  %15999 = vmatmul.mubr.bf16.gmra.mrb[16].mxu0 %v7081_v35  ;;  %v7097_v34 = vsel %vm7053_vm4, %v7092_v5, %v7096_v23  ;;  %v1104_v35 = vshll.u32 %v19251_v25, 16  ;;  %v7102_v56 = vrot.slane %v24696_v33, 1 }
 0x143   :  { %14746 = vmatprep.mubr.msk.bf16.mxu1 %vm19810_vm0, %v19809_v0  ;;  %16002 = vmatprep.mubr.msk.bf16.mxu0 %vm19810_vm0, %v19809_v0 }
 0x144   :  { %v1106_v49 = vrot.slane %v1104_v35, 1  ;;  %v7104_v6 = vor.u32 %v7103_v48, %v7102_v56  ;;  %v19261_v48 = vld [vmem:[%s24671_s1 + $0xc8] sm:$0xff]  }
 0x146   :  { %v7105_v26 = vsel %vm7053_vm4, %v7100_v39, %v7104_v6  ;;  %v1110_v35 = vor.u32 %v1108_v7, %v1106_v49 }
 0x14a   :  { %14747 = vmatmul.mubr.bf16.gmra.mrb[64].mxu1 %v19241_v20  ;;  %16003 = vmatmul.mubr.bf16.gmra.mrb[20].mxu0 %v7085_v47  ;;  %v1097_v20 = vshrl.u32 %v13062_v17, 16  ;;  %v1101_v47 = vrot.slane %v1099_v27, 1  ;;  %v7107_v17 = vrot.slane %v24695_v58, 2 }
 0x14b   :  { %14750 = vmatprep.mubr.msk.bf16.mxu1 %vm19810_vm0, %v19809_v0  ;;  %16006 = vmatprep.mubr.msk.bf16.mxu0 %vm19810_vm0, %v19809_v0 }
 0x14c   :  { %v1102_v5 = vor.u32 %v1101_v47, %v1097_v20 }
 0x14e   :  { %v1107_v25 = vsel %vm1095_vm5, %v1102_v5, %v1106_v49 }
 0x152   :  { %14751 = vmatmul.mubr.bf16.gmra.mrb[68].mxu1 %v19244_v57  ;;  %16007 = vmatmul.mubr.bf16.gmra.mrb[24].mxu0 %v7089_v60  ;;  %v19253_v57 = vld [vmem:[%s24672_s0 + $0x10] sm:$0xff]   ;;  %v24694_v60 = vshrl.u32 %v20673_v37, 16 }
 0x153   :  { %14754 = vmatprep.mubr.msk.bf16.mxu1 %vm19810_vm0, %v19809_v0  ;;  %16010 = vmatprep.mubr.msk.bf16.mxu0 %vm19810_vm0, %v19809_v0  ;;  %v1112_v10 = vshll.u32 %v19253_v57, 16  ;;  %v1116_v47 = vshrl.u32 %v19253_v57, 16 }
 0x154   :  { %v7106_v12 = vrot.slane %v24694_v60, 1 }
 0x156   :  { %v7108_v20 = vor.u32 %v7107_v17, %v7106_v12  ;;  %v19269_v12 = vld [vmem:[%s24671_s1 + $0xd0] sm:$0xff]  }
 0x158   :  { %v7109_v7 = vsel %vm7053_vm4, %v7104_v6, %v7108_v20 }
 0x15a   :  { %14755 = vmatmul.mubr.bf16.gmra.mrb[72].mxu1 %v19245_v4  ;;  %16011 = vmatmul.mubr.bf16.gmra.mrb[28].mxu0 %v7093_v13  ;;  %v20695_v4 = vld [vmem:[%s24672_s0 + $0x6c] sm:$0xff]   ;;  %v19256_v13 = vld [vmem:[%s24672_s0 + $0x18] sm:$0xff]  }
 0x15b   :  { %14758 = vmatprep.mubr.msk.bf16.mxu1 %vm19810_vm0, %v19809_v0  ;;  %16014 = vmatprep.mubr.msk.bf16.mxu0 %vm19810_vm0, %v19809_v0  ;;  %v24691_v23 = vshll.u32 %v20695_v4, 16  ;;  %v24690_v24 = vshrl.u32 %v20695_v4, 16  ;;  %v1120_v27 = vshll.u32 %v19256_v13, 16 }
 0x15d   :  { %v7110_v39 = vrot.slane %v24690_v24, 1  ;;  %v1122_v56 = vrot.slane %v1120_v27, 1  ;;  %v7111_v49 = vrot.slane %v24691_v23, 2 }
 0x162   :  { %14759 = vmatmul.mubr.bf16.gmra.mrb[76].mxu1 %v19246_v21  ;;  %16015 = vmatmul.mubr.bf16.gmra.mrb[32].mxu0 %v7097_v34  ;;  %v19255_v21 = vld [vmem:[%s24671_s1 + $0xc0] sm:$0xff]   ;;  %v20718_v34 = vld [vmem:[%s24672_s0 + $0x74] sm:$0xff]  }
 0x163   :  { %14762 = vmatprep.mubr.msk.bf16.mxu1 %vm19810_vm0, %v19809_v0  ;;  %16018 = vmatprep.mubr.msk.bf16.mxu0 %vm19810_vm0, %v19809_v0  ;;  %v24689_v5 = vshll.u32 %v20718_v34, 16 }
 0x16a   :  { %14763 = vmatmul.mubr.bf16.gmra.mrb[80].mxu1 %v19249_v38  ;;  %16019 = vmatmul.mubr.bf16.gmra.mrb[36].mxu0 %v7101_v59  ;;  %v1114_v38 = vrot.slane %v1112_v10, 1  ;;  %v19258_v59 = vld [vmem:[%s24672_s0 + $0x20] sm:$0xff]   ;;  %v24686_v10 = vshrl.u32 %v20718_v34, 16 }
 0x16b   :  { %14782 = vmatprep.mubr.msk.bf16.mxu1 %vm19810_vm0, %v19809_v0  ;;  %16022 = vmatprep.mubr.msk.bf16.mxu0 %vm19810_vm0, %v19809_v0  ;;  %v1128_v6 = vshll.u32 %v19258_v59, 16 }
 0x16c   :  { %v1115_v57 = vsel %vm1095_vm5, %v1110_v35, %v1114_v38  ;;  %v1118_v17 = vor.u32 %v1116_v47, %v1114_v38  ;;  %v7114_v27 = vrot.slane %v24686_v10, 1  ;;  %v7115_v35 = vrot.slane %v24689_v5, 2  ;;  %v20758_v38 = vld [vmem:[%s24672_s0 + $0x7c] sm:$0xff]  }
 0x16e   :  { %v1123_v47 = vsel %vm1095_vm5, %v1118_v17, %v1122_v56  ;;  %v19291_v17 = vld [vmem:[%s24671_s1 + $0xe8] sm:$0xff]  }
 0x172   :  { %14783 = vmatmul.mubr.bf16.vlgmr.msra.gmra.mrb[0].mxu1 %v1107_v25  ;;  %16023 = vmatmul.mubr.bf16.gmra.mrb[40].mxu0 %v7105_v26  ;;  %v19276_v25 = vld [vmem:[%s24671_s1 + $0xd8] sm:$0xff]   ;;  %v1124_v26 = vshrl.u32 %v19256_v13, 16  ;;  %v19283_v13 = vld [vmem:[%s24671_s1 + $0xe0] sm:$0xff]  }
 0x173   :  { %14786 = vmatprep.mubr.msk.bf16.mxu1 %vm19810_vm0, %v19809_v0  ;;  %16026 = vmatprep.mubr.msk.bf16.mxu0 %vm19810_vm0, %v19809_v0 }
 0x174   :  { %14867 = vmatpush3.bf16.msra.mxu1 %v19255_v21  ;;  %v7112_v21 = vor.u32 %v7111_v49, %v7110_v39  ;;  %v19262_v49 = vld [vmem:[%s24672_s0 + $0x28] sm:$0xff]  }
 0x175   :  { %14868 = vmatprep.subr.bf16.mxu1 %v19809_v0 }
 0x176   :  { %v7113_v39 = vsel %vm7053_vm4, %v7108_v20, %v7112_v21  ;;  %v7116_v20 = vor.u32 %v7115_v35, %v7114_v27  ;;  %v20788_v35 = vld [vmem:[%s24672_s0 + $0x84] sm:$0xff]  }
 0x177   :  { %v24680_v40 = vshrl.u32 %v20788_v35, 16 }
 0x178   :  { %14869 = vmatpush3.bf16.msra.mxu1 %v19261_v48  ;;  %v1130_v48 = vrot.slane %v1128_v6, 1 }
 0x179   :  { %14870 = vmatprep.subr.bf16.mxu1 %v19809_v0 }
 0x17a   :  { %14787 = vmatmul.mubr.bf16.gmra.mrb[4].mxu1 %v1115_v57  ;;  %16027 = vmatmul.mubr.bf16.gmra.mrb[44].mxu0 %v7109_v7  ;;  %v1126_v57 = vor.u32 %v1124_v26, %v1122_v56  ;;  %v24683_v7 = vshll.u32 %v20758_v38, 16  ;;  %v7117_v56 = vsel %vm7053_vm4, %v7112_v21, %v7116_v20 }
 0x17b   :  { %14790 = vmatprep.mubr.msk.bf16.mxu1 %vm19810_vm0, %v19809_v0  ;;  %16030 = vmatprep.mubr.msk.bf16.mxu0 %vm19810_vm0, %v19809_v0 }
 0x17c   :  { %14871 = vmatpush3.bf16.msra.mxu1 %v19269_v12  ;;  %v24682_v12 = vshrl.u32 %v20758_v38, 16  ;;  %v1131_v6 = vsel %vm1095_vm5, %v1126_v57, %v1130_v48  ;;  %v7119_v27 = vrot.slane %v24683_v7, 2 }
 0x17d   :  { %14872 = vmatprep.subr.bf16.mxu1 %v19809_v0 }
 0x17e   :  { %v7118_v26 = vrot.slane %v24682_v12, 1 }
 0x180   :  { %14873 = vmatpush3.bf16.msra.mxu1 %v19276_v25  ;;  %v1132_v25 = vshrl.u32 %v19258_v59, 16  ;;  %v7120_v57 = vor.u32 %v7119_v27, %v7118_v26  ;;  %v7122_v26 = vrot.slane %v24680_v40, 1 }
 0x181   :  { %14874 = vmatprep.subr.bf16.mxu1 %v19809_v0 }
 0x182   :  { %14791 = vmatmul.mubr.bf16.gmra.mrb[8].mxu1 %v1123_v47  ;;  %16031 = vmatmul.mubr.bf16.gmra.mrb[48].mxu0 %v7113_v39  ;;  %v1136_v47 = vshll.u32 %v19262_v49, 16  ;;  %v19297_v39 = vld [vmem:[%s24671_s1 + $0xf0] sm:$0xff]   ;;  %v1134_v59 = vor.u32 %v1132_v25, %v1130_v48  ;;  %v1140_v25 = vshrl.u32 %v19262_v49, 16 }
 0x183   :  { %14794 = vmatprep.mubr.msk.bf16.mxu1 %vm19810_vm0, %v19809_v0  ;;  %16034 = vmatprep.mubr.msk.bf16.mxu0 %vm19810_vm0, %v19809_v0 }
 0x184   :  { %14875 = vmatpush3.bf16.msra.mxu1 %v19283_v13  ;;  %v1138_v21 = vrot.slane %v1136_v47, 1  ;;  %v19264_v13 = vld [vmem:[%s24672_s0 + $0x30] sm:$0xff]  }
 0x185   :  { %14876 = vmatprep.subr.bf16.mxu1 %v19809_v0  ;;  %v1144_v47 = vshll.u32 %v19264_v13, 16 }
 0x186   :  { %v1139_v48 = vsel %vm1095_vm5, %v1134_v59, %v1138_v21  ;;  %v1142_v49 = vor.u32 %v1140_v25, %v1138_v21  ;;  %v19267_v59 = vld [vmem:[%s24672_s0 + $0x38] sm:$0xff]  }
 0x187   :  { %v1152_v12 = vshll.u32 %v19267_v59, 16 }
 0x188   :  { %14877 = vmatpush3.bf16.msra.mxu1 %v19291_v17  ;;  %v24681_v17 = vshll.u32 %v20788_v35, 16 }
 0x189   :  { %14878 = vmatprep.subr.bf16.mxu1 %v19809_v0 }
 0x18a   :  { %14795 = vmatmul.mubr.bf16.gmra.mrb[12].mxu1 %v1131_v6  ;;  %16035 = vmatmul.mubr.bf16.gmra.mrb[52].mxu0 %v7117_v56  ;;  %v19305_v6 = vld [vmem:[%s24671_s1 + $0xf8] sm:$0xff]   ;;  %v7121_v56 = vsel %vm7053_vm4, %v7116_v20, %v7120_v57  ;;  %v7123_v27 = vrot.slane %v24681_v17, 2  ;;  %v1146_v20 = vrot.slane %v1144_v47, 1 }
 0x18b   :  { %14798 = vmatprep.mubr.msk.bf16.mxu1 %vm19810_vm0, %v19809_v0  ;;  %16038 = vmatprep.mubr.msk.bf16.mxu0 %vm19810_vm0, %v19809_v0  ;;  %v20837_v47 = vld [vmem:[%s24672_s0 + $0x94] sm:$0xff]  }
 0x18c   :  { %14879 = vmatpush3.bf16.msra.mxu1 %v19297_v39  ;;  %v20816_v39 = vld [vmem:[%s24672_s0 + $0x8c] sm:$0xff]   ;;  %v7124_v40 = vor.u32 %v7123_v27, %v7122_v26  ;;  %24762 = vst [vmem:[#allocation3_spill] sm:$0xff] %v20837_v47  ;;  %v1154_v26 = vrot.slane %v1152_v12, 1 }
 0x18d   :  { %14880 = vmatprep.subr.bf16.mxu1 %v19809_v0  ;;  %v24685_v17 = vshll.u32 %v20816_v39, 16 }
 0x18e   :  { %v7125_v7 = vsel %vm7053_vm4, %v7120_v57, %v7124_v40  ;;  %v19270_v57 = vld [vmem:[%s24672_s0 + $0x40] sm:$0xff]  }
 0x18f   :  { %v7127_v25 = vrot.slane %v24685_v17, 2  ;;  %v1160_v17 = vshll.u32 %v19270_v57, 16 }
 0x190   :  { %14881 = vmatpush3.bf16.msra.mxu1 %v19305_v6  ;;  %v24684_v6 = vshrl.u32 %v20816_v39, 16 }
 0x191   :  { %14966 = vmatprep.subr.bf16.mxu1 %v19809_v0 }
 0x192   :  { %14799 = vmatmul.mubr.bf16.gmra.mrb[16].mxu1 %v1139_v48  ;;  %16039 = vmatmul.mubr.bf16.gmra.mrb[56].mxu0 %v7121_v56  ;;  %v1147_v48 = vsel %vm1095_vm5, %v1142_v49, %v1146_v20  ;;  %v1148_v56 = vshrl.u32 %v19264_v13, 16  ;;  %v7126_v21 = vrot.slane %v24684_v6, 1  ;;  %v24688_v49 = vshll.u32 %v20837_v47, 16 }
 0x193   :  { %14802 = vmatprep.mubr.msk.bf16.mxu1 %vm19810_vm0, %v19809_v0  ;;  %16042 = vmatprep.mubr.msk.bf16.mxu0 %vm19810_vm0, %v19809_v0  ;;  %v24687_v6 = vshrl.u32 %v20837_v47, 16  ;;  %v21724_v47 = vld [vmem:[%s24672_s0 + $0x288] sm:$0x7f]  }
 0x194   :  { %v1150_v13 = vor.u32 %v1148_v56, %v1146_v20  ;;  %v7128_v27 = vor.u32 %v7127_v25, %v7126_v21  ;;  %v7131_v20 = vrot.slane %v24688_v49, 2  ;;  %v20857_v56 = vld [vmem:[%s24672_s0 + $0x9c] sm:$0xff]   ;;  %v1162_v21 = vrot.slane %v1160_v17, 1  ;;  %v7032_v17 = vld [vmem:[%s24672_s0 + $0xa8] sm:$0x3] }
 0x195   :  { %v7130_v12 = vrot.slane %v24687_v6, 1  ;;  %24763 = vst [vmem:[#allocation4_spill] sm:$0xff] %v20857_v56  ;;  %v24692_v6 = vshrl.u32 %v20857_v56, 16 }
 0x196   :  { %v7129_v10 = vsel %vm7053_vm4, %v7124_v40, %v7128_v27  ;;  %v19272_v40 = vld [vmem:[%s24672_s0 + $0x48] sm:$0xff]  }
 0x197   :  { %v7132_v25 = vor.u32 %v7131_v20, %v7130_v12  ;;  %v7134_v12 = vrot.slane %v24692_v6, 1 }
 0x199   :  { %v7133_v49 = vsel %vm7053_vm4, %v7128_v27, %v7132_v25 }
 0x19a   :  { %14803 = vmatmul.mubr.bf16.gmra.mrb[20].mxu1 %v1147_v48  ;;  %16043 = vmatmul.mubr.bf16.gmra.mrb[60].mxu0 %v7125_v7  ;;  %v1155_v48 = vsel %vm1095_vm5, %v1150_v13, %v1154_v26  ;;  %v1156_v7 = vshrl.u32 %v19267_v59, 16  ;;  %v24693_v13 = vshll.u32 %v20857_v56, 16  ;;  %v21708_v56 = vld [vmem:[%s24672_s0 + $0x280] sm:$0xff]  }
 0x19b   :  { %14806 = vmatprep.mubr.msk.bf16.mxu1 %vm19810_vm0, %v19809_v0  ;;  %16046 = vmatprep.mubr.msk.bf16.mxu0 %vm19810_vm0, %v19809_v0 }
 0x19c   :  { %v1158_v59 = vor.u32 %v1156_v7, %v1154_v26  ;;  %v1168_v7 = vshll.u32 %v19272_v40, 16  ;;  %v7135_v20 = vrot.slane %v24693_v13, 2 }
 0x19e   :  { %v1163_v26 = vsel %vm1095_vm5, %v1158_v59, %v1162_v21  ;;  %v1170_v23 = vrot.slane %v1168_v7, 1  ;;  %v7136_v27 = vor.u32 %v7135_v20, %v7134_v12  ;;  %v19278_v7 = vld [vmem:[%s24672_s0 + $0x58] sm:$0xff]  }
 0x1a2   :  { %14807 = vmatmul.mubr.bf16.gmra.mrb[24].mxu1 %v1155_v48  ;;  %16047 = vmatmul.mubr.bf16.gmra.mrb[64].mxu0 %v7129_v10  ;;  %v5024_v10 = vld [vmem:[%s24672_s0 + $0xa4] sm:$0xf]  ;;  %v1164_v48 = vshrl.u32 %v19270_v57, 16  ;;  %v19275_v57 = vld [vmem:[%s24672_s0 + $0x50] sm:$0xff]  }
 0x1a3   :  { %14810 = vmatprep.mubr.msk.bf16.mxu1 %vm19810_vm0, %v19809_v0  ;;  %16050 = vmatprep.mubr.msk.bf16.mxu0 %vm19810_vm0, %v19809_v0  ;;  %v13482_v5 = vcombine.low %v5024_v10, %v7032_v17  ;;  %v1172_v10 = vshrl.u32 %v19272_v40, 16  ;;  %v1176_v17 = vshll.u32 %v19275_v57, 16 }
 0x1a4   :  { %v1166_v24 = vor.u32 %v1164_v48, %v1162_v21 }
 0x1a5   :  { %v7139_v59 = vshrl.u32 %v13482_v5, 16  ;;  %v7142_v6 = vshll.u32 %v13482_v5, 16  ;;  %v1174_v21 = vor.u32 %v1172_v10, %v1170_v23  ;;  %v1178_v48 = vrot.slane %v1176_v17, 1  ;;  %v7457_v5 = vld [vmem:[%s24672_s0 + $0x148] sm:$0xf] }
 0x1a6   :  { %v1171_v13 = vsel %vm1095_vm5, %v1166_v24, %v1170_v23  ;;  %v1180_v23 = vshrl.u32 %v19275_v57, 16  ;;  %v20914_v57 = vld [vmem:[%s24672_s0 + $0x150] sm:$0xff]   ;;  %v1188_v17 = vshrl.u32 %v19278_v7, 16 }
 0x1a7   :  { %v7144_v60 = vrot.slane %v7142_v6, 2  ;;  %v7458_v6 = vld [vmem:[%s24672_s0 + $0x14c] sm:$0xf]  ;;  %v1179_v40 = vsel %vm1095_vm5, %v1174_v21, %v1178_v48 }
 0x1a8   :  { %v13507_v12 = vcombine.low %v7457_v5, %v7458_v6 }
 0x1aa   :  { %14811 = vmatmul.mubr.bf16.gmra.mrb[28].mxu1 %v1163_v26  ;;  %16051 = vmatmul.mubr.bf16.gmra.mrb[68].mxu0 %v7133_v49  ;;  %v7137_v49 = vsel %vm7053_vm4, %v7132_v25, %v7136_v27  ;;  %v7141_v26 = vrot.slane %v7139_v59, 1  ;;  %v1184_v25 = vshll.u32 %v19278_v7, 16  ;;  %v19279_v59 = vld [vmem:[%s24672_s0 + $0x60] sm:$0xff]  }
 0x1ab   :  { %14814 = vmatprep.mubr.msk.bf16.mxu1 %vm19810_vm0, %v19809_v0  ;;  %16054 = vmatprep.mubr.msk.bf16.mxu0 %vm19810_vm0, %v19809_v0 }
 0x1ac   :  { %v7145_v24 = vor.u32 %v7144_v60, %v7141_v26  ;;  %v1182_v60 = vor.u32 %v1180_v23, %v1178_v48  ;;  %v1186_v20 = vrot.slane %v1184_v25, 1  ;;  %v7622_v26 = vshrl.u32 %v13507_v12, 16 }
 0x1ad   :  { %v24754_v48 = vshll.u32 %v20914_v57, 16 }
 0x1ae   :  { %v1187_v10 = vsel %vm1095_vm5, %v1182_v60, %v1186_v20  ;;  %v1190_v5 = vor.u32 %v1188_v17, %v1186_v20  ;;  %v19282_v20 = vld [vmem:[%s24671_s1 + $0x400] sm:$0xff]  }
 0x1af   :  { %v7631_v23 = vrot.slane %v24754_v48, 1 }
 0x1b2   :  { %14815 = vmatmul.mubr.bf16.gmra.mrb[32].mxu1 %v1171_v13  ;;  %16055 = vmatmul.mubr.bf16.gmra.mrb[72].mxu0 %v7137_v49  ;;  %v7146_v13 = vsel %vm7053_vm4, %v7136_v27, %v7145_v24  ;;  %v7624_v27 = vshll.u32 %v13507_v12, 16  ;;  %v1192_v49 = vshll.u32 %v19279_v59, 16 }
 0x1b3   :  { %14818 = vmatprep.mubr.msk.bf16.mxu1 %vm19810_vm0, %v19809_v0  ;;  %16058 = vmatprep.mubr.msk.bf16.mxu0 %vm19810_vm0, %v19809_v0 }
 0x1b4   :  { %v7626_v21 = vrot.slane %v7624_v27, 1  ;;  %v1194_v6 = vrot.slane %v1192_v49, 1  ;;  %v24755_v27 = vshrl.u32 %v20914_v57, 16 }
 0x1b6   :  { %v7627_v7 = vor.u32 %v7626_v21, %v7622_v26  ;;  %v1195_v25 = vsel %vm1095_vm5, %v1190_v5, %v1194_v6  ;;  %v7635_v26 = vor.u32 %v24755_v27, %v7631_v23  ;;  %v20953_v5 = vld [vmem:[%s24672_s0 + $0x160] sm:$0xff]  }
 0x1b7   :  { %v24751_v33 = vshrl.u32 %v20953_v5, 16 }
 0x1b8   :  { %v7632_v60 = vsel %vm1095_vm5, %v7627_v7, %v7631_v23 }
 0x1ba   :  { %14819 = vmatmul.mubr.bf16.gmra.mrb[36].mxu1 %v1179_v40  ;;  %16059 = vmatmul.mubr.bf16.gmra.mrb[76].mxu0 %v7146_v13  ;;  %v19284_v40 = vld [vmem:[%s24672_s0 + $0x68] sm:$0xff]   ;;  %v1196_v13 = vshrl.u32 %v19279_v59, 16  ;;  %v19286_v59 = vld [vmem:[%s24672_s0 + $0x70] sm:$0xff]  }
 0x1bb   :  { %14822 = vmatprep.mubr.msk.bf16.mxu1 %vm19810_vm0, %v19809_v0  ;;  %16062 = vmatprep.mubr.msk.bf16.mxu0 %vm19810_vm0, %v19809_v0  ;;  %v1200_v12 = vshll.u32 %v19284_v40, 16 }
 0x1bc   :  { %v1198_v17 = vor.u32 %v1196_v13, %v1194_v6  ;;  %v19288_v6 = vld [vmem:[%s24671_s1 + $0x408] sm:$0xff]   ;;  %v1208_v13 = vshll.u32 %v19286_v59, 16 }
 0x1bd   :  { %v1202_v49 = vrot.slane %v1200_v12, 1 }
 0x1bf   :  { %v1203_v7 = vsel %vm1095_vm5, %v1198_v17, %v1202_v49  ;;  %v1210_v17 = vrot.slane %v1208_v13, 1  ;;  %v1212_v13 = vshrl.u32 %v19286_v59, 16 }
 0x1c1   :  { %v1214_v59 = vor.u32 %v1212_v13, %v1210_v17 }
 0x1c2   :  { %14823 = vmatmul.mubr.bf16.gmra.mrb[40].mxu1 %v1187_v10  ;;  %16063 = vmatmul.mubr.bf16.gmra.mrb[80].mxu0 %v7145_v24  ;;  %v20930_v24 = vld [vmem:[%s24672_s0 + $0x158] sm:$0xff]  }
 0x1c3   :  { %14826 = vmatprep.mubr.msk.bf16.mxu1 %vm19810_vm0, %v19809_v0  ;;  %16082 = vmatprep.mubr.msk.bf16.mxu0 %vm19810_vm0, %v19809_v0  ;;  %v24752_v10 = vshll.u32 %v20930_v24, 16  ;;  %v24753_v12 = vshrl.u32 %v20930_v24, 16 }
 0x1c5   :  { %v7639_v21 = vrot.slane %v24752_v10, 1 }
 0x1c7   :  { %v7640_v23 = vsel %vm1095_vm5, %v7635_v26, %v7639_v21  ;;  %v19289_v26 = vld [vmem:[%s24672_s0 + $0x78] sm:$0xff]  }
 0x1ca   :  { %14827 = vmatmul.mubr.bf16.gmra.mrb[44].mxu1 %v1195_v25  ;;  %16083 = vmatmul.mubr.bf16.vlgmr.msra.gmra.mrb[0].mxu0 %v7632_v60  ;;  %v1204_v25 = vshrl.u32 %v19284_v40, 16  ;;  %v24750_v60 = vshll.u32 %v20953_v5, 16 }
 0x1cb   :  { %14830 = vmatprep.mubr.msk.bf16.mxu1 %vm19810_vm0, %v19809_v0  ;;  %16167 = vmatpush3.bf16.msra.mxu0 %v19282_v20  ;;  %v19296_v20 = vld [vmem:[%s24671_s1 + $0x410] sm:$0xff]  }
 0x1cc   :  { %16086 = vmatprep.mubr.msk.bf16.mxu0 %vm19810_vm0, %v19809_v0  ;;  %16168 = vmatprep.subr.bf16.mxu0 %v19809_v0  ;;  %v1206_v40 = vor.u32 %v1204_v25, %v1202_v49  ;;  %v7647_v58 = vrot.slane %v24750_v60, 1  ;;  %v19304_v49 = vld [vmem:[%s24671_s1 + $0x418] sm:$0xff]  }
 0x1ce   :  { %v1211_v25 = vsel %vm1095_vm5, %v1206_v40, %v1210_v17  ;;  %v19313_v17 = vld [vmem:[%s24671_s1 + $0x428] sm:$0xff]  }
 0x1cf   :  { %16169 = vmatpush3.bf16.msra.mxu0 %v19288_v6  ;;  %v7643_v6 = vor.u32 %v24753_v12, %v7639_v21 }
 0x1d0   :  { %16170 = vmatprep.subr.bf16.mxu0 %v19809_v0 }
 0x1d1   :  { %v7648_v21 = vsel %vm1095_vm5, %v7643_v6, %v7647_v58  ;;  %v19292_v6 = vld [vmem:[%s24672_s0 + $0x80] sm:$0xff]  }
 0x1d2   :  { %14831 = vmatmul.mubr.bf16.gmra.mrb[48].mxu1 %v1203_v7  ;;  %16087 = vmatmul.mubr.bf16.gmra.mrb[4].mxu0 %v7640_v23  ;;  %v20981_v7 = vld [vmem:[%s24672_s0 + $0x168] sm:$0xff]   ;;  %v1216_v23 = vshll.u32 %v19289_v26, 16 }
 0x1d3   :  { %14834 = vmatprep.mubr.msk.bf16.mxu1 %vm19810_vm0, %v19809_v0  ;;  %16090 = vmatprep.mubr.msk.bf16.mxu0 %vm19810_vm0, %v19809_v0  ;;  %v24745_v31 = vshll.u32 %v20981_v7, 16  ;;  %v24746_v15 = vshrl.u32 %v20981_v7, 16 }
 0x1d4   :  { %16171 = vmatpush3.bf16.msra.mxu0 %v19296_v20  ;;  %v19308_v20 = vld [vmem:[%s24671_s1 + $0x420] sm:$0xff]   ;;  %v1218_v40 = vrot.slane %v1216_v23, 1  ;;  %v1220_v23 = vshrl.u32 %v19289_v26, 16 }
 0x1d5   :  { %16172 = vmatprep.subr.bf16.mxu0 %v19809_v0  ;;  %v7655_v16 = vrot.slane %v24745_v31, 1 }
 0x1d6   :  { %v1219_v13 = vsel %vm1095_vm5, %v1214_v59, %v1218_v40  ;;  %v1222_v26 = vor.u32 %v1220_v23, %v1218_v40  ;;  %v19322_v40 = vld [vmem:[%s24671_s1 + $0x438] sm:$0xff]  }
 0x1d8   :  { %16173 = vmatpush3.bf16.msra.mxu0 %v19304_v49  ;;  %v7651_v49 = vor.u32 %v24751_v33, %v7647_v58 }
 0x1d9   :  { %16174 = vmatprep.subr.bf16.mxu0 %v19809_v0 }
 0x1da   :  { %14835 = vmatmul.mubr.bf16.gmra.mrb[52].mxu1 %v1211_v25  ;;  %16091 = vmatmul.mubr.bf16.gmra.mrb[8].mxu0 %v7648_v21  ;;  %v21009_v25 = vld [vmem:[%s24672_s0 + $0x170] sm:$0xff]   ;;  %v1224_v21 = vshll.u32 %v19292_v6, 16  ;;  %v7656_v58 = vsel %vm1095_vm5, %v7651_v49, %v7655_v16  ;;  %v19294_v49 = vld [vmem:[%s24672_s0 + $0x88] sm:$0xff]  }
 0x1db   :  { %14838 = vmatprep.mubr.msk.bf16.mxu1 %vm19810_vm0, %v19809_v0  ;;  %16094 = vmatprep.mubr.msk.bf16.mxu0 %vm19810_vm0, %v19809_v0  ;;  %v24741_v3 = vshll.u32 %v21009_v25, 16  ;;  %v24744_v52 = vshrl.u32 %v21009_v25, 16 }
 0x1dc   :  { %16175 = vmatpush3.bf16.msra.mxu0 %v19308_v20  ;;  %v19317_v20 = vld [vmem:[%s24671_s1 + $0x430] sm:$0xff]   ;;  %v1226_v59 = vrot.slane %v1224_v21, 1  ;;  %v1228_v21 = vshrl.u32 %v19292_v6, 16 }
 0x1dd   :  { %16176 = vmatprep.subr.bf16.mxu0 %v19809_v0  ;;  %v7663_v2 = vrot.slane %v24741_v3, 1  ;;  %v19298_v6 = vld [vmem:[%s24672_s0 + $0x90] sm:$0xff]  }
 0x1de   :  { %v1227_v23 = vsel %vm1095_vm5, %v1222_v26, %v1226_v59 }
 0x1df   :  { %v7667_v26 = vor.u32 %v24744_v52, %v7663_v2 }
 0x1e0   :  { %16177 = vmatpush3.bf16.msra.mxu0 %v19313_v17  ;;  %v7659_v17 = vor.u32 %v24746_v15, %v7655_v16 }
 0x1e1   :  { %16178 = vmatprep.subr.bf16.mxu0 %v19809_v0 }
 0x1e2   :  { %14839 = vmatmul.mubr.bf16.gmra.mrb[56].mxu1 %v1219_v13  ;;  %16095 = vmatmul.mubr.bf16.gmra.mrb[12].mxu0 %v7656_v58  ;;  %v21037_v13 = vld [vmem:[%s24672_s0 + $0x178] sm:$0xff]   ;;  %v1232_v58 = vshll.u32 %v19294_v49, 16  ;;  %v7664_v16 = vsel %vm1095_vm5, %v7659_v17, %v7663_v2 }
 0x1e3   :  { %14842 = vmatprep.mubr.msk.bf16.mxu1 %vm19810_vm0, %v19809_v0  ;;  %16098 = vmatprep.mubr.msk.bf16.mxu0 %vm19810_vm0, %v19809_v0  ;;  %v24735_v51 = vshll.u32 %v21037_v13, 16 }
 0x1e4   :  { %16179 = vmatpush3.bf16.msra.mxu0 %v19317_v20  ;;  %v1230_v20 = vor.u32 %v1228_v21, %v1226_v59  ;;  %v1234_v43 = vrot.slane %v1232_v58, 1  ;;  %v1240_v21 = vshll.u32 %v19298_v6, 16 }
 0x1e5   :  { %16180 = vmatprep.subr.bf16.mxu0 %v19809_v0  ;;  %v7671_v17 = vrot.slane %v24735_v51, 1 }
 0x1e6   :  { %v1235_v59 = vsel %vm1095_vm5, %v1230_v20, %v1234_v43  ;;  %v1242_v32 = vrot.slane %v1240_v21, 1 }
 0x1e7   :  { %v7672_v58 = vsel %vm1095_vm5, %v7667_v26, %v7671_v17  ;;  %v21082_v26 = vld [vmem:[%s24672_s0 + $0x188] sm:$0xff]  }
 0x1e8   :  { %16181 = vmatpush3.bf16.msra.mxu0 %v19322_v40  ;;  %v21062_v40 = vld [vmem:[%s24672_s0 + $0x180] sm:$0xff]   ;;  %v24719_v19 = vshll.u32 %v21082_v26, 16 }
 0x1e9   :  { %16266 = vmatprep.subr.bf16.mxu0 %v19809_v0  ;;  %v24721_v42 = vshll.u32 %v21062_v40, 16 }
 0x1ea   :  { %14843 = vmatmul.mubr.bf16.gmra.mrb[60].mxu1 %v1227_v23  ;;  %16099 = vmatmul.mubr.bf16.gmra.mrb[16].mxu0 %v7664_v16  ;;  %v1236_v23 = vshrl.u32 %v19294_v49, 16  ;;  %v24738_v16 = vshrl.u32 %v21037_v13, 16 }
 0x1eb   :  { %14846 = vmatprep.mubr.msk.bf16.mxu1 %vm19810_vm0, %v19809_v0  ;;  %16102 = vmatprep.mubr.msk.bf16.mxu0 %vm19810_vm0, %v19809_v0  ;;  %v7679_v20 = vrot.slane %v24721_v42, 1 }
 0x1ec   :  { %v1238_v2 = vor.u32 %v1236_v23, %v1234_v43  ;;  %v7675_v49 = vor.u32 %v24738_v16, %v7671_v17  ;;  %v1248_v23 = vshll.u32 %v19300_v30, 16 }
 0x1ee   :  { %v1243_v43 = vsel %vm1095_vm5, %v1238_v2, %v1242_v32  ;;  %v7680_v21 = vsel %vm1095_vm5, %v7675_v49, %v7679_v20  ;;  %v1250_v22 = vrot.slane %v1248_v23, 1  ;;  %v7687_v2 = vrot.slane %v24719_v19, 1  ;;  %v21102_v49 = vld [vmem:[%s24672_s0 + $0x190] sm:$0xff]  }
 0x1ef   :  { %v24718_v11 = vshll.u32 %v21102_v49, 16 }
 0x1f2   :  { %14847 = vmatmul.mubr.bf16.gmra.mrb[64].mxu1 %v1235_v59  ;;  %16103 = vmatmul.mubr.bf16.gmra.mrb[20].mxu0 %v7672_v58  ;;  %v1244_v59 = vshrl.u32 %v19298_v6, 16  ;;  %v24734_v58 = vshrl.u32 %v21062_v40, 16 }
 0x1f3   :  { %14850 = vmatprep.mubr.msk.bf16.mxu1 %vm19810_vm0, %v19809_v0  ;;  %16106 = vmatprep.mubr.msk.bf16.mxu0 %vm19810_vm0, %v19809_v0 }
 0x1f4   :  { %v1246_v17 = vor.u32 %v1244_v59, %v1242_v32  ;;  %v7683_v6 = vor.u32 %v24734_v58, %v7679_v20  ;;  %v1256_v59 = vshll.u32 %v19302_v9, 16 }
 0x1f6   :  { %v1251_v32 = vsel %vm1095_vm5, %v1246_v17, %v1250_v22  ;;  %v7688_v23 = vsel %vm1095_vm5, %v7683_v6, %v7687_v2  ;;  %v1258_v62 = vrot.slane %v1256_v59, 1  ;;  %v7695_v17 = vrot.slane %v24718_v11, 1  ;;  %v21119_v6 = vld [vmem:[%s24672_s0 + $0x198] sm:$0xff]  }
 0x1f7   :  { %v1260_v59 = vshrl.u32 %v19302_v9, 16 }
 0x1fa   :  { %14851 = vmatmul.mubr.bf16.gmra.mrb[68].mxu1 %v1243_v43  ;;  %16107 = vmatmul.mubr.bf16.gmra.mrb[24].mxu0 %v7680_v21  ;;  %v1252_v43 = vshrl.u32 %v19300_v30, 16  ;;  %v24720_v21 = vshrl.u32 %v21082_v26, 16 }
 0x1fb   :  { %14854 = vmatprep.mubr.msk.bf16.mxu1 %vm19810_vm0, %v19809_v0  ;;  %16110 = vmatprep.mubr.msk.bf16.mxu0 %vm19810_vm0, %v19809_v0 }
 0x1fc   :  { %v1254_v20 = vor.u32 %v1252_v43, %v1250_v22  ;;  %v7691_v30 = vor.u32 %v24720_v21, %v7687_v2  ;;  %v24731_v22 = vshrl.u32 %v21102_v49, 16  ;;  %v24722_v43 = vshll.u32 %v21119_v6, 16  ;;  %v19596_v2 = vld [vmem:[%s24672_s0 + $0xa0] sm:$0xfc]  }
 0x1fd   :  { %v1596_v1 = vshrl.u32 %v19596_v2, 16  ;;  %v1599_v55 = vshll.u32 %v19596_v2, 16  ;;  %v1262_v2 = vor.u32 %v1260_v59, %v1258_v62  ;;  %v24728_v21 = vshrl.u32 %v21119_v6, 16 }
 0x1fe   :  { %v7699_v9 = vor.u32 %v24731_v22, %v7695_v17 }
 0x1ff   :  { %v1598_v46 = vrot.slane %v1596_v1, 2  ;;  %v1601_v45 = vrot.slane %v1599_v55, 3 }
 0x202   :  { %14855 = vmatmul.mubr.bf16.gmra.mrb[72].mxu1 %v1251_v32  ;;  %16111 = vmatmul.mubr.bf16.gmra.mrb[28].mxu0 %v7688_v23  ;;  %v1259_v32 = vsel %vm1095_vm5, %v1254_v20, %v1258_v62  ;;  %v7696_v23 = vsel %vm1095_vm5, %v7691_v30, %v7695_v17  ;;  %v19597_v20 = vld [vmem:[%s24672_s0 + $0xa8] sm:$0xff]   ;;  %v1602_v17 = vor.u32 %v1601_v45, %v1598_v46  ;;  %v19598_v62 = vld [vmem:[%s24672_s0 + $0xb0] sm:$0xff]  }
 0x203   :  { %14858 = vmatprep.mubr.msk.bf16.mxu1 %vm19810_vm0, %v19809_v0  ;;  %16114 = vmatprep.mubr.msk.bf16.mxu0 %vm19810_vm0, %v19809_v0  ;;  %v1604_v30 = vshrl.u32 %v19597_v20, 16  ;;  %v1607_v54 = vshll.u32 %v19597_v20, 16  ;;  %v1613_v55 = vshrl.u32 %v19598_v62, 16  ;;  %v1616_v1 = vshll.u32 %v19598_v62, 16  ;;  %v21161_v45 = vld [vmem:[%s24672_s0 + $0x1a8] sm:$0xff]  }
 0x205   :  { %v1606_v11 = vrot.slane %v1604_v30, 2  ;;  %v1609_v19 = vrot.slane %v1607_v54, 3 }
 0x20a   :  { %14859 = vmatmul.mubr.bf16.gmra.mrb[76].mxu1 %v1259_v32  ;;  %16115 = vmatmul.mubr.bf16.gmra.mrb[32].mxu0 %v7696_v23  ;;  %v7703_v32 = vrot.slane %v24722_v43, 1  ;;  %v21142_v23 = vld [vmem:[%s24672_s0 + $0x1a0] sm:$0xff]   ;;  %v1610_v43 = vor.u32 %v1609_v19, %v1606_v11  ;;  %v1615_v11 = vrot.slane %v1613_v55, 2  ;;  %v1618_v19 = vrot.slane %v1616_v1, 3 }
 0x20b   :  { %14862 = vmatprep.mubr.msk.bf16.mxu1 %vm19810_vm0, %v19809_v0  ;;  %16118 = vmatprep.mubr.msk.bf16.mxu0 %vm19810_vm0, %v19809_v0  ;;  %v24724_v42 = vshll.u32 %v21142_v23, 16 }
 0x20c   :  { %v7704_v20 = vsel %vm1095_vm5, %v7699_v9, %v7703_v32  ;;  %v7707_v54 = vor.u32 %v24728_v21, %v7703_v32  ;;  %v1611_v46 = vsel %vm1594_vm6, %v1602_v17, %v1610_v43  ;;  %v24725_v9 = vshrl.u32 %v21142_v23, 16  ;;  %v19310_v32 = vld [vmem:[%s24671_s1 + $0x100] sm:$0xff]   ;;  %v19599_v17 = vld [vmem:[%s24672_s0 + $0xb8] sm:$0xff]  }
 0x20d   :  { %v7711_v59 = vrot.slane %v24724_v42, 1  ;;  %v1622_v62 = vshrl.u32 %v19599_v17, 16  ;;  %v1625_v55 = vshll.u32 %v19599_v17, 16  ;;  %v19319_v42 = vld [vmem:[%s24671_s1 + $0x110] sm:$0xff]  }
 0x20f   :  { %v7712_v30 = vsel %vm1095_vm5, %v7707_v54, %v7711_v59  ;;  %v7715_v1 = vor.u32 %v24725_v9, %v7711_v59  ;;  %v1627_v17 = vrot.slane %v1625_v55, 3 }
 0x212   :  { %14863 = vmatmul.mubr.bf16.gmra.mrb[80].mxu1 %v1262_v2  ;;  %16119 = vmatmul.mubr.bf16.gmra.mrb[36].mxu0 %v7704_v20  ;;  %v24723_v2 = vshll.u32 %v21161_v45, 16  ;;  %v1619_v20 = vor.u32 %v1618_v19, %v1615_v11  ;;  %v19314_v11 = vld [vmem:[%s24671_s1 + $0x108] sm:$0xff]  }
 0x213   :  { %14882 = vmatprep.mubr.msk.bf16.mxu1 %vm19810_vm0, %v19809_v0  ;;  %16122 = vmatprep.mubr.msk.bf16.mxu0 %vm19810_vm0, %v19809_v0 }
 0x214   :  { %v7719_v54 = vrot.slane %v24723_v2, 1  ;;  %v1620_v19 = vsel %vm1594_vm6, %v1610_v43, %v1619_v20  ;;  %v24727_v2 = vshrl.u32 %v21161_v45, 16 }
 0x216   :  { %v7720_v59 = vsel %vm1095_vm5, %v7715_v1, %v7719_v54 }
 0x21a   :  { %14883 = vmatmul.mubr.bf16.vlgmr.msra.gmra.mrb[0].mxu1 %v1611_v46  ;;  %16123 = vmatmul.mubr.bf16.gmra.mrb[40].mxu0 %v7712_v30  ;;  %v21184_v46 = vld [vmem:[%s24672_s0 + $0x1b0] sm:$0xff]   ;;  %v1624_v30 = vrot.slane %v1622_v62, 2  ;;  %v19600_v62 = vld [vmem:[%s24672_s0 + $0xc0] sm:$0xff]  }
 0x21b   :  { %14886 = vmatprep.mubr.msk.bf16.mxu1 %vm19810_vm0, %v19809_v0  ;;  %16126 = vmatprep.mubr.msk.bf16.mxu0 %vm19810_vm0, %v19809_v0  ;;  %v1631_v55 = vshrl.u32 %v19600_v62, 16  ;;  %v1634_v1 = vshll.u32 %v19600_v62, 16 }
 0x21c   :  { %14967 = vmatpush3.bf16.msra.mxu1 %v19310_v32  ;;  %v24726_v32 = vshll.u32 %v21184_v46, 16  ;;  %v1628_v43 = vor.u32 %v1627_v17, %v1624_v30  ;;  %v19323_v30 = vld [vmem:[%s24671_s1 + $0x118] sm:$0xff]  }
 0x21d   :  { %14968 = vmatprep.subr.bf16.mxu1 %v19809_v0  ;;  %v1633_v62 = vrot.slane %v1631_v55, 2  ;;  %v1636_v9 = vrot.slane %v1634_v1, 3  ;;  %v19601_v55 = vld [vmem:[%s24672_s0 + $0xc8] sm:$0xff]  }
 0x21e   :  { %v1629_v17 = vsel %vm1594_vm6, %v1619_v20, %v1628_v43  ;;  %v1640_v1 = vshrl.u32 %v19601_v55, 16 }
 0x21f   :  { %v1637_v20 = vor.u32 %v1636_v9, %v1633_v62  ;;  %v19333_v9 = vld [vmem:[%s24671_s1 + $0x128] sm:$0xff]  }
 0x220   :  { %14969 = vmatpush3.bf16.msra.mxu1 %v19314_v11  ;;  %v7723_v11 = vor.u32 %v24727_v2, %v7719_v54 }
 0x221   :  { %14970 = vmatprep.subr.bf16.mxu1 %v19809_v0  ;;  %v1638_v62 = vsel %vm1594_vm6, %v1628_v43, %v1637_v20 }
 0x222   :  { %14887 = vmatmul.mubr.bf16.gmra.mrb[4].mxu1 %v1620_v19  ;;  %16127 = vmatmul.mubr.bf16.gmra.mrb[44].mxu0 %v7720_v59  ;;  %v7727_v19 = vrot.slane %v24726_v32, 1  ;;  %v21212_v59 = vld [vmem:[%s24672_s0 + $0x1b8] sm:$0xff]   ;;  %v24730_v32 = vshrl.u32 %v21184_v46, 16 }
 0x223   :  { %14890 = vmatprep.mubr.msk.bf16.mxu1 %vm19810_vm0, %v19809_v0  ;;  %16130 = vmatprep.mubr.msk.bf16.mxu0 %vm19810_vm0, %v19809_v0  ;;  %v24729_v2 = vshll.u32 %v21212_v59, 16 }
 0x224   :  { %14971 = vmatpush3.bf16.msra.mxu1 %v19319_v42  ;;  %v7728_v54 = vsel %vm1095_vm5, %v7723_v11, %v7727_v19  ;;  %v19328_v42 = vld [vmem:[%s24671_s1 + $0x120] sm:$0xff]   ;;  %v1643_v11 = vshll.u32 %v19601_v55, 16  ;;  %v1642_v55 = vrot.slane %v1640_v1, 2  ;;  %v19602_v1 = vld [vmem:[%s24672_s0 + $0xd0] sm:$0xff]  }
 0x225   :  { %14972 = vmatprep.subr.bf16.mxu1 %v19809_v0 }
 0x226   :  { %v1645_v21 = vrot.slane %v1643_v11, 3  ;;  %v1649_v11 = vshrl.u32 %v19602_v1, 16 }
 0x228   :  { %14973 = vmatpush3.bf16.msra.mxu1 %v19323_v30  ;;  %v7731_v30 = vor.u32 %v24730_v32, %v7727_v19  ;;  %v1646_v43 = vor.u32 %v1645_v21, %v1642_v55  ;;  %v19342_v21 = vld [vmem:[%s24671_s1 + $0x138] sm:$0xff]  }
 0x229   :  { %14974 = vmatprep.subr.bf16.mxu1 %v19809_v0 }
 0x22a   :  { %14891 = vmatmul.mubr.bf16.gmra.mrb[8].mxu1 %v1629_v17  ;;  %16131 = vmatmul.mubr.bf16.gmra.mrb[48].mxu0 %v7728_v54  ;;  %v7735_v17 = vrot.slane %v24729_v2, 1  ;;  %v21240_v54 = vld [vmem:[%s24672_s0 + $0x1c0] sm:$0xff]   ;;  %v24733_v2 = vshrl.u32 %v21212_v59, 16  ;;  %v1647_v55 = vsel %vm1594_vm6, %v1637_v20, %v1646_v43  ;;  %v19603_v20 = vld [vmem:[%s24672_s0 + $0xd8] sm:$0xff]  }
 0x22b   :  { %14894 = vmatprep.mubr.msk.bf16.mxu1 %vm19810_vm0, %v19809_v0  ;;  %16134 = vmatprep.mubr.msk.bf16.mxu0 %vm19810_vm0, %v19809_v0  ;;  %v24732_v32 = vshll.u32 %v21240_v54, 16 }
 0x22c   :  { %14975 = vmatpush3.bf16.msra.mxu1 %v19328_v42  ;;  %v7736_v19 = vsel %vm1095_vm5, %v7731_v30, %v7735_v17  ;;  %v19337_v42 = vld [vmem:[%s24671_s1 + $0x130] sm:$0xff]   ;;  %v1652_v30 = vshll.u32 %v19602_v1, 16  ;;  %v1651_v1 = vrot.slane %v1649_v11, 2  ;;  %v1658_v11 = vshrl.u32 %v19603_v20, 16 }
 0x22d   :  { %14976 = vmatprep.subr.bf16.mxu1 %v19809_v0 }
 0x22e   :  { %v1654_v22 = vrot.slane %v1652_v30, 3  ;;  %v1661_v30 = vshll.u32 %v19603_v20, 16 }
 0x230   :  { %14977 = vmatpush3.bf16.msra.mxu1 %v19333_v9  ;;  %v7739_v9 = vor.u32 %v24733_v2, %v7735_v17 }
 0x231   :  { %14978 = vmatprep.subr.bf16.mxu1 %v19809_v0 }
 0x232   :  { %14895 = vmatmul.mubr.bf16.gmra.mrb[12].mxu1 %v1638_v62  ;;  %16135 = vmatmul.mubr.bf16.gmra.mrb[52].mxu0 %v7736_v19  ;;  %v7743_v62 = vrot.slane %v24732_v32, 1  ;;  %v21268_v19 = vld [vmem:[%s24672_s0 + $0x1c8] sm:$0xff]   ;;  %v24737_v32 = vshrl.u32 %v21240_v54, 16 }
 0x233   :  { %14898 = vmatprep.mubr.msk.bf16.mxu1 %vm19810_vm0, %v19809_v0  ;;  %16138 = vmatprep.mubr.msk.bf16.mxu0 %vm19810_vm0, %v19809_v0  ;;  %v24736_v2 = vshll.u32 %v21268_v19, 16  ;;  %v24740_v58 = vshrl.u32 %v21268_v19, 16 }
 0x234   :  { %14979 = vmatpush3.bf16.msra.mxu1 %v19337_v42  ;;  %v7744_v17 = vsel %vm1095_vm5, %v7739_v9, %v7743_v62  ;;  %v1655_v42 = vor.u32 %v1654_v22, %v1651_v1  ;;  %v7747_v9 = vor.u32 %v24737_v32, %v7743_v62  ;;  %v1660_v1 = vrot.slane %v1658_v11, 2 }
 0x235   :  { %14980 = vmatprep.subr.bf16.mxu1 %v19809_v0 }
 0x236   :  { %v1656_v22 = vsel %vm1594_vm6, %v1646_v43, %v1655_v42 }
 0x238   :  { %14981 = vmatpush3.bf16.msra.mxu1 %v19342_v21  ;;  %v7751_v21 = vrot.slane %v24736_v2, 1  ;;  %v19604_v2 = vld [vmem:[%s24672_s0 + $0xe0] sm:$0xff]  }
 0x239   :  { %15066 = vmatprep.subr.bf16.mxu1 %v19809_v0  ;;  %v1667_v32 = vshrl.u32 %v19604_v2, 16  ;;  %v1670_v43 = vshll.u32 %v19604_v2, 16 }
 0x23a   :  { %14899 = vmatmul.mubr.bf16.gmra.mrb[16].mxu1 %v1647_v55  ;;  %16139 = vmatmul.mubr.bf16.gmra.mrb[56].mxu0 %v7744_v17  ;;  %v21293_v55 = vld [vmem:[%s24672_s0 + $0x1d0] sm:$0xff]   ;;  %v1663_v17 = vrot.slane %v1661_v30, 3  ;;  %v7752_v20 = vsel %vm1095_vm5, %v7747_v9, %v7751_v21  ;;  %v7755_v11 = vor.u32 %v24740_v58, %v7751_v21  ;;  %v21313_v9 = vld [vmem:[%s24672_s0 + $0x1d8] sm:$0xff]  }
 0x23b   :  { %14902 = vmatprep.mubr.msk.bf16.mxu1 %vm19810_vm0, %v19809_v0  ;;  %16142 = vmatprep.mubr.msk.bf16.mxu0 %vm19810_vm0, %v19809_v0  ;;  %v24739_v51 = vshll.u32 %v21293_v55, 16  ;;  %v24742_v16 = vshll.u32 %v21313_v9, 16 }
 0x23c   :  { %v1664_v62 = vor.u32 %v1663_v17, %v1660_v1  ;;  %v1669_v1 = vrot.slane %v1667_v32, 2  ;;  %v1672_v17 = vrot.slane %v1670_v43, 3 }
 0x23d   :  { %v7759_v30 = vrot.slane %v24739_v51, 1  ;;  %v19605_v51 = vld [vmem:[%s24672_s0 + $0xe8] sm:$0xff]   ;;  %v7767_v43 = vrot.slane %v24742_v16, 1 }
 0x23e   :  { %v1673_v21 = vor.u32 %v1672_v17, %v1669_v1  ;;  %v1676_v58 = vshrl.u32 %v19605_v51, 16  ;;  %v7498_v16 = vld [vmem:[%s24672_s0 + $0x1ec] sm:$0x1] }
 0x23f   :  { %v7760_v2 = vsel %vm1095_vm5, %v7755_v11, %v7759_v30  ;;  %v21333_v11 = vld [vmem:[%s24672_s0 + $0x1e0] sm:$0xff]  }
 0x240   :  { %v1678_v1 = vrot.slane %v1676_v58, 2  ;;  %v24747_v3 = vshll.u32 %v21333_v11, 16  ;;  %v24748_v15 = vshrl.u32 %v21333_v11, 16 }
 0x242   :  { %14903 = vmatmul.mubr.bf16.gmra.mrb[20].mxu1 %v1656_v22  ;;  %16143 = vmatmul.mubr.bf16.gmra.mrb[60].mxu0 %v7752_v20  ;;  %v1665_v22 = vsel %vm1594_vm6, %v1655_v42, %v1664_v62  ;;  %v24743_v20 = vshrl.u32 %v21293_v55, 16  ;;  %v1679_v42 = vshll.u32 %v19605_v51, 16 }
 0x243   :  { %14906 = vmatprep.mubr.msk.bf16.mxu1 %vm19810_vm0, %v19809_v0  ;;  %16146 = vmatprep.mubr.msk.bf16.mxu0 %vm19810_vm0, %v19809_v0 }
 0x244   :  { %v7763_v32 = vor.u32 %v24743_v20, %v7759_v30  ;;  %v1681_v17 = vrot.slane %v1679_v42, 3  ;;  %v7497_v30 = vld [vmem:[%s24672_s0 + $0x1e8] sm:$0xf] }
 0x246   :  { %v7768_v51 = vsel %vm1095_vm5, %v7763_v32, %v7767_v43  ;;  %v1682_v58 = vor.u32 %v1681_v17, %v1678_v1 }
 0x248   :  { %v1683_v52 = vsel %vm1594_vm6, %v1673_v21, %v1682_v58 }
 0x24a   :  { %14907 = vmatmul.mubr.bf16.gmra.mrb[24].mxu1 %v1665_v22  ;;  %16147 = vmatmul.mubr.bf16.gmra.mrb[64].mxu0 %v7760_v2  ;;  %v1674_v22 = vsel %vm1594_vm6, %v1664_v62, %v1673_v21  ;;  %v24749_v2 = vshrl.u32 %v21313_v9, 16  ;;  %v19606_v62 = vld [vmem:[%s24672_s0 + $0xf0] sm:$0xff]  }
 0x24b   :  { %14910 = vmatprep.mubr.msk.bf16.mxu1 %vm19810_vm0, %v19809_v0  ;;  %16150 = vmatprep.mubr.msk.bf16.mxu0 %vm19810_vm0, %v19809_v0  ;;  %v1685_v42 = vshrl.u32 %v19606_v62, 16  ;;  %v1688_v32 = vshll.u32 %v19606_v62, 16 }
 0x24c   :  { %v7771_v20 = vor.u32 %v24749_v2, %v7767_v43 }
 0x24d   :  { %v1687_v1 = vrot.slane %v1685_v42, 2  ;;  %v1690_v17 = vrot.slane %v1688_v32, 3 }
 0x24f   :  { %v1691_v43 = vor.u32 %v1690_v17, %v1687_v1 }
 0x251   :  { %v1692_v32 = vsel %vm1594_vm6, %v1682_v58, %v1691_v43  ;;  %v19608_v58 = vld [vmem:[%s24672_s0 + $0x100] sm:$0xff]  }
 0x252   :  { %14911 = vmatmul.mubr.bf16.gmra.mrb[28].mxu1 %v1674_v22  ;;  %16151 = vmatmul.mubr.bf16.gmra.mrb[68].mxu0 %v7768_v51  ;;  %v7775_v22 = vrot.slane %v24747_v3, 1  ;;  %v21356_v51 = vcombine.low %v7497_v30, %v7498_v16  ;;  %v19607_v16 = vld [vmem:[%s24672_s0 + $0xf8] sm:$0xff]  }
 0x253   :  { %14914 = vmatprep.mubr.msk.bf16.mxu1 %vm19810_vm0, %v19809_v0  ;;  %16154 = vmatprep.mubr.msk.bf16.mxu0 %vm19810_vm0, %v19809_v0  ;;  %v1694_v30 = vshrl.u32 %v19607_v16, 16  ;;  %v1697_v21 = vshll.u32 %v19607_v16, 16 }
 0x254   :  { %v7776_v31 = vsel %vm1095_vm5, %v7771_v20, %v7775_v22  ;;  %v7781_v62 = vshll.u32 %v21356_v51, 16  ;;  %v7779_v20 = vor.u32 %v24748_v15, %v7775_v22  ;;  %v19326_v22 = vld [vmem:[%s24672_s0 + $0x1f0] sm:$0xff]   ;;  %v7785_v15 = vshrl.u32 %v21356_v51, 16 }
 0x255   :  { %v1696_v1 = vrot.slane %v1694_v30, 2  ;;  %v1699_v17 = vrot.slane %v1697_v21, 3  ;;  %v1703_v30 = vshrl.u32 %v19608_v58, 16  ;;  %v1706_v21 = vshll.u32 %v19608_v58, 16  ;;  %v19329_v58 = vld [vmem:[%s24672_s0 + $0x1f8] sm:$0xff]  }
 0x256   :  { %v7783_v42 = vrot.slane %v7781_v62, 1 }
 0x257   :  { %v1700_v62 = vor.u32 %v1699_v17, %v1696_v1  ;;  %v1705_v60 = vrot.slane %v1703_v30, 2  ;;  %v1708_v1 = vrot.slane %v1706_v21, 3  ;;  %v8280_v21 = vshrl.u32 %v19329_v58, 16 }
 0x258   :  { %v7784_v16 = vsel %vm1095_vm5, %v7779_v20, %v7783_v42  ;;  %v7787_v2 = vor.u32 %v7785_v15, %v7783_v42  ;;  %v19609_v15 = vld [vmem:[%s24672_s0 + $0x108] sm:$0xff]  }
 0x259   :  { %v1715_v42 = vshll.u32 %v19609_v15, 16 }
 0x25a   :  { %14915 = vmatmul.mubr.bf16.gmra.mrb[32].mxu1 %v1683_v52  ;;  %16155 = vmatmul.mubr.bf16.gmra.mrb[72].mxu0 %v7776_v31  ;;  %v8098_v52 = vld [vmem:[%s24672_s0 + $0x1e8] sm:$0xc]  ;;  %v8099_v31 = vld [vmem:[%s24672_s0 + $0x1ec] sm:$0xf] }
 0x25b   :  { %14918 = vmatprep.mubr.msk.bf16.mxu1 %vm19810_vm0, %v19809_v0  ;;  %16158 = vmatprep.mubr.msk.bf16.mxu0 %vm19810_vm0, %v19809_v0  ;;  %v13552_v3 = vcombine.low %v8098_v52, %v8099_v31  ;;  %v8271_v31 = vshrl.u32 %v19326_v22, 16 }
 0x25d   :  { %v8263_v20 = vshrl.u32 %v13552_v3, 16  ;;  %v8266_v52 = vshll.u32 %v13552_v3, 16  ;;  %v8273_v10 = vrot.slane %v8271_v31, 2  ;;  %v1709_v3 = vor.u32 %v1708_v1, %v1705_v60  ;;  %v19327_v60 = vld [vmem:[%s24671_s1 + $0x440] sm:$0xff]  }
 0x25e   :  { %v1717_v31 = vrot.slane %v1715_v42, 3  ;;  %v19331_v42 = vld [vmem:[%s24671_s1 + $0x448] sm:$0xff]  }
 0x25f   :  { %v8265_v17 = vrot.slane %v8263_v20, 2  ;;  %v8268_v33 = vrot.slane %v8266_v52, 3  ;;  %v8283_v20 = vshll.u32 %v19329_v58, 16  ;;  %v1710_v52 = vsel %vm1594_vm6, %v1700_v62, %v1709_v3 }
 0x261   :  { %v8285_v1 = vrot.slane %v8283_v20, 3 }
 0x262   :  { %14919 = vmatmul.mubr.bf16.gmra.mrb[36].mxu1 %v1692_v32  ;;  %16159 = vmatmul.mubr.bf16.gmra.mrb[76].mxu0 %v7784_v16  ;;  %v8274_v32 = vshll.u32 %v19326_v22, 16  ;;  %v1701_v16 = vsel %vm1594_vm6, %v1691_v43, %v1700_v62  ;;  %v1712_v43 = vshrl.u32 %v19609_v15, 16  ;;  %v8269_v22 = vor.u32 %v8268_v33, %v8265_v17  ;;  %v19330_v15 = vld [vmem:[%s24672_s0 + $0x200] sm:$0xff]  }
 0x263   :  { %14922 = vmatprep.mubr.msk.bf16.mxu1 %vm19810_vm0, %v19809_v0  ;;  %16162 = vmatprep.mubr.msk.bf16.mxu0 %vm19810_vm0, %v19809_v0  ;;  %v8289_v58 = vshrl.u32 %v19330_v15, 16 }
 0x264   :  { %v8276_v12 = vrot.slane %v8274_v32, 3 }
 0x266   :  { %v8277_v30 = vor.u32 %v8276_v12, %v8273_v10  ;;  %v19610_v10 = vld [vmem:[%s24672_s0 + $0x110] sm:$0xff]  }
 0x267   :  { %v1721_v12 = vshrl.u32 %v19610_v10, 16  ;;  %v1724_v62 = vshll.u32 %v19610_v10, 16 }
 0x268   :  { %v8278_v32 = vsel %vm1594_vm6, %v8269_v22, %v8277_v30 }
 0x269   :  { %v1726_v20 = vrot.slane %v1724_v62, 3  ;;  %v19341_v62 = vld [vmem:[%s24671_s1 + $0x458] sm:$0xff]  }
 0x26a   :  { %14923 = vmatmul.mubr.bf16.gmra.mrb[40].mxu1 %v1701_v16  ;;  %16163 = vmatmul.mubr.bf16.gmra.mrb[80].mxu0 %v7787_v2  ;;  %v1714_v2 = vrot.slane %v1712_v43, 2  ;;  %v8282_v16 = vrot.slane %v8280_v21, 2  ;;  %v8292_v43 = vshll.u32 %v19330_v15, 16  ;;  %v1723_v21 = vrot.slane %v1721_v12, 2 }
 0x26b   :  { %14926 = vmatprep.mubr.msk.bf16.mxu1 %vm19810_vm0, %v19809_v0  ;;  %16182 = vmatprep.mubr.msk.bf16.mxu0 %vm19810_vm0, %v19809_v0 }
 0x26c   :  { %v1718_v33 = vor.u32 %v1717_v31, %v1714_v2  ;;  %v8286_v17 = vor.u32 %v8285_v1, %v8282_v16  ;;  %v8291_v2 = vrot.slane %v8289_v58, 2  ;;  %v8294_v31 = vrot.slane %v8292_v43, 3 }
 0x26e   :  { %v1719_v22 = vsel %vm1594_vm6, %v1709_v3, %v1718_v33  ;;  %v1727_v3 = vor.u32 %v1726_v20, %v1723_v21  ;;  %v8295_v15 = vor.u32 %v8294_v31, %v8291_v2  ;;  %v19346_v2 = vld [vmem:[%s24671_s1 + $0x460] sm:$0xff]  }
 0x270   :  { %v1728_v58 = vsel %vm1594_vm6, %v1718_v33, %v1727_v3 }
 0x272   :  { %14927 = vmatmul.mubr.bf16.gmra.mrb[44].mxu1 %v1710_v52  ;;  %16183 = vmatmul.mubr.bf16.vlgmr.msra.gmra.mrb[0].mxu0 %v8278_v32  ;;  %v8287_v52 = vsel %vm1594_vm6, %v8277_v30, %v8286_v17  ;;  %v19332_v32 = vld [vmem:[%s24672_s0 + $0x208] sm:$0xff]   ;;  %v19611_v30 = vld [vmem:[%s24672_s0 + $0x118] sm:$0xff]  }
 0x273   :  { %14930 = vmatprep.mubr.msk.bf16.mxu1 %vm19810_vm0, %v19809_v0  ;;  %16267 = vmatpush3.bf16.msra.mxu0 %v19327_v60  ;;  %v19336_v60 = vld [vmem:[%s24671_s1 + $0x450] sm:$0xff]   ;;  %v1730_v16 = vshrl.u32 %v19611_v30, 16  ;;  %v1733_v1 = vshll.u32 %v19611_v30, 16  ;;  %v8298_v10 = vshrl.u32 %v19332_v32, 16  ;;  %v8301_v12 = vshll.u32 %v19332_v32, 16 }
 0x274   :  { %16186 = vmatprep.mubr.msk.bf16.mxu0 %vm19810_vm0, %v19809_v0  ;;  %16268 = vmatprep.subr.bf16.mxu0 %v19809_v0 }
 0x275   :  { %v1732_v43 = vrot.slane %v1730_v16, 2  ;;  %v8300_v21 = vrot.slane %v8298_v10, 2  ;;  %v8303_v20 = vrot.slane %v8301_v12, 3 }
 0x277   :  { %16269 = vmatpush3.bf16.msra.mxu0 %v19331_v42  ;;  %v1735_v42 = vrot.slane %v1733_v1, 3  ;;  %v19351_v1 = vld [vmem:[%s24671_s1 + $0x468] sm:$0xff]  }
 0x278   :  { %16270 = vmatprep.subr.bf16.mxu0 %v19809_v0 }
 0x279   :  { %v1736_v33 = vor.u32 %v1735_v42, %v1732_v43 }
 0x27a   :  { %14931 = vmatmul.mubr.bf16.gmra.mrb[48].mxu1 %v1719_v22  ;;  %16187 = vmatmul.mubr.bf16.gmra.mrb[4].mxu0 %v8287_v52  ;;  %v8296_v22 = vsel %vm1594_vm6, %v8286_v17, %v8295_v15  ;;  %v19334_v52 = vld [vmem:[%s24672_s0 + $0x210] sm:$0xff]   ;;  %v19612_v17 = vld [vmem:[%s24672_s0 + $0x120] sm:$0xff]  }
 0x27b   :  { %14934 = vmatprep.mubr.msk.bf16.mxu1 %vm19810_vm0, %v19809_v0  ;;  %16190 = vmatprep.mubr.msk.bf16.mxu0 %vm19810_vm0, %v19809_v0  ;;  %v1739_v31 = vshrl.u32 %v19612_v17, 16  ;;  %v1742_v32 = vshll.u32 %v19612_v17, 16  ;;  %v8307_v30 = vshrl.u32 %v19334_v52, 16  ;;  %v8310_v16 = vshll.u32 %v19334_v52, 16 }
 0x27c   :  { %16271 = vmatpush3.bf16.msra.mxu0 %v19336_v60  ;;  %v8304_v60 = vor.u32 %v8303_v20, %v8300_v21  ;;  %v1737_v10 = vsel %vm1594_vm6, %v1727_v3, %v1736_v33  ;;  %v19355_v21 = vld [vmem:[%s24671_s1 + $0x470] sm:$0xff]  }
 0x27d   :  { %16272 = vmatprep.subr.bf16.mxu0 %v19809_v0  ;;  %v1741_v12 = vrot.slane %v1739_v31, 2  ;;  %v8309_v43 = vrot.slane %v8307_v30, 2  ;;  %v8312_v42 = vrot.slane %v8310_v16, 3 }
 0x280   :  { %16273 = vmatpush3.bf16.msra.mxu0 %v19341_v62  ;;  %v1744_v62 = vrot.slane %v1742_v32, 3  ;;  %v19360_v32 = vld [vmem:[%s24671_s1 + $0x478] sm:$0xff]  }
 0x281   :  { %16274 = vmatprep.subr.bf16.mxu0 %v19809_v0 }
 0x282   :  { %14935 = vmatmul.mubr.bf16.gmra.mrb[52].mxu1 %v1728_v58  ;;  %16191 = vmatmul.mubr.bf16.gmra.mrb[8].mxu0 %v8296_v22  ;;  %v8305_v58 = vsel %vm1594_vm6, %v8295_v15, %v8304_v60  ;;  %v19335_v22 = vld [vmem:[%s24672_s0 + $0x218] sm:$0xff]   ;;  %v1745_v3 = vor.u32 %v1744_v62, %v1741_v12  ;;  %v19613_v15 = vld [vmem:[%s24672_s0 + $0x128] sm:$0xff]  }
 0x283   :  { %14938 = vmatprep.mubr.msk.bf16.mxu1 %vm19810_vm0, %v19809_v0  ;;  %16194 = vmatprep.mubr.msk.bf16.mxu0 %vm19810_vm0, %v19809_v0  ;;  %v1748_v20 = vshrl.u32 %v19613_v15, 16  ;;  %v1751_v52 = vshll.u32 %v19613_v15, 16  ;;  %v8316_v17 = vshrl.u32 %v19335_v22, 16  ;;  %v8319_v31 = vshll.u32 %v19335_v22, 16 }
 0x284   :  { %16275 = vmatpush3.bf16.msra.mxu0 %v19346_v2  ;;  %v8313_v2 = vor.u32 %v8312_v42, %v8309_v43  ;;  %v1746_v30 = vsel %vm1594_vm6, %v1736_v33, %v1745_v3  ;;  %v19614_v33 = vld [vmem:[%s24672_s0 + $0x130] sm:$0xff]  }
 0x285   :  { %16276 = vmatprep.subr.bf16.mxu0 %v19809_v0  ;;  %v1750_v16 = vrot.slane %v1748_v20, 2  ;;  %v8318_v12 = vrot.slane %v8316_v17, 2  ;;  %v8321_v62 = vrot.slane %v8319_v31, 3  ;;  %v1760_v42 = vshll.u32 %v19614_v33, 16 }
 0x287   :  { %v8322_v22 = vor.u32 %v8321_v62, %v8318_v12  ;;  %v1762_v17 = vrot.slane %v1760_v42, 3 }
 0x288   :  { %16277 = vmatpush3.bf16.msra.mxu0 %v19351_v1  ;;  %v1753_v1 = vrot.slane %v1751_v52, 3 }
 0x289   :  { %16278 = vmatprep.subr.bf16.mxu0 %v19809_v0  ;;  %v8323_v31 = vsel %vm1594_vm6, %v8313_v2, %v8322_v22 }
 0x28a   :  { %14939 = vmatmul.mubr.bf16.gmra.mrb[56].mxu1 %v1737_v10  ;;  %16195 = vmatmul.mubr.bf16.gmra.mrb[12].mxu0 %v8305_v58  ;;  %v8314_v10 = vsel %vm1594_vm6, %v8304_v60, %v8313_v2  ;;  %v19338_v58 = vld [vmem:[%s24672_s0 + $0x220] sm:$0xff]   ;;  %v1754_v43 = vor.u32 %v1753_v1, %v1750_v16  ;;  %v1757_v60 = vshrl.u32 %v19614_v33, 16  ;;  %v21498_v16 = vld [vmem:[%s24672_s0 + $0x228] sm:$0xff]  }
 0x28b   :  { %14942 = vmatprep.mubr.msk.bf16.mxu1 %vm19810_vm0, %v19809_v0  ;;  %16198 = vmatprep.mubr.msk.bf16.mxu0 %vm19810_vm0, %v19809_v0  ;;  %v8328_v15 = vshll.u32 %v19338_v58, 16  ;;  %v1573_v2 = vld [vmem:[%s24672_s0 + $0x144] sm:$0x7]  ;;  %v8337_v33 = vshll.u32 %v21498_v16, 16 }
 0x28c   :  { %16279 = vmatpush3.bf16.msra.mxu0 %v19355_v21  ;;  %v8325_v21 = vshrl.u32 %v19338_v58, 16  ;;  %v1755_v20 = vsel %vm1594_vm6, %v1745_v3, %v1754_v43  ;;  %v1759_v52 = vrot.slane %v1757_v60, 2  ;;  %v19615_v3 = vld [vmem:[%s24672_s0 + $0x138] sm:$0xff]   ;;  %v8334_v58 = vshrl.u32 %v21498_v16, 16  ;;  %v19616_v60 = vld [vmem:[%s24672_s0 + $0x140] sm:$0xf] }
 0x28d   :  { %16280 = vmatprep.subr.bf16.mxu0 %v19809_v0  ;;  %v1769_v12 = vshll.u32 %v19615_v3, 16  ;;  %v13107_v42 = vcombine.low %v19616_v60, %v1573_v2 }
 0x28e   :  { %v1763_v1 = vor.u32 %v1762_v17, %v1759_v52  ;;  %v8336_v17 = vrot.slane %v8334_v58, 2 }
 0x28f   :  { %v1778_v2 = vshll.u32 %v13107_v42, 16 }
 0x290   :  { %16281 = vmatpush3.bf16.msra.mxu0 %v19360_v32  ;;  %v8327_v32 = vrot.slane %v8325_v21, 2  ;;  %v1764_v21 = vsel %vm1594_vm6, %v1754_v43, %v1763_v1 }
 0x291   :  { %16366 = vmatprep.subr.bf16.mxu0 %v19809_v0 }
 0x292   :  { %14943 = vmatmul.mubr.bf16.gmra.mrb[60].mxu1 %v1746_v30  ;;  %16199 = vmatmul.mubr.bf16.gmra.mrb[16].mxu0 %v8314_v10  ;;  %v8330_v30 = vrot.slane %v8328_v15, 3  ;;  %v1766_v10 = vshrl.u32 %v19615_v3, 16  ;;  %v1775_v3 = vshrl.u32 %v13107_v42, 16  ;;  %v21533_v42 = vld [vmem:[%s24672_s0 + $0x238] sm:$0xff]  }
 0x293   :  { %14946 = vmatprep.mubr.msk.bf16.mxu1 %vm19810_vm0, %v19809_v0  ;;  %16202 = vmatprep.mubr.msk.bf16.mxu0 %vm19810_vm0, %v19809_v0 }
 0x294   :  { %v8331_v62 = vor.u32 %v8330_v30, %v8327_v32  ;;  %v1768_v15 = vrot.slane %v1766_v10, 2  ;;  %v21520_v32 = vld [vmem:[%s24672_s0 + $0x230] sm:$0xff]   ;;  %v1777_v58 = vrot.slane %v1775_v3, 2 }
 0x295   :  { %v8346_v10 = vshll.u32 %v21520_v32, 16 }
 0x296   :  { %v8332_v52 = vsel %vm1594_vm6, %v8322_v22, %v8331_v62  ;;  %v8343_v22 = vshrl.u32 %v21520_v32, 16 }
 0x29a   :  { %14947 = vmatmul.mubr.bf16.gmra.mrb[64].mxu1 %v1755_v20  ;;  %16203 = vmatmul.mubr.bf16.gmra.mrb[20].mxu0 %v8323_v31  ;;  %v1771_v20 = vrot.slane %v1769_v12, 3  ;;  %v8339_v31 = vrot.slane %v8337_v33, 3  ;;  %v1780_v33 = vrot.slane %v1778_v2, 3 }
 0x29b   :  { %14950 = vmatprep.mubr.msk.bf16.mxu1 %vm19810_vm0, %v19809_v0  ;;  %16206 = vmatprep.mubr.msk.bf16.mxu0 %vm19810_vm0, %v19809_v0 }
 0x29c   :  { %v1772_v30 = vor.u32 %v1771_v20, %v1768_v15  ;;  %v8340_v43 = vor.u32 %v8339_v31, %v8336_v17  ;;  %v1781_v15 = vor.u32 %v1780_v33, %v1777_v58  ;;  %v8352_v20 = vshrl.u32 %v21533_v42, 16  ;;  %v19617_v58 = vld [vmem:[%s24672_s0 + $0x4] sm:$0xf] }
 0x29e   :  { %v1773_v12 = vsel %vm1594_vm6, %v1763_v1, %v1772_v30  ;;  %v8341_v60 = vsel %vm1594_vm6, %v8331_v62, %v8340_v43  ;;  %v8355_v62 = vshll.u32 %v21533_v42, 16  ;;  %v1782_v17 = vsel %vm1594_vm6, %v1772_v30, %v1781_v15  ;;  %v2093_v30 = vld [vmem:[%s24672_s0] sm:$0xe] }
 0x29f   :  { %v8354_v3 = vrot.slane %v8352_v20, 2  ;;  %v13132_v33 = vcombine.low %v2093_v30, %v19617_v58  ;;  %v21564_v20 = vld [vmem:[%s24672_s0 + $0x248] sm:$0xff]   ;;  %v19348_v58 = vld [vmem:[%s24671_s1 + $0x140] sm:$0xff]  }
 0x2a0   :  { %v8357_v2 = vrot.slane %v8355_v62, 3 }
 0x2a1   :  { %v2115_v62 = vrot.slane %v13132_v33, 1  ;;  %v21583_v33 = vld [vmem:[%s24672_s0 + $0x250] sm:$0xff]  }
 0x2a2   :  { %14951 = vmatmul.mubr.bf16.gmra.mrb[68].mxu1 %v1764_v21  ;;  %16207 = vmatmul.mubr.bf16.gmra.mrb[24].mxu0 %v8332_v52  ;;  %v8345_v21 = vrot.slane %v8343_v22, 2  ;;  %v8348_v52 = vrot.slane %v8346_v10, 3  ;;  %v21546_v22 = vld [vmem:[%s24672_s0 + $0x240] sm:$0xff]   ;;  %v8358_v10 = vor.u32 %v8357_v2, %v8354_v3  ;;  %v8370_v3 = vshrl.u32 %v21564_v20, 16 }
 0x2a3   :  { %14954 = vmatprep.mubr.msk.bf16.mxu1 %vm19810_vm0, %v19809_v0  ;;  %16210 = vmatprep.mubr.msk.bf16.mxu0 %vm19810_vm0, %v19809_v0  ;;  %v8373_v2 = vshll.u32 %v21564_v20, 16 }
 0x2a4   :  { %v8349_v1 = vor.u32 %v8348_v52, %v8345_v21 }
 0x2a6   :  { %v8350_v31 = vsel %vm1594_vm6, %v8340_v43, %v8349_v1  ;;  %v8361_v43 = vshrl.u32 %v21546_v22, 16 }
 0x2a8   :  { %v8363_v21 = vrot.slane %v8361_v43, 2  ;;  %v8372_v43 = vrot.slane %v8370_v3, 2 }
 0x2aa   :  { %14955 = vmatmul.mubr.bf16.gmra.mrb[72].mxu1 %v1773_v12  ;;  %16211 = vmatmul.mubr.bf16.gmra.mrb[28].mxu0 %v8341_v60  ;;  %v8364_v12 = vshll.u32 %v21546_v22, 16  ;;  %v8359_v60 = vsel %vm1594_vm6, %v8349_v1, %v8358_v10 }
 0x2ab   :  { %14958 = vmatprep.mubr.msk.bf16.mxu1 %vm19810_vm0, %v19809_v0  ;;  %16214 = vmatprep.mubr.msk.bf16.mxu0 %vm19810_vm0, %v19809_v0 }
 0x2ac   :  { %v8366_v52 = vrot.slane %v8364_v12, 3  ;;  %v8375_v12 = vrot.slane %v8373_v2, 3 }
 0x2ae   :  { %v8367_v1 = vor.u32 %v8366_v52, %v8363_v21  ;;  %v8376_v21 = vor.u32 %v8375_v12, %v8372_v43  ;;  %v8379_v52 = vshrl.u32 %v21583_v33, 16  ;;  %v21603_v43 = vld [vmem:[%s24672_s0 + $0x258] sm:$0xff]   ;;  %v19357_v12 = vld [vmem:[%s24671_s1 + $0x150] sm:$0xff]  }
 0x2b0   :  { %v8368_v30 = vsel %vm1594_vm6, %v8358_v10, %v8367_v1  ;;  %v19619_v10 = vld [vmem:[%s24672_s0 + $0x10] sm:$0xff]   ;;  %v8377_v2 = vsel %vm1594_vm6, %v8367_v1, %v8376_v21 }
 0x2b2   :  { %14959 = vmatmul.mubr.bf16.gmra.mrb[76].mxu1 %v1782_v17  ;;  %16215 = vmatmul.mubr.bf16.gmra.mrb[32].mxu0 %v8350_v31  ;;  %v19618_v17 = vld [vmem:[%s24672_s0 + $0x8] sm:$0xff]  }
 0x2b3   :  { %14962 = vmatprep.mubr.msk.bf16.mxu1 %vm19810_vm0, %v19809_v0  ;;  %16218 = vmatprep.mubr.msk.bf16.mxu0 %vm19810_vm0, %v19809_v0  ;;  %v2116_v31 = vrot.slane %v19618_v17, 1  ;;  %v19352_v17 = vld [vmem:[%s24671_s1 + $0x148] sm:$0xff]  }
 0x2ba   :  { %14963 = vmatmul.mubr.bf16.gmra.mrb[80].mxu1 %v1781_v15  ;;  %16219 = vmatmul.mubr.bf16.gmra.mrb[36].mxu0 %v8359_v60  ;;  %v2117_v15 = vsel %vm2114_vm2, %v2115_v62, %v2116_v31  ;;  %v2118_v60 = vrot.slane %v19619_v10, 1  ;;  %v8382_v62 = vshll.u32 %v21583_v33, 16  ;;  %v8388_v10 = vshrl.u32 %v21603_v43, 16 }
 0x2bb   :  { %14982 = vmatprep.mubr.msk.bf16.mxu1 %vm19810_vm0, %v19809_v0  ;;  %16222 = vmatprep.mubr.msk.bf16.mxu0 %vm19810_vm0, %v19809_v0 }
 0x2bc   :  { %v2119_v3 = vsel %vm2114_vm2, %v2116_v31, %v2118_v60  ;;  %v19620_v31 = vld [vmem:[%s24672_s0 + $0x18] sm:$0xff]  }
 0x2bd   :  { %v2120_v1 = vrot.slane %v19620_v31, 1 }
 0x2c2   :  { %14983 = vmatmul.mubr.bf16.vlgmr.msra.gmra.mrb[0].mxu1 %v2117_v15  ;;  %16223 = vmatmul.mubr.bf16.gmra.mrb[40].mxu0 %v8368_v30  ;;  %v8381_v15 = vrot.slane %v8379_v52, 2  ;;  %v8384_v30 = vrot.slane %v8382_v62, 3  ;;  %v8391_v52 = vshll.u32 %v21603_v43, 16  ;;  %v19361_v62 = vld [vmem:[%s24671_s1 + $0x158] sm:$0xff]  }
 0x2c3   :  { %14986 = vmatprep.mubr.msk.bf16.mxu1 %vm19810_vm0, %v19809_v0  ;;  %16226 = vmatprep.mubr.msk.bf16.mxu0 %vm19810_vm0, %v19809_v0 }
 0x2c4   :  { %15067 = vmatpush3.bf16.msra.mxu1 %v19348_v58  ;;  %v8385_v58 = vor.u32 %v8384_v30, %v8381_v15  ;;  %v8393_v31 = vrot.slane %v8391_v52, 3  ;;  %v21627_v15 = vld [vmem:[%s24672_s0 + $0x260] sm:$0xff]  }
 0x2c5   :  { %15068 = vmatprep.subr.bf16.mxu1 %v19809_v0  ;;  %v19365_v30 = vld [vmem:[%s24671_s1 + $0x160] sm:$0xff]   ;;  %v8400_v52 = vshll.u32 %v21627_v15, 16 }
 0x2c7   :  { %v8402_v48 = vrot.slane %v8400_v52, 3 }
 0x2c8   :  { %15069 = vmatpush3.bf16.msra.mxu1 %v19352_v17  ;;  %v2121_v17 = vsel %vm2114_vm2, %v2118_v60, %v2120_v1  ;;  %v19621_v60 = vld [vmem:[%s24672_s0 + $0x20] sm:$0xff]  }
 0x2c9   :  { %15070 = vmatprep.subr.bf16.mxu1 %v19809_v0 }
 0x2ca   :  { %14987 = vmatmul.mubr.bf16.gmra.mrb[4].mxu1 %v2119_v3  ;;  %16227 = vmatmul.mubr.bf16.gmra.mrb[44].mxu0 %v8377_v2  ;;  %v8386_v3 = vsel %vm1594_vm6, %v8376_v21, %v8385_v58  ;;  %v8390_v2 = vrot.slane %v8388_v10, 2  ;;  %v2122_v21 = vrot.slane %v19621_v60, 1  ;;  %v8397_v10 = vshrl.u32 %v21627_v15, 16 }
 0x2cb   :  { %14990 = vmatprep.mubr.msk.bf16.mxu1 %vm19810_vm0, %v19809_v0  ;;  %16230 = vmatprep.mubr.msk.bf16.mxu0 %vm19810_vm0, %v19809_v0 }
 0x2cc   :  { %15071 = vmatpush3.bf16.msra.mxu1 %v19357_v12  ;;  %v8394_v12 = vor.u32 %v8393_v31, %v8390_v2  ;;  %v8399_v60 = vrot.slane %v8397_v10, 2  ;;  %v21651_v2 = vld [vmem:[%s24672_s0 + $0x268] sm:$0xff]   ;;  %v19369_v31 = vld [vmem:[%s24671_s1 + $0x170] sm:$0xff]  }
 0x2cd   :  { %15072 = vmatprep.subr.bf16.mxu1 %v19809_v0  ;;  %v8406_v10 = vshrl.u32 %v21651_v2, 16  ;;  %v8409_v52 = vshll.u32 %v21651_v2, 16 }
 0x2cf   :  { %v8411_v27 = vrot.slane %v8409_v52, 3 }
 0x2d0   :  { %15073 = vmatpush3.bf16.msra.mxu1 %v19361_v62  ;;  %v19367_v62 = vld [vmem:[%s24671_s1 + $0x168] sm:$0xff]  }
 0x2d1   :  { %15074 = vmatprep.subr.bf16.mxu1 %v19809_v0 }
 0x2d2   :  { %14991 = vmatmul.mubr.bf16.gmra.mrb[8].mxu1 %v2121_v17  ;;  %16231 = vmatmul.mubr.bf16.gmra.mrb[48].mxu0 %v8386_v3  ;;  %v2123_v17 = vsel %vm2114_vm2, %v2120_v1, %v2122_v21  ;;  %v8395_v3 = vsel %vm1594_vm6, %v8385_v58, %v8394_v12  ;;  %v19622_v1 = vld [vmem:[%s24672_s0 + $0x28] sm:$0xff]  }
 0x2d3   :  { %14994 = vmatprep.mubr.msk.bf16.mxu1 %vm19810_vm0, %v19809_v0  ;;  %16234 = vmatprep.mubr.msk.bf16.mxu0 %vm19810_vm0, %v19809_v0  ;;  %v2124_v58 = vrot.slane %v19622_v1, 1  ;;  %v8408_v1 = vrot.slane %v8406_v10, 2 }
 0x2d4   :  { %15075 = vmatpush3.bf16.msra.mxu1 %v19365_v30  ;;  %v8403_v30 = vor.u32 %v8402_v48, %v8399_v60  ;;  %v21675_v48 = vld [vmem:[%s24672_s0 + $0x270] sm:$0xff]  }
 0x2d5   :  { %15076 = vmatprep.subr.bf16.mxu1 %v19809_v0  ;;  %v8412_v60 = vor.u32 %v8411_v27, %v8408_v1  ;;  %v8418_v10 = vshll.u32 %v21675_v48, 16  ;;  %v19624_v27 = vld [vmem:[%s24672_s0 + $0x38] sm:$0xff]  }
 0x2d6   :  { %v2128_v1 = vrot.slane %v19624_v27, 1  ;;  %v8436_v27 = vshll.u32 %v21708_v56, 16 }
 0x2d8   :  { %15077 = vmatpush3.bf16.msra.mxu1 %v19367_v62  ;;  %v19371_v62 = vld [vmem:[%s24671_s1 + $0x178] sm:$0xff]  }
 0x2d9   :  { %15078 = vmatprep.subr.bf16.mxu1 %v19809_v0 }
 0x2da   :  { %14995 = vmatmul.mubr.bf16.gmra.mrb[12].mxu1 %v2123_v17  ;;  %16235 = vmatmul.mubr.bf16.gmra.mrb[52].mxu0 %v8395_v3  ;;  %v2125_v17 = vsel %vm2114_vm2, %v2122_v21, %v2124_v58  ;;  %v8404_v3 = vsel %vm1594_vm6, %v8394_v12, %v8403_v30  ;;  %v19623_v21 = vld [vmem:[%s24672_s0 + $0x30] sm:$0xff]  }
 0x2db   :  { %14998 = vmatprep.mubr.msk.bf16.mxu1 %vm19810_vm0, %v19809_v0  ;;  %16238 = vmatprep.mubr.msk.bf16.mxu0 %vm19810_vm0, %v19809_v0  ;;  %v2126_v12 = vrot.slane %v19623_v21, 1  ;;  %v8427_v21 = vshll.u32 %v21692_v36, 16 }
 0x2dc   :  { %15079 = vmatpush3.bf16.msra.mxu1 %v19369_v31  ;;  %v8415_v31 = vshrl.u32 %v21675_v48, 16 }
 0x2dd   :  { %15080 = vmatprep.subr.bf16.mxu1 %v19809_v0  ;;  %v2127_v52 = vsel %vm2114_vm2, %v2124_v58, %v2126_v12 }
 0x2e0   :  { %15081 = vmatpush3.bf16.msra.mxu1 %v19371_v62  ;;  %v8413_v62 = vsel %vm1594_vm6, %v8403_v30, %v8412_v60  ;;  %v8424_v30 = vshrl.u32 %v21692_v36, 16 }
 0x2e1   :  { %15166 = vmatprep.subr.bf16.mxu1 %v19809_v0 }
 0x2e2   :  { %14999 = vmatmul.mubr.bf16.gmra.mrb[16].mxu1 %v2125_v17  ;;  %16239 = vmatmul.mubr.bf16.gmra.mrb[56].mxu0 %v8404_v3  ;;  %v8417_v17 = vrot.slane %v8415_v31, 2  ;;  %v8420_v3 = vrot.slane %v8418_v10, 3  ;;  %v2129_v31 = vsel %vm2114_vm2, %v2126_v12, %v2128_v1 }
 0x2e3   :  { %15002 = vmatprep.mubr.msk.bf16.mxu1 %vm19810_vm0, %v19809_v0  ;;  %16242 = vmatprep.mubr.msk.bf16.mxu0 %vm19810_vm0, %v19809_v0 }
 0x2e4   :  { %v8421_v58 = vor.u32 %v8420_v3, %v8417_v17  ;;  %v19625_v17 = vld [vmem:[%s24672_s0 + $0x40] sm:$0xff]  }
 0x2e5   :  { %v2130_v3 = vrot.slane %v19625_v17, 1  ;;  %v8445_v17 = vshll.u32 %v21724_v47, 16 }
 0x2e6   :  { %v8422_v10 = vsel %vm1594_vm6, %v8412_v60, %v8421_v58  ;;  %v8433_v60 = vshrl.u32 %v21708_v56, 16 }
 0x2ea   :  { %15003 = vmatmul.mubr.bf16.gmra.mrb[20].mxu1 %v2127_v52  ;;  %16243 = vmatmul.mubr.bf16.gmra.mrb[60].mxu0 %v8413_v62  ;;  %v8426_v52 = vrot.slane %v8424_v30, 2  ;;  %v8429_v62 = vrot.slane %v8427_v21, 3  ;;  %v2131_v30 = vsel %vm2114_vm2, %v2128_v1, %v2130_v3 }
 0x2eb   :  { %15006 = vmatprep.mubr.msk.bf16.mxu1 %vm19810_vm0, %v19809_v0  ;;  %16246 = vmatprep.mubr.msk.bf16.mxu0 %vm19810_vm0, %v19809_v0 }
 0x2ec   :  { %v8430_v12 = vor.u32 %v8429_v62, %v8426_v52  ;;  %v19626_v52 = vld [vmem:[%s24672_s0 + $0x48] sm:$0xff]  }
 0x2ed   :  { %v2132_v62 = vrot.slane %v19626_v52, 1  ;;  %v19627_v52 = vld [vmem:[%s24672_s0 + $0x50] sm:$0xff]  }
 0x2ee   :  { %v8431_v21 = vsel %vm1594_vm6, %v8421_v58, %v8430_v12  ;;  %v8442_v58 = vshrl.u32 %v21724_v47, 16 }
 0x2f2   :  { %15007 = vmatmul.mubr.bf16.gmra.mrb[24].mxu1 %v2129_v31  ;;  %16247 = vmatmul.mubr.bf16.gmra.mrb[64].mxu0 %v8422_v10  ;;  %v8435_v31 = vrot.slane %v8433_v60, 2  ;;  %v8438_v10 = vrot.slane %v8436_v27, 3  ;;  %v2133_v60 = vsel %vm2114_vm2, %v2130_v3, %v2132_v62 }
 0x2f3   :  { %15010 = vmatprep.mubr.msk.bf16.mxu1 %vm19810_vm0, %v19809_v0  ;;  %16250 = vmatprep.mubr.msk.bf16.mxu0 %vm19810_vm0, %v19809_v0 }
 0x2f4   :  { %v8439_v1 = vor.u32 %v8438_v10, %v8435_v31  ;;  %v2134_v31 = vrot.slane %v19627_v52, 1 }
 0x2f6   :  { %v8440_v27 = vsel %vm1594_vm6, %v8430_v12, %v8439_v1  ;;  %v2135_v3 = vsel %vm2114_vm2, %v2132_v62, %v2134_v31 }
 0x2fa   :  { %15011 = vmatmul.mubr.bf16.gmra.mrb[28].mxu1 %v2131_v30  ;;  %16251 = vmatmul.mubr.bf16.gmra.mrb[68].mxu0 %v8431_v21  ;;  %v8444_v30 = vrot.slane %v8442_v58, 2  ;;  %v8447_v21 = vrot.slane %v8445_v17, 3  ;;  %v19628_v58 = vld [vmem:[%s24672_s0 + $0x58] sm:$0xff]  }
 0x2fb   :  { %15014 = vmatprep.mubr.msk.bf16.mxu1 %vm19810_vm0, %v19809_v0  ;;  %16254 = vmatprep.mubr.msk.bf16.mxu0 %vm19810_vm0, %v19809_v0  ;;  %v2136_v17 = vrot.slane %v19628_v58, 1  ;;  %v19364_v58 = vld [vmem:[%s24671_s1 + $0x480] sm:$0xff]  }
 0x2fc   :  { %v8448_v10 = vor.u32 %v8447_v21, %v8444_v30  ;;  %v19630_v30 = vld [vmem:[%s24672_s0 + $0x60] sm:$0xff]  }
 0x2fd   :  { %v2137_v62 = vsel %vm2114_vm2, %v2134_v31, %v2136_v17  ;;  %v2138_v21 = vrot.slane %v19630_v30, 1  ;;  %v19631_v31 = vld [vmem:[%s24672_s0 + $0x150] sm:$0xff]   ;;  %v19366_v30 = vld [vmem:[%s24671_s1 + $0x488] sm:$0xff]  }
 0x2fe   :  { %v8449_v12 = vsel %vm1594_vm6, %v8439_v1, %v8448_v10  ;;  %v19629_v1 = vld [vmem:[%s24672_s0 + $0x14c] sm:$0xf] }
 0x302   :  { %15015 = vmatmul.mubr.bf16.gmra.mrb[32].mxu1 %v2133_v60  ;;  %16255 = vmatmul.mubr.bf16.gmra.mrb[72].mxu0 %v8440_v27  ;;  %v8760_v60 = vld [vmem:[%s24672_s0 + $0x148] sm:$0xe] }
 0x303   :  { %15018 = vmatprep.mubr.msk.bf16.mxu1 %vm19810_vm0, %v19809_v0  ;;  %16258 = vmatprep.mubr.msk.bf16.mxu0 %vm19810_vm0, %v19809_v0  ;;  %v21760_v27 = vcombine.low %v8760_v60, %v19629_v1  ;;  %v19632_v60 = vld [vmem:[%s24672_s0 + $0x68] sm:$0xff]  }
 0x305   :  { %v8781_v52 = vrot.slane %v21760_v27, 1 }
 0x30a   :  { %15019 = vmatmul.mubr.bf16.gmra.mrb[36].mxu1 %v2135_v3  ;;  %16259 = vmatmul.mubr.bf16.gmra.mrb[76].mxu0 %v8449_v12  ;;  %v8782_v3 = vrot.slane %v19631_v31, 1 }
 0x30b   :  { %15022 = vmatprep.mubr.msk.bf16.mxu1 %vm19810_vm0, %v19809_v0  ;;  %16262 = vmatprep.mubr.msk.bf16.mxu0 %vm19810_vm0, %v19809_v0 }
 0x30c   :  { %v8783_v12 = vsel %vm2114_vm2, %v8781_v52, %v8782_v3 }
 0x312   :  { %15023 = vmatmul.mubr.bf16.gmra.mrb[40].mxu1 %v2137_v62  ;;  %16263 = vmatmul.mubr.bf16.gmra.mrb[80].mxu0 %v8448_v10  ;;  %v2139_v10 = vsel %vm2114_vm2, %v2136_v17, %v2138_v21  ;;  %v2140_v62 = vrot.slane %v19632_v60, 1  ;;  %v19633_v17 = vld [vmem:[%s24672_s0 + $0x158] sm:$0xff]  }
 0x313   :  { %15026 = vmatprep.mubr.msk.bf16.mxu1 %vm19810_vm0, %v19809_v0  ;;  %16282 = vmatprep.mubr.msk.bf16.mxu0 %vm19810_vm0, %v19809_v0  ;;  %v8784_v1 = vrot.slane %v19633_v17, 1  ;;  %v19370_v60 = vld [vmem:[%s24671_s1 + $0x498] sm:$0xff]  }
 0x314   :  { %v2141_v52 = vsel %vm2114_vm2, %v2138_v21, %v2140_v62  ;;  %v19635_v21 = vld [vmem:[%s24672_s0 + $0x160] sm:$0xff]  }
 0x315   :  { %v8785_v31 = vsel %vm2114_vm2, %v8782_v3, %v8784_v1  ;;  %v8786_v3 = vrot.slane %v19635_v21, 1 }
 0x31a   :  { %15027 = vmatmul.mubr.bf16.gmra.mrb[44].mxu1 %v2139_v10  ;;  %16283 = vmatmul.mubr.bf16.vlgmr.msra.gmra.mrb[0].mxu0 %v8783_v12  ;;  %v19368_v10 = vld [vmem:[%s24671_s1 + $0x490] sm:$0xff]  }
 0x31b   :  { %15030 = vmatprep.mubr.msk.bf16.mxu1 %vm19810_vm0, %v19809_v0  ;;  %16367 = vmatpush3.bf16.msra.mxu0 %v19364_v58  ;;  %v19634_v12 = vld [vmem:[%s24672_s0 + $0x70] sm:$0xff]  }
 0x31c   :  { %16286 = vmatprep.mubr.msk.bf16.mxu0 %vm19810_vm0, %v19809_v0  ;;  %16368 = vmatprep.subr.bf16.mxu0 %v19809_v0  ;;  %v2142_v58 = vrot.slane %v19634_v12, 1  ;;  %v19378_v12 = vld [vmem:[%s24671_s1 + $0x4a8] sm:$0xff]  }
 0x31e   :  { %v2143_v17 = vsel %vm2114_vm2, %v2140_v62, %v2142_v58  ;;  %v19637_v62 = vld [vmem:[%s24672_s0 + $0x168] sm:$0xff]  }
 0x31f   :  { %16369 = vmatpush3.bf16.msra.mxu0 %v19366_v30  ;;  %v8787_v30 = vsel %vm2114_vm2, %v8784_v1, %v8786_v3  ;;  %v8788_v1 = vrot.slane %v19637_v62, 1 }
 0x320   :  { %16370 = vmatprep.subr.bf16.mxu0 %v19809_v0 }
 0x322   :  { %15031 = vmatmul.mubr.bf16.gmra.mrb[48].mxu1 %v2141_v52  ;;  %16287 = vmatmul.mubr.bf16.gmra.mrb[4].mxu0 %v8785_v31  ;;  %v19373_v52 = vld [vmem:[%s24671_s1 + $0x4a0] sm:$0xff]   ;;  %v19636_v31 = vld [vmem:[%s24672_s0 + $0x78] sm:$0xff]  }
 0x323   :  { %15034 = vmatprep.mubr.msk.bf16.mxu1 %vm19810_vm0, %v19809_v0  ;;  %16290 = vmatprep.mubr.msk.bf16.mxu0 %vm19810_vm0, %v19809_v0 }
 0x324   :  { %16371 = vmatpush3.bf16.msra.mxu0 %v19368_v10  ;;  %v2144_v10 = vrot.slane %v19636_v31, 1  ;;  %v19387_v31 = vld [vmem:[%s24671_s1 + $0x4b8] sm:$0xff]  }
 0x325   :  { %16372 = vmatprep.subr.bf16.mxu0 %v19809_v0 }
 0x326   :  { %v2145_v21 = vsel %vm2114_vm2, %v2142_v58, %v2144_v10  ;;  %v19639_v58 = vld [vmem:[%s24672_s0 + $0x170] sm:$0xff]  }
 0x328   :  { %16373 = vmatpush3.bf16.msra.mxu0 %v19370_v60  ;;  %v8789_v60 = vsel %vm2114_vm2, %v8786_v3, %v8788_v1  ;;  %v8790_v3 = vrot.slane %v19639_v58, 1  ;;  %v19642_v58 = vld [vmem:[%s24672_s0 + $0x90] sm:$0xff]  }
 0x329   :  { %16374 = vmatprep.subr.bf16.mxu0 %v19809_v0 }
 0x32a   :  { %15035 = vmatmul.mubr.bf16.gmra.mrb[52].mxu1 %v2143_v17  ;;  %16291 = vmatmul.mubr.bf16.gmra.mrb[8].mxu0 %v8787_v30  ;;  %v19382_v17 = vld [vmem:[%s24671_s1 + $0x4b0] sm:$0xff]   ;;  %v19638_v30 = vld [vmem:[%s24672_s0 + $0x80] sm:$0xff]  }
 0x32b   :  { %15038 = vmatprep.mubr.msk.bf16.mxu1 %vm19810_vm0, %v19809_v0  ;;  %16294 = vmatprep.mubr.msk.bf16.mxu0 %vm19810_vm0, %v19809_v0 }
 0x32c   :  { %16375 = vmatpush3.bf16.msra.mxu0 %v19373_v52  ;;  %v2146_v52 = vrot.slane %v19638_v30, 1 }
 0x32d   :  { %16376 = vmatprep.subr.bf16.mxu0 %v19809_v0 }
 0x32e   :  { %v2147_v62 = vsel %vm2114_vm2, %v2144_v10, %v2146_v52  ;;  %v19641_v10 = vld [vmem:[%s24672_s0 + $0x178] sm:$0xff]  }
 0x330   :  { %16377 = vmatpush3.bf16.msra.mxu0 %v19378_v12  ;;  %v8791_v12 = vsel %vm2114_vm2, %v8788_v1, %v8790_v3  ;;  %v8792_v1 = vrot.slane %v19641_v10, 1 }
 0x331   :  { %16378 = vmatprep.subr.bf16.mxu0 %v19809_v0 }
 0x332   :  { %15039 = vmatmul.mubr.bf16.gmra.mrb[56].mxu1 %v2145_v21  ;;  %16295 = vmatmul.mubr.bf16.gmra.mrb[12].mxu0 %v8789_v60  ;;  %v19640_v21 = vld [vmem:[%s24672_s0 + $0x88] sm:$0xff]   ;;  %v8793_v30 = vsel %vm2114_vm2, %v8790_v3, %v8792_v1 }
 0x333   :  { %15042 = vmatprep.mubr.msk.bf16.mxu1 %vm19810_vm0, %v19809_v0  ;;  %16298 = vmatprep.mubr.msk.bf16.mxu0 %vm19810_vm0, %v19809_v0  ;;  %v2148_v60 = vrot.slane %v19640_v21, 1  ;;  %v19644_v21 = vld [vmem:[%s24672_s0 + $0x98] sm:$0xff]  }
 0x334   :  { %16379 = vmatpush3.bf16.msra.mxu0 %v19382_v17  ;;  %v2152_v10 = vrot.slane %v19644_v21, 1  ;;  %v19648_v21 = vld [vmem:[%s24672_s0 + $0x198] sm:$0xff]  }
 0x335   :  { %16380 = vmatprep.subr.bf16.mxu0 %v19809_v0  ;;  %v2149_v17 = vsel %vm2114_vm2, %v2146_v52, %v2148_v60 }
 0x338   :  { %16381 = vmatpush3.bf16.msra.mxu0 %v19387_v31  ;;  %v2150_v31 = vrot.slane %v19642_v58, 1  ;;  %v19646_v58 = vld [vmem:[%s24672_s0 + $0xa0] sm:$0x1f]  }
 0x339   :  { %16466 = vmatprep.subr.bf16.mxu0 %v19809_v0 }
 0x33a   :  { %15043 = vmatmul.mubr.bf16.gmra.mrb[60].mxu1 %v2147_v62  ;;  %16299 = vmatmul.mubr.bf16.gmra.mrb[16].mxu0 %v8791_v12  ;;  %v19643_v62 = vld [vmem:[%s24672_s0 + $0x180] sm:$0xff]   ;;  %v2151_v3 = vsel %vm2114_vm2, %v2148_v60, %v2150_v31 }
 0x33b   :  { %15046 = vmatprep.mubr.msk.bf16.mxu1 %vm19810_vm0, %v19809_v0  ;;  %16302 = vmatprep.mubr.msk.bf16.mxu0 %vm19810_vm0, %v19809_v0  ;;  %v8794_v52 = vrot.slane %v19643_v62, 1  ;;  %v2154_v62 = vrot.slane %v19646_v58, 1 }
 0x33d   :  { %v8795_v12 = vsel %vm2114_vm2, %v8792_v1, %v8794_v52  ;;  %v2153_v1 = vsel %vm2114_vm2, %v2150_v31, %v2152_v10 }
 0x342   :  { %15047 = vmatmul.mubr.bf16.gmra.mrb[64].mxu1 %v2149_v17  ;;  %16303 = vmatmul.mubr.bf16.gmra.mrb[20].mxu0 %v8793_v30  ;;  %v19645_v17 = vld [vmem:[%s24672_s0 + $0x188] sm:$0xff]  }
 0x343   :  { %15050 = vmatprep.mubr.msk.bf16.mxu1 %vm19810_vm0, %v19809_v0  ;;  %16306 = vmatprep.mubr.msk.bf16.mxu0 %vm19810_vm0, %v19809_v0  ;;  %v8796_v60 = vrot.slane %v19645_v17, 1  ;;  %v8800_v17 = vrot.slane %v19648_v21, 1 }
 0x345   :  { %v8797_v30 = vsel %vm2114_vm2, %v8794_v52, %v8796_v60  ;;  %v2155_v52 = vsel %vm2114_vm2, %v2152_v10, %v2154_v62  ;;  %v19649_v10 = vld [vmem:[%s24672_s0 + $0x1a0] sm:$0xff]  }
 0x34a   :  { %15051 = vmatmul.mubr.bf16.gmra.mrb[68].mxu1 %v2151_v3  ;;  %16307 = vmatmul.mubr.bf16.gmra.mrb[24].mxu0 %v8795_v12  ;;  %v19647_v3 = vld [vmem:[%s24672_s0 + $0x190] sm:$0xff]  }
 0x34b   :  { %15054 = vmatprep.mubr.msk.bf16.mxu1 %vm19810_vm0, %v19809_v0  ;;  %16310 = vmatprep.mubr.msk.bf16.mxu0 %vm19810_vm0, %v19809_v0  ;;  %v8798_v31 = vrot.slane %v19647_v3, 1  ;;  %v19650_v3 = vld [vmem:[%s24672_s0 + $0x1a8] sm:$0xff]  }
 0x34d   :  { %v8799_v12 = vsel %vm2114_vm2, %v8796_v60, %v8798_v31  ;;  %v8802_v60 = vrot.slane %v19649_v10, 1 }
 0x34f   :  { %v8803_v58 = vsel %vm2114_vm2, %v8800_v17, %v8802_v60 }
 0x352   :  { %15055 = vmatmul.mubr.bf16.gmra.mrb[72].mxu1 %v2153_v1  ;;  %16311 = vmatmul.mubr.bf16.gmra.mrb[28].mxu0 %v8797_v30  ;;  %v8801_v1 = vsel %vm2114_vm2, %v8798_v31, %v8800_v17  ;;  %v19372_v30 = vld [vmem:[%s24672_s0 + $0x144] sm:$0xff]   ;;  %v8804_v31 = vrot.slane %v19650_v3, 1  ;;  %v19384_v17 = vld [vmem:[%s24671_s1 + $0x190] sm:$0xff]   ;;  %v19652_v3 = vld [vmem:[%s24672_s0 + $0x1b8] sm:$0xff]  }
 0x353   :  { %15058 = vmatprep.mubr.msk.bf16.mxu1 %vm19810_vm0, %v19809_v0  ;;  %16314 = vmatprep.mubr.msk.bf16.mxu0 %vm19810_vm0, %v19809_v0 }
 0x354   :  { %v8805_v21 = vsel %vm2114_vm2, %v8802_v60, %v8804_v31  ;;  %v19389_v60 = vld [vmem:[%s24671_s1 + $0x198] sm:$0xff]  }
 0x35a   :  { %15059 = vmatmul.mubr.bf16.gmra.mrb[76].mxu1 %v2155_v52  ;;  %16315 = vmatmul.mubr.bf16.gmra.mrb[32].mxu0 %v8799_v12  ;;  %v19379_v52 = vld [vmem:[%s24671_s1 + $0x188] sm:$0xff]  }
 0x35b   :  { %15062 = vmatprep.mubr.msk.bf16.mxu1 %vm19810_vm0, %v19809_v0  ;;  %16318 = vmatprep.mubr.msk.bf16.mxu0 %vm19810_vm0, %v19809_v0  ;;  %v19374_v12 = vld [vmem:[%s24672_s0 + $0x14c] sm:$0xff]  }
 0x362   :  { %15063 = vmatmul.mubr.bf16.gmra.mrb[80].mxu1 %v2154_v62  ;;  %16319 = vmatmul.mubr.bf16.gmra.mrb[36].mxu0 %v8801_v1  ;;  %v19375_v62 = vld [vmem:[%s24671_s1 + $0x180] sm:$0xff]   ;;  %v19651_v1 = vld [vmem:[%s24672_s0 + $0x1b0] sm:$0xff]  }
 0x363   :  { %15082 = vmatprep.mubr.msk.bf16.mxu1 %vm19810_vm0, %v19809_v0  ;;  %16322 = vmatprep.mubr.msk.bf16.mxu0 %vm19810_vm0, %v19809_v0  ;;  %v8806_v10 = vrot.slane %v19651_v1, 1  ;;  %v19653_v1 = vld [vmem:[%s24672_s0 + $0x1c0] sm:$0xff]  }
 0x36a   :  { %15083 = vmatmul.mubr.bf16.vlgmr.msra.gmra.mrb[0].mxu1 %v19372_v30  ;;  %16323 = vmatmul.mubr.bf16.gmra.mrb[40].mxu0 %v8803_v58  ;;  %v19376_v30 = vld [vmem:[%s24672_s0 + $0x154] sm:$0xff]   ;;  %v8807_v58 = vsel %vm2114_vm2, %v8804_v31, %v8806_v10  ;;  %v8808_v31 = vrot.slane %v19652_v3, 1 }
 0x36b   :  { %15086 = vmatprep.mubr.msk.bf16.mxu1 %vm19810_vm0, %v19809_v0  ;;  %16326 = vmatprep.mubr.msk.bf16.mxu0 %vm19810_vm0, %v19809_v0 }
 0x36c   :  { %15167 = vmatpush3.bf16.msra.mxu1 %v19375_v62  ;;  %v19394_v62 = vld [vmem:[%s24671_s1 + $0x1a0] sm:$0xff]  }
 0x36d   :  { %15168 = vmatprep.subr.bf16.mxu1 %v19809_v0 }
 0x370   :  { %15169 = vmatpush3.bf16.msra.mxu1 %v19379_v52  ;;  %v19399_v52 = vld [vmem:[%s24671_s1 + $0x1a8] sm:$0xff]  }
 0x371   :  { %15170 = vmatprep.subr.bf16.mxu1 %v19809_v0 }
 0x372   :  { %15087 = vmatmul.mubr.bf16.gmra.mrb[4].mxu1 %v19374_v12  ;;  %16327 = vmatmul.mubr.bf16.gmra.mrb[44].mxu0 %v8805_v21  ;;  %v19377_v12 = vld [vmem:[%s24672_s0 + $0x15c] sm:$0xff]   ;;  %v8809_v21 = vsel %vm2114_vm2, %v8806_v10, %v8808_v31  ;;  %v8810_v10 = vrot.slane %v19653_v1, 1 }
 0x373   :  { %15090 = vmatprep.mubr.msk.bf16.mxu1 %vm19810_vm0, %v19809_v0  ;;  %16330 = vmatprep.mubr.msk.bf16.mxu0 %vm19810_vm0, %v19809_v0 }
 0x374   :  { %15171 = vmatpush3.bf16.msra.mxu1 %v19384_v17  ;;  %v19403_v17 = vld [vmem:[%s24671_s1 + $0x1b0] sm:$0xff]  }
 0x375   :  { %15172 = vmatprep.subr.bf16.mxu1 %v19809_v0 }
 0x378   :  { %15173 = vmatpush3.bf16.msra.mxu1 %v19389_v60  ;;  %v19408_v60 = vld [vmem:[%s24671_s1 + $0x1b8] sm:$0xff]  }
 0x379   :  { %15174 = vmatprep.subr.bf16.mxu1 %v19809_v0 }
 0x37a   :  { %15091 = vmatmul.mubr.bf16.gmra.mrb[8].mxu1 %v19376_v30  ;;  %16331 = vmatmul.mubr.bf16.gmra.mrb[48].mxu0 %v8807_v58  ;;  %v19380_v30 = vld [vmem:[%s24672_s0 + $0x164] sm:$0xff]   ;;  %v8811_v58 = vsel %vm2114_vm2, %v8808_v31, %v8810_v10  ;;  %v19381_v31 = vld [vmem:[%s24672_s0 + $0x16c] sm:$0xff]  }
 0x37b   :  { %15094 = vmatprep.mubr.msk.bf16.mxu1 %vm19810_vm0, %v19809_v0  ;;  %16334 = vmatprep.mubr.msk.bf16.mxu0 %vm19810_vm0, %v19809_v0 }
 0x37c   :  { %15175 = vmatpush3.bf16.msra.mxu1 %v19394_v62  ;;  %v19654_v62 = vld [vmem:[%s24672_s0 + $0x1c8] sm:$0xff]  }
 0x37d   :  { %15176 = vmatprep.subr.bf16.mxu1 %v19809_v0  ;;  %v8812_v3 = vrot.slane %v19654_v62, 1  ;;  %v19657_v62 = vld [vmem:[%s24672_s0 + $0x1e0] sm:$0xff]  }
 0x380   :  { %15177 = vmatpush3.bf16.msra.mxu1 %v19399_v52  ;;  %v8813_v52 = vsel %vm2114_vm2, %v8810_v10, %v8812_v3  ;;  %v19656_v10 = vld [vmem:[%s24672_s0 + $0x1d8] sm:$0xff]  }
 0x381   :  { %15178 = vmatprep.subr.bf16.mxu1 %v19809_v0 }
 0x382   :  { %15095 = vmatmul.mubr.bf16.gmra.mrb[12].mxu1 %v19377_v12  ;;  %16335 = vmatmul.mubr.bf16.gmra.mrb[52].mxu0 %v8809_v21  ;;  %v19655_v12 = vld [vmem:[%s24672_s0 + $0x1d0] sm:$0xff]  }
 0x383   :  { %15098 = vmatprep.mubr.msk.bf16.mxu1 %vm19810_vm0, %v19809_v0  ;;  %16338 = vmatprep.mubr.msk.bf16.mxu0 %vm19810_vm0, %v19809_v0  ;;  %v8814_v21 = vrot.slane %v19655_v12, 1  ;;  %v8820_v12 = vrot.slane %v21356_v51, 1  ;;  %v19390_v51 = vld [vmem:[%s24672_s0 + $0x194] sm:$0xff]  }
 0x384   :  { %15179 = vmatpush3.bf16.msra.mxu1 %v19403_v17  ;;  %v19383_v17 = vld [vmem:[%s24672_s0 + $0x174] sm:$0xff]  }
 0x385   :  { %15180 = vmatprep.subr.bf16.mxu1 %v19809_v0  ;;  %v8815_v1 = vsel %vm2114_vm2, %v8812_v3, %v8814_v21  ;;  %v8818_v3 = vrot.slane %v19657_v62, 1 }
 0x388   :  { %15181 = vmatpush3.bf16.msra.mxu1 %v19408_v60  ;;  %v8816_v60 = vrot.slane %v19656_v10, 1  ;;  %v19658_v10 = vld [vmem:[%s24672_s0 + $0x1ec] sm:$0xf] }
 0x389   :  { %15266 = vmatprep.subr.bf16.mxu1 %v19809_v0 }
 0x38a   :  { %15099 = vmatmul.mubr.bf16.gmra.mrb[16].mxu1 %v19380_v30  ;;  %16339 = vmatmul.mubr.bf16.gmra.mrb[56].mxu0 %v8811_v58  ;;  %v19385_v30 = vld [vmem:[%s24672_s0 + $0x17c] sm:$0xff]   ;;  %v8817_v58 = vsel %vm2114_vm2, %v8814_v21, %v8816_v60  ;;  %v19388_v21 = vld [vmem:[%s24672_s0 + $0x18c] sm:$0xff]  }
 0x38b   :  { %15102 = vmatprep.mubr.msk.bf16.mxu1 %vm19810_vm0, %v19809_v0  ;;  %16342 = vmatprep.mubr.msk.bf16.mxu0 %vm19810_vm0, %v19809_v0 }
 0x392   :  { %15103 = vmatmul.mubr.bf16.gmra.mrb[20].mxu1 %v19381_v31  ;;  %16343 = vmatmul.mubr.bf16.gmra.mrb[60].mxu0 %v8813_v52  ;;  %v19386_v31 = vld [vmem:[%s24672_s0 + $0x184] sm:$0xff]   ;;  %v8819_v52 = vsel %vm2114_vm2, %v8816_v60, %v8818_v3 }
 0x393   :  { %15106 = vmatprep.mubr.msk.bf16.mxu1 %vm19810_vm0, %v19809_v0  ;;  %16346 = vmatprep.mubr.msk.bf16.mxu0 %vm19810_vm0, %v19809_v0 }
 0x39a   :  { %15107 = vmatmul.mubr.bf16.gmra.mrb[24].mxu1 %v19383_v17  ;;  %16347 = vmatmul.mubr.bf16.gmra.mrb[64].mxu0 %v8815_v1  ;;  %v8821_v17 = vsel %vm2114_vm2, %v8818_v3, %v8820_v12  ;;  %v9132_v1 = vld [vmem:[%s24672_s0 + $0x1e8] sm:$0x8]  ;;  %v19391_v3 = vld [vmem:[%s24672_s0 + $0x19c] sm:$0xff]  }
 0x39b   :  { %15110 = vmatprep.mubr.msk.bf16.mxu1 %vm19810_vm0, %v19809_v0  ;;  %16350 = vmatprep.mubr.msk.bf16.mxu0 %vm19810_vm0, %v19809_v0  ;;  %v13622_v60 = vcombine.low %v9132_v1, %v19658_v10  ;;  %v19395_v1 = vld [vmem:[%s24672_s0 + $0x1a4] sm:$0xff]   ;;  %v19402_v10 = vld [vmem:[%s24671_s1 + $0x4d0] sm:$0xff]  }
 0x3a2   :  { %15111 = vmatmul.mubr.bf16.gmra.mrb[28].mxu1 %v19385_v30  ;;  %16351 = vmatmul.mubr.bf16.gmra.mrb[68].mxu0 %v8817_v58  ;;  %v9153_v30 = vrot.slane %v13622_v60, 3  ;;  %v19659_v58 = vld [vmem:[%s24672_s0 + $0x1f0] sm:$0xff]   ;;  %v19661_v60 = vld [vmem:[%s24672_s0 + $0x200] sm:$0xff]  }
 0x3a3   :  { %15114 = vmatprep.mubr.msk.bf16.mxu1 %vm19810_vm0, %v19809_v0  ;;  %16354 = vmatprep.mubr.msk.bf16.mxu0 %vm19810_vm0, %v19809_v0  ;;  %v9154_v62 = vrot.slane %v19659_v58, 3  ;;  %v19407_v58 = vld [vmem:[%s24671_s1 + $0x4d8] sm:$0xff]  }
 0x3aa   :  { %15115 = vmatmul.mubr.bf16.gmra.mrb[32].mxu1 %v19386_v31  ;;  %16355 = vmatmul.mubr.bf16.gmra.mrb[72].mxu0 %v8819_v52  ;;  %v9155_v31 = vsel %vm6680_vm3, %v9153_v30, %v9154_v62  ;;  %v19393_v52 = vld [vmem:[%s24671_s1 + $0x4c0] sm:$0xff]   ;;  %v9158_v30 = vrot.slane %v19661_v60, 3 }
 0x3ab   :  { %15118 = vmatprep.mubr.msk.bf16.mxu1 %vm19810_vm0, %v19809_v0  ;;  %16358 = vmatprep.mubr.msk.bf16.mxu0 %vm19810_vm0, %v19809_v0 }
 0x3b2   :  { %15119 = vmatmul.mubr.bf16.gmra.mrb[36].mxu1 %v19388_v21  ;;  %16359 = vmatmul.mubr.bf16.gmra.mrb[76].mxu0 %v8821_v17  ;;  %v19397_v17 = vld [vmem:[%s24671_s1 + $0x4c8] sm:$0xff]  }
 0x3b3   :  { %15122 = vmatprep.mubr.msk.bf16.mxu1 %vm19810_vm0, %v19809_v0  ;;  %16362 = vmatprep.mubr.msk.bf16.mxu0 %vm19810_vm0, %v19809_v0 }
 0x3ba   :  { %15123 = vmatmul.mubr.bf16.gmra.mrb[40].mxu1 %v19390_v51  ;;  %16363 = vmatmul.mubr.bf16.gmra.mrb[80].mxu0 %v8820_v12  ;;  %v19660_v12 = vld [vmem:[%s24672_s0 + $0x1f8] sm:$0xff]  }
 0x3bb   :  { %15126 = vmatprep.mubr.msk.bf16.mxu1 %vm19810_vm0, %v19809_v0  ;;  %16382 = vmatprep.mubr.msk.bf16.mxu0 %vm19810_vm0, %v19809_v0  ;;  %v9156_v21 = vrot.slane %v19660_v12, 3 }
 0x3bd   :  { %v9157_v51 = vsel %vm6680_vm3, %v9154_v62, %v9156_v21  ;;  %v19396_v62 = vld [vmem:[%s24672_s0 + $0x1ac] sm:$0xff]  }
 0x3c2   :  { %15127 = vmatmul.mubr.bf16.gmra.mrb[44].mxu1 %v19391_v3  ;;  %16383 = vmatmul.mubr.bf16.vlgmr.msra.gmra.mrb[0].mxu0 %v9155_v31  ;;  %v9159_v3 = vsel %vm6680_vm3, %v9156_v21, %v9158_v30  ;;  %v19412_v31 = vld [vmem:[%s24671_s1 + $0x4e0] sm:$0xff]   ;;  %v19417_v21 = vld [vmem:[%s24671_s1 + $0x4e8] sm:$0xff]  }
 0x3c3   :  { %15130 = vmatprep.mubr.msk.bf16.mxu1 %vm19810_vm0, %v19809_v0  ;;  %16467 = vmatpush3.bf16.msra.mxu0 %v19393_v52  ;;  %v19662_v52 = vld [vmem:[%s24672_s0 + $0x208] sm:$0xff]  }
 0x3c4   :  { %16386 = vmatprep.mubr.msk.bf16.mxu0 %vm19810_vm0, %v19809_v0  ;;  %16468 = vmatprep.subr.bf16.mxu0 %v19809_v0  ;;  %v9160_v12 = vrot.slane %v19662_v52, 3  ;;  %v19401_v52 = vld [vmem:[%s24672_s0 + $0x1c4] sm:$0xff]  }
 0x3c7   :  { %16469 = vmatpush3.bf16.msra.mxu0 %v19397_v17  ;;  %v19398_v17 = vld [vmem:[%s24672_s0 + $0x1b4] sm:$0xff]  }
 0x3c8   :  { %16470 = vmatprep.subr.bf16.mxu0 %v19809_v0 }
 0x3ca   :  { %15131 = vmatmul.mubr.bf16.gmra.mrb[48].mxu1 %v19395_v1  ;;  %16387 = vmatmul.mubr.bf16.gmra.mrb[4].mxu0 %v9157_v51  ;;  %v9161_v1 = vsel %vm6680_vm3, %v9158_v30, %v9160_v12  ;;  %v19421_v51 = vld [vmem:[%s24671_s1 + $0x4f0] sm:$0xff]   ;;  %v19426_v30 = vld [vmem:[%s24671_s1 + $0x4f8] sm:$0xff]  }
 0x3cb   :  { %15134 = vmatprep.mubr.msk.bf16.mxu1 %vm19810_vm0, %v19809_v0  ;;  %16390 = vmatprep.mubr.msk.bf16.mxu0 %vm19810_vm0, %v19809_v0 }
 0x3cc   :  { %16471 = vmatpush3.bf16.msra.mxu0 %v19402_v10  ;;  %v19663_v10 = vld [vmem:[%s24672_s0 + $0x210] sm:$0xff]  }
 0x3cd   :  { %16472 = vmatprep.subr.bf16.mxu0 %v19809_v0  ;;  %v9162_v60 = vrot.slane %v19663_v10, 3  ;;  %v9168_v10 = vrot.slane %v21498_v16, 3  ;;  %v19406_v16 = vld [vmem:[%s24672_s0 + $0x1dc] sm:$0xff]  }
 0x3d0   :  { %16473 = vmatpush3.bf16.msra.mxu0 %v19407_v58  ;;  %v19400_v58 = vld [vmem:[%s24672_s0 + $0x1bc] sm:$0xff]  }
 0x3d1   :  { %16474 = vmatprep.subr.bf16.mxu0 %v19809_v0 }
 0x3d2   :  { %15135 = vmatmul.mubr.bf16.gmra.mrb[52].mxu1 %v19396_v62  ;;  %16391 = vmatmul.mubr.bf16.gmra.mrb[8].mxu0 %v9159_v3  ;;  %v9163_v62 = vsel %vm6680_vm3, %v9160_v12, %v9162_v60  ;;  %v19664_v3 = vld [vmem:[%s24672_s0 + $0x218] sm:$0xff]  }
 0x3d3   :  { %15138 = vmatprep.mubr.msk.bf16.mxu1 %vm19810_vm0, %v19809_v0  ;;  %16394 = vmatprep.mubr.msk.bf16.mxu0 %vm19810_vm0, %v19809_v0 }
 0x3d4   :  { %16475 = vmatpush3.bf16.msra.mxu0 %v19412_v31  ;;  %v9164_v31 = vrot.slane %v19664_v3, 3  ;;  %v9172_v3 = vrot.slane %v21533_v42, 3 }
 0x3d5   :  { %16476 = vmatprep.subr.bf16.mxu0 %v19809_v0 }
 0x3d6   :  { %v9165_v12 = vsel %vm6680_vm3, %v9162_v60, %v9164_v31  ;;  %v19405_v60 = vld [vmem:[%s24672_s0 + $0x1d4] sm:$0xff]  }
 0x3d8   :  { %16477 = vmatpush3.bf16.msra.mxu0 %v19417_v21  ;;  %v19665_v21 = vld [vmem:[%s24672_s0 + $0x220] sm:$0xff]  }
 0x3d9   :  { %16478 = vmatprep.subr.bf16.mxu0 %v19809_v0 }
 0x3da   :  { %15139 = vmatmul.mubr.bf16.gmra.mrb[56].mxu1 %v19398_v17  ;;  %16395 = vmatmul.mubr.bf16.gmra.mrb[12].mxu0 %v9161_v1  ;;  %v9166_v17 = vrot.slane %v19665_v21, 3  ;;  %v19404_v1 = vld [vmem:[%s24672_s0 + $0x1cc] sm:$0xff]  }
 0x3db   :  { %15142 = vmatprep.mubr.msk.bf16.mxu1 %vm19810_vm0, %v19809_v0  ;;  %16398 = vmatprep.mubr.msk.bf16.mxu0 %vm19810_vm0, %v19809_v0 }
 0x3dc   :  { %16479 = vmatpush3.bf16.msra.mxu0 %v19421_v51  ;;  %v9167_v51 = vsel %vm6680_vm3, %v9164_v31, %v9166_v17  ;;  %v19410_v31 = vld [vmem:[%s24672_s0 + $0x1e4] sm:$0xfc]  }
 0x3dd   :  { %16480 = vmatprep.subr.bf16.mxu0 %v19809_v0  ;;  %v3101_v42 = vrot.slane %v19410_v31, 2  ;;  %v9178_v31 = vrot.slane %v21583_v33, 3  ;;  %v19432_v33 = vld [vmem:[%s24671_s1 + $0x1e0] sm:$0xff]  }
 0x3e0   :  { %16481 = vmatpush3.bf16.msra.mxu0 %v19426_v30  ;;  %v9169_v30 = vsel %vm6680_vm3, %v9166_v17, %v9168_v10  ;;  %v9174_v17 = vrot.slane %v21546_v22, 3  ;;  %v9176_v22 = vrot.slane %v21564_v20, 3  ;;  %v19423_v20 = vld [vmem:[%s24671_s1 + $0x1d0] sm:$0xff]  }
 0x3e1   :  { %16566 = vmatprep.subr.bf16.mxu0 %v19809_v0 }
 0x3e2   :  { %15143 = vmatmul.mubr.bf16.gmra.mrb[60].mxu1 %v19400_v58  ;;  %16399 = vmatmul.mubr.bf16.gmra.mrb[16].mxu0 %v9163_v62  ;;  %v9170_v58 = vrot.slane %v21520_v32, 3  ;;  %v19409_v32 = vld [vmem:[%s24672_s0 + $0x1e4] ss:$0 sps:$4 sm:$0xff]  }
 0x3e3   :  { %15146 = vmatprep.mubr.msk.bf16.mxu1 %vm19810_vm0, %v19809_v0  ;;  %16402 = vmatprep.mubr.msk.bf16.mxu0 %vm19810_vm0, %v19809_v0 }
 0x3e4   :  { %v9171_v62 = vsel %vm6680_vm3, %v9168_v10, %v9170_v58  ;;  %v9175_v10 = vsel %vm6680_vm3, %v9172_v3, %v9174_v17 }
 0x3ea   :  { %15147 = vmatmul.mubr.bf16.gmra.mrb[64].mxu1 %v19401_v52  ;;  %16403 = vmatmul.mubr.bf16.gmra.mrb[20].mxu0 %v9165_v12  ;;  %v19411_v52 = vld [vmem:[%s24672_s0 + $0x1ec] sm:$0xff]   ;;  %v9173_v12 = vsel %vm6680_vm3, %v9170_v58, %v9172_v3  ;;  %v9177_v3 = vsel %vm6680_vm3, %v9174_v17, %v9176_v22 }
 0x3eb   :  { %15150 = vmatprep.mubr.msk.bf16.mxu1 %vm19810_vm0, %v19809_v0  ;;  %16406 = vmatprep.mubr.msk.bf16.mxu0 %vm19810_vm0, %v19809_v0  ;;  %v3102_v21 = vrot.slane %v19411_v52, 2  ;;  %v19418_v58 = vld [vmem:[%s24671_s1 + $0x1c8] sm:$0xff]   ;;  %v19428_v52 = vld [vmem:[%s24671_s1 + $0x1d8] sm:$0xff]  }
 0x3f2   :  { %15151 = vmatmul.mubr.bf16.gmra.mrb[68].mxu1 %v19404_v1  ;;  %16407 = vmatmul.mubr.bf16.gmra.mrb[24].mxu0 %v9167_v51  ;;  %v3103_v1 = vsel %vm248_vm1, %v3101_v42, %v3102_v21  ;;  %v19413_v51 = vld [vmem:[%s24672_s0 + $0x1f4] sm:$0xff]   ;;  %v19416_v42 = vld [vmem:[%s24672_s0 + $0x204] sm:$0xff]  }
 0x3f3   :  { %15154 = vmatprep.mubr.msk.bf16.mxu1 %vm19810_vm0, %v19809_v0  ;;  %16410 = vmatprep.mubr.msk.bf16.mxu0 %vm19810_vm0, %v19809_v0  ;;  %v3108_v17 = vrot.slane %v19416_v42, 2 }
 0x3fa   :  { %15155 = vmatmul.mubr.bf16.gmra.mrb[72].mxu1 %v19405_v60  ;;  %16411 = vmatmul.mubr.bf16.gmra.mrb[28].mxu0 %v9169_v30  ;;  %v19414_v60 = vld [vmem:[%s24671_s1 + $0x1c0] sm:$0xff]   ;;  %v3104_v30 = vrot.slane %v19413_v51, 2  ;;  %v19437_v51 = vld [vmem:[%s24671_s1 + $0x1e8] sm:$0xff]  }
 0x3fb   :  { %15158 = vmatprep.mubr.msk.bf16.mxu1 %vm19810_vm0, %v19809_v0  ;;  %16414 = vmatprep.mubr.msk.bf16.mxu0 %vm19810_vm0, %v19809_v0 }
 0x402   :  { %15159 = vmatmul.mubr.bf16.gmra.mrb[76].mxu1 %v19406_v16  ;;  %16415 = vmatmul.mubr.bf16.gmra.mrb[32].mxu0 %v9171_v62  ;;  %v3105_v16 = vsel %vm248_vm1, %v3102_v21, %v3104_v30  ;;  %v19415_v62 = vld [vmem:[%s24672_s0 + $0x1fc] sm:$0xff]   ;;  %v9179_v21 = vsel %vm6680_vm3, %v9176_v22, %v9178_v31 }
 0x403   :  { %15162 = vmatprep.mubr.msk.bf16.mxu1 %vm19810_vm0, %v19809_v0  ;;  %16418 = vmatprep.mubr.msk.bf16.mxu0 %vm19810_vm0, %v19809_v0 }
 0x40a   :  { %15163 = vmatmul.mubr.bf16.gmra.mrb[80].mxu1 %v19409_v32  ;;  %16419 = vmatmul.mubr.bf16.gmra.mrb[36].mxu0 %v9173_v12  ;;  %v3106_v32 = vrot.slane %v19415_v62, 2 }
 0x40b   :  { %15182 = vmatprep.mubr.msk.bf16.mxu1 %vm19810_vm0, %v19809_v0  ;;  %16422 = vmatprep.mubr.msk.bf16.mxu0 %vm19810_vm0, %v19809_v0 }
 0x40c   :  { %v3107_v12 = vsel %vm248_vm1, %v3104_v30, %v3106_v32 }
 0x412   :  { %15183 = vmatmul.mubr.bf16.vlgmr.msra.gmra.mrb[0].mxu1 %v3103_v1  ;;  %16423 = vmatmul.mubr.bf16.gmra.mrb[40].mxu0 %v9175_v10  ;;  %v9180_v1 = vrot.slane %v21603_v43, 3  ;;  %v3109_v10 = vsel %vm248_vm1, %v3106_v32, %v3108_v17  ;;  %v19441_v43 = vld [vmem:[%s24671_s1 + $0x1f0] sm:$0xff]   ;;  %v9184_v32 = vrot.slane %v21651_v2, 3 }
 0x413   :  { %15186 = vmatprep.mubr.msk.bf16.mxu1 %vm19810_vm0, %v19809_v0  ;;  %16426 = vmatprep.mubr.msk.bf16.mxu0 %vm19810_vm0, %v19809_v0 }
 0x414   :  { %15267 = vmatpush3.bf16.msra.mxu1 %v19414_v60  ;;  %v19419_v60 = vld [vmem:[%s24672_s0 + $0x20c] sm:$0xff]   ;;  %v9181_v30 = vsel %vm6680_vm3, %v9178_v31, %v9180_v1 }
 0x415   :  { %15268 = vmatprep.subr.bf16.mxu1 %v19809_v0  ;;  %v3110_v22 = vrot.slane %v19419_v60, 2 }
 0x417   :  { %v3111_v62 = vsel %vm248_vm1, %v3108_v17, %v3110_v22 }
 0x418   :  { %15269 = vmatpush3.bf16.msra.mxu1 %v19418_v58  ;;  %v9182_v58 = vrot.slane %v21627_v15, 3 }
 0x419   :  { %15270 = vmatprep.subr.bf16.mxu1 %v19809_v0 }
 0x41a   :  { %15187 = vmatmul.mubr.bf16.gmra.mrb[4].mxu1 %v3105_v16  ;;  %16427 = vmatmul.mubr.bf16.gmra.mrb[44].mxu0 %v9177_v3  ;;  %v19447_v16 = vld [vmem:[%s24671_s1 + $0x1f8] sm:$0xff]  }
 0x41b   :  { %15190 = vmatprep.mubr.msk.bf16.mxu1 %vm19810_vm0, %v19809_v0  ;;  %16430 = vmatprep.mubr.msk.bf16.mxu0 %vm19810_vm0, %v19809_v0  ;;  %v19420_v3 = vld [vmem:[%s24672_s0 + $0x214] sm:$0xff]  }
 0x41c   :  { %15271 = vmatpush3.bf16.msra.mxu1 %v19423_v20  ;;  %v9183_v20 = vsel %vm6680_vm3, %v9180_v1, %v9182_v58  ;;  %v3112_v15 = vrot.slane %v19420_v3, 2  ;;  %v19429_v3 = vld [vmem:[%s24672_s0 + $0x23c] sm:$0xff]  }
 0x41d   :  { %15272 = vmatprep.subr.bf16.mxu1 %v19809_v0 }
 0x41e   :  { %v3113_v31 = vsel %vm248_vm1, %v3110_v22, %v3112_v15  ;;  %v19427_v22 = vld [vmem:[%s24672_s0 + $0x234] sm:$0xff]  }
 0x420   :  { %15273 = vmatpush3.bf16.msra.mxu1 %v19428_v52  ;;  %v19422_v52 = vld [vmem:[%s24672_s0 + $0x21c] sm:$0xff]  }
 0x421   :  { %15274 = vmatprep.subr.bf16.mxu1 %v19809_v0  ;;  %v3114_v42 = vrot.slane %v19422_v52, 2  ;;  %v19430_v52 = vld [vmem:[%s24672_s0 + $0x244] sm:$0xff]  }
 0x422   :  { %15191 = vmatmul.mubr.bf16.gmra.mrb[8].mxu1 %v3107_v12  ;;  %16431 = vmatmul.mubr.bf16.gmra.mrb[48].mxu0 %v9179_v21  ;;  %v9185_v12 = vsel %vm6680_vm3, %v9182_v58, %v9184_v32  ;;  %v9186_v21 = vrot.slane %v21675_v48, 3 }
 0x423   :  { %15194 = vmatprep.mubr.msk.bf16.mxu1 %vm19810_vm0, %v19809_v0  ;;  %16434 = vmatprep.mubr.msk.bf16.mxu0 %vm19810_vm0, %v19809_v0  ;;  %v3115_v2 = vsel %vm248_vm1, %v3112_v15, %v3114_v42  ;;  %v3122_v15 = vrot.slane %v19429_v3, 2 }
 0x424   :  { %15275 = vmatpush3.bf16.msra.mxu1 %v19432_v33  ;;  %v19424_v33 = vld [vmem:[%s24672_s0 + $0x224] sm:$0xff]   ;;  %v9187_v17 = vsel %vm6680_vm3, %v9184_v32, %v9186_v21  ;;  %v9526_v32 = vshrl.u32 %v21760_v27, 16 }
 0x425   :  { %15276 = vmatprep.subr.bf16.mxu1 %v19809_v0  ;;  %v3116_v1 = vrot.slane %v19424_v33, 2  ;;  %v24765_v33 = vshll.u32 %v20914_v57, 16 }
 0x427   :  { %v3117_v48 = vsel %vm248_vm1, %v3114_v42, %v3116_v1 }
 0x428   :  { %15277 = vmatpush3.bf16.msra.mxu1 %v19437_v51  ;;  %v9188_v51 = vrot.slane %v21692_v36, 3 }
 0x429   :  { %15278 = vmatprep.subr.bf16.mxu1 %v19809_v0 }
 0x42a   :  { %15195 = vmatmul.mubr.bf16.gmra.mrb[12].mxu1 %v3109_v10  ;;  %16435 = vmatmul.mubr.bf16.gmra.mrb[52].mxu0 %v9181_v30  ;;  %v19425_v10 = vld [vmem:[%s24672_s0 + $0x22c] sm:$0xff]   ;;  %v9189_v60 = vsel %vm6680_vm3, %v9186_v21, %v9188_v51  ;;  %v9528_v21 = vrot.slane %v9526_v32, 1  ;;  %v24769_v32 = vshll.u32 %v20953_v5, 16 }
 0x42b   :  { %15198 = vmatprep.mubr.msk.bf16.mxu1 %vm19810_vm0, %v19809_v0  ;;  %16438 = vmatprep.mubr.msk.bf16.mxu0 %vm19810_vm0, %v19809_v0  ;;  %v3118_v30 = vrot.slane %v19425_v10, 2  ;;  %v19433_v10 = vld [vmem:[%s24672_s0 + $0x24c] sm:$0xff]  }
 0x42c   :  { %15279 = vmatpush3.bf16.msra.mxu1 %v19441_v43  ;;  %v9190_v43 = vrot.slane %v21708_v56, 3 }
 0x42d   :  { %15280 = vmatprep.subr.bf16.mxu1 %v19809_v0  ;;  %v3119_v36 = vsel %vm248_vm1, %v3116_v1, %v3118_v30 }
 0x42e   :  { %v9191_v58 = vsel %vm6680_vm3, %v9188_v51, %v9190_v43 }
 0x430   :  { %15281 = vmatpush3.bf16.msra.mxu1 %v19447_v16  ;;  %v3120_v16 = vrot.slane %v19427_v22, 2 }
 0x431   :  { %15366 = vmatprep.subr.bf16.mxu1 %v19809_v0 }
 0x432   :  { %15199 = vmatmul.mubr.bf16.gmra.mrb[16].mxu1 %v3111_v62  ;;  %16439 = vmatmul.mubr.bf16.gmra.mrb[56].mxu0 %v9183_v20  ;;  %v9192_v62 = vrot.slane %v21724_v47, 3  ;;  %v3121_v56 = vsel %vm248_vm1, %v3118_v30, %v3120_v16  ;;  %v9529_v47 = vshll.u32 %v21760_v27, 16  ;;  %v3124_v27 = vrot.slane %v19430_v52, 2 }
 0x433   :  { %15202 = vmatprep.mubr.msk.bf16.mxu1 %vm19810_vm0, %v19809_v0  ;;  %16442 = vmatprep.mubr.msk.bf16.mxu0 %vm19810_vm0, %v19809_v0  ;;  %v24766_v30 = vshrl.u32 %v20930_v24, 16 }
 0x434   :  { %v9193_v20 = vsel %vm6680_vm3, %v9190_v43, %v9192_v62 }
 0x435   :  { %v9537_v43 = vrot.slane %v24766_v30, 1 }
 0x43a   :  { %15203 = vmatmul.mubr.bf16.gmra.mrb[20].mxu1 %v3113_v31  ;;  %16443 = vmatmul.mubr.bf16.gmra.mrb[60].mxu0 %v9185_v12  ;;  %v3123_v31 = vsel %vm248_vm1, %v3120_v16, %v3122_v15  ;;  %v24764_v12 = vshrl.u32 %v20914_v57, 16 }
 0x43b   :  { %15206 = vmatprep.mubr.msk.bf16.mxu1 %vm19810_vm0, %v19809_v0  ;;  %16446 = vmatprep.mubr.msk.bf16.mxu0 %vm19810_vm0, %v19809_v0 }
 0x43c   :  { %v9533_v42 = vrot.slane %v24764_v12, 1 }
 0x442   :  { %15207 = vmatmul.mubr.bf16.gmra.mrb[24].mxu1 %v3115_v2  ;;  %16447 = vmatmul.mubr.bf16.gmra.mrb[64].mxu0 %v9187_v17  ;;  %v9531_v2 = vrot.slane %v9529_v47, 2  ;;  %v9534_v17 = vrot.slane %v24765_v33, 2  ;;  %v9542_v47 = vrot.slane %v24769_v32, 2  ;;  %v24770_v33 = vshrl.u32 %v20981_v7, 16 }
 0x443   :  { %15210 = vmatprep.mubr.msk.bf16.mxu1 %vm19810_vm0, %v19809_v0  ;;  %16450 = vmatprep.mubr.msk.bf16.mxu0 %vm19810_vm0, %v19809_v0 }
 0x444   :  { %v9532_v1 = vor.u32 %v9531_v2, %v9528_v21  ;;  %v9535_v51 = vor.u32 %v9534_v17, %v9533_v42  ;;  %v19436_v21 = vld [vmem:[%s24672_s0 + $0x25c] sm:$0xff]   ;;  %v9545_v17 = vrot.slane %v24770_v33, 1  ;;  %v24777_v33 = vshll.u32 %v21062_v40, 16 }
 0x446   :  { %v9536_v57 = vsel %vm7053_vm4, %v9532_v1, %v9535_v51 }
 0x44a   :  { %15211 = vmatmul.mubr.bf16.gmra.mrb[28].mxu1 %v3117_v48  ;;  %16451 = vmatmul.mubr.bf16.gmra.mrb[68].mxu0 %v9189_v60  ;;  %v3125_v48 = vsel %vm248_vm1, %v3122_v15, %v3124_v27  ;;  %v19431_v60 = vld [vmem:[%s24671_s1 + $0x500] sm:$0xff]  }
 0x44b   :  { %15214 = vmatprep.mubr.msk.bf16.mxu1 %vm19810_vm0, %v19809_v0  ;;  %16454 = vmatprep.mubr.msk.bf16.mxu0 %vm19810_vm0, %v19809_v0 }
 0x452   :  { %15215 = vmatmul.mubr.bf16.gmra.mrb[32].mxu1 %v3119_v36  ;;  %16455 = vmatmul.mubr.bf16.gmra.mrb[72].mxu0 %v9191_v58  ;;  %v24767_v36 = vshll.u32 %v20930_v24, 16  ;;  %v3126_v58 = vrot.slane %v19433_v10, 2 }
 0x453   :  { %15218 = vmatprep.mubr.msk.bf16.mxu1 %vm19810_vm0, %v19809_v0  ;;  %16458 = vmatprep.mubr.msk.bf16.mxu0 %vm19810_vm0, %v19809_v0 }
 0x454   :  { %v9538_v22 = vrot.slane %v24767_v36, 2  ;;  %v3127_v24 = vsel %vm248_vm1, %v3124_v27, %v3126_v58  ;;  %v24771_v27 = vshll.u32 %v20981_v7, 16  ;;  %v19455_v7 = vld [vmem:[%s24671_s1 + $0x528] sm:$0xff]  }
 0x456   :  { %v9539_v16 = vor.u32 %v9538_v22, %v9537_v43  ;;  %v9546_v1 = vrot.slane %v24771_v27, 2  ;;  %v24772_v43 = vshrl.u32 %v21009_v25, 16  ;;  %v24773_v22 = vshll.u32 %v21009_v25, 16  ;;  %v19464_v25 = vld [vmem:[%s24671_s1 + $0x538] sm:$0xff]  }
 0x458   :  { %v9540_v3 = vsel %vm7053_vm4, %v9535_v51, %v9539_v16  ;;  %v19450_v51 = vld [vmem:[%s24671_s1 + $0x520] sm:$0xff]   ;;  %v9547_v10 = vor.u32 %v9546_v1, %v9545_v17  ;;  %v9549_v36 = vrot.slane %v24772_v43, 1  ;;  %v9558_v17 = vrot.slane %v24777_v33, 2 }
 0x45a   :  { %15219 = vmatmul.mubr.bf16.gmra.mrb[36].mxu1 %v3121_v56  ;;  %16459 = vmatmul.mubr.bf16.gmra.mrb[76].mxu0 %v9193_v20  ;;  %v19434_v56 = vld [vmem:[%s24672_s0 + $0x254] sm:$0xff]   ;;  %v24768_v20 = vshrl.u32 %v20953_v5, 16 }
 0x45b   :  { %15222 = vmatprep.mubr.msk.bf16.mxu1 %vm19810_vm0, %v19809_v0  ;;  %16462 = vmatprep.mubr.msk.bf16.mxu0 %vm19810_vm0, %v19809_v0  ;;  %v3128_v52 = vrot.slane %v19434_v56, 2  ;;  %v19446_v5 = vld [vmem:[%s24671_s1 + $0x518] sm:$0xff]  }
 0x45c   :  { %v9541_v15 = vrot.slane %v24768_v20, 1 }
 0x45d   :  { %v3129_v42 = vsel %vm248_vm1, %v3126_v58, %v3128_v52  ;;  %v9550_v58 = vrot.slane %v24773_v22, 2  ;;  %v2978_v22 = vld [vmem:[%s24672_s0 + $0x288] sm:$0x3] }
 0x45e   :  { %v9543_v12 = vor.u32 %v9542_v47, %v9541_v15  ;;  %v24774_v15 = vshrl.u32 %v21037_v13, 16  ;;  %v24775_v47 = vshll.u32 %v21037_v13, 16  ;;  %v19442_v13 = vld [vmem:[%s24672_s0 + $0x274] sm:$0xff]  }
 0x45f   :  { %v3136_v27 = vrot.slane %v19442_v13, 2 }
 0x460   :  { %v9544_v2 = vsel %vm7053_vm4, %v9539_v16, %v9543_v12  ;;  %v9548_v30 = vsel %vm7053_vm4, %v9543_v12, %v9547_v10  ;;  %v19459_v16 = vld [vmem:[%s24671_s1 + $0x530] sm:$0xff]   ;;  %v9553_v32 = vrot.slane %v24774_v15, 1  ;;  %v3452_v15 = vld [vmem:[%s24672_s0 + $0x144] sm:$0xf] }
 0x462   :  { %15223 = vmatmul.mubr.bf16.gmra.mrb[40].mxu1 %v3123_v31  ;;  %16463 = vmatmul.mubr.bf16.gmra.mrb[80].mxu0 %v9192_v62  ;;  %v19435_v62 = vld [vmem:[%s24671_s1 + $0x508] sm:$0xff]   ;;  %v19440_v31 = vld [vmem:[%s24671_s1 + $0x510] sm:$0xff]  }
 0x463   :  { %15226 = vmatprep.mubr.msk.bf16.mxu1 %vm19810_vm0, %v19809_v0  ;;  %16482 = vmatprep.mubr.msk.bf16.mxu0 %vm19810_vm0, %v19809_v0 }
 0x46a   :  { %15227 = vmatmul.mubr.bf16.gmra.mrb[44].mxu1 %v3125_v48  ;;  %16483 = vmatmul.mubr.bf16.vlgmr.msra.gmra.mrb[0].mxu0 %v9536_v57  ;;  %v3130_v48 = vrot.slane %v19436_v21, 2  ;;  %v24776_v21 = vshrl.u32 %v21062_v40, 16  ;;  %v24778_v40 = vshrl.u32 %v21082_v26, 16 }
 0x46b   :  { %15230 = vmatprep.mubr.msk.bf16.mxu1 %vm19810_vm0, %v19809_v0  ;;  %16567 = vmatpush3.bf16.msra.mxu0 %v19431_v60  ;;  %v19438_v60 = vld [vmem:[%s24672_s0 + $0x264] sm:$0xff]  }
 0x46c   :  { %16486 = vmatprep.mubr.msk.bf16.mxu0 %vm19810_vm0, %v19809_v0  ;;  %16568 = vmatprep.subr.bf16.mxu0 %v19809_v0  ;;  %v3131_v57 = vsel %vm248_vm1, %v3128_v52, %v3130_v48 }
 0x46f   :  { %16569 = vmatpush3.bf16.msra.mxu0 %v19435_v62  ;;  %v3132_v62 = vrot.slane %v19438_v60, 2 }
 0x470   :  { %16570 = vmatprep.subr.bf16.mxu0 %v19809_v0 }
 0x471   :  { %v3133_v56 = vsel %vm248_vm1, %v3130_v48, %v3132_v62  ;;  %v19443_v48 = vld [vmem:[%s24672_s0 + $0x27c] sm:$0xff]  }
 0x472   :  { %15231 = vmatmul.mubr.bf16.gmra.mrb[48].mxu1 %v3127_v24  ;;  %16487 = vmatmul.mubr.bf16.gmra.mrb[4].mxu0 %v9540_v3  ;;  %v9551_v24 = vor.u32 %v9550_v58, %v9549_v36  ;;  %v19439_v3 = vld [vmem:[%s24672_s0 + $0x26c] sm:$0xff]   ;;  %v2977_v36 = vld [vmem:[%s24672_s0 + $0x284] sm:$0xf] }
 0x473   :  { %15234 = vmatprep.mubr.msk.bf16.mxu1 %vm19810_vm0, %v19809_v0  ;;  %16490 = vmatprep.mubr.msk.bf16.mxu0 %vm19810_vm0, %v19809_v0  ;;  %v3134_v52 = vrot.slane %v19439_v3, 2  ;;  %v13222_v58 = vcombine.low %v2977_v36, %v2978_v22  ;;  %v24786_v22 = vshrl.u32 %v21161_v45, 16 }
 0x474   :  { %16571 = vmatpush3.bf16.msra.mxu0 %v19440_v31  ;;  %v9552_v20 = vsel %vm7053_vm4, %v9547_v10, %v9551_v24  ;;  %v9554_v31 = vrot.slane %v24775_v47, 2 }
 0x475   :  { %16572 = vmatprep.subr.bf16.mxu0 %v19809_v0  ;;  %v3140_v3 = vrot.slane %v13222_v58, 2  ;;  %v24787_v58 = vshll.u32 %v21161_v45, 16 }
 0x476   :  { %v9555_v12 = vor.u32 %v9554_v31, %v9553_v32  ;;  %v3453_v32 = vld [vmem:[%s24672_s0 + $0x148] sm:$0xf] }
 0x477   :  { %v13247_v47 = vcombine.low %v3452_v15, %v3453_v32 }
 0x478   :  { %16573 = vmatpush3.bf16.msra.mxu0 %v19446_v5  ;;  %v3135_v5 = vsel %vm248_vm1, %v3132_v62, %v3134_v52  ;;  %v24780_v62 = vshrl.u32 %v21102_v49, 16 }
 0x479   :  { %16574 = vmatprep.subr.bf16.mxu0 %v19809_v0  ;;  %v3617_v33 = vshrl.u32 %v13247_v47, 16 }
 0x47a   :  { %15235 = vmatmul.mubr.bf16.gmra.mrb[52].mxu1 %v3129_v42  ;;  %16491 = vmatmul.mubr.bf16.gmra.mrb[8].mxu0 %v9544_v2  ;;  %v9556_v42 = vsel %vm7053_vm4, %v9551_v24, %v9555_v12  ;;  %v9557_v2 = vrot.slane %v24776_v21, 1  ;;  %v9565_v24 = vrot.slane %v24780_v62, 1  ;;  %v3619_v21 = vshll.u32 %v13247_v47, 16  ;;  %v19452_v62 = vld [vmem:[%s24671_s1 + $0x200] sm:$0xff]  }
 0x47b   :  { %15238 = vmatprep.mubr.msk.bf16.mxu1 %vm19810_vm0, %v19809_v0  ;;  %16494 = vmatprep.mubr.msk.bf16.mxu0 %vm19810_vm0, %v19809_v0  ;;  %v24788_v47 = vshrl.u32 %v21184_v46, 16 }
 0x47c   :  { %16575 = vmatpush3.bf16.msra.mxu0 %v19450_v51  ;;  %v9559_v1 = vor.u32 %v9558_v17, %v9557_v2  ;;  %v3137_v51 = vsel %vm248_vm1, %v3134_v52, %v3136_v27  ;;  %v24782_v52 = vshrl.u32 %v21119_v6, 16  ;;  %v3621_v17 = vrot.slane %v3619_v21, 1  ;;  %v19454_v21 = vld [vmem:[%s24672_s0 + $0x164] sm:$0xff]  }
 0x47d   :  { %16576 = vmatprep.subr.bf16.mxu0 %v19809_v0 }
 0x47e   :  { %v9560_v10 = vsel %vm7053_vm4, %v9555_v12, %v9559_v1  ;;  %v9569_v12 = vrot.slane %v24782_v52, 1  ;;  %v24789_v52 = vshll.u32 %v21184_v46, 16 }
 0x480   :  { %16577 = vmatpush3.bf16.msra.mxu0 %v19455_v7  ;;  %v9561_v7 = vrot.slane %v24778_v40, 1  ;;  %v3622_v40 = vor.u32 %v3621_v17, %v3617_v33 }
 0x481   :  { %16578 = vmatprep.subr.bf16.mxu0 %v19809_v0 }
 0x482   :  { %15239 = vmatmul.mubr.bf16.gmra.mrb[56].mxu1 %v3131_v57  ;;  %16495 = vmatmul.mubr.bf16.gmra.mrb[12].mxu0 %v9548_v30  ;;  %v24779_v57 = vshll.u32 %v21082_v26, 16  ;;  %v3138_v30 = vrot.slane %v19443_v48, 2  ;;  %v24785_v48 = vshll.u32 %v21142_v23, 16 }
 0x483   :  { %15242 = vmatprep.mubr.msk.bf16.mxu1 %vm19810_vm0, %v19809_v0  ;;  %16498 = vmatprep.mubr.msk.bf16.mxu0 %vm19810_vm0, %v19809_v0 }
 0x484   :  { %16579 = vmatpush3.bf16.msra.mxu0 %v19459_v16  ;;  %v9562_v60 = vrot.slane %v24779_v57, 2  ;;  %v3139_v26 = vsel %vm248_vm1, %v3136_v27, %v3138_v30  ;;  %v19451_v57 = vld [vmem:[%s24672_s0 + $0x154] sm:$0xff]  }
 0x485   :  { %16580 = vmatprep.subr.bf16.mxu0 %v19809_v0  ;;  %v3636_v15 = vshrl.u32 %v19451_v57, 16 }
 0x486   :  { %v9563_v43 = vor.u32 %v9562_v60, %v9561_v7 }
 0x488   :  { %16581 = vmatpush3.bf16.msra.mxu0 %v19464_v25  ;;  %v9564_v16 = vsel %vm7053_vm4, %v9559_v1, %v9563_v43  ;;  %v24781_v25 = vshll.u32 %v21102_v49, 16  ;;  %v3141_v49 = vsel %vm248_vm1, %v3138_v30, %v3140_v3  ;;  %v24784_v1 = vshrl.u32 %v21142_v23, 16 }
 0x489   :  { %16666 = vmatprep.subr.bf16.mxu0 %v19809_v0  ;;  %v3632_v23 = vshll.u32 %v19451_v57, 16 }
 0x48a   :  { %15243 = vmatmul.mubr.bf16.gmra.mrb[60].mxu1 %v3133_v56  ;;  %16499 = vmatmul.mubr.bf16.gmra.mrb[16].mxu0 %v9552_v20  ;;  %v9566_v56 = vrot.slane %v24781_v25, 2 }
 0x48b   :  { %15246 = vmatprep.mubr.msk.bf16.mxu1 %vm19810_vm0, %v19809_v0  ;;  %16502 = vmatprep.mubr.msk.bf16.mxu0 %vm19810_vm0, %v19809_v0  ;;  %v3634_v25 = vrot.slane %v3632_v23, 1  ;;  %v3652_v23 = vshrl.u32 %v19454_v21, 16 }
 0x48c   :  { %v9567_v20 = vor.u32 %v9566_v56, %v9565_v24  ;;  %v19453_v56 = vld [vmem:[%s24672_s0 + $0x15c] sm:$0xff]  }
 0x48d   :  { %v3640_v32 = vshll.u32 %v19453_v56, 16  ;;  %v3644_v17 = vshrl.u32 %v19453_v56, 16 }
 0x48e   :  { %v9568_v31 = vsel %vm7053_vm4, %v9563_v43, %v9567_v20 }
 0x492   :  { %15247 = vmatmul.mubr.bf16.gmra.mrb[64].mxu1 %v3135_v5  ;;  %16503 = vmatmul.mubr.bf16.gmra.mrb[20].mxu0 %v9556_v42  ;;  %v24783_v5 = vshll.u32 %v21119_v6, 16  ;;  %v19449_v42 = vld [vmem:[%s24672_s0 + $0x14c] sm:$0xff]  }
 0x493   :  { %15250 = vmatprep.mubr.msk.bf16.mxu1 %vm19810_vm0, %v19809_v0  ;;  %16506 = vmatprep.mubr.msk.bf16.mxu0 %vm19810_vm0, %v19809_v0  ;;  %v3624_v27 = vshll.u32 %v19449_v42, 16  ;;  %v3628_v43 = vshrl.u32 %v19449_v42, 16  ;;  %v3642_v42 = vrot.slane %v3640_v32, 1 }
 0x494   :  { %v9570_v13 = vrot.slane %v24783_v5, 2  ;;  %v19461_v5 = vld [vmem:[%s24671_s1 + $0x210] sm:$0xff]  }
 0x495   :  { %v3626_v7 = vrot.slane %v3624_v27, 1  ;;  %v3648_v27 = vshll.u32 %v19454_v21, 16 }
 0x496   :  { %v9571_v2 = vor.u32 %v9570_v13, %v9569_v12  ;;  %v9582_v12 = vrot.slane %v24789_v52, 2  ;;  %v3638_v13 = vor.u32 %v3636_v15, %v3634_v25  ;;  %v24795_v52 = vshll.u32 %v21268_v19, 16 }
 0x497   :  { %v3627_v30 = vsel %vm1095_vm5, %v3622_v40, %v3626_v7  ;;  %v3630_v24 = vor.u32 %v3628_v43, %v3626_v7  ;;  %v19473_v40 = vld [vmem:[%s24671_s1 + $0x220] sm:$0xff]   ;;  %v3646_v7 = vor.u32 %v3644_v17, %v3642_v42  ;;  %v3650_v57 = vrot.slane %v3648_v27, 1 }
 0x498   :  { %v9572_v6 = vsel %vm7053_vm4, %v9567_v20, %v9571_v2  ;;  %v3643_v33 = vsel %vm1095_vm5, %v3638_v13, %v3642_v42  ;;  %v19460_v42 = vld [vmem:[%s24672_s0 + $0x17c] sm:$0xff]   ;;  %v24796_v17 = vshrl.u32 %v21293_v55, 16 }
 0x499   :  { %v3635_v20 = vsel %vm1095_vm5, %v3630_v24, %v3634_v25  ;;  %v3651_v43 = vsel %vm1095_vm5, %v3646_v7, %v3650_v57  ;;  %v19487_v24 = vld [vmem:[%s24671_s1 + $0x230] sm:$0xff]   ;;  %v3654_v25 = vor.u32 %v3652_v23, %v3650_v57  ;;  %v3676_v57 = vshrl.u32 %v19460_v42, 16 }
 0x49a   :  { %15251 = vmatmul.mubr.bf16.gmra.mrb[68].mxu1 %v3137_v51  ;;  %16507 = vmatmul.mubr.bf16.gmra.mrb[24].mxu0 %v9560_v10  ;;  %v9573_v51 = vrot.slane %v24784_v1, 1  ;;  %v9574_v10 = vrot.slane %v24785_v48, 2  ;;  %v24790_v1 = vshrl.u32 %v21212_v59, 16  ;;  %v24791_v48 = vshll.u32 %v21212_v59, 16 }
 0x49b   :  { %15254 = vmatprep.mubr.msk.bf16.mxu1 %vm19810_vm0, %v19809_v0  ;;  %16510 = vmatprep.mubr.msk.bf16.mxu0 %vm19810_vm0, %v19809_v0  ;;  %v9597_v27 = vrot.slane %v24796_v17, 1 }
 0x49c   :  { %v9575_v60 = vor.u32 %v9574_v10, %v9573_v51  ;;  %v9585_v51 = vrot.slane %v24790_v1, 1  ;;  %v9586_v10 = vrot.slane %v24791_v48, 2 }
 0x49e   :  { %v9576_v36 = vsel %vm7053_vm4, %v9571_v2, %v9575_v60  ;;  %v19466_v2 = vld [vmem:[%s24671_s1 + $0x218] sm:$0xff]   ;;  %v9587_v59 = vor.u32 %v9586_v10, %v9585_v51  ;;  %v19462_v10 = vld [vmem:[%s24672_s0 + $0x184] sm:$0xff]  }
 0x4a2   :  { %15255 = vmatmul.mubr.bf16.gmra.mrb[72].mxu1 %v3139_v26  ;;  %16511 = vmatmul.mubr.bf16.gmra.mrb[28].mxu0 %v9564_v16  ;;  %v9577_v26 = vrot.slane %v24786_v22, 1  ;;  %v9578_v16 = vrot.slane %v24787_v58, 2 }
 0x4a3   :  { %15258 = vmatprep.mubr.msk.bf16.mxu1 %vm19810_vm0, %v19809_v0  ;;  %16514 = vmatprep.mubr.msk.bf16.mxu0 %vm19810_vm0, %v19809_v0 }
 0x4a4   :  { %v9579_v45 = vor.u32 %v9578_v16, %v9577_v26  ;;  %v24792_v26 = vshrl.u32 %v21240_v54, 16  ;;  %v24793_v16 = vshll.u32 %v21240_v54, 16 }
 0x4a6   :  { %v9589_v58 = vrot.slane %v24792_v26, 1  ;;  %v19463_v26 = vld [vmem:[%s24672_s0 + $0x18c] sm:$0xff]  }
 0x4aa   :  { %15259 = vmatmul.mubr.bf16.gmra.mrb[76].mxu1 %v3141_v49  ;;  %16515 = vmatmul.mubr.bf16.gmra.mrb[32].mxu0 %v9568_v31  ;;  %v9580_v49 = vsel %vm7053_vm4, %v9575_v60, %v9579_v45  ;;  %v9581_v31 = vrot.slane %v24788_v47, 1  ;;  %v19457_v60 = vld [vmem:[%s24672_s0 + $0x16c] sm:$0xff]   ;;  %v24794_v47 = vshrl.u32 %v21268_v19, 16 }
 0x4ab   :  { %15262 = vmatprep.mubr.msk.bf16.mxu1 %vm19810_vm0, %v19809_v0  ;;  %16518 = vmatprep.mubr.msk.bf16.mxu0 %vm19810_vm0, %v19809_v0  ;;  %v3660_v15 = vshrl.u32 %v19457_v60, 16 }
 0x4ac   :  { %v9583_v46 = vor.u32 %v9582_v12, %v9581_v31  ;;  %v9593_v31 = vrot.slane %v24794_v47, 1  ;;  %v9594_v12 = vrot.slane %v24795_v52, 2  ;;  %v19465_v47 = vld [vmem:[%s24672_s0 + $0x194] sm:$0xff]  }
 0x4ae   :  { %v9588_v22 = vsel %vm7053_vm4, %v9583_v46, %v9587_v59  ;;  %v9595_v21 = vor.u32 %v9594_v12, %v9593_v31 }
 0x4b2   :  { %15263 = vmatmul.mubr.bf16.gmra.mrb[80].mxu1 %v3140_v3  ;;  %16519 = vmatmul.mubr.bf16.gmra.mrb[36].mxu0 %v9572_v6  ;;  %v19456_v3 = vld [vmem:[%s24671_s1 + $0x208] sm:$0xff]   ;;  %v9584_v6 = vsel %vm7053_vm4, %v9579_v45, %v9583_v46  ;;  %v19458_v45 = vld [vmem:[%s24672_s0 + $0x174] sm:$0xff]  }
 0x4b3   :  { %15282 = vmatprep.mubr.msk.bf16.mxu1 %vm19810_vm0, %v19809_v0  ;;  %16522 = vmatprep.mubr.msk.bf16.mxu0 %vm19810_vm0, %v19809_v0  ;;  %v3664_v32 = vshll.u32 %v19458_v45, 16  ;;  %v3668_v46 = vshrl.u32 %v19458_v45, 16 }
 0x4b5   :  { %v3666_v13 = vrot.slane %v3664_v32, 1 }
 0x4b7   :  { %v3670_v51 = vor.u32 %v3668_v46, %v3666_v13 }
 0x4ba   :  { %15283 = vmatmul.mubr.bf16.vlgmr.msra.gmra.mrb[0].mxu1 %v3627_v30  ;;  %16523 = vmatmul.mubr.bf16.gmra.mrb[40].mxu0 %v9576_v36  ;;  %v19481_v30 = vld [vmem:[%s24671_s1 + $0x228] sm:$0xff]   ;;  %v3656_v36 = vshll.u32 %v19457_v60, 16 }
 0x4bb   :  { %15286 = vmatprep.mubr.msk.bf16.mxu1 %vm19810_vm0, %v19809_v0  ;;  %16526 = vmatprep.mubr.msk.bf16.mxu0 %vm19810_vm0, %v19809_v0 }
 0x4bc   :  { %15367 = vmatpush3.bf16.msra.mxu1 %v19452_v62  ;;  %v9590_v62 = vrot.slane %v24793_v16, 2  ;;  %v3658_v56 = vrot.slane %v3656_v36, 1 }
 0x4bd   :  { %15368 = vmatprep.subr.bf16.mxu1 %v19809_v0 }
 0x4be   :  { %v9591_v54 = vor.u32 %v9590_v62, %v9589_v58  ;;  %v3684_v62 = vshrl.u32 %v19462_v10, 16 }
 0x4c0   :  { %15369 = vmatpush3.bf16.msra.mxu1 %v19456_v3  ;;  %v19495_v3 = vld [vmem:[%s24671_s1 + $0x238] sm:$0xff]  }
 0x4c1   :  { %15370 = vmatprep.subr.bf16.mxu1 %v19809_v0 }
 0x4c2   :  { %15287 = vmatmul.mubr.bf16.gmra.mrb[4].mxu1 %v3635_v20  ;;  %16527 = vmatmul.mubr.bf16.gmra.mrb[44].mxu0 %v9580_v49  ;;  %v3659_v20 = vsel %vm1095_vm5, %v3654_v25, %v3658_v56  ;;  %v9592_v49 = vsel %vm7053_vm4, %v9587_v59, %v9591_v54  ;;  %v24798_v59 = vshrl.u32 %v21313_v9, 16 }
 0x4c3   :  { %15290 = vmatprep.mubr.msk.bf16.mxu1 %vm19810_vm0, %v19809_v0  ;;  %16530 = vmatprep.mubr.msk.bf16.mxu0 %vm19810_vm0, %v19809_v0 }
 0x4c4   :  { %15371 = vmatpush3.bf16.msra.mxu1 %v19461_v5  ;;  %v3662_v5 = vor.u32 %v3660_v15, %v3658_v56  ;;  %v24800_v56 = vshrl.u32 %v21333_v11, 16 }
 0x4c5   :  { %15372 = vmatprep.subr.bf16.mxu1 %v19809_v0 }
 0x4c6   :  { %v3667_v19 = vsel %vm1095_vm5, %v3662_v5, %v3666_v13  ;;  %v9605_v45 = vrot.slane %v24800_v56, 1  ;;  %v3692_v5 = vshrl.u32 %v19463_v26, 16  ;;  %v3696_v13 = vshll.u32 %v19465_v47, 16  ;;  %v19475_v56 = vld [vmem:[%s24672_s0 + $0x18] sm:$0xff]  }
 0x4c8   :  { %15373 = vmatpush3.bf16.msra.mxu1 %v19466_v2  ;;  %v3672_v2 = vshll.u32 %v19460_v42, 16 }
 0x4c9   :  { %15374 = vmatprep.subr.bf16.mxu1 %v19809_v0 }
 0x4ca   :  { %15291 = vmatmul.mubr.bf16.gmra.mrb[8].mxu1 %v3643_v33  ;;  %16531 = vmatmul.mubr.bf16.gmra.mrb[48].mxu0 %v9584_v6  ;;  %v9596_v33 = vsel %vm7053_vm4, %v9591_v54, %v9595_v21  ;;  %v24797_v6 = vshll.u32 %v21293_v55, 16  ;;  %v3674_v48 = vrot.slane %v3672_v2, 1  ;;  %v3680_v55 = vshll.u32 %v19462_v10, 16 }
 0x4cb   :  { %15294 = vmatprep.mubr.msk.bf16.mxu1 %vm19810_vm0, %v19809_v0  ;;  %16534 = vmatprep.mubr.msk.bf16.mxu0 %vm19810_vm0, %v19809_v0  ;;  %v24801_v54 = vshll.u32 %v21333_v11, 16  ;;  %v3698_v2 = vrot.slane %v3696_v13, 1  ;;  %v19479_v13 = vld [vmem:[%s24672_s0 + $0x1bc] sm:$0xff]  }
 0x4cc   :  { %15375 = vmatpush3.bf16.msra.mxu1 %v19473_v40  ;;  %v9598_v1 = vrot.slane %v24797_v6, 2  ;;  %v3675_v7 = vsel %vm1095_vm5, %v3670_v51, %v3674_v48  ;;  %v3678_v36 = vor.u32 %v3676_v57, %v3674_v48  ;;  %v3700_v6 = vshrl.u32 %v19465_v47, 16  ;;  %v9929_v57 = vld [vmem:[%s24672_s0 + $0xc] sm:$0xf] }
 0x4cd   :  { %15376 = vmatprep.subr.bf16.mxu1 %v19809_v0 }
 0x4ce   :  { %v9599_v40 = vor.u32 %v9598_v1, %v9597_v27  ;;  %v3702_v48 = vor.u32 %v3700_v6, %v3698_v2 }
 0x4d0   :  { %15377 = vmatpush3.bf16.msra.mxu1 %v19481_v30  ;;  %v9600_v60 = vsel %vm7053_vm4, %v9595_v21, %v9599_v40  ;;  %v9601_v30 = vrot.slane %v24798_v59, 1 }
 0x4d1   :  { %15378 = vmatprep.subr.bf16.mxu1 %v19809_v0 }
 0x4d2   :  { %15295 = vmatmul.mubr.bf16.gmra.mrb[12].mxu1 %v3651_v43  ;;  %16535 = vmatmul.mubr.bf16.gmra.mrb[52].mxu0 %v9588_v22  ;;  %v24799_v43 = vshll.u32 %v21313_v9, 16  ;;  %v3682_v22 = vrot.slane %v3680_v55, 1  ;;  %v9504_v9 = vld [vmem:[%s24672_s0 + $0x1ec] sm:$0x3] }
 0x4d3   :  { %15298 = vmatprep.mubr.msk.bf16.mxu1 %vm19810_vm0, %v19809_v0  ;;  %16538 = vmatprep.mubr.msk.bf16.mxu0 %vm19810_vm0, %v19809_v0 }
 0x4d4   :  { %15379 = vmatpush3.bf16.msra.mxu1 %v19487_v24  ;;  %v9602_v23 = vrot.slane %v24799_v43, 2  ;;  %v3683_v16 = vsel %vm1095_vm5, %v3678_v36, %v3682_v22  ;;  %v3688_v24 = vshll.u32 %v19463_v26, 16  ;;  %v3686_v32 = vor.u32 %v3684_v62, %v3682_v22  ;;  %v19471_v43 = vld [vmem:[%s24672_s0 + $0x10] sm:$0xff]  }
 0x4d5   :  { %15380 = vmatprep.subr.bf16.mxu1 %v19809_v0  ;;  %v19474_v22 = vld [vmem:[%s24672_s0 + $0x1ac] sm:$0xff]  }
 0x4d6   :  { %v9603_v58 = vor.u32 %v9602_v23, %v9601_v30  ;;  %v3720_v62 = vshll.u32 %v19474_v22, 16 }
 0x4d8   :  { %15381 = vmatpush3.bf16.msra.mxu1 %v19495_v3  ;;  %v9604_v25 = vsel %vm7053_vm4, %v9599_v40, %v9603_v58  ;;  %v9606_v3 = vrot.slane %v24801_v54, 2  ;;  %v19469_v40 = vld [vmem:[%s24672_s0 + $0x1a4] sm:$0xff]   ;;  %v3722_v54 = vrot.slane %v3720_v62, 1 }
 0x4d9   :  { %15466 = vmatprep.subr.bf16.mxu1 %v19809_v0  ;;  %v3712_v59 = vshll.u32 %v19469_v40, 16 }
 0x4da   :  { %15299 = vmatmul.mubr.bf16.gmra.mrb[16].mxu1 %v3659_v20  ;;  %16539 = vmatmul.mubr.bf16.gmra.mrb[56].mxu0 %v9592_v49  ;;  %v19666_v20 = vld [vmem:[%s24672_s0 + $0x1e8] sm:$0xf]  ;;  %v3690_v49 = vrot.slane %v3688_v24, 1  ;;  %v9607_v11 = vor.u32 %v9606_v3, %v9605_v45  ;;  %v19476_v3 = vld [vmem:[%s24672_s0 + $0x1b4] sm:$0xff]  }
 0x4db   :  { %15302 = vmatprep.mubr.msk.bf16.mxu1 %vm19810_vm0, %v19809_v0  ;;  %16542 = vmatprep.mubr.msk.bf16.mxu0 %vm19810_vm0, %v19809_v0  ;;  %v13647_v15 = vcombine.low %v19666_v20, %v9504_v9  ;;  %v3714_v36 = vrot.slane %v3712_v59, 1  ;;  %v10095_v20 = vrot.slane %v19475_v56, 1  ;;  %v3728_v47 = vshll.u32 %v19476_v3, 16  ;;  %v19507_v59 = vld [vmem:[%s24671_s1 + $0x570] sm:$0xff]  }
 0x4dc   :  { %v3691_v12 = vsel %vm1095_vm5, %v3686_v32, %v3690_v49  ;;  %v9608_v42 = vsel %vm7053_vm4, %v9603_v58, %v9607_v11  ;;  %v3694_v46 = vor.u32 %v3692_v5, %v3690_v49  ;;  %v10093_v58 = vrot.slane %v19471_v43, 1 }
 0x4dd   :  { %v9610_v31 = vshrl.u32 %v13647_v15, 16  ;;  %v9613_v52 = vshll.u32 %v13647_v15, 16  ;;  %v19478_v15 = vld [vmem:[%s24671_s1 + $0x548] sm:$0xff]   ;;  %v3724_v49 = vshrl.u32 %v19474_v22, 16  ;;  %v3730_v5 = vrot.slane %v3728_v47, 1 }
 0x4de   :  { %v3699_v27 = vsel %vm1095_vm5, %v3694_v46, %v3698_v2  ;;  %v3732_v46 = vshrl.u32 %v19476_v3, 16  ;;  %v3736_v2 = vshll.u32 %v19479_v13, 16 }
 0x4df   :  { %v9612_v21 = vrot.slane %v9610_v31, 1  ;;  %v19477_v31 = vld [vmem:[%s24672_s0 + $0x20] sm:$0xff]  }
 0x4e0   :  { %v3734_v6 = vor.u32 %v3732_v46, %v3730_v5 }
 0x4e2   :  { %15303 = vmatmul.mubr.bf16.gmra.mrb[20].mxu1 %v3667_v19  ;;  %16543 = vmatmul.mubr.bf16.gmra.mrb[60].mxu0 %v9596_v33  ;;  %v9615_v19 = vrot.slane %v9613_v52, 2  ;;  %v19468_v33 = vld [vmem:[%s24672_s0 + $0x19c] sm:$0xff]   ;;  %v19486_v52 = vld [vmem:[%s24671_s1 + $0x550] sm:$0xff]  }
 0x4e3   :  { %15306 = vmatprep.mubr.msk.bf16.mxu1 %vm19810_vm0, %v19809_v0  ;;  %16546 = vmatprep.mubr.msk.bf16.mxu0 %vm19810_vm0, %v19809_v0  ;;  %v3704_v1 = vshll.u32 %v19468_v33, 16 }
 0x4e4   :  { %v9616_v17 = vor.u32 %v9615_v19, %v9612_v21  ;;  %v19494_v21 = vld [vmem:[%s24671_s1 + $0x558] sm:$0xff]  }
 0x4e5   :  { %v3706_v10 = vrot.slane %v3704_v1, 1  ;;  %v3738_v1 = vrot.slane %v3736_v2, 1  ;;  %v19492_v2 = vld [vmem:[%s24672_s0 + $0x1e4] sm:$0x1f]  }
 0x4e6   :  { %v9617_v51 = vsel %vm7053_vm4, %v9607_v11, %v9616_v17  ;;  %v10096_v11 = vsel %vm2114_vm2, %v10093_v58, %v10095_v20 }
 0x4e7   :  { %v3707_v55 = vsel %vm1095_vm5, %v3702_v48, %v3706_v10 }
 0x4ea   :  { %15307 = vmatmul.mubr.bf16.gmra.mrb[24].mxu1 %v3675_v7  ;;  %16547 = vmatmul.mubr.bf16.gmra.mrb[64].mxu0 %v9600_v60  ;;  %v9928_v7 = vld [vmem:[%s24672_s0 + $0x8] sm:$0xe]  ;;  %v3708_v60 = vshrl.u32 %v19468_v33, 16 }
 0x4eb   :  { %15310 = vmatprep.mubr.msk.bf16.mxu1 %vm19810_vm0, %v19809_v0  ;;  %16550 = vmatprep.mubr.msk.bf16.mxu0 %vm19810_vm0, %v19809_v0  ;;  %v22693_v30 = vcombine.low %v9928_v7, %v9929_v57  ;;  %v3740_v7 = vshrl.u32 %v19479_v13, 16 }
 0x4ec   :  { %v3710_v23 = vor.u32 %v3708_v60, %v3706_v10  ;;  %v19503_v10 = vld [vmem:[%s24671_s1 + $0x568] sm:$0xff]   ;;  %v19483_v60 = vld [vmem:[%s24672_s0 + $0x30] sm:$0xff]  }
 0x4ed   :  { %v10092_v26 = vrot.slane %v22693_v30, 1  ;;  %v3742_v43 = vor.u32 %v3740_v7, %v3738_v1  ;;  %v10101_v22 = vrot.slane %v19483_v60, 1  ;;  %v3780_v60 = vshrl.u32 %v19492_v2, 16 }
 0x4ee   :  { %v3715_v9 = vsel %vm1095_vm5, %v3710_v23, %v3714_v36 }
 0x4ef   :  { %v10094_v24 = vsel %vm2114_vm2, %v10092_v26, %v10093_v58  ;;  %v19512_v26 = vld [vmem:[%s24671_s1 + $0x578] sm:$0xff]  }
 0x4f2   :  { %15311 = vmatmul.mubr.bf16.gmra.mrb[28].mxu1 %v3683_v16  ;;  %16551 = vmatmul.mubr.bf16.gmra.mrb[68].mxu0 %v9604_v25  ;;  %v3716_v16 = vshrl.u32 %v19469_v40, 16  ;;  %v19472_v25 = vld [vmem:[%s24671_s1 + $0x540] sm:$0xff]   ;;  %v3739_v40 = vsel %vm1095_vm5, %v3734_v6, %v3738_v1  ;;  %v3776_v6 = vshll.u32 %v19492_v2, 16  ;;  %v19504_v2 = vld [vmem:[%s24671_s1 + $0x248] sm:$0xff]  }
 0x4f3   :  { %15314 = vmatprep.mubr.msk.bf16.mxu1 %vm19810_vm0, %v19809_v0  ;;  %16554 = vmatprep.mubr.msk.bf16.mxu0 %vm19810_vm0, %v19809_v0 }
 0x4f4   :  { %v3718_v45 = vor.u32 %v3716_v16, %v3714_v36  ;;  %v19484_v36 = vld [vmem:[%s24672_s0 + $0x1cc] sm:$0xff]  }
 0x4f5   :  { %v3752_v16 = vshll.u32 %v19484_v36, 16 }
 0x4f6   :  { %v3723_v32 = vsel %vm1095_vm5, %v3718_v45, %v3722_v54  ;;  %v19488_v45 = vld [vmem:[%s24672_s0 + $0x1d4] sm:$0xff]  }
 0x4f7   :  { %v3754_v56 = vrot.slane %v3752_v16, 1 }
 0x4fa   :  { %15315 = vmatmul.mubr.bf16.gmra.mrb[32].mxu1 %v3691_v12  ;;  %16555 = vmatmul.mubr.bf16.gmra.mrb[72].mxu0 %v9608_v42  ;;  %v3726_v12 = vor.u32 %v3724_v49, %v3722_v54  ;;  %v10097_v42 = vrot.slane %v19477_v31, 1  ;;  %v19489_v49 = vld [vmem:[%s24672_s0 + $0x40] sm:$0xff]  }
 0x4fb   :  { %15318 = vmatprep.mubr.msk.bf16.mxu1 %vm19810_vm0, %v19809_v0  ;;  %16558 = vmatprep.mubr.msk.bf16.mxu0 %vm19810_vm0, %v19809_v0  ;;  %v19490_v31 = vld [vmem:[%s24672_s0 + $0x1dc] sm:$0xff]  }
 0x4fc   :  { %v3731_v19 = vsel %vm1095_vm5, %v3726_v12, %v3730_v5  ;;  %v10098_v33 = vsel %vm2114_vm2, %v10095_v20, %v10097_v42  ;;  %v3756_v20 = vshrl.u32 %v19484_v36, 16  ;;  %v3764_v5 = vshrl.u32 %v19488_v45, 16  ;;  %v19668_v36 = vld [vmem:[%s24672_s0 + $0x1ec] sm:$0xff]  }
 0x4fd   :  { %v3768_v13 = vshll.u32 %v19490_v31, 16 }
 0x4fe   :  { %v3758_v47 = vor.u32 %v3756_v20, %v3754_v56  ;;  %v19669_v20 = vld [vmem:[%s24672_s0 + $0x1f4] sm:$0xff]  }
 0x4ff   :  { %v3770_v46 = vrot.slane %v3768_v13, 1 }
 0x502   :  { %15319 = vmatmul.mubr.bf16.gmra.mrb[36].mxu1 %v3699_v27  ;;  %16559 = vmatmul.mubr.bf16.gmra.mrb[76].mxu0 %v9617_v51  ;;  %v19498_v27 = vld [vmem:[%s24671_s1 + $0x560] sm:$0xff]  }
 0x503   :  { %15322 = vmatprep.mubr.msk.bf16.mxu1 %vm19810_vm0, %v19809_v0  ;;  %16562 = vmatprep.mubr.msk.bf16.mxu0 %vm19810_vm0, %v19809_v0  ;;  %v19482_v51 = vld [vmem:[%s24672_s0 + $0x1c4] sm:$0xff]  }
 0x504   :  { %v3744_v57 = vshll.u32 %v19482_v51, 16 }
 0x506   :  { %v3746_v23 = vrot.slane %v3744_v57, 1 }
 0x508   :  { %v3747_v58 = vsel %vm1095_vm5, %v3742_v43, %v3746_v23 }
 0x50a   :  { %15323 = vmatmul.mubr.bf16.gmra.mrb[40].mxu1 %v3707_v55  ;;  %16563 = vmatmul.mubr.bf16.gmra.mrb[80].mxu0 %v9616_v17  ;;  %v19480_v17 = vld [vmem:[%s24672_s0 + $0x28] sm:$0xff]  }
 0x50b   :  { %15326 = vmatprep.mubr.msk.bf16.mxu1 %vm19810_vm0, %v19809_v0  ;;  %16582 = vmatprep.mubr.msk.bf16.mxu0 %vm19810_vm0, %v19809_v0  ;;  %v10099_v48 = vrot.slane %v19480_v17, 1 }
 0x50d   :  { %v10100_v55 = vsel %vm2114_vm2, %v10097_v42, %v10099_v48  ;;  %v10102_v62 = vsel %vm2114_vm2, %v10099_v48, %v10101_v22 }
 0x512   :  { %15327 = vmatmul.mubr.bf16.gmra.mrb[44].mxu1 %v3715_v9  ;;  %16583 = vmatmul.mubr.bf16.vlgmr.msra.gmra.mrb[0].mxu0 %v10094_v24  ;;  %v3748_v9 = vshrl.u32 %v19482_v51, 16  ;;  %v19485_v24 = vld [vmem:[%s24672_s0 + $0x38] sm:$0xff]   ;;  %v19493_v51 = vld [vmem:[%s24672_s0 + $0x50] sm:$0xff]  }
 0x513   :  { %15330 = vmatprep.mubr.msk.bf16.mxu1 %vm19810_vm0, %v19809_v0  ;;  %16667 = vmatpush3.bf16.msra.mxu0 %v19472_v25  ;;  %v10103_v54 = vrot.slane %v19485_v24, 1 }
 0x514   :  { %16586 = vmatprep.mubr.msk.bf16.mxu0 %vm19810_vm0, %v19809_v0  ;;  %16668 = vmatprep.subr.bf16.mxu0 %v19809_v0  ;;  %v3750_v25 = vor.u32 %v3748_v9, %v3746_v23 }
 0x516   :  { %v3755_v3 = vsel %vm1095_vm5, %v3750_v25, %v3754_v56 }
 0x517   :  { %16669 = vmatpush3.bf16.msra.mxu0 %v19478_v15  ;;  %v3760_v15 = vshll.u32 %v19488_v45, 16  ;;  %v19497_v45 = vld [vmem:[%s24672_s0 + $0x60] sm:$0xff]  }
 0x518   :  { %16670 = vmatprep.subr.bf16.mxu0 %v19809_v0 }
 0x51a   :  { %15331 = vmatmul.mubr.bf16.gmra.mrb[48].mxu1 %v3723_v32  ;;  %16587 = vmatmul.mubr.bf16.gmra.mrb[4].mxu0 %v10096_v11  ;;  %v10104_v32 = vsel %vm2114_vm2, %v10101_v22, %v10103_v54  ;;  %v3762_v11 = vrot.slane %v3760_v15, 1  ;;  %v4123_v22 = vshrl.u32 %v19668_v36, 16  ;;  %v4132_v15 = vshrl.u32 %v19669_v20, 16 }
 0x51b   :  { %15334 = vmatprep.mubr.msk.bf16.mxu1 %vm19810_vm0, %v19809_v0  ;;  %16590 = vmatprep.mubr.msk.bf16.mxu0 %vm19810_vm0, %v19809_v0 }
 0x51c   :  { %16671 = vmatpush3.bf16.msra.mxu0 %v19486_v52  ;;  %v10105_v52 = vrot.slane %v19489_v49, 1  ;;  %v3763_v12 = vsel %vm1095_vm5, %v3758_v47, %v3762_v11  ;;  %v4125_v24 = vrot.slane %v4123_v22, 2  ;;  %v10113_v49 = vrot.slane %v19497_v45, 1  ;;  %v19519_v22 = vld [vmem:[%s24671_s1 + $0x260] sm:$0xff]  }
 0x51d   :  { %16672 = vmatprep.subr.bf16.mxu0 %v19809_v0 }
 0x51e   :  { %v10106_v42 = vsel %vm2114_vm2, %v10103_v54, %v10105_v52 }
 0x520   :  { %16673 = vmatpush3.bf16.msra.mxu0 %v19494_v21  ;;  %v19491_v21 = vld [vmem:[%s24672_s0 + $0x48] sm:$0xff]  }
 0x521   :  { %16674 = vmatprep.subr.bf16.mxu0 %v19809_v0 }
 0x522   :  { %15335 = vmatmul.mubr.bf16.gmra.mrb[52].mxu1 %v3731_v19  ;;  %16591 = vmatmul.mubr.bf16.gmra.mrb[8].mxu0 %v10098_v33  ;;  %v3766_v19 = vor.u32 %v3764_v5, %v3762_v11  ;;  %v10107_v33 = vrot.slane %v19491_v21, 1  ;;  %v4134_v11 = vrot.slane %v4132_v15, 2  ;;  %v19500_v5 = vld [vmem:[%s24671_s1 + $0x240] sm:$0xff]  }
 0x523   :  { %15338 = vmatprep.mubr.msk.bf16.mxu1 %vm19810_vm0, %v19809_v0  ;;  %16594 = vmatprep.mubr.msk.bf16.mxu0 %vm19810_vm0, %v19809_v0 }
 0x524   :  { %16675 = vmatpush3.bf16.msra.mxu0 %v19498_v27  ;;  %v3771_v17 = vsel %vm1095_vm5, %v3766_v19, %v3770_v46  ;;  %v3772_v27 = vshrl.u32 %v19490_v31, 16  ;;  %v10108_v1 = vsel %vm2114_vm2, %v10105_v52, %v10107_v33 }
 0x525   :  { %16676 = vmatprep.subr.bf16.mxu0 %v19809_v0 }
 0x526   :  { %v3774_v48 = vor.u32 %v3772_v27, %v3770_v46 }
 0x528   :  { %16677 = vmatpush3.bf16.msra.mxu0 %v19503_v10  ;;  %v3778_v10 = vrot.slane %v3776_v6, 1 }
 0x529   :  { %16678 = vmatprep.subr.bf16.mxu0 %v19809_v0 }
 0x52a   :  { %15339 = vmatmul.mubr.bf16.gmra.mrb[56].mxu1 %v3739_v40  ;;  %16595 = vmatmul.mubr.bf16.gmra.mrb[12].mxu0 %v10100_v55  ;;  %v10109_v40 = vrot.slane %v19493_v51, 1  ;;  %v3779_v7 = vsel %vm1095_vm5, %v3774_v48, %v3778_v10  ;;  %v19496_v55 = vld [vmem:[%s24672_s0 + $0x58] sm:$0xff]   ;;  %v3782_v9 = vor.u32 %v3780_v60, %v3778_v10  ;;  %v19509_v51 = vld [vmem:[%s24671_s1 + $0x250] sm:$0xff]   ;;  %v19671_v10 = vld [vmem:[%s24672_s0 + $0x204] sm:$0xff]  }
 0x52b   :  { %15342 = vmatprep.mubr.msk.bf16.mxu1 %vm19810_vm0, %v19809_v0  ;;  %16598 = vmatprep.mubr.msk.bf16.mxu0 %vm19810_vm0, %v19809_v0 }
 0x52c   :  { %16679 = vmatpush3.bf16.msra.mxu0 %v19507_v59  ;;  %v10110_v57 = vsel %vm2114_vm2, %v10107_v33, %v10109_v40  ;;  %v19667_v59 = vld [vmem:[%s24672_s0 + $0x1e4] sm:$0xfc]  }
 0x52d   :  { %16680 = vmatprep.subr.bf16.mxu0 %v19809_v0  ;;  %v4115_v43 = vshrl.u32 %v19667_v59, 16  ;;  %v4118_v23 = vshll.u32 %v19667_v59, 16 }
 0x52f   :  { %v4117_v16 = vrot.slane %v4115_v43, 2 }
 0x530   :  { %16681 = vmatpush3.bf16.msra.mxu0 %v19512_v26  ;;  %v4126_v26 = vshll.u32 %v19668_v36, 16  ;;  %v19502_v36 = vld [vmem:[%s24672_s0 + $0x78] sm:$0xff]  }
 0x531   :  { %16766 = vmatprep.subr.bf16.mxu0 %v19809_v0 }
 0x532   :  { %15343 = vmatmul.mubr.bf16.gmra.mrb[60].mxu1 %v3747_v58  ;;  %16599 = vmatmul.mubr.bf16.gmra.mrb[16].mxu0 %v10102_v62  ;;  %v10111_v58 = vrot.slane %v19496_v55, 1  ;;  %v4120_v62 = vrot.slane %v4118_v23, 3  ;;  %v4128_v25 = vrot.slane %v4126_v26, 3  ;;  %v19513_v55 = vld [vmem:[%s24671_s1 + $0x258] sm:$0xff]  }
 0x533   :  { %15346 = vmatprep.mubr.msk.bf16.mxu1 %vm19810_vm0, %v19809_v0  ;;  %16602 = vmatprep.mubr.msk.bf16.mxu0 %vm19810_vm0, %v19809_v0 }
 0x534   :  { %v10112_v56 = vsel %vm2114_vm2, %v10109_v40, %v10111_v58  ;;  %v4121_v54 = vor.u32 %v4120_v62, %v4117_v16  ;;  %v10114_v52 = vsel %vm2114_vm2, %v10111_v58, %v10113_v49  ;;  %v4150_v40 = vshrl.u32 %v19671_v10, 16  ;;  %v19672_v58 = vld [vmem:[%s24672_s0 + $0x20c] sm:$0xff]  }
 0x535   :  { %v4162_v16 = vshll.u32 %v19672_v58, 16  ;;  %v10119_v62 = vrot.slane %v19502_v36, 1 }
 0x536   :  { %v4152_v59 = vrot.slane %v4150_v40, 2 }
 0x537   :  { %v4164_v45 = vrot.slane %v4162_v16, 3 }
 0x53a   :  { %15347 = vmatmul.mubr.bf16.gmra.mrb[64].mxu1 %v3755_v3  ;;  %16603 = vmatmul.mubr.bf16.gmra.mrb[20].mxu0 %v10104_v32  ;;  %v4129_v3 = vor.u32 %v4128_v25, %v4125_v24  ;;  %v4135_v32 = vshll.u32 %v19669_v20, 16  ;;  %v19524_v24 = vld [vmem:[%s24671_s1 + $0x268] sm:$0xff]   ;;  %v19528_v20 = vld [vmem:[%s24671_s1 + $0x270] sm:$0xff]  }
 0x53b   :  { %15350 = vmatprep.mubr.msk.bf16.mxu1 %vm19810_vm0, %v19809_v0  ;;  %16606 = vmatprep.mubr.msk.bf16.mxu0 %vm19810_vm0, %v19809_v0 }
 0x53c   :  { %v4130_v47 = vsel %vm1594_vm6, %v4121_v54, %v4129_v3  ;;  %v4137_v31 = vrot.slane %v4135_v32, 3  ;;  %v19673_v32 = vld [vmem:[%s24672_s0 + $0x214] sm:$0xff]  }
 0x53e   :  { %v4138_v13 = vor.u32 %v4137_v31, %v4134_v11  ;;  %v19533_v31 = vld [vmem:[%s24671_s1 + $0x278] sm:$0xff]  }
 0x540   :  { %v4139_v33 = vsel %vm1594_vm6, %v4129_v3, %v4138_v13  ;;  %v19505_v3 = vld [vmem:[%s24672_s0 + $0x80] sm:$0xff]  }
 0x541   :  { %v10121_v11 = vrot.slane %v19505_v3, 1 }
 0x542   :  { %15351 = vmatmul.mubr.bf16.gmra.mrb[68].mxu1 %v3763_v12  ;;  %16607 = vmatmul.mubr.bf16.gmra.mrb[24].mxu0 %v10106_v42  ;;  %v19499_v12 = vld [vmem:[%s24672_s0 + $0x68] sm:$0xff]   ;;  %v19670_v42 = vld [vmem:[%s24672_s0 + $0x1fc] sm:$0xff]  }
 0x543   :  { %15354 = vmatprep.mubr.msk.bf16.mxu1 %vm19810_vm0, %v19809_v0  ;;  %16610 = vmatprep.mubr.msk.bf16.mxu0 %vm19810_vm0, %v19809_v0  ;;  %v4141_v21 = vshrl.u32 %v19670_v42, 16  ;;  %v4144_v19 = vshll.u32 %v19670_v42, 16  ;;  %v10115_v46 = vrot.slane %v19499_v12, 1  ;;  %v19506_v42 = vld [vmem:[%s24672_s0 + $0x88] sm:$0xff]  }
 0x545   :  { %v4146_v27 = vrot.slane %v4144_v19, 3  ;;  %v10116_v6 = vsel %vm2114_vm2, %v10113_v49, %v10115_v46  ;;  %v4168_v49 = vshrl.u32 %v19673_v32, 16  ;;  %v19674_v19 = vld [vmem:[%s24672_s0 + $0x21c] sm:$0xff]  }
 0x547   :  { %v4170_v12 = vrot.slane %v4168_v49, 2  ;;  %v9969_v49 = vld [vmem:[%s24672_s0 + $0xac] sm:$0x1] }
 0x54a   :  { %15355 = vmatmul.mubr.bf16.gmra.mrb[72].mxu1 %v3771_v17  ;;  %16611 = vmatmul.mubr.bf16.gmra.mrb[28].mxu0 %v10108_v1  ;;  %v4143_v17 = vrot.slane %v4141_v21, 2  ;;  %v19501_v1 = vld [vmem:[%s24672_s0 + $0x70] sm:$0xff]  }
 0x54b   :  { %15358 = vmatprep.mubr.msk.bf16.mxu1 %vm19810_vm0, %v19809_v0  ;;  %16614 = vmatprep.mubr.msk.bf16.mxu0 %vm19810_vm0, %v19809_v0 }
 0x54c   :  { %v4147_v48 = vor.u32 %v4146_v27, %v4143_v17 }
 0x54e   :  { %v4148_v60 = vsel %vm1594_vm6, %v4138_v13, %v4147_v48  ;;  %v10122_v13 = vsel %vm2114_vm2, %v10119_v62, %v10121_v11 }
 0x552   :  { %15359 = vmatmul.mubr.bf16.gmra.mrb[76].mxu1 %v3779_v7  ;;  %16615 = vmatmul.mubr.bf16.gmra.mrb[32].mxu0 %v10110_v57  ;;  %v4153_v7 = vshll.u32 %v19671_v10, 16  ;;  %v10117_v57 = vrot.slane %v19501_v1, 1  ;;  %v19675_v10 = vld [vmem:[%s24672_s0 + $0x224] sm:$0xff]  }
 0x553   :  { %15362 = vmatprep.mubr.msk.bf16.mxu1 %vm19810_vm0, %v19809_v0  ;;  %16618 = vmatprep.mubr.msk.bf16.mxu0 %vm19810_vm0, %v19809_v0  ;;  %v4186_v40 = vshrl.u32 %v19675_v10, 16 }
 0x554   :  { %v4155_v43 = vrot.slane %v4153_v7, 3  ;;  %v10118_v23 = vsel %vm2114_vm2, %v10115_v46, %v10117_v57  ;;  %v10120_v54 = vsel %vm2114_vm2, %v10117_v57, %v10119_v62  ;;  %v4177_v46 = vshrl.u32 %v19674_v19, 16 }
 0x555   :  { %v4189_v7 = vshll.u32 %v19675_v10, 16 }
 0x556   :  { %v4156_v26 = vor.u32 %v4155_v43, %v4152_v59  ;;  %v4179_v27 = vrot.slane %v4177_v46, 2 }
 0x557   :  { %v4191_v59 = vrot.slane %v4189_v7, 3  ;;  %v19516_v7 = vld [vmem:[%s24672_s0 + $0xa8] sm:$0xf8]  }
 0x558   :  { %v4157_v25 = vsel %vm1594_vm6, %v4147_v48, %v4156_v26 }
 0x55a   :  { %15363 = vmatmul.mubr.bf16.gmra.mrb[80].mxu1 %v3782_v9  ;;  %16619 = vmatmul.mubr.bf16.gmra.mrb[36].mxu0 %v10112_v56  ;;  %v4159_v9 = vshrl.u32 %v19672_v58, 16 }
 0x55b   :  { %15382 = vmatprep.mubr.msk.bf16.mxu1 %vm19810_vm0, %v19809_v0  ;;  %16622 = vmatprep.mubr.msk.bf16.mxu0 %vm19810_vm0, %v19809_v0 }
 0x55c   :  { %v4161_v56 = vrot.slane %v4159_v9, 2 }
 0x55e   :  { %v4165_v15 = vor.u32 %v4164_v45, %v4161_v56  ;;  %v19511_v56 = vld [vmem:[%s24672_s0 + $0xa0] sm:$0xff]  }
 0x562   :  { %15383 = vmatmul.mubr.bf16.vlgmr.msra.gmra.mrb[0].mxu1 %v4130_v47  ;;  %16623 = vmatmul.mubr.bf16.gmra.mrb[40].mxu0 %v10114_v52  ;;  %v4171_v47 = vshll.u32 %v19673_v32, 16  ;;  %v4166_v52 = vsel %vm1594_vm6, %v4156_v26, %v4165_v15  ;;  %v9968_v32 = vld [vmem:[%s24672_s0 + $0xa8] sm:$0xf] }
 0x563   :  { %15386 = vmatprep.mubr.msk.bf16.mxu1 %vm19810_vm0, %v19809_v0  ;;  %16626 = vmatprep.mubr.msk.bf16.mxu0 %vm19810_vm0, %v19809_v0 }
 0x564   :  { %15467 = vmatpush3.bf16.msra.mxu1 %v19500_v5  ;;  %v4173_v5 = vrot.slane %v4171_v47, 3 }
 0x565   :  { %15468 = vmatprep.subr.bf16.mxu1 %v19809_v0 }
 0x566   :  { %v4174_v21 = vor.u32 %v4173_v5, %v4170_v12  ;;  %v13692_v12 = vcombine.low %v9968_v32, %v9969_v49 }
 0x568   :  { %15469 = vmatpush3.bf16.msra.mxu1 %v19504_v2  ;;  %v4180_v2 = vshll.u32 %v19674_v19, 16  ;;  %v4175_v17 = vsel %vm1594_vm6, %v4165_v15, %v4174_v21  ;;  %v10129_v15 = vrot.slane %v19511_v56, 1  ;;  %v10131_v19 = vrot.slane %v13692_v12, 1 }
 0x569   :  { %15470 = vmatprep.subr.bf16.mxu1 %v19809_v0 }
 0x56a   :  { %15387 = vmatmul.mubr.bf16.gmra.mrb[4].mxu1 %v4139_v33  ;;  %16627 = vmatmul.mubr.bf16.gmra.mrb[44].mxu0 %v10116_v6  ;;  %v10123_v33 = vrot.slane %v19506_v42, 1  ;;  %v4182_v6 = vrot.slane %v4180_v2, 3 }
 0x56b   :  { %15390 = vmatprep.mubr.msk.bf16.mxu1 %vm19810_vm0, %v19809_v0  ;;  %16630 = vmatprep.mubr.msk.bf16.mxu0 %vm19810_vm0, %v19809_v0 }
 0x56c   :  { %15471 = vmatpush3.bf16.msra.mxu1 %v19509_v51  ;;  %v10124_v1 = vsel %vm2114_vm2, %v10121_v11, %v10123_v33  ;;  %v19508_v51 = vld [vmem:[%s24672_s0 + $0x90] sm:$0xff]   ;;  %v4183_v48 = vor.u32 %v4182_v6, %v4179_v27  ;;  %v19679_v6 = vld [vmem:[%s24672_s0 + $0x244] sm:$0xff]  }
 0x56d   :  { %15472 = vmatprep.subr.bf16.mxu1 %v19809_v0  ;;  %v10125_v57 = vrot.slane %v19508_v51, 1  ;;  %v4225_v51 = vshll.u32 %v19679_v6, 16 }
 0x56f   :  { %v10126_v43 = vsel %vm2114_vm2, %v10123_v33, %v10125_v57 }
 0x570   :  { %15473 = vmatpush3.bf16.msra.mxu1 %v19513_v55  ;;  %v4184_v55 = vsel %vm1594_vm6, %v4174_v21, %v4183_v48 }
 0x571   :  { %15474 = vmatprep.subr.bf16.mxu1 %v19809_v0 }
 0x572   :  { %15391 = vmatmul.mubr.bf16.gmra.mrb[8].mxu1 %v4148_v60  ;;  %16631 = vmatmul.mubr.bf16.gmra.mrb[48].mxu0 %v10118_v23  ;;  %v4188_v60 = vrot.slane %v4186_v40, 2  ;;  %v19510_v23 = vld [vmem:[%s24672_s0 + $0x98] sm:$0xff]   ;;  %v4227_v40 = vrot.slane %v4225_v51, 3 }
 0x573   :  { %15394 = vmatprep.mubr.msk.bf16.mxu1 %vm19810_vm0, %v19809_v0  ;;  %16634 = vmatprep.mubr.msk.bf16.mxu0 %vm19810_vm0, %v19809_v0  ;;  %v10127_v9 = vrot.slane %v19510_v23, 1  ;;  %v10607_v23 = vrot.slane %v19516_v7, 3 }
 0x574   :  { %15475 = vmatpush3.bf16.msra.mxu1 %v19519_v22  ;;  %v4192_v36 = vor.u32 %v4191_v59, %v4188_v60  ;;  %v19676_v22 = vld [vmem:[%s24672_s0 + $0x22c] sm:$0xff]  }
 0x575   :  { %15476 = vmatprep.subr.bf16.mxu1 %v19809_v0  ;;  %v4195_v26 = vshrl.u32 %v19676_v22, 16  ;;  %v4198_v58 = vshll.u32 %v19676_v22, 16  ;;  %v19680_v60 = vld [vmem:[%s24672_s0 + $0x24c] sm:$0xff]  }
 0x576   :  { %v4193_v16 = vsel %vm1594_vm6, %v4183_v48, %v4192_v36  ;;  %v4231_v59 = vshrl.u32 %v19680_v60, 16 }
 0x577   :  { %v4197_v62 = vrot.slane %v4195_v26, 2 }
 0x578   :  { %15477 = vmatpush3.bf16.msra.mxu1 %v19524_v24  ;;  %v4200_v24 = vrot.slane %v4198_v58, 3  ;;  %v4233_v26 = vrot.slane %v4231_v59, 2  ;;  %v19546_v59 = vld [vmem:[%s24671_s1 + $0x5b0] sm:$0xff]  }
 0x579   :  { %15478 = vmatprep.subr.bf16.mxu1 %v19809_v0 }
 0x57a   :  { %15395 = vmatmul.mubr.bf16.gmra.mrb[12].mxu1 %v4157_v25  ;;  %16635 = vmatmul.mubr.bf16.gmra.mrb[52].mxu0 %v10120_v54  ;;  %v10128_v25 = vsel %vm2114_vm2, %v10125_v57, %v10127_v9  ;;  %v4201_v45 = vor.u32 %v4200_v24, %v4197_v62  ;;  %v19677_v54 = vld [vmem:[%s24672_s0 + $0x234] sm:$0xff]  }
 0x57b   :  { %15398 = vmatprep.mubr.msk.bf16.mxu1 %vm19810_vm0, %v19809_v0  ;;  %16638 = vmatprep.mubr.msk.bf16.mxu0 %vm19810_vm0, %v19809_v0  ;;  %v4204_v3 = vshrl.u32 %v19677_v54, 16  ;;  %v19517_v57 = vld [vmem:[%s24672_s0 + $0xb0] sm:$0xff]   ;;  %v19520_v62 = vld [vmem:[%s24672_s0 + $0xb8] sm:$0xff]  }
 0x57c   :  { %15479 = vmatpush3.bf16.msra.mxu1 %v19528_v20  ;;  %v4207_v20 = vshll.u32 %v19677_v54, 16  ;;  %v4202_v47 = vsel %vm1594_vm6, %v4192_v36, %v4201_v45  ;;  %v10608_v36 = vrot.slane %v19517_v57, 3  ;;  %v10610_v54 = vrot.slane %v19520_v62, 3 }
 0x57d   :  { %15480 = vmatprep.subr.bf16.mxu1 %v19809_v0  ;;  %v4206_v11 = vrot.slane %v4204_v3, 2  ;;  %v19522_v3 = vld [vmem:[%s24671_s1 + $0x588] sm:$0xff]  }
 0x57e   :  { %v10611_v49 = vsel %vm6680_vm3, %v10608_v36, %v10610_v54 }
 0x580   :  { %15481 = vmatpush3.bf16.msra.mxu1 %v19533_v31  ;;  %v4209_v31 = vrot.slane %v4207_v20, 3 }
 0x581   :  { %15566 = vmatprep.subr.bf16.mxu1 %v19809_v0 }
 0x582   :  { %15399 = vmatmul.mubr.bf16.gmra.mrb[16].mxu1 %v4166_v52  ;;  %16639 = vmatmul.mubr.bf16.gmra.mrb[56].mxu0 %v10122_v13  ;;  %v10130_v52 = vsel %vm2114_vm2, %v10127_v9, %v10129_v15  ;;  %v4210_v5 = vor.u32 %v4209_v31, %v4206_v11  ;;  %v19678_v13 = vld [vmem:[%s24672_s0 + $0x23c] sm:$0xff]   ;;  %v10609_v9 = vsel %vm6680_vm3, %v10607_v23, %v10608_v36  ;;  %v19527_v11 = vld [vmem:[%s24671_s1 + $0x590] sm:$0xff]  }
 0x583   :  { %15402 = vmatprep.mubr.msk.bf16.mxu1 %vm19810_vm0, %v19809_v0  ;;  %16642 = vmatprep.mubr.msk.bf16.mxu0 %vm19810_vm0, %v19809_v0  ;;  %v4213_v42 = vshrl.u32 %v19678_v13, 16  ;;  %v4216_v21 = vshll.u32 %v19678_v13, 16  ;;  %v19684_v23 = vld [vmem:[%s24672_s0 + $0x26c] sm:$0xff]  }
 0x584   :  { %v4211_v46 = vsel %vm1594_vm6, %v4201_v45, %v4210_v5  ;;  %v4267_v36 = vshrl.u32 %v19684_v23, 16 }
 0x585   :  { %v4215_v2 = vrot.slane %v4213_v42, 2  ;;  %v4218_v33 = vrot.slane %v4216_v21, 3  ;;  %v19532_v42 = vld [vmem:[%s24671_s1 + $0x598] sm:$0xff]  }
 0x587   :  { %v4219_v27 = vor.u32 %v4218_v33, %v4215_v2  ;;  %v19523_v33 = vld [vmem:[%s24672_s0 + $0xc8] sm:$0xff]  }
 0x589   :  { %v4220_v48 = vsel %vm1594_vm6, %v4210_v5, %v4219_v27 }
 0x58a   :  { %15403 = vmatmul.mubr.bf16.gmra.mrb[20].mxu1 %v4175_v17  ;;  %16643 = vmatmul.mubr.bf16.gmra.mrb[60].mxu0 %v10124_v1  ;;  %v10132_v17 = vsel %vm2114_vm2, %v10129_v15, %v10131_v19  ;;  %v4222_v1 = vshrl.u32 %v19679_v6, 16  ;;  %v19683_v6 = vld [vmem:[%s24672_s0 + $0x264] sm:$0xff]  }
 0x58b   :  { %15406 = vmatprep.mubr.msk.bf16.mxu1 %vm19810_vm0, %v19809_v0  ;;  %16646 = vmatprep.mubr.msk.bf16.mxu0 %vm19810_vm0, %v19809_v0  ;;  %v4261_v51 = vshll.u32 %v19683_v6, 16 }
 0x58c   :  { %v4224_v10 = vrot.slane %v4222_v1, 2  ;;  %v4258_v1 = vshrl.u32 %v19683_v6, 16 }
 0x58d   :  { %v4263_v57 = vrot.slane %v4261_v51, 3 }
 0x58e   :  { %v4260_v7 = vrot.slane %v4258_v1, 2 }
 0x592   :  { %15407 = vmatmul.mubr.bf16.gmra.mrb[24].mxu1 %v4184_v55  ;;  %16647 = vmatmul.mubr.bf16.gmra.mrb[64].mxu0 %v10126_v43  ;;  %v4228_v55 = vor.u32 %v4227_v40, %v4224_v10  ;;  %v4234_v43 = vshll.u32 %v19680_v60, 16  ;;  %v19542_v10 = vld [vmem:[%s24671_s1 + $0x5a8] sm:$0xff]   ;;  %v19525_v60 = vld [vmem:[%s24672_s0 + $0xd0] sm:$0xff]  }
 0x593   :  { %15410 = vmatprep.mubr.msk.bf16.mxu1 %vm19810_vm0, %v19809_v0  ;;  %16650 = vmatprep.mubr.msk.bf16.mxu0 %vm19810_vm0, %v19809_v0 }
 0x594   :  { %v4229_v22 = vsel %vm1594_vm6, %v4219_v27, %v4228_v55  ;;  %v4236_v58 = vrot.slane %v4234_v43, 3  ;;  %v4264_v43 = vor.u32 %v4263_v57, %v4260_v7 }
 0x596   :  { %v4237_v24 = vor.u32 %v4236_v58, %v4233_v26  ;;  %v10616_v26 = vrot.slane %v19525_v60, 3  ;;  %v19551_v58 = vld [vmem:[%s24671_s1 + $0x5b8] sm:$0xff]  }
 0x598   :  { %v4238_v20 = vsel %vm1594_vm6, %v4228_v55, %v4237_v24 }
 0x59a   :  { %15411 = vmatmul.mubr.bf16.gmra.mrb[28].mxu1 %v4193_v16  ;;  %16651 = vmatmul.mubr.bf16.gmra.mrb[68].mxu0 %v10128_v25  ;;  %v19518_v16 = vld [vmem:[%s24671_s1 + $0x580] sm:$0xff]   ;;  %v19681_v25 = vld [vmem:[%s24672_s0 + $0x254] sm:$0xff]  }
 0x59b   :  { %15414 = vmatprep.mubr.msk.bf16.mxu1 %vm19810_vm0, %v19809_v0  ;;  %16654 = vmatprep.mubr.msk.bf16.mxu0 %vm19810_vm0, %v19809_v0  ;;  %v4240_v56 = vshrl.u32 %v19681_v25, 16  ;;  %v4243_v45 = vshll.u32 %v19681_v25, 16  ;;  %v19526_v25 = vld [vmem:[%s24672_s0 + $0xd8] sm:$0xff]  }
 0x59d   :  { %v4242_v15 = vrot.slane %v4240_v56, 2  ;;  %v4245_v32 = vrot.slane %v4243_v45, 3  ;;  %v19685_v45 = vld [vmem:[%s24672_s0 + $0x274] sm:$0xff]  }
 0x59f   :  { %v4246_v31 = vor.u32 %v4245_v32, %v4242_v15 }
 0x5a1   :  { %v4247_v21 = vsel %vm1594_vm6, %v4237_v24, %v4246_v31 }
 0x5a2   :  { %15415 = vmatmul.mubr.bf16.gmra.mrb[32].mxu1 %v4202_v47  ;;  %16655 = vmatmul.mubr.bf16.gmra.mrb[72].mxu0 %v10130_v52  ;;  %v19521_v47 = vld [vmem:[%s24672_s0 + $0xc0] sm:$0xff]  }
 0x5a3   :  { %15418 = vmatprep.mubr.msk.bf16.mxu1 %vm19810_vm0, %v19809_v0  ;;  %16658 = vmatprep.mubr.msk.bf16.mxu0 %vm19810_vm0, %v19809_v0  ;;  %v19682_v52 = vld [vmem:[%s24672_s0 + $0x25c] sm:$0xff]   ;;  %v10612_v13 = vrot.slane %v19521_v47, 3 }
 0x5a4   :  { %v4249_v12 = vshrl.u32 %v19682_v52, 16  ;;  %v4252_v5 = vshll.u32 %v19682_v52, 16  ;;  %v19686_v52 = vld [vmem:[%s24672_s0 + $0x27c] sm:$0xff]  }
 0x5a5   :  { %v10613_v2 = vsel %vm6680_vm3, %v10610_v54, %v10612_v13  ;;  %v4276_v54 = vshrl.u32 %v19685_v45, 16 }
 0x5a7   :  { %v4278_v32 = vrot.slane %v4276_v54, 2 }
 0x5aa   :  { %15419 = vmatmul.mubr.bf16.gmra.mrb[36].mxu1 %v4211_v46  ;;  %16659 = vmatmul.mubr.bf16.gmra.mrb[76].mxu0 %v10132_v17  ;;  %v4254_v46 = vrot.slane %v4252_v5, 3  ;;  %v19537_v17 = vld [vmem:[%s24671_s1 + $0x5a0] sm:$0xff]   ;;  %v4288_v5 = vshll.u32 %v19686_v52, 16 }
 0x5ab   :  { %15422 = vmatprep.mubr.msk.bf16.mxu1 %vm19810_vm0, %v19809_v0  ;;  %16662 = vmatprep.mubr.msk.bf16.mxu0 %vm19810_vm0, %v19809_v0 }
 0x5b2   :  { %15423 = vmatmul.mubr.bf16.gmra.mrb[40].mxu1 %v4220_v48  ;;  %16663 = vmatmul.mubr.bf16.gmra.mrb[80].mxu0 %v10131_v19  ;;  %v4251_v19 = vrot.slane %v4249_v12, 2  ;;  %v10614_v48 = vrot.slane %v19523_v33, 3  ;;  %v4285_v12 = vshrl.u32 %v19686_v52, 16  ;;  %v4290_v33 = vrot.slane %v4288_v5, 3  ;;  %v19548_v5 = vld [vmem:[%s24671_s1 + $0x290] sm:$0xff]  }
 0x5b3   :  { %15426 = vmatprep.mubr.msk.bf16.mxu1 %vm19810_vm0, %v19809_v0  ;;  %16682 = vmatprep.mubr.msk.bf16.mxu0 %vm19810_vm0, %v19809_v0 }
 0x5b4   :  { %v4255_v27 = vor.u32 %v4254_v46, %v4251_v19  ;;  %v10615_v55 = vsel %vm6680_vm3, %v10612_v13, %v10614_v48  ;;  %v10617_v24 = vsel %vm6680_vm3, %v10614_v48, %v10616_v26  ;;  %v4093_v13 = vld [vmem:[%s24672_s0 + $0x288] sm:$0x7] }
 0x5b6   :  { %v4256_v40 = vsel %vm1594_vm6, %v4246_v31, %v4255_v27 }
 0x5ba   :  { %15427 = vmatmul.mubr.bf16.gmra.mrb[44].mxu1 %v4229_v22  ;;  %16683 = vmatmul.mubr.bf16.vlgmr.msra.gmra.mrb[0].mxu0 %v10609_v9  ;;  %v4270_v22 = vshll.u32 %v19684_v23, 16  ;;  %v4265_v9 = vsel %vm1594_vm6, %v4255_v27, %v4264_v43  ;;  %v19530_v27 = vld [vmem:[%s24672_s0 + $0xe8] sm:$0xff]  }
 0x5bb   :  { %15430 = vmatprep.mubr.msk.bf16.mxu1 %vm19810_vm0, %v19809_v0  ;;  %16767 = vmatpush3.bf16.msra.mxu0 %v19518_v16  ;;  %v4269_v16 = vrot.slane %v4267_v36, 2  ;;  %v10622_v48 = vrot.slane %v19530_v27, 3  ;;  %v19534_v36 = vld [vmem:[%s24672_s0 + $0xf8] sm:$0xff]   ;;  %v19692_v27 = vld [vmem:[%s24672_s0 + $0x164] sm:$0xff]  }
 0x5bc   :  { %16686 = vmatprep.mubr.msk.bf16.mxu0 %vm19810_vm0, %v19809_v0  ;;  %16768 = vmatprep.subr.bf16.mxu0 %v19809_v0  ;;  %v4272_v62 = vrot.slane %v4270_v22, 3  ;;  %v10626_v22 = vrot.slane %v19534_v36, 3  ;;  %v19545_v36 = vld [vmem:[%s24672_s0 + $0x128] sm:$0xff]  }
 0x5be   :  { %v4273_v56 = vor.u32 %v4272_v62, %v4269_v16  ;;  %v19536_v62 = vld [vmem:[%s24672_s0 + $0x100] sm:$0xff]  }
 0x5bf   :  { %16769 = vmatpush3.bf16.msra.mxu0 %v19522_v3  ;;  %v4279_v3 = vshll.u32 %v19685_v45, 16  ;;  %v10628_v45 = vrot.slane %v19536_v62, 3  ;;  %v19547_v62 = vld [vmem:[%s24672_s0 + $0x130] sm:$0xff]  }
 0x5c0   :  { %16770 = vmatprep.subr.bf16.mxu0 %v19809_v0  ;;  %v4274_v15 = vsel %vm1594_vm6, %v4264_v43, %v4273_v56 }
 0x5c2   :  { %15431 = vmatmul.mubr.bf16.gmra.mrb[48].mxu1 %v4238_v20  ;;  %16687 = vmatmul.mubr.bf16.gmra.mrb[4].mxu0 %v10611_v49  ;;  %v10618_v20 = vrot.slane %v19526_v25, 3  ;;  %v4281_v49 = vrot.slane %v4279_v3, 3  ;;  %v19689_v25 = vld [vmem:[%s24672_s0 + $0x14c] sm:$0xff]   ;;  %v10629_v3 = vsel %vm6680_vm3, %v10626_v22, %v10628_v45 }
 0x5c3   :  { %15434 = vmatprep.mubr.msk.bf16.mxu1 %vm19810_vm0, %v19809_v0  ;;  %16690 = vmatprep.mubr.msk.bf16.mxu0 %vm19810_vm0, %v19809_v0 }
 0x5c4   :  { %16771 = vmatpush3.bf16.msra.mxu0 %v19527_v11  ;;  %v10619_v47 = vsel %vm6680_vm3, %v10616_v26, %v10618_v20  ;;  %v19529_v11 = vld [vmem:[%s24672_s0 + $0xe0] sm:$0xff]   ;;  %v4282_v31 = vor.u32 %v4281_v49, %v4278_v32  ;;  %v19690_v32 = vld [vmem:[%s24672_s0 + $0x154] sm:$0xff]  }
 0x5c5   :  { %16772 = vmatprep.subr.bf16.mxu0 %v19809_v0  ;;  %v4612_v26 = vld [vmem:[%s24672_s0 + $0x144] sm:$0xe]  ;;  %v4636_v49 = vrot.slane %v19690_v32, 1 }
 0x5c6   :  { %v4283_v46 = vsel %vm1594_vm6, %v4273_v56, %v4282_v31  ;;  %v4634_v56 = vrot.slane %v19689_v25, 1 }
 0x5c8   :  { %16773 = vmatpush3.bf16.msra.mxu0 %v19532_v42  ;;  %v10620_v42 = vrot.slane %v19529_v11, 3  ;;  %v19543_v11 = vld [vmem:[%s24671_s1 + $0x288] sm:$0xff]  }
 0x5c9   :  { %16774 = vmatprep.subr.bf16.mxu0 %v19809_v0 }
 0x5ca   :  { %15435 = vmatmul.mubr.bf16.gmra.mrb[52].mxu1 %v4247_v21  ;;  %16691 = vmatmul.mubr.bf16.gmra.mrb[8].mxu0 %v10613_v2  ;;  %v19687_v21 = vld [vmem:[%s24672_s0 + $0x284] sm:$0xf]  ;;  %v4287_v2 = vrot.slane %v4285_v12, 2  ;;  %v10623_v57 = vsel %vm6680_vm3, %v10620_v42, %v10622_v48  ;;  %v19540_v12 = vld [vmem:[%s24672_s0 + $0x110] sm:$0xff]  }
 0x5cb   :  { %15438 = vmatprep.mubr.msk.bf16.mxu1 %vm19810_vm0, %v19809_v0  ;;  %16694 = vmatprep.mubr.msk.bf16.mxu0 %vm19810_vm0, %v19809_v0  ;;  %v13292_v19 = vcombine.low %v19687_v21, %v4093_v13  ;;  %v19691_v13 = vld [vmem:[%s24672_s0 + $0x15c] sm:$0xff]   ;;  %v10632_v21 = vrot.slane %v19540_v12, 3 }
 0x5cc   :  { %16775 = vmatpush3.bf16.msra.mxu0 %v19537_v17  ;;  %v10621_v17 = vsel %vm6680_vm3, %v10618_v20, %v10620_v42  ;;  %v4291_v6 = vor.u32 %v4290_v33, %v4287_v2  ;;  %v19538_v20 = vld [vmem:[%s24672_s0 + $0x108] sm:$0xff]   ;;  %v4638_v42 = vrot.slane %v19691_v13, 1  ;;  %v19541_v33 = vld [vmem:[%s24672_s0 + $0x118] sm:$0xff]  }
 0x5cd   :  { %16776 = vmatprep.subr.bf16.mxu0 %v19809_v0  ;;  %v4294_v1 = vshrl.u32 %v13292_v19, 16  ;;  %v4297_v51 = vshll.u32 %v13292_v19, 16  ;;  %v19552_v19 = vld [vmem:[%s24671_s1 + $0x298] sm:$0xff]   ;;  %v10484_v13 = vld [vmem:[%s24672_s0 + $0x14c] sm:$0x7] }
 0x5cf   :  { %v4299_v7 = vrot.slane %v4297_v51, 3  ;;  %v19558_v51 = vld [vmem:[%s24671_s1 + $0x2a8] sm:$0xff]  }
 0x5d0   :  { %16777 = vmatpush3.bf16.msra.mxu0 %v19542_v10  ;;  %v4292_v10 = vsel %vm1594_vm6, %v4282_v31, %v4291_v6  ;;  %v4637_v31 = vsel %vm2114_vm2, %v4634_v56, %v4636_v49 }
 0x5d1   :  { %16778 = vmatprep.subr.bf16.mxu0 %v19809_v0 }
 0x5d2   :  { %15439 = vmatmul.mubr.bf16.gmra.mrb[56].mxu1 %v4256_v40  ;;  %16695 = vmatmul.mubr.bf16.gmra.mrb[12].mxu0 %v10615_v55  ;;  %v4296_v40 = vrot.slane %v4294_v1, 2  ;;  %v19531_v55 = vld [vmem:[%s24672_s0 + $0xf0] sm:$0xff]   ;;  %v10634_v1 = vrot.slane %v19541_v33, 3 }
 0x5d3   :  { %15442 = vmatprep.mubr.msk.bf16.mxu1 %vm19810_vm0, %v19809_v0  ;;  %16698 = vmatprep.mubr.msk.bf16.mxu0 %vm19810_vm0, %v19809_v0 }
 0x5d4   :  { %16779 = vmatpush3.bf16.msra.mxu0 %v19546_v59  ;;  %v4300_v60 = vor.u32 %v4299_v7, %v4296_v40  ;;  %v10624_v59 = vrot.slane %v19531_v55, 3  ;;  %v19544_v40 = vld [vmem:[%s24672_s0 + $0x120] sm:$0xff]   ;;  %v19560_v7 = vld [vmem:[%s24671_s1 + $0x2b0] sm:$0xff]  }
 0x5d5   :  { %16780 = vmatprep.subr.bf16.mxu0 %v19809_v0 }
 0x5d6   :  { %v4301_v43 = vsel %vm1594_vm6, %v4291_v6, %v4300_v60  ;;  %v10625_v23 = vsel %vm6680_vm3, %v10622_v48, %v10624_v59  ;;  %v10627_v16 = vsel %vm6680_vm3, %v10624_v59, %v10626_v22  ;;  %v4640_v6 = vrot.slane %v19692_v27, 1  ;;  %v19562_v59 = vld [vmem:[%s24671_s1 + $0x2b8] sm:$0xff]  }
 0x5d7   :  { %v19694_v22 = vld [vmem:[%s24672_s0 + $0x174] sm:$0xff]  }
 0x5d8   :  { %16781 = vmatpush3.bf16.msra.mxu0 %v19551_v58  ;;  %v19688_v58 = vld [vmem:[%s24672_s0 + $0x148] sm:$0xf]  ;;  %v4641_v48 = vsel %vm2114_vm2, %v4638_v42, %v4640_v6 }
 0x5d9   :  { %16866 = vmatprep.subr.bf16.mxu0 %v19809_v0 }
 0x5da   :  { %15443 = vmatmul.mubr.bf16.gmra.mrb[60].mxu1 %v4265_v9  ;;  %16699 = vmatmul.mubr.bf16.gmra.mrb[16].mxu0 %v10617_v24  ;;  %v13317_v9 = vcombine.low %v4612_v26, %v19688_v58  ;;  %v4644_v26 = vrot.slane %v19694_v22, 1  ;;  %v10638_v58 = vrot.slane %v19545_v36, 3 }
 0x5db   :  { %15446 = vmatprep.mubr.msk.bf16.mxu1 %vm19810_vm0, %v19809_v0  ;;  %16702 = vmatprep.mubr.msk.bf16.mxu0 %vm19810_vm0, %v19809_v0 }
 0x5dc   :  { %v4633_v24 = vrot.slane %v13317_v9, 1 }
 0x5de   :  { %v4635_v54 = vsel %vm2114_vm2, %v4633_v24, %v4634_v56  ;;  %v19695_v24 = vld [vmem:[%s24672_s0 + $0x17c] sm:$0xff]   ;;  %v10640_v56 = vrot.slane %v19547_v62, 3 }
 0x5df   :  { %v4646_v25 = vrot.slane %v19695_v24, 1  ;;  %v19555_v24 = vld [vmem:[%s24671_s1 + $0x5c0] sm:$0xff]  }
 0x5e2   :  { %15447 = vmatmul.mubr.bf16.gmra.mrb[64].mxu1 %v4274_v15  ;;  %16703 = vmatmul.mubr.bf16.gmra.mrb[20].mxu0 %v10619_v47  ;;  %v19539_v15 = vld [vmem:[%s24671_s1 + $0x280] sm:$0xff]   ;;  %v10630_v47 = vrot.slane %v19538_v20, 3 }
 0x5e3   :  { %15450 = vmatprep.mubr.msk.bf16.mxu1 %vm19810_vm0, %v19809_v0  ;;  %16706 = vmatprep.mubr.msk.bf16.mxu0 %vm19810_vm0, %v19809_v0  ;;  %v19696_v20 = vld [vmem:[%s24672_s0 + $0x184] sm:$0xff]  }
 0x5e4   :  { %v10631_v52 = vsel %vm6680_vm3, %v10628_v45, %v10630_v47  ;;  %v10633_v2 = vsel %vm6680_vm3, %v10630_v47, %v10632_v21  ;;  %v4647_v45 = vsel %vm2114_vm2, %v4644_v26, %v4646_v25 }
 0x5ea   :  { %15451 = vmatmul.mubr.bf16.gmra.mrb[68].mxu1 %v4283_v46  ;;  %16707 = vmatmul.mubr.bf16.gmra.mrb[24].mxu0 %v10621_v17  ;;  %v4639_v46 = vsel %vm2114_vm2, %v4636_v49, %v4638_v42  ;;  %v19556_v17 = vld [vmem:[%s24671_s1 + $0x2a0] sm:$0xff]  }
 0x5eb   :  { %15454 = vmatprep.mubr.msk.bf16.mxu1 %vm19810_vm0, %v19809_v0  ;;  %16710 = vmatprep.mubr.msk.bf16.mxu0 %vm19810_vm0, %v19809_v0 }
 0x5f2   :  { %15455 = vmatmul.mubr.bf16.gmra.mrb[72].mxu1 %v4292_v10  ;;  %16711 = vmatmul.mubr.bf16.gmra.mrb[28].mxu0 %v10623_v57  ;;  %v10635_v10 = vsel %vm6680_vm3, %v10632_v21, %v10634_v1  ;;  %v19693_v57 = vld [vmem:[%s24672_s0 + $0x16c] sm:$0xff]  }
 0x5f3   :  { %15458 = vmatprep.mubr.msk.bf16.mxu1 %vm19810_vm0, %v19809_v0  ;;  %16714 = vmatprep.mubr.msk.bf16.mxu0 %vm19810_vm0, %v19809_v0  ;;  %v4642_v55 = vrot.slane %v19693_v57, 1 }
 0x5f5   :  { %v4645_v9 = vsel %vm2114_vm2, %v4642_v55, %v4644_v26  ;;  %v19702_v26 = vld [vmem:[%s24672_s0 + $0x18] sm:$0xff]  }
 0x5fa   :  { %15459 = vmatmul.mubr.bf16.gmra.mrb[76].mxu1 %v4301_v43  ;;  %16715 = vmatmul.mubr.bf16.gmra.mrb[32].mxu0 %v10625_v23  ;;  %v4643_v43 = vsel %vm2114_vm2, %v4640_v6, %v4642_v55  ;;  %v19699_v6 = vld [vmem:[%s24672_s0 + $0x19c] sm:$0xff]  }
 0x5fb   :  { %15462 = vmatprep.mubr.msk.bf16.mxu1 %vm19810_vm0, %v19809_v0  ;;  %16718 = vmatprep.mubr.msk.bf16.mxu0 %vm19810_vm0, %v19809_v0 }
 0x602   :  { %15463 = vmatmul.mubr.bf16.gmra.mrb[80].mxu1 %v4300_v60  ;;  %16719 = vmatmul.mubr.bf16.gmra.mrb[36].mxu0 %v10627_v16  ;;  %v10636_v60 = vrot.slane %v19544_v40, 3 }
 0x603   :  { %15482 = vmatprep.mubr.msk.bf16.mxu1 %vm19810_vm0, %v19809_v0  ;;  %16722 = vmatprep.mubr.msk.bf16.mxu0 %vm19810_vm0, %v19809_v0 }
 0x604   :  { %v10637_v23 = vsel %vm6680_vm3, %v10634_v1, %v10636_v60  ;;  %v10639_v16 = vsel %vm6680_vm3, %v10636_v60, %v10638_v58  ;;  %v4654_v1 = vrot.slane %v19699_v6, 1 }
 0x60a   :  { %15483 = vmatmul.mubr.bf16.vlgmr.msra.gmra.mrb[0].mxu1 %v4635_v54  ;;  %16723 = vmatmul.mubr.bf16.gmra.mrb[40].mxu0 %v10629_v3  ;;  %v10641_v54 = vsel %vm6680_vm3, %v10638_v58, %v10640_v56  ;;  %v19549_v3 = vld [vmem:[%s24672_s0 + $0x138] sm:$0xff]   ;;  %v10997_v58 = vshrl.u32 %v19702_v26, 16 }
 0x60b   :  { %15486 = vmatprep.mubr.msk.bf16.mxu1 %vm19810_vm0, %v19809_v0  ;;  %16726 = vmatprep.mubr.msk.bf16.mxu0 %vm19810_vm0, %v19809_v0  ;;  %v10642_v32 = vrot.slane %v19549_v3, 3 }
 0x60c   :  { %15567 = vmatpush3.bf16.msra.mxu1 %v19539_v15  ;;  %v4648_v15 = vrot.slane %v19696_v20, 1  ;;  %v19704_v20 = vld [vmem:[%s24672_s0 + $0x20] sm:$0xff]  }
 0x60d   :  { %15568 = vmatprep.subr.bf16.mxu1 %v19809_v0  ;;  %v10643_v47 = vsel %vm6680_vm3, %v10640_v56, %v10642_v32 }
 0x60e   :  { %v4649_v49 = vsel %vm2114_vm2, %v4646_v25, %v4648_v15  ;;  %v10999_v25 = vrot.slane %v10997_v58, 1  ;;  %v19710_v58 = vld [vmem:[%s24672_s0 + $0x38] sm:$0xff]  }
 0x610   :  { %15569 = vmatpush3.bf16.msra.mxu1 %v19543_v11  ;;  %v19550_v11 = vld [vmem:[%s24672_s0 + $0x140] sm:$0xff]  }
 0x611   :  { %15570 = vmatprep.subr.bf16.mxu1 %v19809_v0  ;;  %v10644_v12 = vrot.slane %v19550_v11, 3 }
 0x612   :  { %15487 = vmatmul.mubr.bf16.gmra.mrb[4].mxu1 %v4637_v31  ;;  %16727 = vmatmul.mubr.bf16.gmra.mrb[44].mxu0 %v10631_v52  ;;  %v19697_v31 = vld [vmem:[%s24672_s0 + $0x18c] sm:$0xff]  }
 0x613   :  { %15490 = vmatprep.mubr.msk.bf16.mxu1 %vm19810_vm0, %v19809_v0  ;;  %16730 = vmatprep.mubr.msk.bf16.mxu0 %vm19810_vm0, %v19809_v0  ;;  %v4650_v52 = vrot.slane %v19697_v31, 1  ;;  %v10645_v21 = vsel %vm6680_vm3, %v10642_v32, %v10644_v12  ;;  %v11009_v32 = vshll.u32 %v19704_v20, 16 }
 0x614   :  { %15571 = vmatpush3.bf16.msra.mxu1 %v19548_v5  ;;  %v10483_v5 = vld [vmem:[%s24672_s0 + $0x148] sm:$0xf] }
 0x615   :  { %15572 = vmatprep.subr.bf16.mxu1 %v19809_v0  ;;  %v4651_v42 = vsel %vm2114_vm2, %v4648_v15, %v4650_v52  ;;  %v11006_v15 = vshrl.u32 %v19704_v20, 16 }
 0x617   :  { %v11008_v31 = vrot.slane %v11006_v15, 1  ;;  %v19712_v15 = vld [vmem:[%s24672_s0 + $0x40] sm:$0xff]  }
 0x618   :  { %15573 = vmatpush3.bf16.msra.mxu1 %v19552_v19  ;;  %v13737_v19 = vcombine.low %v10483_v5, %v10484_v13  ;;  %v19705_v5 = vld [vmem:[%s24672_s0 + $0x1b4] sm:$0xff]  }
 0x619   :  { %15574 = vmatprep.subr.bf16.mxu1 %v19809_v0  ;;  %v4660_v13 = vrot.slane %v19705_v5, 1 }
 0x61a   :  { %15491 = vmatmul.mubr.bf16.gmra.mrb[8].mxu1 %v4639_v46  ;;  %16731 = vmatmul.mubr.bf16.gmra.mrb[48].mxu0 %v10633_v2  ;;  %v19698_v46 = vld [vmem:[%s24672_s0 + $0x194] sm:$0xff]   ;;  %v10646_v33 = vrot.slane %v13737_v19, 3 }
 0x61b   :  { %15494 = vmatprep.mubr.msk.bf16.mxu1 %vm19810_vm0, %v19809_v0  ;;  %16734 = vmatprep.mubr.msk.bf16.mxu0 %vm19810_vm0, %v19809_v0  ;;  %v4652_v2 = vrot.slane %v19698_v46, 1 }
 0x61c   :  { %15575 = vmatpush3.bf16.msra.mxu1 %v19556_v17  ;;  %v10647_v27 = vsel %vm6680_vm3, %v10644_v12, %v10646_v33  ;;  %v19559_v12 = vld [vmem:[%s24671_s1 + $0x5d0] sm:$0xff]  }
 0x61d   :  { %15576 = vmatprep.subr.bf16.mxu1 %v19809_v0  ;;  %v4653_v17 = vsel %vm2114_vm2, %v4650_v52, %v4652_v2  ;;  %v4655_v57 = vsel %vm2114_vm2, %v4652_v2, %v4654_v1  ;;  %v11011_v52 = vrot.slane %v11009_v32, 2  ;;  %v19561_v2 = vld [vmem:[%s24671_s1 + $0x5d8] sm:$0xff]   ;;  %v11042_v32 = vshrl.u32 %v19712_v15, 16 }
 0x620   :  { %15577 = vmatpush3.bf16.msra.mxu1 %v19558_v51  ;;  %v10980_v51 = vshrl.u32 %v22693_v30, 16 }
 0x621   :  { %15578 = vmatprep.subr.bf16.mxu1 %v19809_v0 }
 0x622   :  { %15495 = vmatmul.mubr.bf16.gmra.mrb[12].mxu1 %v4641_v48  ;;  %16735 = vmatmul.mubr.bf16.gmra.mrb[52].mxu0 %v10635_v10  ;;  %v10983_v48 = vshll.u32 %v22693_v30, 16  ;;  %v19700_v10 = vld [vmem:[%s24672_s0 + $0x10] sm:$0xff]   ;;  %v10982_v55 = vrot.slane %v10980_v51, 1  ;;  %v19701_v30 = vld [vmem:[%s24672_s0 + $0x1a4] sm:$0xff]   ;;  %v19707_v51 = vld [vmem:[%s24672_s0 + $0x1bc] sm:$0xff]  }
 0x623   :  { %15498 = vmatprep.mubr.msk.bf16.mxu1 %vm19810_vm0, %v19809_v0  ;;  %16738 = vmatprep.mubr.msk.bf16.mxu0 %vm19810_vm0, %v19809_v0  ;;  %v10988_v40 = vshrl.u32 %v19700_v10, 16 }
 0x624   :  { %15579 = vmatpush3.bf16.msra.mxu1 %v19560_v7  ;;  %v10991_v7 = vshll.u32 %v19700_v10, 16  ;;  %v10985_v60 = vrot.slane %v10983_v48, 2  ;;  %v4662_v48 = vrot.slane %v19707_v51, 1  ;;  %v19716_v51 = vld [vmem:[%s24672_s0 + $0x50] sm:$0xff]  }
 0x625   :  { %15580 = vmatprep.subr.bf16.mxu1 %v19809_v0 }
 0x626   :  { %v10986_v36 = vor.u32 %v10985_v60, %v10982_v55  ;;  %v19565_v55 = vld [vmem:[%s24671_s1 + $0x5e8] sm:$0xff]   ;;  %v4663_v60 = vsel %vm2114_vm2, %v4660_v13, %v4662_v48 }
 0x628   :  { %15581 = vmatpush3.bf16.msra.mxu1 %v19562_v59  ;;  %v10990_v59 = vrot.slane %v10988_v40, 1  ;;  %v19708_v40 = vld [vmem:[%s24672_s0 + $0x30] sm:$0xff]  }
 0x629   :  { %15666 = vmatprep.subr.bf16.mxu1 %v19809_v0 }
 0x62a   :  { %15499 = vmatmul.mubr.bf16.gmra.mrb[16].mxu1 %v4643_v43  ;;  %16739 = vmatmul.mubr.bf16.gmra.mrb[56].mxu0 %v10637_v23  ;;  %v10993_v43 = vrot.slane %v10991_v7, 2  ;;  %v4656_v23 = vrot.slane %v19701_v30, 1  ;;  %v11024_v7 = vshrl.u32 %v19708_v40, 16 }
 0x62b   :  { %15502 = vmatprep.mubr.msk.bf16.mxu1 %vm19810_vm0, %v19809_v0  ;;  %16742 = vmatprep.mubr.msk.bf16.mxu0 %vm19810_vm0, %v19809_v0 }
 0x62c   :  { %v10994_v22 = vor.u32 %v10993_v43, %v10990_v59  ;;  %v11026_v43 = vrot.slane %v11024_v7, 1 }
 0x62e   :  { %v10995_v62 = vsel %vm7053_vm4, %v10986_v36, %v10994_v22  ;;  %v19709_v36 = vld [vmem:[%s24672_s0 + $0x1c4] sm:$0xff]  }
 0x632   :  { %15503 = vmatmul.mubr.bf16.gmra.mrb[20].mxu1 %v4645_v9  ;;  %16743 = vmatmul.mubr.bf16.gmra.mrb[60].mxu0 %v10639_v16  ;;  %v11000_v9 = vshll.u32 %v19702_v26, 16  ;;  %v4657_v16 = vsel %vm2114_vm2, %v4654_v1, %v4656_v23  ;;  %v19563_v1 = vld [vmem:[%s24671_s1 + $0x5e0] sm:$0xff]  }
 0x633   :  { %15506 = vmatprep.mubr.msk.bf16.mxu1 %vm19810_vm0, %v19809_v0  ;;  %16746 = vmatprep.mubr.msk.bf16.mxu0 %vm19810_vm0, %v19809_v0 }
 0x634   :  { %v11002_v56 = vrot.slane %v11000_v9, 2  ;;  %v11033_v9 = vshrl.u32 %v19710_v58, 16 }
 0x636   :  { %v11003_v3 = vor.u32 %v11002_v56, %v10999_v25  ;;  %v11035_v56 = vrot.slane %v11033_v9, 1 }
 0x638   :  { %v11004_v11 = vsel %vm7053_vm4, %v10994_v22, %v11003_v3  ;;  %v4664_v22 = vrot.slane %v19709_v36, 1 }
 0x63a   :  { %15507 = vmatmul.mubr.bf16.gmra.mrb[24].mxu1 %v4647_v45  ;;  %16747 = vmatmul.mubr.bf16.gmra.mrb[64].mxu0 %v10641_v54  ;;  %v19703_v45 = vld [vmem:[%s24672_s0 + $0x1ac] sm:$0xff]  }
 0x63b   :  { %15510 = vmatprep.mubr.msk.bf16.mxu1 %vm19810_vm0, %v19809_v0  ;;  %16750 = vmatprep.mubr.msk.bf16.mxu0 %vm19810_vm0, %v19809_v0  ;;  %v4658_v54 = vrot.slane %v19703_v45, 1 }
 0x642   :  { %15511 = vmatmul.mubr.bf16.gmra.mrb[28].mxu1 %v4649_v49  ;;  %16751 = vmatmul.mubr.bf16.gmra.mrb[68].mxu0 %v10643_v47  ;;  %v19557_v49 = vld [vmem:[%s24671_s1 + $0x5c8] sm:$0xff]   ;;  %v4659_v47 = vsel %vm2114_vm2, %v4656_v23, %v4658_v54  ;;  %v19567_v23 = vld [vmem:[%s24671_s1 + $0x5f0] sm:$0xff]  }
 0x643   :  { %15514 = vmatprep.mubr.msk.bf16.mxu1 %vm19810_vm0, %v19809_v0  ;;  %16754 = vmatprep.mubr.msk.bf16.mxu0 %vm19810_vm0, %v19809_v0 }
 0x64a   :  { %15515 = vmatmul.mubr.bf16.gmra.mrb[32].mxu1 %v4651_v42  ;;  %16755 = vmatmul.mubr.bf16.gmra.mrb[72].mxu0 %v10645_v21  ;;  %v11012_v42 = vor.u32 %v11011_v52, %v11008_v31  ;;  %v19706_v21 = vld [vmem:[%s24672_s0 + $0x28] sm:$0xff]   ;;  %v11044_v31 = vrot.slane %v11042_v32, 1 }
 0x64b   :  { %15518 = vmatprep.mubr.msk.bf16.mxu1 %vm19810_vm0, %v19809_v0  ;;  %16758 = vmatprep.mubr.msk.bf16.mxu0 %vm19810_vm0, %v19809_v0  ;;  %v11015_v19 = vshrl.u32 %v19706_v21, 16  ;;  %v11018_v46 = vshll.u32 %v19706_v21, 16 }
 0x64d   :  { %v11020_v6 = vrot.slane %v11018_v46, 2 }
 0x652   :  { %15519 = vmatmul.mubr.bf16.gmra.mrb[36].mxu1 %v4653_v17  ;;  %16759 = vmatmul.mubr.bf16.gmra.mrb[76].mxu0 %v10647_v27  ;;  %v11013_v17 = vsel %vm7053_vm4, %v11003_v3, %v11012_v42  ;;  %v11017_v27 = vrot.slane %v11015_v19, 1 }
 0x653   :  { %15522 = vmatprep.mubr.msk.bf16.mxu1 %vm19810_vm0, %v19809_v0  ;;  %16762 = vmatprep.mubr.msk.bf16.mxu0 %vm19810_vm0, %v19809_v0 }
 0x654   :  { %v11021_v10 = vor.u32 %v11020_v6, %v11017_v27  ;;  %v19715_v27 = vld [vmem:[%s24672_s0 + $0x1dc] sm:$0xff]  }
 0x655   :  { %v4670_v6 = vrot.slane %v19715_v27, 1 }
 0x656   :  { %v11022_v59 = vsel %vm7053_vm4, %v11012_v42, %v11021_v10  ;;  %v19714_v42 = vld [vmem:[%s24672_s0 + $0x48] sm:$0xff]  }
 0x657   :  { %v11051_v21 = vshrl.u32 %v19714_v42, 16  ;;  %v11054_v19 = vshll.u32 %v19714_v42, 16 }
 0x65a   :  { %15523 = vmatmul.mubr.bf16.gmra.mrb[40].mxu1 %v4655_v57  ;;  %16763 = vmatmul.mubr.bf16.gmra.mrb[80].mxu0 %v10646_v33  ;;  %v4661_v33 = vsel %vm2114_vm2, %v4658_v54, %v4660_v13  ;;  %v11027_v57 = vshll.u32 %v19708_v40, 16  ;;  %v19711_v54 = vld [vmem:[%s24672_s0 + $0x1cc] sm:$0xff]  }
 0x65b   :  { %15526 = vmatprep.mubr.msk.bf16.mxu1 %vm19810_vm0, %v19809_v0  ;;  %16782 = vmatprep.mubr.msk.bf16.mxu0 %vm19810_vm0, %v19809_v0  ;;  %v4666_v3 = vrot.slane %v19711_v54, 1 }
 0x65c   :  { %v11029_v30 = vrot.slane %v11027_v57, 2 }
 0x65e   :  { %v11030_v26 = vor.u32 %v11029_v30, %v11026_v43  ;;  %v4984_v43 = vld [vmem:[%s24672_s0 + $0x4] sm:$0xf] }
 0x660   :  { %v11031_v25 = vsel %vm7053_vm4, %v11021_v10, %v11030_v26  ;;  %v11063_v10 = vshll.u32 %v19716_v51, 16 }
 0x662   :  { %15527 = vmatmul.mubr.bf16.gmra.mrb[44].mxu1 %v4657_v16  ;;  %16783 = vmatmul.mubr.bf16.vlgmr.msra.gmra.mrb[0].mxu0 %v10995_v62  ;;  %v11036_v16 = vshll.u32 %v19710_v58, 16  ;;  %v19569_v62 = vld [vmem:[%s24671_s1 + $0x5f8] sm:$0xff]  }
 0x663   :  { %15530 = vmatprep.mubr.msk.bf16.mxu1 %vm19810_vm0, %v19809_v0  ;;  %16867 = vmatpush3.bf16.msra.mxu0 %v19555_v24  ;;  %v4665_v24 = vsel %vm2114_vm2, %v4662_v48, %v4664_v22  ;;  %v11060_v48 = vshrl.u32 %v19716_v51, 16 }
 0x664   :  { %16786 = vmatprep.mubr.msk.bf16.mxu0 %vm19810_vm0, %v19809_v0  ;;  %16868 = vmatprep.subr.bf16.mxu0 %v19809_v0  ;;  %v11038_v45 = vrot.slane %v11036_v16, 2 }
 0x665   :  { %v11062_v57 = vrot.slane %v11060_v48, 1  ;;  %v19722_v48 = vld [vmem:[%s24672_s0 + $0x70] sm:$0xff]  }
 0x666   :  { %v11039_v20 = vor.u32 %v11038_v45, %v11035_v56  ;;  %v19720_v45 = vld [vmem:[%s24672_s0 + $0x60] sm:$0xff]  }
 0x667   :  { %16869 = vmatpush3.bf16.msra.mxu0 %v19557_v49  ;;  %v11045_v49 = vshll.u32 %v19712_v15, 16  ;;  %v11078_v54 = vshrl.u32 %v19720_v45, 16 }
 0x668   :  { %16870 = vmatprep.subr.bf16.mxu0 %v19809_v0 }
 0x669   :  { %v11047_v52 = vrot.slane %v11045_v49, 2  ;;  %v11080_v49 = vrot.slane %v11078_v54, 1 }
 0x66a   :  { %15531 = vmatmul.mubr.bf16.gmra.mrb[48].mxu1 %v4659_v47  ;;  %16787 = vmatmul.mubr.bf16.gmra.mrb[4].mxu0 %v11004_v11  ;;  %v4667_v47 = vsel %vm2114_vm2, %v4664_v22, %v4666_v3  ;;  %v11040_v11 = vsel %vm7053_vm4, %v11030_v26, %v11039_v20  ;;  %v19719_v26 = vld [vmem:[%s24672_s0 + $0x8] sm:$0xf] }
 0x66b   :  { %15534 = vmatprep.mubr.msk.bf16.mxu1 %vm19810_vm0, %v19809_v0  ;;  %16790 = vmatprep.mubr.msk.bf16.mxu0 %vm19810_vm0, %v19809_v0  ;;  %v11048_v13 = vor.u32 %v11047_v52, %v11044_v31  ;;  %v13342_v58 = vcombine.low %v4984_v43, %v19719_v26  ;;  %v24802_v31 = vshll.u32 %v20440_v44, 16  ;;  %v24805_v43 = vshrl.u32 %v20458_v53, 16  ;;  %v19723_v26 = vld [vmem:[%s24672_s0 + $0x78] sm:$0xff]  }
 0x66c   :  { %16871 = vmatpush3.bf16.msra.mxu0 %v19559_v12  ;;  %v19713_v12 = vld [vmem:[%s24672_s0 + $0x1d4] sm:$0xff]  }
 0x66d   :  { %16872 = vmatprep.subr.bf16.mxu0 %v19809_v0  ;;  %v4668_v5 = vrot.slane %v19713_v12, 1  ;;  %v5158_v52 = vrot.slane %v24802_v31, 1 }
 0x66f   :  { %v4669_v46 = vsel %vm2114_vm2, %v4666_v3, %v4668_v5  ;;  %v4671_v40 = vsel %vm2114_vm2, %v4668_v5, %v4670_v6  ;;  %v11081_v3 = vshll.u32 %v19720_v45, 16  ;;  %v19721_v5 = vld [vmem:[%s24672_s0 + $0x68] sm:$0xff]   ;;  %v24807_v45 = vshrl.u32 %v20476_v61, 16 }
 0x670   :  { %16873 = vmatpush3.bf16.msra.mxu0 %v19561_v2  ;;  %v11049_v2 = vsel %vm7053_vm4, %v11039_v20, %v11048_v13  ;;  %v5149_v20 = vshrl.u32 %v13342_v58, 16  ;;  %v11090_v42 = vshll.u32 %v19721_v5, 16 }
 0x671   :  { %16874 = vmatprep.subr.bf16.mxu0 %v19809_v0 }
 0x672   :  { %15535 = vmatmul.mubr.bf16.gmra.mrb[52].mxu1 %v4661_v33  ;;  %16791 = vmatmul.mubr.bf16.gmra.mrb[8].mxu0 %v11013_v17  ;;  %v11053_v33 = vrot.slane %v11051_v21, 1  ;;  %v11056_v17 = vrot.slane %v11054_v19, 2 }
 0x673   :  { %15538 = vmatprep.mubr.msk.bf16.mxu1 %vm19810_vm0, %v19809_v0  ;;  %16794 = vmatprep.mubr.msk.bf16.mxu0 %vm19810_vm0, %v19809_v0 }
 0x674   :  { %16875 = vmatpush3.bf16.msra.mxu0 %v19563_v1  ;;  %v11057_v1 = vor.u32 %v11056_v17, %v11053_v33  ;;  %v19564_v33 = vld [vmem:[%s24671_s1 + $0x2c0] sm:$0xff]   ;;  %v24803_v17 = vshrl.u32 %v20440_v44, 16 }
 0x675   :  { %16876 = vmatprep.subr.bf16.mxu0 %v19809_v0 }
 0x676   :  { %v11058_v7 = vsel %vm7053_vm4, %v11048_v13, %v11057_v1  ;;  %v11087_v13 = vshrl.u32 %v19721_v5, 16  ;;  %v5162_v27 = vor.u32 %v24803_v17, %v5158_v52  ;;  %v19576_v5 = vld [vmem:[%s24671_s1 + $0x2f0] sm:$0xff]  }
 0x678   :  { %16877 = vmatpush3.bf16.msra.mxu0 %v19565_v55  ;;  %v11065_v55 = vrot.slane %v11063_v10, 2  ;;  %v11096_v10 = vshrl.u32 %v19722_v48, 16 }
 0x679   :  { %16878 = vmatprep.subr.bf16.mxu0 %v19809_v0 }
 0x67a   :  { %15539 = vmatmul.mubr.bf16.gmra.mrb[56].mxu1 %v4663_v60  ;;  %16795 = vmatmul.mubr.bf16.gmra.mrb[12].mxu0 %v11022_v59  ;;  %v19717_v60 = vld [vmem:[%s24672_s0 + $0x1e4] sm:$0x1f]   ;;  %v11066_v30 = vor.u32 %v11065_v55, %v11062_v57  ;;  %v11098_v55 = vrot.slane %v11096_v10, 1 }
 0x67b   :  { %15542 = vmatprep.mubr.msk.bf16.mxu1 %vm19810_vm0, %v19809_v0  ;;  %16798 = vmatprep.mubr.msk.bf16.mxu0 %vm19810_vm0, %v19809_v0  ;;  %v4672_v59 = vrot.slane %v19717_v60, 1 }
 0x67c   :  { %16879 = vmatpush3.bf16.msra.mxu0 %v19567_v23  ;;  %v19718_v23 = vld [vmem:[%s24672_s0 + $0x58] sm:$0xff]   ;;  %v11067_v16 = vsel %vm7053_vm4, %v11057_v1, %v11066_v30 }
 0x67d   :  { %16880 = vmatprep.subr.bf16.mxu0 %v19809_v0  ;;  %v11069_v36 = vshrl.u32 %v19718_v23, 16  ;;  %v11072_v22 = vshll.u32 %v19718_v23, 16  ;;  %v4673_v9 = vsel %vm2114_vm2, %v4670_v6, %v4672_v59  ;;  %v24804_v6 = vshll.u32 %v20458_v53, 16 }
 0x67e   :  { %v24806_v23 = vshll.u32 %v20476_v61, 16 }
 0x67f   :  { %v5166_v1 = vrot.slane %v24804_v6, 1 }
 0x680   :  { %16881 = vmatpush3.bf16.msra.mxu0 %v19569_v62  ;;  %v11071_v62 = vrot.slane %v11069_v36, 1  ;;  %v5174_v36 = vrot.slane %v24806_v23, 1  ;;  %v24813_v23 = vshrl.u32 %v20557_v29, 16 }
 0x681   :  { %16966 = vmatprep.subr.bf16.mxu0 %v19809_v0  ;;  %v5167_v44 = vsel %vm1095_vm5, %v5162_v27, %v5166_v1  ;;  %v19579_v27 = vld [vmem:[%s24671_s1 + $0x2f8] sm:$0xff]  }
 0x682   :  { %15543 = vmatmul.mubr.bf16.gmra.mrb[60].mxu1 %v4665_v24  ;;  %16799 = vmatmul.mubr.bf16.gmra.mrb[16].mxu0 %v11031_v25  ;;  %v11074_v24 = vrot.slane %v11072_v22, 2  ;;  %v5151_v25 = vshll.u32 %v13342_v58, 16  ;;  %v11105_v58 = vshrl.u32 %v19723_v26, 16  ;;  %v5178_v54 = vor.u32 %v24807_v45, %v5174_v36 }
 0x683   :  { %15546 = vmatprep.mubr.msk.bf16.mxu1 %vm19810_vm0, %v19809_v0  ;;  %16802 = vmatprep.mubr.msk.bf16.mxu0 %vm19810_vm0, %v19809_v0 }
 0x684   :  { %v11075_v56 = vor.u32 %v11074_v24, %v11071_v62  ;;  %v5153_v15 = vrot.slane %v5151_v25, 1  ;;  %v11107_v24 = vrot.slane %v11105_v58, 1 }
 0x686   :  { %v11076_v32 = vsel %vm7053_vm4, %v11066_v30, %v11075_v56  ;;  %v5170_v30 = vor.u32 %v24805_v43, %v5166_v1 }
 0x688   :  { %v5175_v53 = vsel %vm1095_vm5, %v5170_v30, %v5174_v36 }
 0x68a   :  { %15547 = vmatmul.mubr.bf16.gmra.mrb[64].mxu1 %v4667_v47  ;;  %16803 = vmatmul.mubr.bf16.gmra.mrb[20].mxu0 %v11040_v11  ;;  %v11083_v47 = vrot.slane %v11081_v3, 2  ;;  %v5154_v11 = vor.u32 %v5153_v15, %v5149_v20  ;;  %v24808_v3 = vshll.u32 %v20503_v8, 16 }
 0x68b   :  { %15550 = vmatprep.mubr.msk.bf16.mxu1 %vm19810_vm0, %v19809_v0  ;;  %16806 = vmatprep.mubr.msk.bf16.mxu0 %vm19810_vm0, %v19809_v0 }
 0x68c   :  { %v11084_v12 = vor.u32 %v11083_v47, %v11080_v49  ;;  %v5159_v21 = vsel %vm1095_vm5, %v5154_v11, %v5158_v52  ;;  %v5182_v20 = vrot.slane %v24808_v3, 1  ;;  %v19574_v11 = vld [vmem:[%s24671_s1 + $0x2e8] sm:$0xff]  }
 0x68e   :  { %v11085_v19 = vsel %vm7053_vm4, %v11075_v56, %v11084_v12  ;;  %v19572_v56 = vld [vmem:[%s24671_s1 + $0x2e0] sm:$0xff]   ;;  %v5183_v61 = vsel %vm1095_vm5, %v5178_v54, %v5182_v20  ;;  %v24816_v54 = vshll.u32 %v20600_v50, 16 }
 0x690   :  { %v5214_v3 = vrot.slane %v24816_v54, 1  ;;  %v19571_v54 = vld [vmem:[%s24671_s1 + $0x600] sm:$0xff]  }
 0x692   :  { %15551 = vmatmul.mubr.bf16.gmra.mrb[68].mxu1 %v4669_v46  ;;  %16807 = vmatmul.mubr.bf16.gmra.mrb[24].mxu0 %v11049_v2  ;;  %v11089_v46 = vrot.slane %v11087_v13, 1  ;;  %v11092_v2 = vrot.slane %v11090_v42, 2  ;;  %v24809_v13 = vshrl.u32 %v20503_v8, 16 }
 0x693   :  { %15554 = vmatprep.mubr.msk.bf16.mxu1 %vm19810_vm0, %v19809_v0  ;;  %16810 = vmatprep.mubr.msk.bf16.mxu0 %vm19810_vm0, %v19809_v0 }
 0x694   :  { %v11093_v51 = vor.u32 %v11092_v2, %v11089_v46  ;;  %v5186_v42 = vor.u32 %v24809_v13, %v5182_v20  ;;  %v19725_v2 = vld [vmem:[%s24672_s0 + $0x88] sm:$0xff]  }
 0x695   :  { %v11126_v17 = vshll.u32 %v19725_v2, 16 }
 0x696   :  { %v11094_v57 = vsel %vm7053_vm4, %v11084_v12, %v11093_v51 }
 0x69a   :  { %15555 = vmatmul.mubr.bf16.gmra.mrb[72].mxu1 %v4671_v40  ;;  %16811 = vmatmul.mubr.bf16.gmra.mrb[28].mxu0 %v11058_v7  ;;  %v11099_v40 = vshll.u32 %v19722_v48, 16  ;;  %v19566_v7 = vld [vmem:[%s24671_s1 + $0x2c8] sm:$0xff]   ;;  %v24811_v48 = vshrl.u32 %v20529_v18, 16 }
 0x69b   :  { %15558 = vmatprep.mubr.msk.bf16.mxu1 %vm19810_vm0, %v19809_v0  ;;  %16814 = vmatprep.mubr.msk.bf16.mxu0 %vm19810_vm0, %v19809_v0 }
 0x69c   :  { %v11101_v60 = vrot.slane %v11099_v40, 2  ;;  %v24812_v40 = vshll.u32 %v20557_v29, 16 }
 0x69e   :  { %v11102_v22 = vor.u32 %v11101_v60, %v11098_v55 }
 0x6a0   :  { %v11103_v62 = vsel %vm7053_vm4, %v11093_v51, %v11102_v22  ;;  %v11128_v51 = vrot.slane %v11126_v17, 2 }
 0x6a2   :  { %15559 = vmatmul.mubr.bf16.gmra.mrb[76].mxu1 %v4673_v9  ;;  %16815 = vmatmul.mubr.bf16.gmra.mrb[32].mxu0 %v11067_v16  ;;  %v11108_v9 = vshll.u32 %v19723_v26, 16  ;;  %v19570_v16 = vld [vmem:[%s24671_s1 + $0x2d8] sm:$0xff]  }
 0x6a3   :  { %15562 = vmatprep.mubr.msk.bf16.mxu1 %vm19810_vm0, %v19809_v0  ;;  %16818 = vmatprep.mubr.msk.bf16.mxu0 %vm19810_vm0, %v19809_v0 }
 0x6a4   :  { %v11110_v25 = vrot.slane %v11108_v9, 2  ;;  %v19727_v9 = vld [vmem:[%s24672_s0 + $0x98] sm:$0xff]  }
 0x6a6   :  { %v11111_v15 = vor.u32 %v11110_v25, %v11107_v24 }
 0x6a8   :  { %v11112_v31 = vsel %vm7053_vm4, %v11102_v22, %v11111_v15  ;;  %v24814_v22 = vshll.u32 %v20585_v41, 16 }
 0x6aa   :  { %15563 = vmatmul.mubr.bf16.gmra.mrb[80].mxu1 %v4672_v59  ;;  %16819 = vmatmul.mubr.bf16.gmra.mrb[36].mxu0 %v11076_v32  ;;  %v19568_v59 = vld [vmem:[%s24671_s1 + $0x2d0] sm:$0xff]   ;;  %v19724_v32 = vld [vmem:[%s24672_s0 + $0x80] sm:$0xff]   ;;  %v5206_v26 = vrot.slane %v24814_v22, 1 }
 0x6ab   :  { %15582 = vmatprep.mubr.msk.bf16.mxu1 %vm19810_vm0, %v19809_v0  ;;  %16822 = vmatprep.mubr.msk.bf16.mxu0 %vm19810_vm0, %v19809_v0  ;;  %v11114_v49 = vshrl.u32 %v19724_v32, 16  ;;  %v11117_v47 = vshll.u32 %v19724_v32, 16 }
 0x6ad   :  { %v11116_v52 = vrot.slane %v11114_v49, 1  ;;  %v11119_v12 = vrot.slane %v11117_v47, 2  ;;  %v10958_v47 = vld [vmem:[%s24672_s0 + $0xac] sm:$0x3] }
 0x6af   :  { %v11120_v46 = vor.u32 %v11119_v12, %v11116_v52 }
 0x6b1   :  { %v11121_v6 = vsel %vm7053_vm4, %v11111_v15, %v11120_v46  ;;  %v19728_v15 = vld [vmem:[%s24672_s0 + $0xa0] sm:$0xff]  }
 0x6b2   :  { %15583 = vmatmul.mubr.bf16.vlgmr.msra.gmra.mrb[0].mxu1 %v5159_v21  ;;  %16823 = vmatmul.mubr.bf16.gmra.mrb[40].mxu0 %v11085_v19  ;;  %v24810_v21 = vshll.u32 %v20529_v18, 16  ;;  %v11150_v32 = vshrl.u32 %v19728_v15, 16  ;;  %v11153_v49 = vshll.u32 %v19728_v15, 16  ;;  %v24825_v15 = vshrl.u32 %v20673_v37, 16 }
 0x6b3   :  { %15586 = vmatprep.mubr.msk.bf16.mxu1 %vm19810_vm0, %v19809_v0  ;;  %16826 = vmatprep.mubr.msk.bf16.mxu0 %vm19810_vm0, %v19809_v0 }
 0x6b4   :  { %15667 = vmatpush3.bf16.msra.mxu1 %v19564_v33  ;;  %v5190_v19 = vrot.slane %v24810_v21, 1  ;;  %v11123_v33 = vshrl.u32 %v19725_v2, 16  ;;  %v11152_v52 = vrot.slane %v11150_v32, 1  ;;  %v11155_v12 = vrot.slane %v11153_v49, 2 }
 0x6b5   :  { %15668 = vmatprep.subr.bf16.mxu1 %v19809_v0  ;;  %v24826_v49 = vshll.u32 %v20695_v4, 16 }
 0x6b6   :  { %v5191_v8 = vsel %vm1095_vm5, %v5186_v42, %v5190_v19  ;;  %v11125_v1 = vrot.slane %v11123_v33, 1  ;;  %v5194_v10 = vor.u32 %v24811_v48, %v5190_v19  ;;  %v24818_v42 = vshll.u32 %v20619_v63, 16 }
 0x6b7   :  { %v11156_v19 = vor.u32 %v11155_v12, %v11152_v52  ;;  %v19573_v12 = vld [vmem:[%s24671_s1 + $0x608] sm:$0xff]  }
 0x6b8   :  { %15669 = vmatpush3.bf16.msra.mxu1 %v19566_v7  ;;  %v5198_v7 = vrot.slane %v24812_v40, 1  ;;  %v5222_v21 = vrot.slane %v24818_v42, 1 }
 0x6b9   :  { %15670 = vmatprep.subr.bf16.mxu1 %v19809_v0 }
 0x6ba   :  { %15587 = vmatmul.mubr.bf16.gmra.mrb[4].mxu1 %v5167_v44  ;;  %16827 = vmatmul.mubr.bf16.gmra.mrb[44].mxu0 %v11094_v57  ;;  %v11129_v44 = vor.u32 %v11128_v51, %v11125_v1  ;;  %v19726_v57 = vld [vmem:[%s24672_s0 + $0x90] sm:$0xff]   ;;  %v5202_v36 = vor.u32 %v24813_v23, %v5198_v7  ;;  %v24820_v1 = vshll.u32 %v20644_v14, 16 }
 0x6bb   :  { %15590 = vmatprep.mubr.msk.bf16.mxu1 %vm19810_vm0, %v19809_v0  ;;  %16830 = vmatprep.mubr.msk.bf16.mxu0 %vm19810_vm0, %v19809_v0  ;;  %v11132_v55 = vshrl.u32 %v19726_v57, 16  ;;  %v11135_v60 = vshll.u32 %v19726_v57, 16 }
 0x6bc   :  { %15671 = vmatpush3.bf16.msra.mxu1 %v19568_v59  ;;  %v5199_v59 = vsel %vm1095_vm5, %v5194_v10, %v5198_v7  ;;  %v11130_v43 = vsel %vm7053_vm4, %v11120_v46, %v11129_v44  ;;  %v5230_v51 = vrot.slane %v24820_v1, 1  ;;  %v24821_v7 = vshrl.u32 %v20644_v14, 16 }
 0x6bd   :  { %15672 = vmatprep.subr.bf16.mxu1 %v19809_v0  ;;  %v11134_v30 = vrot.slane %v11132_v55, 1  ;;  %v11137_v18 = vrot.slane %v11135_v60, 2  ;;  %v19730_v55 = vld [vmem:[%s24672_s0 + $0xa8] sm:$0xf8]  }
 0x6be   :  { %v11500_v60 = vshrl.u32 %v19730_v55, 16 }
 0x6bf   :  { %v11138_v58 = vor.u32 %v11137_v18, %v11134_v30 }
 0x6c0   :  { %15673 = vmatpush3.bf16.msra.mxu1 %v19570_v16  ;;  %v11141_v16 = vshrl.u32 %v19727_v9, 16  ;;  %v11502_v23 = vrot.slane %v11500_v60, 3 }
 0x6c1   :  { %15674 = vmatprep.subr.bf16.mxu1 %v19809_v0  ;;  %v11139_v24 = vsel %vm7053_vm4, %v11129_v44, %v11138_v58  ;;  %v24822_v44 = vshll.u32 %v20665_v28, 16 }
 0x6c2   :  { %15591 = vmatmul.mubr.bf16.gmra.mrb[8].mxu1 %v5175_v53  ;;  %16831 = vmatmul.mubr.bf16.gmra.mrb[48].mxu0 %v11103_v62  ;;  %v11144_v53 = vshll.u32 %v19727_v9, 16  ;;  %v5207_v62 = vsel %vm1095_vm5, %v5202_v36, %v5206_v26  ;;  %v11143_v25 = vrot.slane %v11141_v16, 1  ;;  %v24824_v16 = vshll.u32 %v20673_v37, 16 }
 0x6c3   :  { %15594 = vmatprep.mubr.msk.bf16.mxu1 %vm19810_vm0, %v19809_v0  ;;  %16834 = vmatprep.mubr.msk.bf16.mxu0 %vm19810_vm0, %v19809_v0  ;;  %v5238_v57 = vrot.slane %v24822_v44, 1 }
 0x6c4   :  { %15675 = vmatpush3.bf16.msra.mxu1 %v19572_v56  ;;  %v11146_v29 = vrot.slane %v11144_v53, 2  ;;  %v24815_v56 = vshrl.u32 %v20585_v41, 16  ;;  %v5246_v53 = vrot.slane %v24824_v16, 1  ;;  %v19736_v16 = vld [vmem:[%s24672_s0 + $0xd8] sm:$0xff]  }
 0x6c5   :  { %15676 = vmatprep.subr.bf16.mxu1 %v19809_v0 }
 0x6c6   :  { %v5210_v45 = vor.u32 %v24815_v56, %v5206_v26  ;;  %v11147_v20 = vor.u32 %v11146_v29, %v11143_v25  ;;  %v19732_v25 = vld [vmem:[%s24672_s0 + $0xb8] sm:$0xff]   ;;  %v5250_v32 = vor.u32 %v24825_v15, %v5246_v53  ;;  %v19737_v15 = vld [vmem:[%s24672_s0 + $0xe0] sm:$0xff]  }
 0x6c7   :  { %v11517_v29 = vshrl.u32 %v19732_v25, 16  ;;  %v11520_v56 = vshll.u32 %v19732_v25, 16 }
 0x6c8   :  { %15677 = vmatpush3.bf16.msra.mxu1 %v19574_v11  ;;  %v5215_v41 = vsel %vm1095_vm5, %v5210_v45, %v5214_v3  ;;  %v19729_v11 = vld [vmem:[%s24672_s0 + $0xa8] sm:$0xf]  ;;  %v11157_v17 = vsel %vm7053_vm4, %v11147_v20, %v11156_v19 }
 0x6c9   :  { %15678 = vmatprep.subr.bf16.mxu1 %v19809_v0 }
 0x6ca   :  { %15595 = vmatmul.mubr.bf16.gmra.mrb[12].mxu1 %v5183_v61  ;;  %16835 = vmatmul.mubr.bf16.gmra.mrb[52].mxu0 %v11112_v31  ;;  %v23628_v61 = vcombine.low %v19729_v11, %v10958_v47  ;;  %v11148_v31 = vsel %vm7053_vm4, %v11138_v58, %v11147_v20  ;;  %v24823_v58 = vshrl.u32 %v20665_v28, 16  ;;  %v11522_v20 = vrot.slane %v11520_v56, 4  ;;  %v19733_v11 = vld [vmem:[%s24672_s0 + $0xc0] sm:$0xff]  }
 0x6cb   :  { %15598 = vmatprep.mubr.msk.bf16.mxu1 %vm19810_vm0, %v19809_v0  ;;  %16838 = vmatprep.mubr.msk.bf16.mxu0 %vm19810_vm0, %v19809_v0  ;;  %v5254_v47 = vrot.slane %v24826_v49, 1  ;;  %v11529_v52 = vshll.u32 %v19733_v11, 16  ;;  %v11565_v49 = vshll.u32 %v19737_v15, 16 }
 0x6cc   :  { %15679 = vmatpush3.bf16.msra.mxu1 %v19576_v5  ;;  %v24817_v5 = vshrl.u32 %v20600_v50, 16  ;;  %v11159_v46 = vshrl.u32 %v23628_v61, 16  ;;  %v11162_v2 = vshll.u32 %v23628_v61, 16  ;;  %v24819_v50 = vshrl.u32 %v20619_v63, 16 }
 0x6cd   :  { %15680 = vmatprep.subr.bf16.mxu1 %v19809_v0  ;;  %v5234_v63 = vor.u32 %v24821_v7, %v5230_v51  ;;  %v5242_v9 = vor.u32 %v24823_v58, %v5238_v57  ;;  %v5255_v37 = vsel %vm1095_vm5, %v5250_v32, %v5254_v47  ;;  %v11531_v42 = vrot.slane %v11529_v52, 4 }
 0x6ce   :  { %v5218_v13 = vor.u32 %v24817_v5, %v5214_v3  ;;  %v11519_v3 = vrot.slane %v11517_v29, 3  ;;  %v11562_v32 = vshrl.u32 %v19737_v15, 16 }
 0x6cf   :  { %v5239_v14 = vsel %vm1095_vm5, %v5234_v63, %v5238_v57  ;;  %v5247_v45 = vsel %vm1095_vm5, %v5242_v9, %v5246_v53  ;;  %v24830_v63 = vshll.u32 %v20758_v38, 16  ;;  %v11553_v53 = vshrl.u32 %v19736_v16, 16 }
 0x6d0   :  { %15681 = vmatpush3.bf16.msra.mxu1 %v19579_v27  ;;  %v5223_v33 = vsel %vm1095_vm5, %v5218_v13, %v5222_v21  ;;  %v11161_v27 = vrot.slane %v11159_v46, 1 }
 0x6d1   :  { %17125 = vmatprep.subr.bf16.mxu1 %v19809_v0  ;;  %v5270_v44 = vrot.slane %v24830_v63, 1  ;;  %v11555_v29 = vrot.slane %v11553_v53, 3 }
 0x6d2   :  { %15599 = vmatmul.mubr.bf16.gmra.mrb[16].mxu1 %v5191_v8  ;;  %16839 = vmatmul.mubr.bf16.gmra.mrb[56].mxu0 %v11121_v6  ;;  %v11164_v8 = vrot.slane %v11162_v2, 2  ;;  %v5226_v6 = vor.u32 %v24819_v50, %v5222_v21  ;;  %v19575_v21 = vld [vmem:[%s24671_s1 + $0x610] sm:$0xff]   ;;  %v24828_v2 = vshll.u32 %v20718_v34, 16 }
 0x6d3   :  { %15602 = vmatprep.mubr.msk.bf16.mxu1 %vm19810_vm0, %v19809_v0  ;;  %16842 = vmatprep.mubr.msk.bf16.mxu0 %vm19810_vm0, %v19809_v0 }
 0x6d4   :  { %v11165_v48 = vor.u32 %v11164_v8, %v11161_v27  ;;  %v5231_v10 = vsel %vm1095_vm5, %v5226_v6, %v5230_v51  ;;  %v19734_v27 = vld [vmem:[%s24672_s0 + $0xc8] sm:$0xff]   ;;  %v19578_v6 = vld [vmem:[%s24671_s1 + $0x618] sm:$0xff]  }
 0x6d5   :  { %v11535_v8 = vshrl.u32 %v19734_v27, 16  ;;  %v11538_v50 = vshll.u32 %v19734_v27, 16 }
 0x6d6   :  { %v11166_v40 = vsel %vm7053_vm4, %v11156_v19, %v11165_v48  ;;  %v24827_v19 = vshrl.u32 %v20695_v4, 16 }
 0x6d7   :  { %v11537_v51 = vrot.slane %v11535_v8, 3 }
 0x6d8   :  { %v5258_v46 = vor.u32 %v24827_v19, %v5254_v47 }
 0x6da   :  { %15603 = vmatmul.mubr.bf16.gmra.mrb[20].mxu1 %v5199_v59  ;;  %16843 = vmatmul.mubr.bf16.gmra.mrb[60].mxu0 %v11130_v43  ;;  %v11503_v59 = vshll.u32 %v19730_v55, 16  ;;  %v19731_v43 = vld [vmem:[%s24672_s0 + $0xb0] sm:$0xff]  }
 0x6db   :  { %15606 = vmatprep.mubr.msk.bf16.mxu1 %vm19810_vm0, %v19809_v0  ;;  %16846 = vmatprep.mubr.msk.bf16.mxu0 %vm19810_vm0, %v19809_v0  ;;  %v11508_v30 = vshrl.u32 %v19731_v43, 16  ;;  %v11511_v18 = vshll.u32 %v19731_v43, 16  ;;  %v19735_v55 = vld [vmem:[%s24672_s0 + $0xd0] sm:$0xff]   ;;  %v19581_v43 = vld [vmem:[%s24671_s1 + $0x628] sm:$0xff]  }
 0x6dc   :  { %v11505_v36 = vrot.slane %v11503_v59, 4  ;;  %v11544_v60 = vshrl.u32 %v19735_v55, 16  ;;  %v11547_v59 = vshll.u32 %v19735_v55, 16 }
 0x6dd   :  { %v11510_v22 = vrot.slane %v11508_v30, 3  ;;  %v11513_v26 = vrot.slane %v11511_v18, 4 }
 0x6de   :  { %v11546_v18 = vrot.slane %v11544_v60, 3 }
 0x6e2   :  { %15607 = vmatmul.mubr.bf16.gmra.mrb[24].mxu1 %v5207_v62  ;;  %16847 = vmatmul.mubr.bf16.gmra.mrb[64].mxu0 %v11139_v24  ;;  %v11506_v62 = vor.u32 %v11505_v36, %v11502_v23  ;;  %v11514_v24 = vor.u32 %v11513_v26, %v11510_v22  ;;  %v19582_v23 = vld [vmem:[%s24671_s1 + $0x630] sm:$0xff]   ;;  %v24831_v36 = vshrl.u32 %v20758_v38, 16  ;;  %v24832_v26 = vshll.u32 %v20788_v35, 16 }
 0x6e3   :  { %15610 = vmatprep.mubr.msk.bf16.mxu1 %vm19810_vm0, %v19809_v0  ;;  %16850 = vmatprep.mubr.msk.bf16.mxu0 %vm19810_vm0, %v19809_v0 }
 0x6e4   :  { %v11515_v28 = vsel %vm11498_vm7, %v11506_v62, %v11514_v24  ;;  %v5274_v22 = vor.u32 %v24831_v36, %v5270_v44  ;;  %v5278_v58 = vrot.slane %v24832_v26, 1  ;;  %v11556_v62 = vshll.u32 %v19736_v16, 16 }
 0x6e6   :  { %v5279_v38 = vsel %vm1095_vm5, %v5274_v22, %v5278_v58  ;;  %v11558_v56 = vrot.slane %v11556_v62, 4  ;;  %v19742_v22 = vld [vmem:[%s24672_s0 + $0xa8] sm:$0xf] }
 0x6ea   :  { %15611 = vmatmul.mubr.bf16.gmra.mrb[28].mxu1 %v5215_v41  ;;  %16851 = vmatmul.mubr.bf16.gmra.mrb[68].mxu0 %v11148_v31  ;;  %v11523_v41 = vor.u32 %v11522_v20, %v11519_v3  ;;  %v11526_v31 = vshrl.u32 %v19733_v11, 16  ;;  %v11559_v20 = vor.u32 %v11558_v56, %v11555_v29  ;;  %v11564_v11 = vrot.slane %v11562_v32, 3 }
 0x6eb   :  { %15614 = vmatprep.mubr.msk.bf16.mxu1 %vm19810_vm0, %v19809_v0  ;;  %16854 = vmatprep.mubr.msk.bf16.mxu0 %vm19810_vm0, %v19809_v0 }
 0x6ec   :  { %v11524_v5 = vsel %vm11498_vm7, %v11514_v24, %v11523_v41  ;;  %v11528_v13 = vrot.slane %v11526_v31, 3  ;;  %v19583_v24 = vld [vmem:[%s24671_s1 + $0x638] sm:$0xff]   ;;  %v24835_v31 = vshrl.u32 %v20816_v39, 16 }
 0x6f2   :  { %15615 = vmatmul.mubr.bf16.gmra.mrb[32].mxu1 %v5223_v33  ;;  %16855 = vmatmul.mubr.bf16.gmra.mrb[72].mxu0 %v11157_v17  ;;  %v5262_v33 = vrot.slane %v24828_v2, 1  ;;  %v11532_v17 = vor.u32 %v11531_v42, %v11528_v13  ;;  %v19738_v42 = vld [vmem:[%s24672_s0 + $0xe8] sm:$0xff]  }
 0x6f3   :  { %15618 = vmatprep.mubr.msk.bf16.mxu1 %vm19810_vm0, %v19809_v0  ;;  %16858 = vmatprep.mubr.msk.bf16.mxu0 %vm19810_vm0, %v19809_v0  ;;  %v11574_v19 = vshll.u32 %v19738_v42, 16 }
 0x6f4   :  { %v5263_v4 = vsel %vm1095_vm5, %v5258_v46, %v5262_v33  ;;  %v11533_v1 = vsel %vm11498_vm7, %v11523_v41, %v11532_v17 }
 0x6fa   :  { %15619 = vmatmul.mubr.bf16.gmra.mrb[36].mxu1 %v5231_v10  ;;  %16859 = vmatmul.mubr.bf16.gmra.mrb[76].mxu0 %v11166_v40  ;;  %v19580_v10 = vld [vmem:[%s24671_s1 + $0x620] sm:$0xff]   ;;  %v24829_v40 = vshrl.u32 %v20718_v34, 16 }
 0x6fb   :  { %15622 = vmatprep.mubr.msk.bf16.mxu1 %vm19810_vm0, %v19809_v0  ;;  %16862 = vmatprep.mubr.msk.bf16.mxu0 %vm19810_vm0, %v19809_v0 }
 0x6fc   :  { %v5266_v7 = vor.u32 %v24829_v40, %v5262_v33 }
 0x6fe   :  { %v5271_v34 = vsel %vm1095_vm5, %v5266_v7, %v5270_v44 }
 0x702   :  { %15623 = vmatmul.mubr.bf16.gmra.mrb[40].mxu1 %v5239_v14  ;;  %16863 = vmatmul.mubr.bf16.gmra.mrb[80].mxu0 %v11165_v48  ;;  %v11540_v48 = vrot.slane %v11538_v50, 4  ;;  %v11549_v14 = vrot.slane %v11547_v59, 4  ;;  %v24839_v50 = vld [vmem:[#allocation4_spill] sm:$0xff] }
 0x703   :  { %15626 = vmatprep.mubr.msk.bf16.mxu1 %vm19810_vm0, %v19809_v0  ;;  %16882 = vmatprep.mubr.msk.bf16.mxu0 %vm19810_vm0, %v19809_v0  ;;  %v24841_v59 = vshrl.u32 %v24839_v50, 16 }
 0x704   :  { %v11541_v57 = vor.u32 %v11540_v48, %v11537_v51  ;;  %v11550_v9 = vor.u32 %v11549_v14, %v11546_v18  ;;  %v19741_v14 = vld [vmem:[%s24672_s0 + $0xf8] sm:$0xff]  }
 0x705   :  { %v11592_v36 = vshll.u32 %v19741_v14, 16 }
 0x706   :  { %v11542_v30 = vsel %vm11498_vm7, %v11532_v17, %v11541_v57  ;;  %v11551_v25 = vsel %vm11498_vm7, %v11541_v57, %v11550_v9  ;;  %v11560_v41 = vsel %vm11498_vm7, %v11550_v9, %v11559_v20  ;;  %v5025_v17 = vld [vmem:[%s24672_s0 + $0xa8] sm:$0x1] }
 0x707   :  { %v11594_v53 = vrot.slane %v11592_v36, 4  ;;  %v19752_v36 = vld [vmem:[%s24672_s0 + $0x118] sm:$0xff]  }
 0x70a   :  { %15627 = vmatmul.mubr.bf16.gmra.mrb[44].mxu1 %v5247_v45  ;;  %16883 = vmatmul.mubr.bf16.vlgmr.msra.gmra.mrb[0].mxu0 %v11515_v28  ;;  %v24833_v45 = vshrl.u32 %v20788_v35, 16  ;;  %v11567_v35 = vrot.slane %v11565_v49, 4 }
 0x70b   :  { %15630 = vmatprep.mubr.msk.bf16.mxu1 %vm19810_vm0, %v19809_v0  ;;  %16967 = vmatpush3.bf16.msra.mxu0 %v19571_v54  ;;  %v24834_v54 = vshll.u32 %v20816_v39, 16  ;;  %v11576_v39 = vrot.slane %v11574_v19, 4 }
 0x70c   :  { %16886 = vmatprep.mubr.msk.bf16.mxu0 %vm19810_vm0, %v19809_v0  ;;  %16968 = vmatprep.subr.bf16.mxu0 %v19809_v0  ;;  %v5282_v28 = vor.u32 %v24833_v45, %v5278_v58  ;;  %v11568_v13 = vor.u32 %v11567_v35, %v11564_v11 }
 0x70d   :  { %v5286_v3 = vrot.slane %v24834_v54, 1 }
 0x70e   :  { %v11569_v2 = vsel %vm11498_vm7, %v11559_v20, %v11568_v13 }
 0x70f   :  { %16969 = vmatpush3.bf16.msra.mxu0 %v19573_v12  ;;  %v5287_v47 = vsel %vm1095_vm5, %v5282_v28, %v5286_v3  ;;  %v5290_v52 = vor.u32 %v24835_v31, %v5286_v3  ;;  %v24836_v12 = vld [vmem:[#allocation3_spill] sm:$0xff]  ;;  %v19744_v28 = vld [vmem:[%s24672_s0 + $0x100] sm:$0xff]  }
 0x710   :  { %16970 = vmatprep.subr.bf16.mxu0 %v19809_v0  ;;  %v24838_v27 = vshrl.u32 %v24836_v12, 16  ;;  %v11598_v54 = vshrl.u32 %v19744_v28, 16  ;;  %v11601_v3 = vshll.u32 %v19744_v28, 16 }
 0x712   :  { %15631 = vmatmul.mubr.bf16.gmra.mrb[48].mxu1 %v5255_v37  ;;  %16887 = vmatmul.mubr.bf16.gmra.mrb[4].mxu0 %v11524_v5  ;;  %v24837_v37 = vshll.u32 %v24836_v12, 16  ;;  %v11600_v11 = vrot.slane %v11598_v54, 3  ;;  %v11603_v35 = vrot.slane %v11601_v3, 4  ;;  %v19745_v12 = vld [vmem:[%s24672_s0 + $0xb4] sm:$0xff]   ;;  %v19756_v3 = vld [vmem:[%s24672_s0 + $0x120] sm:$0xff]  }
 0x713   :  { %15634 = vmatprep.mubr.msk.bf16.mxu1 %vm19810_vm0, %v19809_v0  ;;  %16890 = vmatprep.mubr.msk.bf16.mxu0 %vm19810_vm0, %v19809_v0 }
 0x714   :  { %16971 = vmatpush3.bf16.msra.mxu0 %v19575_v21  ;;  %v5294_v5 = vrot.slane %v24837_v37, 1  ;;  %v11571_v21 = vshrl.u32 %v19738_v42, 16  ;;  %v5807_v37 = vshrl.u32 %v19745_v12, 16  ;;  %v19746_v42 = vld [vmem:[%s24672_s0 + $0x108] sm:$0xff]  }
 0x715   :  { %16972 = vmatprep.subr.bf16.mxu0 %v19809_v0  ;;  %v11610_v19 = vshll.u32 %v19746_v42, 16 }
 0x716   :  { %v5295_v46 = vsel %vm1095_vm5, %v5290_v52, %v5294_v5  ;;  %v11573_v33 = vrot.slane %v11571_v21, 3  ;;  %v5298_v8 = vor.u32 %v24838_v27, %v5294_v5  ;;  %v5810_v5 = vshll.u32 %v19745_v12, 16 }
 0x717   :  { %v11607_v21 = vshrl.u32 %v19746_v42, 16  ;;  %v11612_v27 = vrot.slane %v11610_v19, 4 }
 0x718   :  { %16973 = vmatpush3.bf16.msra.mxu0 %v19578_v6  ;;  %v24840_v6 = vshll.u32 %v24839_v50, 16  ;;  %v11577_v48 = vor.u32 %v11576_v39, %v11573_v33  ;;  %v5812_v33 = vrot.slane %v5810_v5, 3  ;;  %v19747_v50 = vld [vmem:[%s24672_s0 + $0xbc] sm:$0xff]  }
 0x719   :  { %16974 = vmatprep.subr.bf16.mxu0 %v19809_v0 }
 0x71a   :  { %15635 = vmatmul.mubr.bf16.gmra.mrb[52].mxu1 %v5263_v4  ;;  %16891 = vmatmul.mubr.bf16.gmra.mrb[8].mxu0 %v11533_v1  ;;  %v5302_v4 = vrot.slane %v24840_v6, 1  ;;  %v19739_v1 = vld [vmem:[%s24672_s0 + $0xa4] sm:$0xf]  ;;  %v11578_v57 = vsel %vm11498_vm7, %v11568_v13, %v11577_v48  ;;  %v11604_v13 = vor.u32 %v11603_v35, %v11600_v11  ;;  %v5816_v6 = vshrl.u32 %v19747_v50, 16 }
 0x71b   :  { %15638 = vmatprep.mubr.msk.bf16.mxu1 %vm19810_vm0, %v19809_v0  ;;  %16894 = vmatprep.mubr.msk.bf16.mxu0 %vm19810_vm0, %v19809_v0  ;;  %v23802_v51 = vcombine.low %v19739_v1, %v5025_v17  ;;  %v11609_v17 = vrot.slane %v11607_v21, 3  ;;  %v19760_v21 = vld [vmem:[%s24672_s0 + $0x128] sm:$0xff]  }
 0x71c   :  { %16975 = vmatpush3.bf16.msra.mxu0 %v19580_v10  ;;  %v19740_v10 = vld [vmem:[%s24672_s0 + $0xf0] sm:$0xff]   ;;  %v5303_v63 = vsel %vm1095_vm5, %v5298_v8, %v5302_v4  ;;  %v11643_v19 = vshrl.u32 %v19760_v21, 16 }
 0x71d   :  { %16976 = vmatprep.subr.bf16.mxu0 %v19809_v0  ;;  %v11580_v40 = vshrl.u32 %v19740_v10, 16  ;;  %v11583_v7 = vshll.u32 %v19740_v10, 16  ;;  %v5308_v44 = vshll.u32 %v23802_v51, 16  ;;  %v5312_v62 = vshrl.u32 %v23802_v51, 16  ;;  %v19749_v10 = vld [vmem:[%s24672_s0 + $0x110] sm:$0xff]  }
 0x71e   :  { %v11613_v1 = vor.u32 %v11612_v27, %v11609_v17 }
 0x71f   :  { %v11582_v55 = vrot.slane %v11580_v40, 3  ;;  %v11585_v60 = vrot.slane %v11583_v7, 4  ;;  %v11616_v40 = vshrl.u32 %v19749_v10, 16  ;;  %v11619_v7 = vshll.u32 %v19749_v10, 16 }
 0x720   :  { %16977 = vmatpush3.bf16.msra.mxu0 %v19581_v43  ;;  %v5306_v43 = vor.u32 %v24841_v59, %v5302_v4  ;;  %v5819_v4 = vshll.u32 %v19747_v50, 16  ;;  %v12508_v50 = vld [vmem:[%s24673_s4 + $0x10] sm:$0xff] }
 0x721   :  { %16978 = vmatprep.subr.bf16.mxu0 %v19809_v0  ;;  %v11586_v18 = vor.u32 %v11585_v60, %v11582_v55  ;;  %v11614_v55 = vsel %vm11498_vm7, %v11604_v13, %v11613_v1  ;;  %v11618_v60 = vrot.slane %v11616_v40, 3  ;;  %v11621_v59 = vrot.slane %v11619_v7, 4  ;;  %v19763_v40 = vld [vmem:[%s24672_s0 + $0xdc] sm:$0xff]  }
 0x722   :  { %15639 = vmatmul.mubr.bf16.gmra.mrb[56].mxu1 %v5271_v34  ;;  %16895 = vmatmul.mubr.bf16.gmra.mrb[12].mxu0 %v11542_v30  ;;  %v5310_v34 = vrot.slane %v5308_v44, 1  ;;  %v5625_v30 = vld [vmem:[%s24672_s0 + $0xa4] sm:$0xc]  ;;  %v5818_v44 = vrot.slane %v5816_v6, 2  ;;  %v5852_v7 = vshrl.u32 %v19763_v40, 16 }
 0x723   :  { %15642 = vmatprep.mubr.msk.bf16.mxu1 %vm19810_vm0, %v19809_v0  ;;  %16898 = vmatprep.mubr.msk.bf16.mxu0 %vm19810_vm0, %v19809_v0  ;;  %v13387_v26 = vcombine.low %v5625_v30, %v19742_v22  ;;  %v11587_v9 = vsel %vm11498_vm7, %v11577_v48, %v11586_v18  ;;  %v19748_v48 = vld [vmem:[%s24671_s1 + $0x300] sm:$0xff]   ;;  %v11625_v22 = vshrl.u32 %v19752_v36, 16 }
 0x724   :  { %16979 = vmatpush3.bf16.msra.mxu0 %v19582_v23  ;;  %v11589_v23 = vshrl.u32 %v19741_v14, 16  ;;  %v5311_v58 = vsel %vm1095_vm5, %v5306_v43, %v5310_v34  ;;  %v5314_v20 = vor.u32 %v5312_v62, %v5310_v34  ;;  %v19750_v43 = vld [vmem:[%s24671_s1 + $0x308] sm:$0xff]  }
 0x725   :  { %16980 = vmatprep.subr.bf16.mxu0 %v19809_v0  ;;  %v19751_v30 = vld [vmem:[%s24672_s0 + $0xc4] sm:$0xff]  }
 0x726   :  { %v11591_v16 = vrot.slane %v11589_v23, 3  ;;  %v5828_v14 = vshll.u32 %v19751_v30, 16  ;;  %v11622_v23 = vor.u32 %v11621_v59, %v11618_v60  ;;  %v19764_v60 = vld [vmem:[%s24672_s0 + $0x130] sm:$0xff]  }
 0x727   :  { %v11652_v59 = vshrl.u32 %v19764_v60, 16 }
 0x728   :  { %16981 = vmatpush3.bf16.msra.mxu0 %v19583_v24  ;;  %v5790_v24 = vshrl.u32 %v13387_v26, 16  ;;  %v11595_v45 = vor.u32 %v11594_v53, %v11591_v16  ;;  %v5830_v53 = vrot.slane %v5828_v14, 3  ;;  %v11623_v62 = vsel %vm11498_vm7, %v11613_v1, %v11622_v23  ;;  %v12517_v14 = vld [vmem:[%s24673_s4 + $0x58] sm:$0xff] }
 0x72a   :  { %15643 = vmatmul.mubr.bf16.gmra.mrb[60].mxu1 %v5279_v38  ;;  %16899 = vmatmul.mubr.bf16.gmra.mrb[16].mxu0 %v11551_v25  ;;  %v5793_v38 = vshll.u32 %v13387_v26, 16  ;;  %v19743_v25 = vld [vmem:[%s24672_s0 + $0xac] sm:$0xff]   ;;  %v5792_v15 = vrot.slane %v5790_v24, 2  ;;  %v11605_v39 = vsel %vm11498_vm7, %v11595_v45, %v11604_v13  ;;  %v11628_v26 = vshll.u32 %v19752_v36, 16 }
 0x72b   :  { %15646 = vmatprep.mubr.msk.bf16.mxu1 %vm19810_vm0, %v19809_v0  ;;  %16902 = vmatprep.mubr.msk.bf16.mxu0 %vm19810_vm0, %v19809_v0  ;;  %v5798_v29 = vshrl.u32 %v19743_v25, 16  ;;  %v5801_v56 = vshll.u32 %v19743_v25, 16  ;;  %v11627_v24 = vrot.slane %v11625_v22, 3  ;;  %v19754_v25 = vld [vmem:[%s24671_s1 + $0x318] sm:$0xff]   ;;  %v11654_v36 = vrot.slane %v11652_v59, 3 }
 0x72c   :  { %v5795_v32 = vrot.slane %v5793_v38, 3  ;;  %v11630_v38 = vrot.slane %v11628_v26, 4  ;;  %v12509_v59 = vld [vmem:[%s24673_s4 + $0x18] sm:$0xff] }
 0x72d   :  { %v5800_v49 = vrot.slane %v5798_v29, 2 }
 0x72e   :  { %v5796_v31 = vor.u32 %v5795_v32, %v5792_v15  ;;  %v11631_v54 = vor.u32 %v11630_v38, %v11627_v24  ;;  %v11637_v15 = vshll.u32 %v19756_v3, 16  ;;  %v19757_v32 = vld [vmem:[%s24671_s1 + $0x320] sm:$0xff]   ;;  %v19766_v38 = vld [vmem:[%s24672_s0 + $0x138] sm:$0xff]  }
 0x730   :  { %v11632_v11 = vsel %vm11498_vm7, %v11622_v23, %v11631_v54 }
 0x732   :  { %15647 = vmatmul.mubr.bf16.gmra.mrb[64].mxu1 %v5287_v47  ;;  %16903 = vmatmul.mubr.bf16.gmra.mrb[20].mxu0 %v11560_v41  ;;  %v5803_v47 = vrot.slane %v5801_v56, 3  ;;  %v11596_v41 = vsel %vm11498_vm7, %v11586_v18, %v11595_v45  ;;  %v5825_v18 = vshrl.u32 %v19751_v30, 16  ;;  %v19755_v56 = vld [vmem:[%s24672_s0 + $0xcc] sm:$0xff]   ;;  %v5854_v30 = vrot.slane %v5852_v7, 2 }
 0x733   :  { %15650 = vmatprep.mubr.msk.bf16.mxu1 %vm19810_vm0, %v19809_v0  ;;  %16906 = vmatprep.mubr.msk.bf16.mxu0 %vm19810_vm0, %v19809_v0  ;;  %v5834_v45 = vshrl.u32 %v19755_v56, 16  ;;  %v5837_v28 = vshll.u32 %v19755_v56, 16  ;;  %v12510_v56 = vld [vmem:[%s24673_s4 + $0x20] sm:$0xff] }
 0x734   :  { %v5804_v52 = vor.u32 %v5803_v47, %v5800_v49  ;;  %v5827_v16 = vrot.slane %v5825_v18, 2 }
 0x735   :  { %v5836_v47 = vrot.slane %v5834_v45, 2 }
 0x736   :  { %v5831_v29 = vor.u32 %v5830_v53, %v5827_v16  ;;  %v12520_v53 = vld [vmem:[%s24673_s4 + $0x70] sm:$0xff] }
 0x73a   :  { %15651 = vmatmul.mubr.bf16.gmra.mrb[68].mxu1 %v5295_v46  ;;  %16907 = vmatmul.mubr.bf16.gmra.mrb[24].mxu0 %v11569_v2  ;;  %v5805_v46 = vsel %vm1594_vm6, %v5796_v31, %v5804_v52  ;;  %v5809_v2 = vrot.slane %v5807_v37, 2  ;;  %v11639_v31 = vrot.slane %v11637_v15, 4  ;;  %v19759_v37 = vld [vmem:[%s24672_s0 + $0xd4] sm:$0xff]  }
 0x73b   :  { %15654 = vmatprep.mubr.msk.bf16.mxu1 %vm19810_vm0, %v19809_v0  ;;  %16910 = vmatprep.mubr.msk.bf16.mxu0 %vm19810_vm0, %v19809_v0  ;;  %v5843_v5 = vshrl.u32 %v19759_v37, 16  ;;  %v5846_v13 = vshll.u32 %v19759_v37, 16 }
 0x73c   :  { %v5813_v8 = vor.u32 %v5812_v33, %v5809_v2  ;;  %v19761_v2 = vld [vmem:[%s24671_s1 + $0x330] sm:$0xff]   ;;  %v12507_v33 = vld [vmem:[%s24673_s4 + $0x8] sm:$0xff] }
 0x73d   :  { %v5845_v27 = vrot.slane %v5843_v5, 2 }
 0x742   :  { %15655 = vmatmul.mubr.bf16.gmra.mrb[72].mxu1 %v5303_v63  ;;  %16911 = vmatmul.mubr.bf16.gmra.mrb[28].mxu0 %v11578_v57  ;;  %v5814_v63 = vsel %vm1594_vm6, %v5804_v52, %v5813_v8  ;;  %v5821_v57 = vrot.slane %v5819_v4, 3  ;;  %v19758_v52 = vld [vmem:[%s24671_s1 + $0x328] sm:$0xff]   ;;  %v11645_v4 = vrot.slane %v11643_v19, 3 }
 0x743   :  { %15658 = vmatprep.mubr.msk.bf16.mxu1 %vm19810_vm0, %v19809_v0  ;;  %16914 = vmatprep.mubr.msk.bf16.mxu0 %vm19810_vm0, %v19809_v0 }
 0x744   :  { %v5822_v34 = vor.u32 %v5821_v57, %v5818_v44  ;;  %v12511_v44 = vld [vmem:[%s24673_s4 + $0x28] sm:$0xff]  ;;  %v12516_v57 = vld [vmem:[%s24673_s4 + $0x50] sm:$0xff] }
 0x746   :  { %v5832_v49 = vsel %vm1594_vm6, %v5822_v34, %v5831_v29 }
 0x74a   :  { %15659 = vmatmul.mubr.bf16.gmra.mrb[76].mxu1 %v5311_v58  ;;  %16915 = vmatmul.mubr.bf16.gmra.mrb[32].mxu0 %v11587_v9  ;;  %v19753_v58 = vld [vmem:[%s24671_s1 + $0x310] sm:$0xff]   ;;  %v5823_v9 = vsel %vm1594_vm6, %v5813_v8, %v5822_v34  ;;  %v5848_v8 = vrot.slane %v5846_v13, 3  ;;  %v11477_v13 = vld [vmem:[%s24672_s0 + $0x14c] sm:$0xf] }
 0x74b   :  { %15662 = vmatprep.mubr.msk.bf16.mxu1 %vm19810_vm0, %v19809_v0  ;;  %16918 = vmatprep.mubr.msk.bf16.mxu0 %vm19810_vm0, %v19809_v0 }
 0x74c   :  { %v5849_v10 = vor.u32 %v5848_v8, %v5845_v27 }
 0x752   :  { %15663 = vmatmul.mubr.bf16.gmra.mrb[80].mxu1 %v5314_v20  ;;  %16919 = vmatmul.mubr.bf16.gmra.mrb[36].mxu0 %v11596_v41  ;;  %v11634_v20 = vshrl.u32 %v19756_v3, 16  ;;  %v5839_v41 = vrot.slane %v5837_v28, 3  ;;  %v12522_v3 = vld [vmem:[%s24673_s4 + $0x80] sm:$0xff] }
 0x753   :  { %15682 = vmatprep.mubr.msk.bf16.mxu1 %vm19810_vm0, %v19809_v0  ;;  %16922 = vmatprep.mubr.msk.bf16.mxu0 %vm19810_vm0, %v19809_v0 }
 0x754   :  { %v11636_v35 = vrot.slane %v11634_v20, 3  ;;  %v5840_v12 = vor.u32 %v5839_v41, %v5836_v47  ;;  %v19767_v47 = vld [vmem:[%s24672_s0 + $0xec] sm:$0xff]  }
 0x755   :  { %v5870_v41 = vshrl.u32 %v19767_v47, 16 }
 0x756   :  { %v11640_v42 = vor.u32 %v11639_v31, %v11636_v35  ;;  %v5841_v17 = vsel %vm1594_vm6, %v5831_v29, %v5840_v12  ;;  %v5850_v34 = vsel %vm1594_vm6, %v5840_v12, %v5849_v10  ;;  %v11664_v29 = vshll.u32 %v19766_v38, 16  ;;  %v12527_v35 = vld [vmem:[%s24673_s4 + $0xa8] sm:$0xff]  ;;  %v12512_v31 = vld [vmem:[%s24673_s4 + $0x30] sm:$0xff]  ;;  %v19768_v12 = vld [vmem:[%s24672_s0 + $0x140] sm:$0xff]  }
 0x757   :  { %v11670_v37 = vshrl.u32 %v19768_v12, 16  ;;  %v11673_v5 = vshll.u32 %v19768_v12, 16  ;;  %v5872_v19 = vrot.slane %v5870_v41, 2  ;;  %v12514_v12 = vld [vmem:[%s24673_s4 + $0x40] sm:$0xff] }
 0x758   :  { %v11641_v6 = vsel %vm11498_vm7, %v11631_v54, %v11640_v42 }
 0x759   :  { %v11672_v27 = vrot.slane %v11670_v37, 3  ;;  %v11675_v8 = vrot.slane %v11673_v5, 4 }
 0x75a   :  { %15683 = vmatmul.mubr.bf16.vlgmr.msra.gmra.mrb[0].mxu1 %v5805_v46  ;;  %16923 = vmatmul.mubr.bf16.gmra.mrb[40].mxu0 %v11605_v39  ;;  %v11646_v46 = vshll.u32 %v19760_v21, 16  ;;  %v19811_v39 = vmov 0  }
 0x75b   :  { %15686 = vmatprep.mubr.msk.bf16.mxu1 %vm19810_vm0, %v19809_v0  ;;  %16926 = vmatprep.mubr.msk.bf16.mxu0 %vm19810_vm0, %v19809_v0 }
 0x75c   :  { %17133 = vmatpush3.bf16.msra.mxu1 %v19748_v48  ;;  %19119 = vset.pattern.permute.xlu1 %v19811_v39  ;;  %v11648_v1 = vrot.slane %v11646_v46, 4  ;;  %v19762_v48 = vld [vmem:[%s24671_s1 + $0x338] sm:$0xff]  }
 0x75d   :  { %17126 = vmatprep.subr.bf16.mxu1 %v19809_v0  ;;  %12554 = vperm.xlu1 %19119, %v12507_v33   ;;  %v19769_v33 = vld [vmem:[%s24672_s0 + $0x148] sm:$0xf] }
 0x75e   :  { %19118 = vset.pattern.permute.xlu0 %v19811_v39  ;;  %v13787_v39 = vcombine.low %v19769_v33, %v11477_v13 }
 0x75f   :  { %12599 = vperm.xlu0 %19118, %v12516_v57  }
 0x760   :  { %17134 = vmatpush3.bf16.msra.mxu1 %v19750_v43  ;;  %v11655_v43 = vshll.u32 %v19764_v60, 16  ;;  %v11679_v7 = vshrl.u32 %v13787_v39, 16 }
 0x761   :  { %17127 = vmatprep.subr.bf16.mxu1 %v19809_v0  ;;  %12559 = vperm.xlu1 %19119, %v12508_v50  }
 0x762   :  { %15687 = vmatmul.mubr.bf16.gmra.mrb[4].mxu1 %v5814_v63  ;;  %16927 = vmatmul.mubr.bf16.gmra.mrb[44].mxu0 %v11614_v55  ;;  %v5855_v63 = vshll.u32 %v19763_v40, 16  ;;  %v11649_v55 = vor.u32 %v11648_v1, %v11645_v4  ;;  %v11657_v22 = vrot.slane %v11655_v43, 4  ;;  %v11676_v40 = vor.u32 %v11675_v8, %v11672_v27 }
 0x763   :  { %15690 = vmatprep.mubr.msk.bf16.mxu1 %vm19810_vm0, %v19809_v0  ;;  %16930 = vmatprep.mubr.msk.bf16.mxu0 %vm19810_vm0, %v19809_v0 }
 0x764   :  { %17135 = vmatpush3.bf16.msra.mxu1 %v19753_v58  ;;  %v5857_v18 = vrot.slane %v5855_v63, 3  ;;  %v11650_v23 = vsel %vm11498_vm7, %v11640_v42, %v11649_v55  ;;  %v19765_v58 = vld [vmem:[%s24672_s0 + $0xe4] sm:$0xff]   ;;  %v11658_v24 = vor.u32 %v11657_v22, %v11654_v36  ;;  %v11682_v63 = vshll.u32 %v13787_v39, 16  ;;  %v12528_v22 = vld [vmem:[%s24673_s4 + $0xb0] sm:$0xff]  ;;  %v19777_v39 = vld [vmem:[%s24672_s0 + $0x18] sm:$0xff]  }
 0x765   :  { %17128 = vmatprep.subr.bf16.mxu1 %v19809_v0  ;;  %12574 = vperm.xlu1 %19119, %v12511_v44   ;;  %v5864_v16 = vshll.u32 %v19765_v58, 16  ;;  %v12518_v42 = vld [vmem:[%s24673_s4 + $0x60] sm:$0xff] }
 0x766   :  { %v5858_v26 = vor.u32 %v5857_v18, %v5854_v30  ;;  %v11659_v20 = vsel %vm11498_vm7, %v11649_v55, %v11658_v24  ;;  %v12526_v44 = vld [vmem:[%s24673_s4 + $0xa0] sm:$0xff]  ;;  %v11684_v30 = vrot.slane %v11682_v63, 4 }
 0x767   :  { %v5866_v54 = vrot.slane %v5864_v16, 3 }
 0x768   :  { %17136 = vmatpush3.bf16.msra.mxu1 %v19754_v25  ;;  %v11661_v25 = vshrl.u32 %v19766_v38, 16  ;;  %v5859_v45 = vsel %vm1594_vm6, %v5849_v10, %v5858_v26  ;;  %v12521_v10 = vld [vmem:[%s24673_s4 + $0x78] sm:$0xff]  ;;  %v19772_v38 = vld [vmem:[%s24672_s0 + $0x104] sm:$0xff]  }
 0x769   :  { %17129 = vmatprep.subr.bf16.mxu1 %v19809_v0  ;;  %12604 = vperm.xlu1 %19119, %v12517_v14   ;;  %v19771_v14 = vld [vmem:[%s24672_s0 + $0xfc] sm:$0xff]  }
 0x76a   :  { %15691 = vmatmul.mubr.bf16.gmra.mrb[8].mxu1 %v5823_v9  ;;  %16931 = vmatmul.mubr.bf16.gmra.mrb[48].mxu0 %v11623_v62  ;;  %v5861_v9 = vshrl.u32 %v19765_v58, 16  ;;  %v12506_v62 = vld [vmem:[%s24673_s4] sm:$0xff]  ;;  %v11663_v15 = vrot.slane %v11661_v25, 3  ;;  %v5891_v36 = vshll.u32 %v19771_v14, 16  ;;  %v12531_v58 = vld [vmem:[%s24673_s4 + $0xc8] sm:$0xff]  ;;  %v5897_v25 = vshrl.u32 %v19772_v38, 16 }
 0x76b   :  { %15694 = vmatprep.mubr.msk.bf16.mxu1 %vm19810_vm0, %v19809_v0  ;;  %16934 = vmatprep.mubr.msk.bf16.mxu0 %vm19810_vm0, %v19809_v0 }
 0x76c   :  { %17137 = vmatpush3.bf16.msra.mxu1 %v19757_v32  ;;  %12549 = vperm.xlu0 %19118, %v12506_v62   ;;  %v5863_v28 = vrot.slane %v5861_v9, 2  ;;  %v11666_v32 = vrot.slane %v11664_v29, 4  ;;  %v5900_v29 = vshll.u32 %v19772_v38, 16 }
 0x76d   :  { %17130 = vmatprep.subr.bf16.mxu1 %v19809_v0  ;;  %12619 = vperm.xlu1 %19119, %v12520_v53   ;;  %v5893_v53 = vrot.slane %v5891_v36, 3 }
 0x770   :  { %17138 = vmatpush3.bf16.msra.mxu1 %v19758_v52  ;;  %12569 = vperm.xlu0 %19118, %v12510_v56   ;;  %v11667_v52 = vor.u32 %v11666_v32, %v11663_v15  ;;  %v12536_v56 = vld [vmem:[%s24673_s4 + $0xf0] sm:$0xff]  ;;  %v19773_v15 = vld [vmem:[%s24672_s0 + $0xc] sm:$0xf] }
 0x771   :  { %17131 = vmatprep.subr.bf16.mxu1 %v19809_v0  ;;  %12629 = vperm.xlu1 %19119, %v12522_v3   ;;  %v5899_v3 = vrot.slane %v5897_v25, 2 }
 0x772   :  { %15695 = vmatmul.mubr.bf16.gmra.mrb[12].mxu1 %v5832_v49  ;;  %16935 = vmatmul.mubr.bf16.gmra.mrb[52].mxu0 %v11632_v11  ;;  %v5867_v49 = vor.u32 %v5866_v54, %v5863_v28  ;;  %v5873_v11 = vshll.u32 %v19767_v47, 16  ;;  %v11677_v43 = vsel %vm11498_vm7, %v11667_v52, %v11676_v40  ;;  %v12513_v28 = vld [vmem:[%s24673_s4 + $0x38] sm:$0xff]  ;;  %v19774_v47 = vld [vmem:[%s24672_s0 + $0x10c] sm:$0xff]  }
 0x773   :  { %15698 = vmatprep.mubr.msk.bf16.mxu1 %vm19810_vm0, %v19809_v0  ;;  %16938 = vmatprep.mubr.msk.bf16.mxu0 %vm19810_vm0, %v19809_v0  ;;  %v5906_v41 = vshrl.u32 %v19774_v47, 16 }
 0x774   :  { %17139 = vmatpush3.bf16.msra.mxu1 %v19761_v2  ;;  %12579 = vperm.xlu0 %19118, %v12512_v31   ;;  %v5868_v21 = vsel %vm1594_vm6, %v5858_v26, %v5867_v49  ;;  %v5875_v46 = vrot.slane %v5873_v11, 3  ;;  %v12530_v2 = vld [vmem:[%s24673_s4 + $0xc0] sm:$0xff]  ;;  %v5909_v11 = vshll.u32 %v19774_v47, 16  ;;  %v19775_v31 = vld [vmem:[%s24672_s0 + $0x10] sm:$0xff]  }
 0x775   :  { %17132 = vmatprep.subr.bf16.mxu1 %v19809_v0  ;;  %12654 = vperm.xlu1 %19119, %v12527_v35   ;;  %v5908_v5 = vrot.slane %v5906_v41, 2  ;;  %v19784_v41 = vld [vmem:[%s24672_s0 + $0x134] sm:$0xff]  }
 0x776   :  { %v5876_v50 = vor.u32 %v5875_v46, %v5872_v19  ;;  %v5911_v13 = vrot.slane %v5909_v11, 3  ;;  %v19776_v46 = vld [vmem:[%s24672_s0 + $0x114] sm:$0xff]   ;;  %v5951_v11 = vshrl.u32 %v19784_v41, 16 }
 0x777   :  { %v5918_v33 = vshll.u32 %v19776_v46, 16 }
 0x778   :  { %17140 = vmatpush3.bf16.msra.mxu1 %v19762_v48  ;;  %12609 = vperm.xlu0 %19118, %v12518_v42   ;;  %v12532_v48 = vld [vmem:[%s24673_s4 + $0xd0] sm:$0xff]  ;;  %v5877_v57 = vsel %vm1594_vm6, %v5867_v49, %v5876_v50  ;;  %v12515_v42 = vld [vmem:[%s24673_s4 + $0x48] sm:$0xff]  ;;  %v5912_v19 = vor.u32 %v5911_v13, %v5908_v5  ;;  %v5953_v13 = vrot.slane %v5951_v11, 2 }
 0x779   :  { %12669 = vperm.xlu1 %19119, %v12530_v2   ;;  %v5915_v2 = vshrl.u32 %v19776_v46, 16  ;;  %v19797_v11 = vld [vmem:[%s24672_s0 + $0x70] sm:$0xff]  }
 0x77a   :  { %15699 = vmatmul.mubr.bf16.gmra.mrb[16].mxu1 %v5841_v17  ;;  %16939 = vmatmul.mubr.bf16.gmra.mrb[56].mxu0 %v11641_v6  ;;  %v11668_v17 = vsel %vm11498_vm7, %v11658_v24, %v11667_v52  ;;  %v19770_v6 = vld [vmem:[%s24672_s0 + $0xf4] sm:$0xff]   ;;  %v12019_v52 = vrot.slane %v19775_v31, 2  ;;  %v12542_v31 = vld [vmem:[%s24673_s4 + $0x120] sm:$0xff] }
 0x77b   :  { %15702 = vmatprep.mubr.msk.bf16.mxu1 %vm19810_vm0, %v19809_v0  ;;  %16942 = vmatprep.mubr.msk.bf16.mxu0 %vm19810_vm0, %v19809_v0  ;;  %v5879_v4 = vshrl.u32 %v19770_v6, 16  ;;  %v5882_v1 = vshll.u32 %v19770_v6, 16  ;;  %v5917_v8 = vrot.slane %v5915_v2, 2  ;;  %v12535_v2 = vld [vmem:[%s24673_s4 + $0xe8] sm:$0xff] }
 0x77c   :  { %12624 = vperm.xlu0 %19118, %v12521_v10  }
 0x77d   :  { %12679 = vperm.xlu1 %19119, %v12532_v48   ;;  %v5881_v55 = vrot.slane %v5879_v4, 2  ;;  %v5884_v60 = vrot.slane %v5882_v1, 3  ;;  %v19778_v1 = vld [vmem:[%s24672_s0 + $0x11c] sm:$0xff]  }
 0x77e   :  { %v5924_v48 = vshrl.u32 %v19778_v1, 16  ;;  %v5927_v10 = vshll.u32 %v19778_v1, 16 }
 0x77f   :  { %v5885_v18 = vor.u32 %v5884_v60, %v5881_v55  ;;  %v12519_v55 = vld [vmem:[%s24673_s4 + $0x68] sm:$0xff] }
 0x780   :  { %12649 = vperm.xlu0 %19118, %v12526_v44   ;;  %v5926_v44 = vrot.slane %v5924_v48, 2  ;;  %v12523_v60 = vld [vmem:[%s24673_s4 + $0x88] sm:$0xff] }
 0x781   :  { %12564 = vperm.xlu1 %19119, %v12509_v59   ;;  %v5886_v9 = vsel %vm1594_vm6, %v5876_v50, %v5885_v18  ;;  %v5920_v50 = vrot.slane %v5918_v33, 3  ;;  %v12543_v33 = vld [vmem:[%s24673_s4 + $0x128] sm:$0xff] }
 0x782   :  { %15703 = vmatmul.mubr.bf16.gmra.mrb[20].mxu1 %v5850_v34  ;;  %16943 = vmatmul.mubr.bf16.gmra.mrb[60].mxu0 %v11650_v23  ;;  %v11681_v34 = vrot.slane %v11679_v7, 3  ;;  %v5888_v23 = vshrl.u32 %v19771_v14, 16  ;;  %v12525_v14 = vld [vmem:[%s24673_s4 + $0x98] sm:$0xff] }
 0x783   :  { %15706 = vmatprep.mubr.msk.bf16.mxu1 %vm19810_vm0, %v19809_v0  ;;  %16946 = vmatprep.mubr.msk.bf16.mxu0 %vm19810_vm0, %v19809_v0  ;;  %v5921_v4 = vor.u32 %v5920_v50, %v5917_v8  ;;  %v19787_v50 = vld [vmem:[%s24672_s0 + $0x40] sm:$0xff]  }
 0x784   :  { %v11685_v26 = vor.u32 %v11684_v30, %v11681_v34  ;;  %12659 = vperm.xlu0 %19118, %v12528_v22   ;;  %v5890_v16 = vrot.slane %v5888_v23, 2  ;;  %v19780_v34 = vld [vmem:[%s24672_s0 + $0x124] sm:$0xff]  }
 0x785   :  { %12589 = vperm.xlu1 %19119, %v12514_v12   ;;  %v5922_v63 = vsel %vm1594_vm6, %v5912_v19, %v5921_v4  ;;  %v5933_v30 = vshrl.u32 %v19780_v34, 16  ;;  %v19781_v23 = vld [vmem:[%s24672_s0 + $0x28] sm:$0xff]   ;;  %v19785_v12 = vld [vmem:[%s24672_s0 + $0x38] sm:$0xff]  }
 0x786   :  { %v11686_v62 = vsel %vm11498_vm7, %v11676_v40, %v11685_v26  ;;  %v5894_v24 = vor.u32 %v5893_v53, %v5890_v16  ;;  %v19779_v40 = vld [vmem:[%s24672_s0 + $0x20] sm:$0xff]   ;;  %v12025_v36 = vrot.slane %v19781_v23, 2 }
 0x787   :  { %v12023_v7 = vrot.slane %v19779_v40, 2  ;;  %v12538_v16 = vld [vmem:[%s24673_s4 + $0x100] sm:$0xff]  ;;  %v12545_v40 = vld [vmem:[%s24673_s4 + $0x138] sm:$0xff] }
 0x788   :  { %12674 = vperm.xlu0 %19118, %v12531_v58   ;;  %v5895_v54 = vsel %vm1594_vm6, %v5885_v18, %v5894_v24  ;;  %v5936_v18 = vshll.u32 %v19780_v34, 16 }
 0x789   :  { %12614 = vperm.xlu1 %19119, %v12519_v55   ;;  %v12026_v53 = vsel %vm248_vm1, %v12023_v7, %v12025_v36 }
 0x78a   :  { %15707 = vmatmul.mubr.bf16.gmra.mrb[24].mxu1 %v5859_v45  ;;  %16947 = vmatmul.mubr.bf16.gmra.mrb[64].mxu0 %v11659_v20  ;;  %v11997_v45 = vld [vmem:[%s24672_s0 + $0x8] sm:$0xc]  ;;  %v5902_v20 = vrot.slane %v5900_v29, 3  ;;  %v5938_v58 = vrot.slane %v5936_v18, 3  ;;  %v12537_v29 = vld [vmem:[%s24673_s4 + $0xf8] sm:$0xff] }
 0x78b   :  { %15710 = vmatprep.mubr.msk.bf16.mxu1 %vm19810_vm0, %v19809_v0  ;;  %16950 = vmatprep.mubr.msk.bf16.mxu0 %vm19810_vm0, %v19809_v0  ;;  %v13812_v32 = vcombine.low %v11997_v45, %v19773_v15  ;;  %v19783_v45 = vld [vmem:[%s24672_s0 + $0x30] sm:$0xff]  }
 0x78c   :  { %12699 = vperm.xlu0 %19118, %v12536_v56   ;;  %v5903_v49 = vor.u32 %v5902_v20, %v5899_v3  ;;  %v12541_v56 = vld [vmem:[%s24673_s4 + $0x118] sm:$0xff]  ;;  %v12540_v15 = vld [vmem:[%s24673_s4 + $0x110] sm:$0xff] }
 0x78d   :  { %v12018_v35 = vrot.slane %v13812_v32, 2  ;;  %v12529_v32 = vld [vmem:[%s24673_s4 + $0xb8] sm:$0xff] }
 0x78e   :  { %v5904_v37 = vsel %vm1594_vm6, %v5894_v24, %v5903_v49  ;;  %v5913_v27 = vsel %vm1594_vm6, %v5903_v49, %v5912_v19  ;;  %v19782_v24 = vld [vmem:[%s24672_s0 + $0x12c] sm:$0xff]   ;;  %v12546_v19 = vld [vmem:[%s24673_s4 + $0x140] sm:$0xff] }
 0x78f   :  { %v5942_v38 = vshrl.u32 %v19782_v24, 16  ;;  %v5945_v25 = vshll.u32 %v19782_v24, 16 }
 0x790   :  { %12584 = vperm.xlu0 %19118, %v12513_v28   ;;  %v12027_v28 = vrot.slane %v19783_v45, 2 }
 0x791   :  { %v5944_v3 = vrot.slane %v5942_v38, 2  ;;  %v5947_v20 = vrot.slane %v5945_v25, 3  ;;  %v19793_v38 = vld [vmem:[%s24672_s0 + $0x60] sm:$0xff]  }
 0x792   :  { %15711 = vmatmul.mubr.bf16.gmra.mrb[28].mxu1 %v5868_v21  ;;  %16951 = vmatmul.mubr.bf16.gmra.mrb[68].mxu0 %v11668_v17  ;;  %v12020_v21 = vsel %vm248_vm1, %v12018_v35, %v12019_v52  ;;  %v12021_v17 = vrot.slane %v19777_v39, 2  ;;  %v12028_v49 = vsel %vm248_vm1, %v12025_v36, %v12027_v28  ;;  %v5954_v35 = vshll.u32 %v19784_v41, 16  ;;  %v19790_v36 = vld [vmem:[%s24672_s0 + $0x50] sm:$0xff]  }
 0x793   :  { %15714 = vmatprep.mubr.msk.bf16.mxu1 %vm19810_vm0, %v19809_v0  ;;  %16954 = vmatprep.mubr.msk.bf16.mxu0 %vm19810_vm0, %v19809_v0  ;;  %v5948_v47 = vor.u32 %v5947_v20, %v5944_v3  ;;  %v12039_v25 = vrot.slane %v19793_v38, 2  ;;  %v19795_v20 = vld [vmem:[%s24672_s0 + $0x68] sm:$0xff]  }
 0x794   :  { %12594 = vperm.xlu0 %19118, %v12515_v42   ;;  %v12022_v6 = vsel %vm248_vm1, %v12019_v52, %v12021_v17  ;;  %v12024_v59 = vsel %vm248_vm1, %v12021_v17, %v12023_v7  ;;  %v12534_v52 = vld [vmem:[%s24673_s4 + $0xe0] sm:$0xff]  ;;  %v5956_v42 = vrot.slane %v5954_v35, 3  ;;  %v12043_v35 = vrot.slane %v19797_v11, 2 }
 0x795   :  { %v19786_v17 = vld [vmem:[%s24672_s0 + $0x13c] sm:$0xff]  }
 0x796   :  { %v5957_v39 = vor.u32 %v5956_v42, %v5953_v13  ;;  %v5963_v8 = vshll.u32 %v19786_v17, 16 }
 0x798   :  { %12634 = vperm.xlu0 %19118, %v12523_v60   ;;  %v5965_v48 = vrot.slane %v5963_v8, 3 }
 0x79a   :  { %15715 = vmatmul.mubr.bf16.gmra.mrb[32].mxu1 %v5877_v57  ;;  %16955 = vmatmul.mubr.bf16.gmra.mrb[72].mxu0 %v11677_v43  ;;  %v5929_v57 = vrot.slane %v5927_v10, 3  ;;  %v12539_v10 = vld [vmem:[%s24673_s4 + $0x108] sm:$0xff] }
 0x79b   :  { %15718 = vmatprep.mubr.msk.bf16.mxu1 %vm19810_vm0, %v19809_v0  ;;  %16958 = vmatprep.mubr.msk.bf16.mxu0 %vm19810_vm0, %v19809_v0 }
 0x79c   :  { %v5930_v43 = vor.u32 %v5929_v57, %v5926_v44  ;;  %12644 = vperm.xlu0 %19118, %v12525_v14   ;;  %v19788_v57 = vld [vmem:[%s24672_s0 + $0x144] sm:$0x7f]  }
 0x79d   :  { %v5969_v55 = vshrl.u32 %v19788_v57, 16  ;;  %v5972_v60 = vshll.u32 %v19788_v57, 16 }
 0x79e   :  { %v5931_v22 = vsel %vm1594_vm6, %v5921_v4, %v5930_v43  ;;  %v5958_v4 = vsel %vm1594_vm6, %v5948_v47, %v5957_v39 }
 0x79f   :  { %v5974_v18 = vrot.slane %v5972_v60, 3 }
 0x7a0   :  { %12709 = vperm.xlu0 %19118, %v12538_v16  }
 0x7a2   :  { %15719 = vmatmul.mubr.bf16.gmra.mrb[36].mxu1 %v5886_v9  ;;  %16959 = vmatmul.mubr.bf16.gmra.mrb[76].mxu0 %v11686_v62  ;;  %v12524_v9 = vld [vmem:[%s24673_s4 + $0x90] sm:$0xff] }
 0x7a3   :  { %15722 = vmatprep.mubr.msk.bf16.mxu1 %vm19810_vm0, %v19809_v0  ;;  %16962 = vmatprep.mubr.msk.bf16.mxu0 %vm19810_vm0, %v19809_v0 }
 0x7a4   :  { %12639 = vperm.xlu1 %19119, %v12524_v9   ;;  %12724 = vperm.xlu0 %19118, %v12541_v56   ;;  %v19791_v9 = vld [vmem:[%s24672_s0 + $0x58] sm:$0xff]  }
 0x7a5   :  { %v12037_v16 = vrot.slane %v19791_v9, 2  ;;  %v6347_v9 = vrot.slane %v23802_v51, 1  ;;  %v12057_v51 = vrot.slane %v23628_v61, 2 }
 0x7a8   :  { %12704 = vperm.xlu1 %19119, %v12537_v29   ;;  %12664 = vperm.xlu0 %19118, %v12529_v32   ;;  %v24842_v29 = vld [vmem:[#allocation2_spill] sm:$0xff] }
 0x7a9   :  { %v24843_v56 = vrot.slane %v24842_v29, 1 }
 0x7aa   :  { %15723 = vmatmul.mubr.bf16.gmra.mrb[40].mxu1 %v5895_v54  ;;  %16963 = vmatmul.mubr.bf16.gmra.mrb[80].mxu0 %v11685_v26  ;;  %v5935_v26 = vrot.slane %v5933_v30, 2  ;;  %v5971_v30 = vrot.slane %v5969_v55, 2 }
 0x7ab   :  { %15726 = vmatprep.mubr.msk.bf16.mxu1 %vm19810_vm0, %v19809_v0  ;;  %16982 = vmatprep.mubr.msk.bf16.mxu0 %vm19810_vm0, %v19809_v0 }
 0x7ac   :  { %v5939_v62 = vor.u32 %v5938_v58, %v5935_v26  ;;  %12719 = vperm.xlu1 %19119, %v12540_v15   ;;  %12689 = vperm.xlu0 %19118, %v12534_v52   ;;  %v5975_v23 = vor.u32 %v5974_v18, %v5971_v30  ;;  %v12041_v15 = vrot.slane %v19795_v20, 2  ;;  %v19807_v30 = vld [vmem:[%s24672_s0 + $0x98] sm:$0xff]  }
 0x7ad   :  { %v12053_v18 = vrot.slane %v19807_v30, 2  ;;  %v12875_v30 = vld [vmem:[%s24674_s5 + $0x8] sm:$0xff] }
 0x7ae   :  { %v5940_v54 = vsel %vm1594_vm6, %v5930_v43, %v5939_v62  ;;  %v5949_v5 = vsel %vm1594_vm6, %v5939_v62, %v5948_v47  ;;  %v19792_v62 = vld [vmem:[%s24672_s0 + $0x64] sm:$0xff]   ;;  %v19796_v47 = vld [vmem:[%s24672_s0 + $0x74] sm:$0xff]   ;;  %v12044_v52 = vsel %vm248_vm1, %v12041_v15, %v12043_v35 }
 0x7af   :  { %v6331_v24 = vrot.slane %v19792_v62, 1  ;;  %v6335_v41 = vrot.slane %v19796_v47, 1 }
 0x7b0   :  { %12729 = vperm.xlu1 %19119, %v12542_v31   ;;  %12749 = vperm.xlu0 %19118, %v12546_v19   ;;  %v19800_v19 = vld [vmem:[%s24672_s0 + $0x84] sm:$0xff]  }
 0x7b1   :  { %v6332_v45 = vsel %vm2114_vm2, %v24843_v56, %v6331_v24 }
 0x7b2   :  { %15727 = vmatmul.mubr.bf16.gmra.mrb[44].mxu1 %v5904_v37  ;;  %16983 = vmatmul.mubr.bf16.vlgmr.msra.gmra.mrb[0].mxu0 %v12020_v21  ;;  %v12029_v37 = vrot.slane %v19785_v12, 2  ;;  %v12533_v21 = vld [vmem:[%s24673_s4 + $0xd8] sm:$0xff] }
 0x7b3   :  { %15730 = vmatprep.mubr.msk.bf16.mxu1 %vm19810_vm0, %v19809_v0  ;;  %16986 = vmatprep.mubr.msk.bf16.mxu0 %vm19810_vm0, %v19809_v0  ;;  %v19798_v12 = vld [vmem:[%s24672_s0 + $0x7c] sm:$0xff]  }
 0x7b4   :  { %v12030_v46 = vsel %vm248_vm1, %v12027_v28, %v12029_v37  ;;  %12684 = vperm.xlu1 %19119, %v12533_v21   ;;  %12734 = vperm.xlu0 %19118, %v12543_v33   ;;  %v12040_v28 = vsel %vm248_vm1, %v12037_v16, %v12039_v25 }
 0x7b8   :  { %12694 = vperm.xlu1 %19119, %v12535_v2   ;;  %12744 = vperm.xlu0 %19118, %v12545_v40   ;;  %v19801_v2 = vld [vmem:[%s24672_s0 + $0x80] sm:$0xff]   ;;  %v19805_v40 = vld [vmem:[%s24672_s0 + $0x90] sm:$0xff]  }
 0x7b9   :  { %v12047_v33 = vrot.slane %v19801_v2, 2 }
 0x7ba   :  { %15731 = vmatmul.mubr.bf16.gmra.mrb[48].mxu1 %v5913_v27  ;;  %16987 = vmatmul.mubr.bf16.gmra.mrb[4].mxu0 %v12022_v6  ;;  %v5960_v27 = vshrl.u32 %v19786_v17, 16  ;;  %v12031_v6 = vrot.slane %v19787_v50, 2  ;;  %v19803_v50 = vld [vmem:[%s24672_s0 + $0x88] sm:$0xff]  }
 0x7bb   :  { %15734 = vmatprep.mubr.msk.bf16.mxu1 %vm19810_vm0, %v19809_v0  ;;  %16990 = vmatprep.mubr.msk.bf16.mxu0 %vm19810_vm0, %v19809_v0 }
 0x7bc   :  { %v5962_v1 = vrot.slane %v5960_v27, 2  ;;  %v12032_v7 = vsel %vm248_vm1, %v12029_v37, %v12031_v6  ;;  %12714 = vperm.xlu1 %19119, %v12539_v10   ;;  %v6337_v37 = vrot.slane %v19798_v12, 1  ;;  %v19802_v27 = vld [vmem:[%s24672_s0 + $0x8c] sm:$0xff]  }
 0x7bd   :  { %v6341_v8 = vrot.slane %v19802_v27, 1 }
 0x7be   :  { %v5966_v44 = vor.u32 %v5965_v48, %v5962_v1  ;;  %v6338_v42 = vsel %vm2114_vm2, %v6335_v41, %v6337_v37  ;;  %v19804_v48 = vld [vmem:[%s24672_s0 + $0x94] sm:$0xff]  }
 0x7bf   :  { %v6343_v10 = vrot.slane %v19804_v48, 1 }
 0x7c0   :  { %v5967_v34 = vsel %vm1594_vm6, %v5957_v39, %v5966_v44  ;;  %v5976_v26 = vsel %vm1594_vm6, %v5966_v44, %v5975_v23 }
 0x7c1   :  { %v6344_v55 = vsel %vm2114_vm2, %v6341_v8, %v6343_v10 }
 0x7c2   :  { %15735 = vmatmul.mubr.bf16.gmra.mrb[52].mxu1 %v5922_v63  ;;  %16991 = vmatmul.mubr.bf16.gmra.mrb[8].mxu0 %v12024_v59  ;;  %v12544_v63 = vld [vmem:[%s24673_s4 + $0x130] sm:$0xff]  ;;  %v19789_v59 = vld [vmem:[%s24672_s0 + $0x48] sm:$0xff]  }
 0x7c3   :  { %15738 = vmatprep.mubr.msk.bf16.mxu1 %vm19810_vm0, %v19809_v0  ;;  %16994 = vmatprep.mubr.msk.bf16.mxu0 %vm19810_vm0, %v19809_v0  ;;  %v12033_v43 = vrot.slane %v19789_v59, 2 }
 0x7c4   :  { %12739 = vperm.xlu1 %19119, %v12544_v63  }
 0x7c5   :  { %v12034_v14 = vsel %vm248_vm1, %v12031_v6, %v12033_v43  ;;  %v12049_v6 = vrot.slane %v19803_v50, 2 }
 0x7c7   :  { %v12050_v1 = vsel %vm248_vm1, %v12047_v33, %v12049_v6 }
 0x7ca   :  { %15739 = vmatmul.mubr.bf16.gmra.mrb[56].mxu1 %v5931_v22  ;;  %16995 = vmatmul.mubr.bf16.gmra.mrb[12].mxu0 %v12026_v53  ;;  %v12035_v22 = vrot.slane %v19790_v36, 2 }
 0x7cb   :  { %15742 = vmatprep.mubr.msk.bf16.mxu1 %vm19810_vm0, %v19809_v0  ;;  %16998 = vmatprep.mubr.msk.bf16.mxu0 %vm19810_vm0, %v19809_v0 }
 0x7cc   :  { %v12036_v58 = vsel %vm248_vm1, %v12033_v43, %v12035_v22  ;;  %v12038_v53 = vsel %vm248_vm1, %v12035_v22, %v12037_v16  ;;  %v19806_v43 = vld [vmem:[%s24672_s0 + $0x9c] sm:$0xff]  }
 0x7cd   :  { %v19808_v16 = vld [vmem:[%s24672_s0 + $0xa0] sm:$0xff]  }
 0x7d2   :  { %15743 = vmatmul.mubr.bf16.gmra.mrb[60].mxu1 %v5940_v54  ;;  %16999 = vmatmul.mubr.bf16.gmra.mrb[16].mxu0 %v12028_v49  ;;  %v19794_v54 = vld [vmem:[%s24672_s0 + $0x6c] sm:$0xff]   ;;  %v12042_v49 = vsel %vm248_vm1, %v12039_v25, %v12041_v15 }
 0x7d3   :  { %15746 = vmatprep.mubr.msk.bf16.mxu1 %vm19810_vm0, %v19809_v0  ;;  %17002 = vmatprep.mubr.msk.bf16.mxu0 %vm19810_vm0, %v19809_v0  ;;  %v6333_v3 = vrot.slane %v19794_v54, 1 }
 0x7d5   :  { %v6334_v32 = vsel %vm2114_vm2, %v6331_v24, %v6333_v3  ;;  %v6336_v31 = vsel %vm2114_vm2, %v6333_v3, %v6335_v41 }
 0x7da   :  { %15747 = vmatmul.mubr.bf16.gmra.mrb[64].mxu1 %v5949_v5  ;;  %17003 = vmatmul.mubr.bf16.gmra.mrb[20].mxu0 %v12030_v46  ;;  %v19799_v5 = vld [vmem:[%s24672_s0 + $0x78] sm:$0xff]   ;;  %v6339_v46 = vrot.slane %v19800_v19, 1 }
 0x7db   :  { %15750 = vmatprep.mubr.msk.bf16.mxu1 %vm19810_vm0, %v19809_v0  ;;  %17006 = vmatprep.mubr.msk.bf16.mxu0 %vm19810_vm0, %v19809_v0  ;;  %v12045_v13 = vrot.slane %v19799_v5, 2 }
 0x7dc   :  { %v6340_v39 = vsel %vm2114_vm2, %v6337_v37, %v6339_v46 }
 0x7dd   :  { %v12046_v21 = vsel %vm248_vm1, %v12043_v35, %v12045_v13  ;;  %v12048_v17 = vsel %vm248_vm1, %v12045_v13, %v12047_v33  ;;  %v24398_v33 = vpop.permute.xlu1 %12554 }
 0x7e2   :  { %15751 = vmatmul.mubr.bf16.gmra.mrb[68].mxu1 %v5958_v4  ;;  %17007 = vmatmul.mubr.bf16.gmra.mrb[24].mxu0 %v12032_v7  ;;  %v6342_v4 = vsel %vm2114_vm2, %v6339_v46, %v6341_v8  ;;  %v12051_v7 = vrot.slane %v19805_v40, 2  ;;  %v24404_v8 = vpop.permute.xlu1 %12559  ;;  %v19812_v40 = vmov 0.0|0.0  }
 0x7e3   :  { %15754 = vmatprep.mubr.msk.bf16.mxu1 %vm19810_vm0, %v19809_v0  ;;  %17010 = vmatprep.mubr.msk.bf16.mxu0 %vm19810_vm0, %v19809_v0 }
 0x7e4   :  { %v12052_v59 = vsel %vm248_vm1, %v12049_v6, %v12051_v7  ;;  %17101 = vmatprep.subr.bf16.mxu1 %v19812_v40 }
 0x7e6   :  { %v24410_v48 = vpop.permute.xlu1 %12574 }
 0x7ea   :  { %15755 = vmatmul.mubr.bf16.gmra.mrb[72].mxu1 %v5967_v34  ;;  %17011 = vmatmul.mubr.bf16.gmra.mrb[28].mxu0 %v12034_v14  ;;  %v6345_v34 = vrot.slane %v19806_v43, 1 }
 0x7eb   :  { %15758 = vmatprep.mubr.msk.bf16.mxu1 %vm19810_vm0, %v19809_v0  ;;  %17014 = vmatprep.mubr.msk.bf16.mxu0 %vm19810_vm0, %v19809_v0 }
 0x7ec   :  { %v6346_v22 = vsel %vm2114_vm2, %v6343_v10, %v6345_v34  ;;  %v6348_v25 = vsel %vm2114_vm2, %v6345_v34, %v6347_v9  ;;  %v12874_v34 = vld [vmem:[%s24674_s5] sm:$0xff] }
 0x7f2   :  { %15759 = vmatmul.mubr.bf16.gmra.mrb[76].mxu1 %v5976_v26  ;;  %17015 = vmatmul.mubr.bf16.gmra.mrb[32].mxu0 %v12036_v58  ;;  %v12054_v58 = vsel %vm248_vm1, %v12051_v7, %v12053_v18 }
 0x7f3   :  { %15762 = vmatprep.mubr.msk.bf16.mxu1 %vm19810_vm0, %v19809_v0  ;;  %17018 = vmatprep.mubr.msk.bf16.mxu0 %vm19810_vm0, %v19809_v0 }
 0x7fa   :  { %15763 = vmatmul.mubr.bf16.gmra.mrb[80].mxu1 %v5975_v23  ;;  %17019 = vmatmul.mubr.bf16.gmra.mrb[36].mxu0 %v12038_v53  ;;  %v12055_v53 = vrot.slane %v19808_v16, 2 }
 0x7fb   :  { %15826 = vmatprep.mubr.msk.bf16.mxu1 %vm19810_vm0, %v19809_v0  ;;  %17022 = vmatprep.mubr.msk.bf16.mxu0 %vm19810_vm0, %v19809_v0 }
 0x7fc   :  { %v12056_v56 = vsel %vm248_vm1, %v12053_v18, %v12055_v53  ;;  %v12058_v20 = vsel %vm248_vm1, %v12055_v53, %v12057_v51  ;;  %v17102_v18 = vpack.c.bf16 %v12875_v30, %v12874_v34 }
 0x802   :  { %15827 = vmatmul.mubr.bf16.vlgmr.msra.gmra.mrb[44].mxu1 %v6332_v45  ;;  %17023 = vmatmul.mubr.bf16.gmra.mrb[40].mxu0 %v12040_v28 }
 0x803   :  { %15830 = vmatprep.mubr.msk.bf16.mxu1 %vm19810_vm0, %v19809_v0  ;;  %17026 = vmatprep.mubr.msk.bf16.mxu0 %vm19810_vm0, %v19809_v0 }
 0x804   :  { %17103 = vmatpush3.bf16.msra.mxu1 %v17102_v18 }
 0x805   :  { %17104 = vmatprep.subr.bf16.mxu1 %v19812_v40 }
 0x80a   :  { %15831 = vmatmul.mubr.bf16.gmra.mrb[48].mxu1 %v6334_v32  ;;  %17027 = vmatmul.mubr.bf16.gmra.mrb[44].mxu0 %v12042_v49 }
 0x80b   :  { %15834 = vmatprep.mubr.msk.bf16.mxu1 %vm19810_vm0, %v19809_v0  ;;  %17030 = vmatprep.mubr.msk.bf16.mxu0 %vm19810_vm0, %v19809_v0 }
 0x812   :  { %15835 = vmatmul.mubr.bf16.gmra.mrb[52].mxu1 %v6336_v31  ;;  %17031 = vmatmul.mubr.bf16.gmra.mrb[48].mxu0 %v12044_v52 }
 0x813   :  { %15838 = vmatprep.mubr.msk.bf16.mxu1 %vm19810_vm0, %v19809_v0  ;;  %17034 = vmatprep.mubr.msk.bf16.mxu0 %vm19810_vm0, %v19809_v0 }
 0x81a   :  { %15839 = vmatmul.mubr.bf16.gmra.mrb[56].mxu1 %v6338_v42  ;;  %17035 = vmatmul.mubr.bf16.gmra.mrb[52].mxu0 %v12046_v21  ;;  %v24392_v21 = vpop.permute.xlu0 %12599 }
 0x81b   :  { %15842 = vmatprep.mubr.msk.bf16.mxu1 %vm19810_vm0, %v19809_v0  ;;  %17038 = vmatprep.mubr.msk.bf16.mxu0 %vm19810_vm0, %v19809_v0 }
 0x822   :  { %15843 = vmatmul.mubr.bf16.gmra.mrb[60].mxu1 %v6340_v39  ;;  %17039 = vmatmul.mubr.bf16.gmra.mrb[56].mxu0 %v12048_v17  ;;  %v24400_v17 = vpop.permute.xlu0 %12549 }
 0x823   :  { %15846 = vmatprep.mubr.msk.bf16.mxu1 %vm19810_vm0, %v19809_v0  ;;  %17042 = vmatprep.mubr.msk.bf16.mxu0 %vm19810_vm0, %v19809_v0 }
 0x826   :  { %v24406_v6 = vpop.permute.xlu0 %12569 }
 0x82a   :  { %15847 = vmatmul.mubr.bf16.gmra.mrb[64].mxu1 %v6342_v4  ;;  %17043 = vmatmul.mubr.bf16.gmra.mrb[60].mxu0 %v12050_v1  ;;  %v24412_v10 = vpop.permute.xlu0 %12579 }
 0x82b   :  { %15850 = vmatprep.mubr.msk.bf16.mxu1 %vm19810_vm0, %v19809_v0  ;;  %17046 = vmatprep.mubr.msk.bf16.mxu0 %vm19810_vm0, %v19809_v0 }
 0x82d   :  { %v24326_v63 = vpop.f32.mrb[0].mxu1 }
 0x82e   :  { %v15684_v44 = vpop.f32.mrb[1].mxu1  ;;  %v24421_v43 = vpop.permute.xlu0 %12609 }
 0x82f   :  { %v24328_v57 = vpop.f32.mrb[2].mxu1 }
 0x830   :  { %v15685_v60 = vpop.f32.mrb[3].mxu1 }
 0x832   :  { %15851 = vmatmul.mubr.bf16.gmra.mrb[68].mxu1 %v6344_v55  ;;  %17047 = vmatmul.mubr.bf16.gmra.mrb[64].mxu0 %v12052_v59  ;;  %v24419_v59 = vpop.permute.xlu1 %12604  ;;  %v24433_v16 = vpop.permute.xlu0 %12624 }
 0x833   :  { %15854 = vmatprep.mubr.msk.bf16.mxu1 %vm19810_vm0, %v19809_v0  ;;  %17050 = vmatprep.mubr.msk.bf16.mxu0 %vm19810_vm0, %v19809_v0 }
 0x835   :  { %v24342_v14 = vpop.f32.mrb[4].mxu1 }
 0x836   :  { %v15688_v23 = vpop.f32.mrb[5].mxu1 }
 0x837   :  { %v24344_v36 = vpop.f32.mrb[6].mxu1 }
 0x838   :  { %v15689_v26 = vpop.f32.mrb[7].mxu1 }
 0x83a   :  { %15855 = vmatmul.mubr.bf16.gmra.mrb[72].mxu1 %v6346_v22  ;;  %17051 = vmatmul.mubr.bf16.gmra.mrb[68].mxu0 %v12054_v58  ;;  %v24430_v22 = vpop.permute.xlu1 %12619 }
 0x83b   :  { %15858 = vmatprep.mubr.msk.bf16.mxu1 %vm19810_vm0, %v19809_v0  ;;  %17054 = vmatprep.mubr.msk.bf16.mxu0 %vm19810_vm0, %v19809_v0 }
 0x83d   :  { %v24356_v62 = vpop.f32.mrb[8].mxu1 }
 0x83e   :  { %v15692_v24 = vpop.f32.mrb[9].mxu1 }
 0x83f   :  { %v24358_v38 = vpop.f32.mrb[10].mxu1 }
 0x840   :  { %v15693_v29 = vpop.f32.mrb[11].mxu1 }
 0x841   :  { %v12877_v29 = vld [vmem:[%s24674_s5 + $0x18] sm:$0xff] }
 0x842   :  { %15859 = vmatmul.mubr.bf16.gmra.mrb[76].mxu1 %v6348_v25  ;;  %17055 = vmatmul.mubr.bf16.gmra.mrb[72].mxu0 %v12056_v56  ;;  %v12876_v25 = vld [vmem:[%s24674_s5 + $0x10] sm:$0xff] }
 0x843   :  { %15862 = vmatprep.mubr.msk.bf16.mxu1 %vm19810_vm0, %v19809_v0  ;;  %17058 = vmatprep.mubr.msk.bf16.mxu0 %vm19810_vm0, %v19809_v0  ;;  %v17105_v56 = vpack.c.bf16 %v12877_v29, %v12876_v25  ;;  %v12880_v25 = vld [vmem:[%s24674_s5 + $0x30] sm:$0xff]  ;;  %v12881_v29 = vld [vmem:[%s24674_s5 + $0x38] sm:$0xff] }
 0x845   :  { %v24367_v45 = vpop.f32.mrb[12].mxu1  ;;  %17106 = vmatpush3.bf16.msra.mxu1 %v17105_v56 }
 0x846   :  { %v15696_v28 = vpop.f32.mrb[13].mxu1  ;;  %17107 = vmatprep.subr.bf16.mxu1 %v19812_v40 }
 0x847   :  { %v24369_v54 = vpop.f32.mrb[14].mxu1  ;;  %v24445_v28 = vpop.permute.xlu0 %12649 }
 0x848   :  { %v15697_v3 = vpop.f32.mrb[15].mxu1 }
 0x84a   :  { %15863 = vmatmul.mubr.bf16.gmra.mrb[80].mxu1 %v6347_v9  ;;  %17059 = vmatmul.mubr.bf16.gmra.mrb[76].mxu0 %v12058_v20 }
 0x84b   :  { %17098 = vmatprep.mubr.msk.f32.mxu1 %vm19810_vm0, %v19809_v0  ;;  %17062 = vmatprep.mubr.msk.bf16.mxu0 %vm19810_vm0, %v19809_v0 }
 0x84d   :  { %v24376_v15 = vpop.f32.mrb[16].mxu1 }
 0x84e   :  { %v15700_v32 = vpop.f32.mrb[17].mxu1 }
 0x84f   :  { %v24378_v61 = vpop.f32.mrb[18].mxu1 }
 0x850   :  { %v15701_v49 = vpop.f32.mrb[19].mxu1 }
 0x852   :  { %17063 = vmatmul.mubr.bf16.gmra.mrb[80].mxu0 %v12057_v51  ;;  %v24442_v51 = vpop.permute.xlu1 %12629 }
 0x855   :  { %v24380_v47 = vpop.f32.mrb[20].mxu1 }
 0x856   :  { %v15704_v41 = vpop.f32.mrb[21].mxu1 }
 0x857   :  { %v24382_v11 = vpop.f32.mrb[22].mxu1 }
 0x858   :  { %v15705_v35 = vpop.f32.mrb[23].mxu1 }
 0x859   :  { %v12878_v35 = vld [vmem:[%s24674_s5 + $0x20] sm:$0xff] }
 0x85d   :  { %v24384_v31 = vpop.f32.mrb[24].mxu1 }
 0x85e   :  { %v15708_v52 = vpop.f32.mrb[25].mxu1 }
 0x85f   :  { %v24386_v12 = vpop.f32.mrb[26].mxu1  ;;  %v12879_v52 = vld [vmem:[%s24674_s5 + $0x28] sm:$0xff] }
 0x860   :  { %v15709_v37 = vpop.f32.mrb[27].mxu1 }
 0x865   :  { %v24388_v0 = vpop.f32.mrb[28].mxu1 }
 0x866   :  { %v15712_v5 = vpop.f32.mrb[29].mxu1 }
 0x867   :  { %v24390_v13 = vpop.f32.mrb[30].mxu1  ;;  %v17108_v5 = vpack.c.bf16 %v12879_v52, %v12878_v35 }
 0x868   :  { %v15713_v42 = vpop.f32.mrb[31].mxu1 }
 0x869   :  { %v24466_v42 = vpop.permute.xlu1 %12654  ;;  %17109 = vmatpush3.bf16.msra.mxu1 %v17108_v5 }
 0x86a   :  { %17110 = vmatprep.subr.bf16.mxu1 %v19812_v40 }
 0x86d   :  { %v24394_v19 = vpop.f32.mrb[32].mxu1  ;;  %v24475_v30 = vpop.permute.xlu1 %12669 }
 0x86e   :  { %v15716_v46 = vpop.f32.mrb[33].mxu1 }
 0x86f   :  { %v24396_v2 = vpop.f32.mrb[34].mxu1  ;;  %v24469_v46 = vpop.permute.xlu0 %12659 }
 0x870   :  { %v15717_v39 = vpop.f32.mrb[35].mxu1 }
 0x871   :  { %v24494_v52 = vpop.permute.xlu1 %12679 }
 0x875   :  { %v24402_v27 = vpop.f32.mrb[36].mxu1 }
 0x876   :  { %v15720_v50 = vpop.f32.mrb[37].mxu1 }
 0x877   :  { %v24408_v4 = vpop.f32.mrb[38].mxu1 }
 0x878   :  { %v15721_v1 = vpop.f32.mrb[39].mxu1 }
 0x87d   :  { %v24415_v7 = vpop.f32.mrb[40].mxu1 }
 0x87e   :  { %v15724_v44 = vpop.f32.mrb[41].mxu1 }
 0x87f   :  { %v24417_v55 = vpop.f32.mrb[42].mxu1 }
 0x880   :  { %v15725_v60 = vpop.f32.mrb[43].mxu1 }
 0x885   :  { %v12162_v23 = vpop.f32.mrb[0].mxu0 }
 0x886   :  { %v17141_v26 = vadd.f32 %v12162_v23, %v24326_v63  ;;  %v16984_v58 = vpop.f32.mrb[1].mxu0 }
 0x887   :  { %v12165_v9 = vpop.f32.mrb[2].mxu0 }
 0x888   :  { %v17142_v53 = vadd.f32 %v12165_v9, %v24328_v57  ;;  %v16985_v24 = vpop.f32.mrb[3].mxu0  ;;  %v24450_v57 = vld [vmem:[%s24675_s2] ss:$0 sm:$0xff]  ;;  %v24479_v9 = vpop.permute.xlu0 %12674 }
 0x889   :  { %v12376_v37 = vmul.f32 %v17141_v26, %v24450_v57 }
 0x88d   :  { %v12170_v63 = vpop.f32.mrb[4].mxu0 }
 0x88e   :  { %v17143_v3 = vadd.f32 %v12170_v63, %v24342_v14  ;;  %v16988_v20 = vpop.f32.mrb[5].mxu0  ;;  %v24464_v14 = vld [vmem:[%s24676_s3] ss:$0 sm:$0xff]  ;;  %v17111_v63 = vpack.c.bf16 %v12881_v29, %v12880_v25 }
 0x88f   :  { %v12173_v32 = vpop.f32.mrb[6].mxu0  ;;  %v12424_v39 = vadd.f32 %v24464_v14, %v12376_v37 }
 0x890   :  { %v17144_v49 = vadd.f32 %v12173_v32, %v24344_v36  ;;  %v16989_v41 = vpop.f32.mrb[7].mxu0  ;;  %v12377_v36 = vmul.f32 %v17142_v53, %v24450_v57  ;;  %v12378_v53 = vmul.f32 %v17143_v3, %v24450_v57  ;;  %17112 = vmatpush3.bf16.msra.mxu1 %v17111_v63 }
 0x891   :  { %v12465_v58 = vmax.f32 %v12424_v39, 0.0  ;;  %17113 = vmatprep.subr.bf16.mxu1 %v19812_v40 }
 0x892   :  { %v12425_v60 = vadd.f32 %v24464_v14, %v12377_v36  ;;  %v12426_v35 = vadd.f32 %v24464_v14, %v12378_v53 }
 0x893   :  { %v12752_v41 = vmul.f32 %v24400_v17, %v12465_v58 }
 0x894   :  { %v12466_v56 = vmax.f32 %v12425_v60, 0.0 }
 0x895   :  { %v12178_v50 = vpop.f32.mrb[8].mxu0 }
 0x896   :  { %v17145_v1 = vadd.f32 %v12178_v50, %v24356_v62  ;;  %v16992_v44 = vpop.f32.mrb[9].mxu0  ;;  %v12753_v17 = vmul.f32 %v24398_v33, %v12466_v56 }
 0x897   :  { %v12181_v34 = vpop.f32.mrb[10].mxu0 }
 0x898   :  { %v12380_v18 = vmul.f32 %v17145_v1, %v24450_v57  ;;  %v17146_v23 = vadd.f32 %v12181_v34, %v24358_v38  ;;  %v16993_v26 = vpop.f32.mrb[11].mxu0  ;;  %v12379_v38 = vmul.f32 %v17144_v49, %v24450_v57  ;;  %v24500_v1 = vpop.permute.xlu0 %12699 }
 0x89a   :  { %v12428_v24 = vadd.f32 %v24464_v14, %v12380_v18  ;;  %v12381_v62 = vmul.f32 %v17146_v23, %v24450_v57  ;;  %v12427_v49 = vadd.f32 %v24464_v14, %v12379_v38  ;;  %v12467_v23 = vmax.f32 %v12426_v35, 0.0 }
 0x89c   :  { %v12469_v20 = vmax.f32 %v12428_v24, 0.0  ;;  %v12429_v32 = vadd.f32 %v24464_v14, %v12381_v62  ;;  %v12468_v53 = vmax.f32 %v12427_v49, 0.0  ;;  %v12565_v24 = vpop.permute.xlu1 %12564  ;;  %v12585_v29 = vpop.permute.xlu0 %12584  ;;  %v12754_v56 = vmul.f32 %v24404_v8, %v12467_v23  ;;  %v12883_v8 = vld [vmem:[%s24674_s5 + $0x48] sm:$0xff] }
 0x89d   :  { %v12186_v3 = vpop.f32.mrb[12].mxu0 }
 0x89e   :  { %v12470_v37 = vmax.f32 %v12429_v32, 0.0  ;;  %v17147_v5 = vadd.f32 %v12186_v3, %v24367_v45  ;;  %v16996_v36 = vpop.f32.mrb[13].mxu0  ;;  %v12756_v39 = vmul.f32 %v24406_v6, %v12469_v20  ;;  %v12755_v20 = vmul.f32 %v12565_v24, %v12468_v53 }
 0x89f   :  { %v12189_v50 = vpop.f32.mrb[14].mxu0  ;;  %v12882_v36 = vld [vmem:[%s24674_s5 + $0x40] sm:$0xff] }
 0x8a0   :  { %v12382_v44 = vmul.f32 %v17147_v5, %v24450_v57  ;;  %v17148_v60 = vadd.f32 %v12189_v50, %v24369_v54  ;;  %v16997_v34 = vpop.f32.mrb[15].mxu0  ;;  %v12793_v18 = vmax.f32 %v12752_v41, %v12756_v39  ;;  %v12757_v45 = vmul.f32 %v24410_v48, %v12470_v37  ;;  %v12590_v50 = vpop.permute.xlu1 %12589 }
 0x8a2   :  { %v12430_v6 = vadd.f32 %v24464_v14, %v12382_v44  ;;  %v12383_v26 = vmul.f32 %v17148_v60, %v24450_v57  ;;  %v12794_v58 = vmax.f32 %v12753_v17, %v12757_v45  ;;  %v12595_v60 = vpop.permute.xlu0 %12594 }
 0x8a4   :  { %v12471_v62 = vmax.f32 %v12430_v6, 0.0  ;;  %v12431_v25 = vadd.f32 %v24464_v14, %v12383_v26 }
 0x8a5   :  { %v12194_v33 = vpop.f32.mrb[16].mxu0 }
 0x8a6   :  { %v12758_v54 = vmul.f32 %v24412_v10, %v12471_v62  ;;  %v17149_v38 = vadd.f32 %v12194_v33, %v24376_v15  ;;  %v17000_v48 = vpop.f32.mrb[17].mxu0  ;;  %v12472_v63 = vmax.f32 %v12431_v25, 0.0  ;;  %v17114_v15 = vpack.c.bf16 %v12883_v8, %v12882_v36 }
 0x8a7   :  { %v12197_v32 = vpop.f32.mrb[18].mxu0 }
 0x8a8   :  { %v12795_v3 = vmax.f32 %v12754_v56, %v12758_v54  ;;  %v12384_v41 = vmul.f32 %v17149_v38, %v24450_v57  ;;  %v12759_v35 = vmul.f32 %v12585_v29, %v12472_v63  ;;  %v17150_v37 = vadd.f32 %v12197_v32, %v24378_v61  ;;  %v17001_v5 = vpop.f32.mrb[19].mxu0  ;;  %17115 = vmatpush3.bf16.msra.mxu1 %v17114_v15 }
 0x8a9   :  { %17116 = vmatprep.subr.bf16.mxu1 %v19812_v40 }
 0x8aa   :  { %v12796_v10 = vmax.f32 %v12755_v20, %v12759_v35  ;;  %v12385_v39 = vmul.f32 %v17150_v37, %v24450_v57  ;;  %v12432_v49 = vadd.f32 %v24464_v14, %v12384_v41  ;;  %v12886_v35 = vld [vmem:[%s24674_s5 + $0x60] sm:$0xff] }
 0x8ac   :  { %v12473_v17 = vmax.f32 %v12432_v49, 0.0  ;;  %v12433_v61 = vadd.f32 %v24464_v14, %v12385_v39  ;;  %v12888_v39 = vld [vmem:[%s24674_s5 + $0x70] sm:$0xff]  ;;  %v12889_v49 = vld [vmem:[%s24674_s5 + $0x78] sm:$0xff] }
 0x8ad   :  { %v12202_v44 = vpop.f32.mrb[20].mxu0 }
 0x8ae   :  { %v12760_v34 = vmul.f32 %v12590_v50, %v12473_v17  ;;  %v17151_v45 = vadd.f32 %v12202_v44, %v24380_v47  ;;  %v17004_v23 = vpop.f32.mrb[21].mxu0  ;;  %v12474_v6 = vmax.f32 %v12433_v61, 0.0  ;;  %v17123_v44 = vpack.c.bf16 %v12889_v49, %v12888_v39 }
 0x8af   :  { %v12205_v26 = vpop.f32.mrb[22].mxu0 }
 0x8b0   :  { %v12797_v53 = vmax.f32 %v12793_v18, %v12760_v34  ;;  %v12386_v24 = vmul.f32 %v17151_v45, %v24450_v57  ;;  %v12761_v62 = vmul.f32 %v12595_v60, %v12474_v6  ;;  %v17152_v25 = vadd.f32 %v12205_v26, %v24382_v11  ;;  %v17005_v33 = vpop.f32.mrb[23].mxu0  ;;  %v12884_v18 = vld [vmem:[%s24674_s5 + $0x50] sm:$0xff]  ;;  %v12885_v11 = vld [vmem:[%s24674_s5 + $0x58] sm:$0xff] }
 0x8b1   :  { %v17117_v5 = vpack.c.bf16 %v12885_v11, %v12884_v18 }
 0x8b2   :  { %v12434_v29 = vadd.f32 %v24464_v14, %v12386_v24  ;;  %v12798_v56 = vmax.f32 %v12794_v58, %v12761_v62  ;;  %v12387_v8 = vmul.f32 %v17152_v25, %v24450_v57 }
 0x8b3   :  { %17118 = vmatpush3.bf16.msra.mxu1 %v17117_v5 }
 0x8b4   :  { %v12475_v54 = vmax.f32 %v12434_v29, 0.0  ;;  %v12802_v38 = vmax.f32 %v12797_v53, %v12798_v56  ;;  %17119 = vmatprep.subr.bf16.mxu1 %v19812_v40  ;;  %v12435_v17 = vadd.f32 %v24464_v14, %v12387_v8 }
 0x8b5   :  { %v12210_v48 = vpop.f32.mrb[24].mxu0 }
 0x8b6   :  { %v12762_v63 = vmul.f32 %v24392_v21, %v12475_v54  ;;  %v17153_v47 = vadd.f32 %v12210_v48, %v24384_v31  ;;  %v17008_v20 = vpop.f32.mrb[25].mxu0  ;;  %v12887_v31 = vld [vmem:[%s24674_s5 + $0x68] sm:$0xff] }
 0x8b7   :  { %v12213_v32 = vpop.f32.mrb[26].mxu0  ;;  %v17120_v15 = vpack.c.bf16 %v12887_v31, %v12886_v35  ;;  %v12615_v31 = vpop.permute.xlu1 %12614 }
 0x8b8   :  { %v12800_v58 = vsel %vm12799_vm8, %v12762_v63, -inf  ;;  %v17009_v41 = vpop.f32.mrb[27].mxu0  ;;  %v17154_v37 = vadd.f32 %v12213_v32, %v24386_v12  ;;  %v12388_v23 = vmul.f32 %v17153_v47, %v24450_v57  ;;  %v12812_v54 = vsel %vm12811_vm9, %v12762_v63, -inf }
 0x8b9   :  { %v12801_v21 = vmax.f32 %v12795_v3, %v12800_v58  ;;  %17121 = vmatpush3.bf16.msra.mxu1 %v17120_v15 }
 0x8ba   :  { %17122 = vmatprep.subr.bf16.mxu1 %v19812_v40  ;;  %v12389_v53 = vmul.f32 %v17154_v37, %v24450_v57  ;;  %v12635_v37 = vpop.permute.xlu0 %12634 }
 0x8bb   :  { %v12803_v36 = vmax.f32 %v12801_v21, %v12796_v10 }
 0x8bc   :  { %v12437_v48 = vadd.f32 %v24464_v14, %v12389_v53 }
 0x8bd   :  { %v24552_v50 = vmax.f32 %v12802_v38, %v12803_v36  ;;  %v12218_v3 = vpop.f32.mrb[28].mxu0  ;;  %17124 = vmatpush3.bf16.msra.mxu1 %v17123_v44 }
 0x8be   :  { %v17155_v12 = vadd.f32 %v12218_v3, %v24388_v0  ;;  %v17012_v10 = vpop.f32.mrb[29].mxu0  ;;  %v12476_v0 = vmax.f32 %v12435_v17, 0.0  ;;  %v12478_v63 = vmax.f32 %v12437_v48, 0.0 }
 0x8bf   :  { %v12221_v61 = vpop.f32.mrb[30].mxu0 }
 0x8c0   :  { %v12390_v60 = vmul.f32 %v17155_v12, %v24450_v57  ;;  %v17156_v34 = vadd.f32 %v12221_v61, %v24390_v13  ;;  %v17013_v45 = vpop.f32.mrb[31].mxu0  ;;  %v12436_v13 = vadd.f32 %v24464_v14, %v12388_v23  ;;  %v12763_v38 = vmul.f32 %v24419_v59, %v12476_v0 }
 0x8c1   :  { %v12765_v39 = vmul.f32 %v12615_v31, %v12478_v63 }
 0x8c2   :  { %v12438_v6 = vadd.f32 %v24464_v14, %v12390_v60  ;;  %v12391_v26 = vmul.f32 %v17156_v34, %v24450_v57  ;;  %v12477_v41 = vmax.f32 %v12436_v13, 0.0  ;;  %v12645_v34 = vpop.permute.xlu0 %12644 }
 0x8c4   :  { %v12479_v24 = vmax.f32 %v12438_v6, 0.0  ;;  %v12439_v62 = vadd.f32 %v24464_v14, %v12391_v26 }
 0x8c5   :  { %v12226_v25 = vpop.f32.mrb[32].mxu0 }
 0x8c6   :  { %v12766_v33 = vmul.f32 %v24430_v22, %v12479_v24  ;;  %v12480_v40 = vmax.f32 %v12439_v62, 0.0  ;;  %v17157_v29 = vadd.f32 %v12226_v25, %v24394_v19  ;;  %v17016_v56 = vpop.f32.mrb[33].mxu0 }
 0x8c7   :  { %v12229_v47 = vpop.f32.mrb[34].mxu0 }
 0x8c8   :  { %v12813_v20 = vmax.f32 %v12812_v54, %v12766_v33  ;;  %v12767_v32 = vmul.f32 %v24433_v16, %v12480_v40  ;;  %v12392_v18 = vmul.f32 %v17157_v29, %v24450_v57  ;;  %v17158_v11 = vadd.f32 %v12229_v47, %v24396_v2  ;;  %v17017_v58 = vpop.f32.mrb[35].mxu0 }
 0x8c9   :  { %v12764_v16 = vmul.f32 %v24421_v43, %v12477_v41 }
 0x8ca   :  { %v12814_v22 = vmax.f32 %v12763_v38, %v12767_v32  ;;  %v12440_v35 = vadd.f32 %v24464_v14, %v12392_v18  ;;  %v12393_v19 = vmul.f32 %v17158_v11, %v24450_v57 }
 0x8cc   :  { %v12481_v59 = vmax.f32 %v12440_v35, 0.0  ;;  %v12441_v21 = vadd.f32 %v24464_v14, %v12393_v19 }
 0x8cd   :  { %v12234_v5 = vpop.f32.mrb[36].mxu0 }
 0x8ce   :  { %v12768_v36 = vmul.f32 %v24442_v51, %v12481_v59  ;;  %v12482_v8 = vmax.f32 %v12441_v21, 0.0  ;;  %v17159_v2 = vadd.f32 %v12234_v5, %v24402_v27  ;;  %v17020_v15 = vpop.f32.mrb[37].mxu0  ;;  %v12640_v51 = vpop.permute.xlu1 %12639 }
 0x8cf   :  { %v12237_v49 = vpop.f32.mrb[38].mxu0 }
 0x8d0   :  { %v12815_v3 = vmax.f32 %v12764_v16, %v12768_v36  ;;  %v12769_v12 = vmul.f32 %v12635_v37, %v12482_v8  ;;  %v12394_v10 = vmul.f32 %v17159_v2, %v24450_v57  ;;  %v17160_v17 = vadd.f32 %v12237_v49, %v24408_v4  ;;  %v17021_v61 = vpop.f32.mrb[39].mxu0  ;;  %v24593_v16 = vpop.permute.xlu0 %12709 }
 0x8d2   :  { %v12816_v44 = vmax.f32 %v12765_v39, %v12769_v12  ;;  %v12442_v60 = vadd.f32 %v24464_v14, %v12394_v10  ;;  %v12395_v43 = vmul.f32 %v17160_v17, %v24450_v57  ;;  %v24587_v47 = vpop.permute.xlu1 %12704 }
 0x8d4   :  { %v12483_v45 = vmax.f32 %v12442_v60, 0.0  ;;  %v12443_v27 = vadd.f32 %v24464_v14, %v12395_v43 }
 0x8d5   :  { %v6540_v23 = vpop.f32.mrb[44].mxu1  ;;  %v12242_v6 = vpop.f32.mrb[40].mxu0 }
 0x8d6   :  { %v15828_v26 = vpop.f32.mrb[45].mxu1  ;;  %v12770_v0 = vmul.f32 %v12640_v51, %v12483_v45  ;;  %v12484_v53 = vmax.f32 %v12443_v27, 0.0  ;;  %v17161_v24 = vadd.f32 %v12242_v6, %v24415_v7  ;;  %v17024_v62 = vpop.f32.mrb[41].mxu0  ;;  %v12805_v7 = vrot.slane %v24552_v50, 4 }
 0x8d7   :  { %v6543_v4 = vpop.f32.mrb[46].mxu1  ;;  %v12245_v25 = vpop.f32.mrb[42].mxu0 }
 0x8d8   :  { %v15829_v13 = vpop.f32.mrb[47].mxu1  ;;  %v12817_v33 = vmax.f32 %v12813_v20, %v12770_v0  ;;  %v12771_v40 = vmul.f32 %v12645_v34, %v12484_v53  ;;  %v12396_v29 = vmul.f32 %v17161_v24, %v24450_v57  ;;  %v17162_v56 = vadd.f32 %v12245_v25, %v24417_v55  ;;  %v17025_v54 = vpop.f32.mrb[43].mxu0 }
 0x8d9   :  { %v12806_v21 = vmax.f32 %v24552_v50, %v12805_v7  ;;  %v24596_v2 = vpop.permute.xlu1 %12719  ;;  %v24603_v0 = vpop.permute.xlu0 %12724 }
 0x8da   :  { %v12818_v38 = vmax.f32 %v12814_v22, %v12771_v40  ;;  %v12444_v48 = vadd.f32 %v24464_v14, %v12396_v29  ;;  %v12397_v8 = vmul.f32 %v17162_v56, %v24450_v57 }
 0x8db   :  { %v12807_v15 = vrot.slane %v12806_v21, 2 }
 0x8dc   :  { %v12822_v32 = vmax.f32 %v12817_v33, %v12818_v38  ;;  %v12485_v18 = vmax.f32 %v12444_v48, 0.0  ;;  %v12445_v50 = vadd.f32 %v24464_v14, %v12397_v8 }
 0x8dd   :  { %v6548_v11 = vpop.f32.mrb[48].mxu1  ;;  %v12250_v58 = vpop.f32.mrb[44].mxu0  ;;  %v12808_v45 = vmax.f32 %v12806_v21, %v12807_v15 }
 0x8de   :  { %v15832_v41 = vpop.f32.mrb[49].mxu1  ;;  %v12772_v20 = vmul.f32 %v24445_v28, %v12485_v18  ;;  %v17163_v35 = vadd.f32 %v12250_v58, %v6540_v23  ;;  %v17028_v19 = vpop.f32.mrb[45].mxu0  ;;  %v12486_v24 = vmax.f32 %v12445_v50, 0.0 }
 0x8df   :  { %v6551_v63 = vpop.f32.mrb[50].mxu1  ;;  %v12253_v55 = vpop.f32.mrb[46].mxu0  ;;  %v12809_v40 = vrot.slane %v12808_v45, 1 }
 0x8e0   :  { %v15833_v31 = vpop.f32.mrb[51].mxu1  ;;  %v12820_v22 = vsel %vm12819_vm10, %v12772_v20, -inf  ;;  %v17029_v59 = vpop.f32.mrb[47].mxu0  ;;  %v17164_v5 = vadd.f32 %v12253_v55, %v6543_v4  ;;  %v12398_v23 = vmul.f32 %v17163_v35, %v24450_v57  ;;  %v12832_v58 = vsel %vm12831_vm11, %v12772_v20, -inf }
 0x8e1   :  { %v12821_v37 = vmax.f32 %v12815_v3, %v12820_v22  ;;  %v24606_v4 = vpop.permute.xlu1 %12729  ;;  %v12773_v41 = vmul.f32 %v24466_v42, %v12486_v24 }
 0x8e2   :  { %v12399_v62 = vmul.f32 %v17164_v5, %v24450_v57  ;;  %v12446_v38 = vadd.f32 %v24464_v14, %v12398_v23 }
 0x8e3   :  { %v12823_v36 = vmax.f32 %v12821_v37, %v12816_v44  ;;  %v12810_v37 = vmax.f32 %v12808_v45, %v12809_v40 }
 0x8e4   :  { %v12447_v35 = vadd.f32 %v24464_v14, %v12399_v62 }
 0x8e5   :  { %v6556_v28 = vpop.f32.mrb[52].mxu1  ;;  %v12824_v39 = vmax.f32 %v12822_v32, %v12823_v36  ;;  %v12258_v49 = vpop.f32.mrb[48].mxu0  ;;  %v12487_v36 = vmax.f32 %v12446_v38, 0.0 }
 0x8e6   :  { %v15836_v12 = vpop.f32.mrb[53].mxu1  ;;  %v17165_v10 = vadd.f32 %v12258_v49, %v6548_v11  ;;  %v17032_v17 = vpop.f32.mrb[49].mxu0  ;;  %v12488_v15 = vmax.f32 %v12447_v35, 0.0 }
 0x8e7   :  { %v6559_v61 = vpop.f32.mrb[54].mxu1  ;;  %v12825_v60 = vrot.slane %v12824_v39, 4  ;;  %v12261_v3 = vpop.f32.mrb[50].mxu0 }
 0x8e8   :  { %v15837_v43 = vpop.f32.mrb[55].mxu1  ;;  %v12400_v34 = vmul.f32 %v17165_v10, %v24450_v57  ;;  %v17166_v44 = vadd.f32 %v12261_v3, %v6551_v63  ;;  %v17033_v51 = vpop.f32.mrb[51].mxu0 }
 0x8e9   :  { %v12826_v27 = vmax.f32 %v12824_v39, %v12825_v60  ;;  %v12685_v49 = vpop.permute.xlu1 %12684  ;;  %v12774_v60 = vmul.f32 %v24469_v46, %v12487_v36 }
 0x8ea   :  { %v12448_v6 = vadd.f32 %v24464_v14, %v12400_v34  ;;  %v12401_v26 = vmul.f32 %v17166_v44, %v24450_v57 }
 0x8eb   :  { %v12827_v53 = vrot.slane %v12826_v27, 2 }
 0x8ec   :  { %v12489_v25 = vmax.f32 %v12448_v6, 0.0  ;;  %v12449_v13 = vadd.f32 %v24464_v14, %v12401_v26 }
 0x8ed   :  { %v6564_v33 = vpop.f32.mrb[56].mxu1  ;;  %v12266_v29 = vpop.f32.mrb[52].mxu0  ;;  %v12828_v54 = vmax.f32 %v12826_v27, %v12827_v53 }
 0x8ee   :  { %v15840_v56 = vpop.f32.mrb[57].mxu1  ;;  %v24611_v48 = vmul.f32 %v24475_v30, %v12489_v25  ;;  %v12490_v32 = vmax.f32 %v12449_v13, 0.0  ;;  %v17167_v18 = vadd.f32 %v12266_v29, %v6556_v28  ;;  %v17036_v11 = vpop.f32.mrb[53].mxu0 }
 0x8ef   :  { %v6567_v7 = vpop.f32.mrb[58].mxu1  ;;  %v12269_v19 = vpop.f32.mrb[54].mxu0  ;;  %v12829_v55 = vrot.slane %v12828_v54, 1 }
 0x8f0   :  { %v15841_v63 = vpop.f32.mrb[59].mxu1  ;;  %v12833_v31 = vmax.f32 %v12832_v58, %v24611_v48  ;;  %v12777_v22 = vmul.f32 %v24479_v9, %v12490_v32  ;;  %v12402_v59 = vmul.f32 %v17167_v18, %v24450_v57  ;;  %v17168_v30 = vadd.f32 %v12269_v19, %v6559_v61  ;;  %v17037_v21 = vpop.f32.mrb[55].mxu0 }
 0x8f1   :  { %v12830_v5 = vmax.f32 %v12828_v54, %v12829_v55  ;;  %v12665_v28 = vpop.permute.xlu0 %12664 }
 0x8f2   :  { %v12834_v8 = vmax.f32 %v12773_v41, %v12777_v22  ;;  %v12450_v20 = vadd.f32 %v24464_v14, %v12402_v59  ;;  %v12403_v42 = vmul.f32 %v17168_v30, %v24450_v57  ;;  %v12775_v51 = vmul.f32 %v12665_v28, %v12488_v15 }
 0x8f3   :  { %v24621_v39 = vsel %vm12799_vm8, %v12810_v37, %v12830_v5 }
 0x8f4   :  { %v12491_v12 = vmax.f32 %v12450_v20, 0.0  ;;  %v12451_v9 = vadd.f32 %v24464_v14, %v12403_v42 }
 0x8f5   :  { %v6572_v10 = vpop.f32.mrb[60].mxu1  ;;  %v12274_v17 = vpop.f32.mrb[56].mxu0 }
 0x8f6   :  { %v15844_v61 = vpop.f32.mrb[61].mxu1  ;;  %v12778_v50 = vmul.f32 %v24494_v52, %v12491_v12  ;;  %v12492_v3 = vmax.f32 %v12451_v9, 0.0  ;;  %v17169_v43 = vadd.f32 %v12274_v17, %v6564_v33  ;;  %v17040_v34 = vpop.f32.mrb[57].mxu0 }
 0x8f7   :  { %v6575_v44 = vpop.f32.mrb[62].mxu1  ;;  %v12277_v45 = vpop.f32.mrb[58].mxu0 }
 0x8f8   :  { %v15845_v27 = vpop.f32.mrb[63].mxu1  ;;  %v12835_v23 = vmax.f32 %v12774_v60, %v12778_v50  ;;  %v12779_v6 = vmul.f32 %v12685_v49, %v12492_v3  ;;  %v12404_v26 = vmul.f32 %v17169_v43, %v24450_v57  ;;  %v17170_v53 = vadd.f32 %v12277_v45, %v6567_v7  ;;  %v17041_v24 = vpop.f32.mrb[59].mxu0 }
 0x8f9   :  { %v12690_v13 = vpop.permute.xlu0 %12689  ;;  %v12695_v52 = vpop.permute.xlu1 %12694 }
 0x8fa   :  { %v12836_v62 = vmax.f32 %v12775_v51, %v12779_v6  ;;  %v12452_v25 = vadd.f32 %v24464_v14, %v12404_v26  ;;  %v12405_v46 = vmul.f32 %v17170_v53, %v24450_v57 }
 0x8fc   :  { %v12493_v40 = vmax.f32 %v12452_v25, 0.0  ;;  %v12453_v33 = vadd.f32 %v24464_v14, %v12405_v46 }
 0x8fd   :  { %v6580_v29 = vpop.f32.mrb[64].mxu1  ;;  %v12282_v56 = vpop.f32.mrb[60].mxu0 }
 0x8fe   :  { %v15848_v54 = vpop.f32.mrb[65].mxu1  ;;  %v12780_v38 = vmul.f32 %v12690_v13, %v12493_v40  ;;  %v12494_v48 = vmax.f32 %v12453_v33, 0.0  ;;  %v17171_v32 = vadd.f32 %v12282_v56, %v6572_v10  ;;  %v17044_v18 = vpop.f32.mrb[61].mxu0 }
 0x8ff   :  { %v6583_v11 = vpop.f32.mrb[66].mxu1  ;;  %v12285_v7 = vpop.f32.mrb[62].mxu0 }
 0x900   :  { %v15849_v58 = vpop.f32.mrb[67].mxu1  ;;  %v12837_v41 = vmax.f32 %v12833_v31, %v12780_v38  ;;  %v12781_v35 = vmul.f32 %v12695_v52, %v12494_v48  ;;  %v12406_v19 = vmul.f32 %v17171_v32, %v24450_v57  ;;  %v17172_v63 = vadd.f32 %v12285_v7, %v6575_v44  ;;  %v17045_v55 = vpop.f32.mrb[63].mxu0 }
 0x901   :  { %v24641_v40 = vpop.permute.xlu0 %12749 }
 0x902   :  { %v12838_v22 = vmax.f32 %v12834_v8, %v12781_v35  ;;  %v12454_v59 = vadd.f32 %v24464_v14, %v12406_v19  ;;  %v12407_v17 = vmul.f32 %v17172_v63, %v24450_v57 }
 0x904   :  { %v12842_v30 = vmax.f32 %v12837_v41, %v12838_v22  ;;  %v12495_v21 = vmax.f32 %v12454_v59, 0.0  ;;  %v12455_v51 = vadd.f32 %v24464_v14, %v12407_v17 }
 0x905   :  { %v6588_v37 = vpop.f32.mrb[68].mxu1  ;;  %v12290_v5 = vpop.f32.mrb[64].mxu0 }
 0x906   :  { %v15852_v36 = vpop.f32.mrb[69].mxu1  ;;  %v12782_v20 = vmul.f32 %v24500_v1, %v12495_v21  ;;  %v17173_v42 = vadd.f32 %v12290_v5, %v6580_v29  ;;  %v17048_v28 = vpop.f32.mrb[65].mxu0  ;;  %v12496_v13 = vmax.f32 %v12455_v51, 0.0 }
 0x907   :  { %v6591_v15 = vpop.f32.mrb[70].mxu1  ;;  %v12293_v31 = vpop.f32.mrb[66].mxu0 }
 0x908   :  { %v15853_v49 = vpop.f32.mrb[71].mxu1  ;;  %v17174_v12 = vadd.f32 %v12293_v31, %v6583_v11  ;;  %v17049_v9 = vpop.f32.mrb[67].mxu0  ;;  %v12840_v10 = vsel %vm12839_vm12, %v12782_v20, -inf  ;;  %v12852_v19 = vsel %vm12851_vm13, %v12782_v20, -inf  ;;  %v12783_v63 = vmul.f32 %v24587_v47, %v12496_v13 }
 0x909   :  { %v12841_v8 = vmax.f32 %v12835_v23, %v12840_v10  ;;  %v12408_v23 = vmul.f32 %v17173_v42, %v24450_v57  ;;  %v12735_v31 = vpop.permute.xlu0 %12734 }
 0x90a   :  { %v12409_v52 = vmul.f32 %v17174_v12, %v24450_v57  ;;  %v12715_v12 = vpop.permute.xlu1 %12714 }
 0x90b   :  { %v12843_v60 = vmax.f32 %v12841_v8, %v12836_v62  ;;  %v12456_v38 = vadd.f32 %v24464_v14, %v12408_v23 }
 0x90c   :  { %v12457_v55 = vadd.f32 %v24464_v14, %v12409_v52 }
 0x90d   :  { %v6596_v61 = vpop.f32.mrb[72].mxu1  ;;  %v12298_v50 = vpop.f32.mrb[68].mxu0  ;;  %v12844_v44 = vmax.f32 %v12842_v30, %v12843_v60  ;;  %v12497_v42 = vmax.f32 %v12456_v38, 0.0 }
 0x90e   :  { %v15856_v3 = vpop.f32.mrb[73].mxu1  ;;  %v17175_v43 = vadd.f32 %v12298_v50, %v6588_v37  ;;  %v17052_v34 = vpop.f32.mrb[69].mxu0  ;;  %v12498_v47 = vmax.f32 %v12457_v55, 0.0 }
 0x90f   :  { %v6599_v1 = vpop.f32.mrb[74].mxu1  ;;  %v12301_v45 = vpop.f32.mrb[70].mxu0  ;;  %v12845_v24 = vrot.slane %v12844_v44, 4  ;;  %v12784_v60 = vmul.f32 %v24593_v16, %v12497_v42 }
 0x910   :  { %v15857_v27 = vpop.f32.mrb[75].mxu1  ;;  %v12410_v6 = vmul.f32 %v17175_v43, %v24450_v57  ;;  %v17176_v26 = vadd.f32 %v12301_v45, %v6591_v15  ;;  %v17053_v53 = vpop.f32.mrb[71].mxu0 }
 0x911   :  { %v12846_v46 = vmax.f32 %v12844_v44, %v12845_v24  ;;  %v12785_v44 = vmul.f32 %v12715_v12, %v12498_v47 }
 0x912   :  { %v12458_v25 = vadd.f32 %v24464_v14, %v12410_v6  ;;  %v12411_v62 = vmul.f32 %v17176_v26, %v24450_v57 }
 0x913   :  { %v12847_v54 = vrot.slane %v12846_v46, 2 }
 0x914   :  { %v12499_v33 = vmax.f32 %v12458_v25, 0.0  ;;  %v12459_v29 = vadd.f32 %v24464_v14, %v12411_v62  ;;  %v12740_v62 = vpop.permute.xlu1 %12739 }
 0x915   :  { %v6604_v56 = vpop.f32.mrb[76].mxu1  ;;  %v12306_v48 = vpop.f32.mrb[72].mxu0  ;;  %v12848_v35 = vmax.f32 %v12846_v46, %v12847_v54 }
 0x916   :  { %v15860_v32 = vpop.f32.mrb[77].mxu1  ;;  %v12786_v18 = vmul.f32 %v24596_v2, %v12499_v33  ;;  %v12500_v11 = vmax.f32 %v12459_v29, 0.0  ;;  %v17177_v7 = vadd.f32 %v12306_v48, %v6596_v61  ;;  %v17056_v58 = vpop.f32.mrb[73].mxu0 }
 0x917   :  { %v6607_v41 = vpop.f32.mrb[78].mxu1  ;;  %v12309_v22 = vpop.f32.mrb[74].mxu0  ;;  %v12849_v2 = vrot.slane %v12848_v35, 1 }
 0x918   :  { %v15861_v59 = vpop.f32.mrb[79].mxu1  ;;  %v12853_v30 = vmax.f32 %v12852_v19, %v12786_v18  ;;  %v12787_v21 = vmul.f32 %v24603_v0, %v12500_v11  ;;  %v12412_v37 = vmul.f32 %v17177_v7, %v24450_v57  ;;  %v17178_v5 = vadd.f32 %v12309_v22, %v6599_v1  ;;  %v17057_v36 = vpop.f32.mrb[75].mxu0 }
 0x919   :  { %v12850_v49 = vmax.f32 %v12848_v35, %v12849_v2 }
 0x91a   :  { %v12854_v28 = vmax.f32 %v12783_v63, %v12787_v21  ;;  %v12460_v15 = vadd.f32 %v24464_v14, %v12412_v37  ;;  %v12413_v20 = vmul.f32 %v17178_v5, %v24450_v57 }
 0x91b   :  { %v12872_v61 = vsel %vm12819_vm10, %v24621_v39, %v12850_v49 }
 0x91c   :  { %v12501_v9 = vmax.f32 %v12460_v15, 0.0  ;;  %v12461_v10 = vadd.f32 %v24464_v14, %v12413_v20 }
 0x91d   :  { %v6612_v8 = vpop.f32.mrb[80].mxu1  ;;  %v12314_v0 = vpop.f32.mrb[76].mxu0 }
 0x91e   :  { %v15864_v17 = vpop.f32.mrb[81].mxu1  ;;  %v12788_v50 = vmul.f32 %v24606_v4, %v12501_v9  ;;  %v12502_v3 = vmax.f32 %v12461_v10, 0.0  ;;  %v17179_v43 = vadd.f32 %v12314_v0, %v6604_v56  ;;  %v17060_v34 = vpop.f32.mrb[77].mxu0 }
 0x91f   :  { %v6615_v1 = vpop.f32.mrb[82].mxu1  ;;  %v12317_v51 = vpop.f32.mrb[78].mxu0 }
 0x920   :  { %v15865_v45 = vpop.f32.mrb[83].mxu1  ;;  %v12855_v27 = vmax.f32 %v12784_v60, %v12788_v50  ;;  %v12789_v6 = vmul.f32 %v12735_v31, %v12502_v3  ;;  %v12414_v26 = vmul.f32 %v17179_v43, %v24450_v57  ;;  %v17180_v53 = vadd.f32 %v12317_v51, %v6607_v41  ;;  %v17061_v24 = vpop.f32.mrb[79].mxu0 }
 0x921   :  { %v12745_v56 = vpop.permute.xlu0 %12744 }
 0x922   :  { %v12856_v23 = vmax.f32 %v12785_v44, %v12789_v6  ;;  %v12462_v39 = vadd.f32 %v24464_v14, %v12414_v26  ;;  %v12415_v16 = vmul.f32 %v17180_v53, %v24450_v57 }
 0x924   :  { %v12503_v25 = vmax.f32 %v12462_v39, 0.0  ;;  %v12463_v4 = vadd.f32 %v24464_v14, %v12415_v16 }
 0x925   :  { %v12322_v46 = vpop.f32.mrb[80].mxu0 }
 0x926   :  { %v12790_v13 = vmul.f32 %v12740_v62, %v12503_v25  ;;  %v12504_v52 = vmax.f32 %v12463_v4, 0.0  ;;  %v17181_v33 = vadd.f32 %v12322_v46, %v6612_v8  ;;  %v17064_v29 = vpop.f32.mrb[81].mxu0 }
 0x927   :  { %v12325_v54 = vpop.f32.mrb[82].mxu0 }
 0x928   :  { %v12857_v38 = vmax.f32 %v12853_v30, %v12790_v13  ;;  %v12791_v48 = vmul.f32 %v12745_v56, %v12504_v52  ;;  %v12416_v32 = vmul.f32 %v17181_v33, %v24450_v57  ;;  %v17065_v18 = vpop.f32.mrb[83].mxu0 }
 0x92a   :  { %v12858_v11 = vmax.f32 %v12854_v28, %v12791_v48  ;;  %v12464_v7 = vadd.f32 %v24464_v14, %v12416_v32  ;;  %v13823_v14 = vld [vmem:[%s24677_s6] ss:$0 sm:$0xff] }
 0x92c   :  { %v12862_v58 = vmax.f32 %v12857_v38, %v12858_v11  ;;  %v12505_v41 = vmax.f32 %v12464_v7, 0.0 }
 0x92e   :  { %v12792_v35 = vmul.f32 %v24641_v40, %v12505_v41 }
 0x930   :  { %v12860_v19 = vsel %vm12859_vm14, %v12792_v35, -inf }
 0x931   :  { %v12861_v63 = vmax.f32 %v12855_v27, %v12860_v19 }
 0x933   :  { %v12863_v55 = vmax.f32 %v12861_v63, %v12856_v23 }
 0x935   :  { %v12864_v22 = vmax.f32 %v12862_v58, %v12863_v55 }
 0x937   :  { %v12865_v59 = vrot.slane %v12864_v22, 4 }
 0x939   :  { %v12866_v21 = vmax.f32 %v12864_v22, %v12865_v59 }
 0x93b   :  { %v12867_v37 = vrot.slane %v12866_v21, 2 }
 0x93d   :  { %v12868_v30 = vmax.f32 %v12866_v21, %v12867_v37 }
 0x93f   :  { %v12869_v5 = vrot.slane %v12868_v30, 1 }
 0x941   :  { %v12870_v36 = vmax.f32 %v12868_v30, %v12869_v5 }
 0x943   :  { %v12873_v57 = vsel %vm12839_vm12, %v12872_v61, %v12870_v36 }
 0x944   :  { %17099 = vmatmul.mubr.f32.vlgmr.msra.gmra.mrb[84].mxu1 %v12873_v57 }
 0xa17   :  { %v12963_v2 = vpop.f32.mrb[84].mxu1 }
 0xa18   :  { %v12964_v42 = vadd.f32 %v13823_v14, %v12963_v2  ;;  %v17100_v40 = vpop.f32.mrb[85].mxu1 }
 0xa1a   :  { %12967 = vst [vmem:[%s24678_s7] sm:$0xf] %v12964_v42 }

</bundles_post_ra>
